<compile_context>
chip_gen: v5e
topology: v5e:2x2
jax: 0.10.0
libtpu: 0.0.40
codegen_flags: <defaults>
</compile_context>

<pallas_src>
import functools

import jax
import jax.numpy as jnp
from jax import lax
from jax.experimental import pallas as pl
from jax.experimental.pallas import tpu as pltpu

EPS = 1e-8
TOPK = 10     # == self.k in the PyTorch module
PAD_K = 128   # lane-dense im2col feature width (27 conv taps + 1 bias + zeros)


# --------------------------------------------------------------------------
# Wrapper-side im2col (channels-last, 3x3, stride 1, pad 1) + bias folding
# --------------------------------------------------------------------------
def _im2col_padded(x_nchw, pad_to=PAD_K):
    """[N, C, H, W] -> [N*H*W, pad_to]: 9*C im2col features (order
    (dy*3+dx)*C + c), then a constant-1 bias column, then zero padding."""
    N, C, H, W = x_nchw.shape
    assert 9 * C + 1 <= pad_to
    xh = jnp.transpose(x_nchw, (0, 2, 3, 1))                      # NHWC
    xp = jnp.pad(xh, ((0, 0), (1, 1), (1, 1), (0, 0)))
    cols = [xp[:, dy:dy + H, dx:dx + W, :] for dy in range(3) for dx in range(3)]
    feat = jnp.concatenate(cols, axis=-1).reshape(N * H * W, 9 * C)
    ones = jnp.ones((N * H * W, 1), feat.dtype)
    zeros = jnp.zeros((N * H * W, pad_to - 9 * C - 1), feat.dtype)
    return jnp.concatenate([feat, ones, zeros], axis=-1)          # lane-dense


def _fold_bias(w_mat, bias, pad_to=PAD_K):
    """[9C, D] weight + [1, D] bias -> [pad_to, D]; row 9C holds the bias so
    the constant-1 patch column applies it inside the encoder matmul."""
    K, D = w_mat.shape
    w_pad = jnp.zeros((pad_to, D), w_mat.dtype)
    w_pad = w_pad.at[:K, :].set(w_mat)
    w_pad = w_pad.at[K, :].set(bias.reshape(-1))
    return w_pad


# --------------------------------------------------------------------------
# Fused kernel: encoder + GAP + prototype/query adaptation + logits
# --------------------------------------------------------------------------
def _paper_kernel(p_ref, w_ref, tao_ref, o_ref, *, n, kshot, q, hw, topk):
    f32 = jnp.float32
    HI = lax.Precision.HIGHEST
    nimg = n * (kshot + q)
    nk = n * kshot
    nq = n * q

    # ---- encoder: one bf16 matmul, bias folded in as an extra K row -------
    h = jnp.dot(p_ref[...], w_ref[...], preferred_element_type=f32)  # [nimg*hw, D]
    h = jnp.maximum(h, 0.0)
    d = h.shape[-1]

    # ---- global average pool: layout-compatible reshape + sublane reduce --
    feats = jnp.sum(h.reshape(nimg, hw, d), axis=1) * (1.0 / hw)     # [nimg, D]

    sup2 = feats[:nk]      # [nk, D] support features, class-major
    query = feats[nk:]     # [nq, D] query features, class-major

    def l2n(v):            # v / max(||v||, EPS), via EUP rsqrt
        ss = jnp.sum(v * v, axis=-1, keepdims=True)
        return v * lax.rsqrt(jnp.maximum(ss, EPS * EPS))

    # group membership: gmat[c, r] = 1 iff support row r belongs to class c
    gc = lax.broadcasted_iota(jnp.int32, (n, nk), 0)
    gr = lax.broadcasted_iota(jnp.int32, (n, nk), 1)
    gmat = ((gr >= gc * kshot) & (gr < (gc + 1) * kshot)).astype(f32)  # [n, nk]

    # Selection-critical dots keep HIGHEST so the argmax / top-k below match
    # the f32 reference; all other dots run at DEFAULT (single MXU pass).
    proto = jnp.dot(gmat, sup2, preferred_element_type=f32,
                    precision=HI) * (1.0 / kshot)                      # [n, D]
    qn, pn, sn = l2n(query), l2n(proto), l2n(sup2)

    # pre_sim[i, c] = cos(query_i, proto_c); hard assignment = first argmax
    pre_sim = jnp.dot(qn, pn.T, preferred_element_type=f32, precision=HI)  # [nq, n]
    coln = lax.broadcasted_iota(jnp.int32, (nq, n), 1)
    rmax = jnp.max(pre_sim, axis=1, keepdims=True)
    first = jnp.min(jnp.where(pre_sim >= rmax, coln, n), axis=1, keepdims=True)
    assign = (coln == first).astype(f32)                                   # [nq, n]

    # ---- prototype adaptation: masked softmax over
    #      {assigned queries} ∪ {own support shots}, per class --------------
    self_sim = jnp.dot(pn, sn.T, preferred_element_type=f32)               # [n, nk]
    m_q = jnp.max(jnp.where(assign > 0, pre_sim, -jnp.inf), axis=0)        # [n]
    m_s = jnp.max(jnp.where(gmat > 0, self_sim, -jnp.inf), axis=1)         # [n]
    mx = jnp.maximum(m_q, m_s)
    e_pre = assign * jnp.exp(pre_sim - mx[None, :])                        # [nq, n]
    e_self = gmat * jnp.exp(self_sim - mx[:, None])                        # [n, nk]
    denom = jnp.sum(e_pre, axis=0) + jnp.sum(e_self, axis=1)               # [n]
    num = (jnp.dot(e_pre.T, query, preferred_element_type=f32)
           + jnp.dot(e_self, sup2, preferred_element_type=f32))
    adapted_proto = num / denom[:, None]                                   # [n, D]

    # ---- query adaptation via mutual top-k neighbours ----------------------
    qsim = jnp.dot(qn, qn.T, preferred_element_type=f32, precision=HI)     # [nq, nq]
    colq = lax.broadcasted_iota(jnp.int32, (nq, nq), 1)
    work = qsim
    kmask = jnp.zeros_like(qsim)
    for _ in range(topk):          # topk is static -> fully unrolled
        m = jnp.max(work, axis=1, keepdims=True)
        fj = jnp.min(jnp.where(work >= m, colq, nq), axis=1, keepdims=True)
        sel = colq == fj
        work = jnp.where(sel, -jnp.inf, work)
        kmask = jnp.where(sel, 1.0, kmask)
    mutual = kmask * kmask.T                                               # [nq, nq]

    rm = jnp.max(jnp.where(mutual > 0, qsim, -jnp.inf), axis=1, keepdims=True)
    e_q = jnp.where(mutual > 0, jnp.exp(qsim - rm), 0.0)
    w_q = e_q / jnp.sum(e_q, axis=1, keepdims=True)
    adapted_query = jnp.dot(w_q, query, preferred_element_type=f32)        # [nq, D]

    sim = jnp.dot(l2n(adapted_query), l2n(adapted_proto).T,
                  preferred_element_type=f32)                              # [nq, n]
    o_ref[...] = tao_ref[0, 0] * sim


def paper_model_forward(x, w_mat, bias, tao, *, n, kshot, q, topk=TOPK):
    N, C, H, W = x.shape
    assert (H * W) % 8 == 0  # keeps the in-kernel GAP reshape layout-compatible
    nq = n * q
    # Re-order the batch: all support images first (class-major), then all
    # query images (class-major).  Equivalent to reshape(n, k+q).split([k, q]);
    # lets the kernel split feats with static slices.
    x5 = x.reshape(n, kshot + q, C, H, W)
    x_ord = jnp.concatenate(
        [x5[:, :kshot].reshape(n * kshot, C, H, W),
         x5[:, kshot:].reshape(nq, C, H, W)], axis=0)
    patches = _im2col_padded(x_ord).astype(jnp.bfloat16)    # [N*H*W, 128] bf16
    w_pad = _fold_bias(w_mat, bias).astype(jnp.bfloat16)    # [128, D]     bf16

    kern = functools.partial(_paper_kernel, n=n, kshot=kshot, q=q,
                             hw=H * W, topk=topk)
    return pl.pallas_call(
        kern,
        out_shape=jax.ShapeDtypeStruct((nq, n), jnp.float32),
        in_specs=[
            pl.BlockSpec(memory_space=pltpu.MemorySpace.VMEM),   # patches
            pl.BlockSpec(memory_space=pltpu.MemorySpace.VMEM),   # conv weight+bias
            pl.BlockSpec(memory_space=pltpu.MemorySpace.SMEM),   # tao scalar
        ],
        out_specs=pl.BlockSpec(memory_space=pltpu.MemorySpace.VMEM),
        compiler_params=pltpu.CompilerParams(
            vmem_limit_bytes=32 * 1024 * 1024),   # ~10 MB footprint, fits v7x too
    )(patches, w_pad, tao)


# --------------------------------------------------------------------------
# Pure-JAX reference (mirrors the PyTorch forward) for validation
# --------------------------------------------------------------------------
def reference_forward(x, w_mat, bias, tao, *, n, kshot, q, topk=TOPK):
    N, C, H, W = x.shape
    HI = lax.Precision.HIGHEST
    patches = _im2col_padded(x).astype(jnp.bfloat16)
    w_pad = _fold_bias(w_mat, bias).astype(jnp.bfloat16)
    h = jnp.maximum(jnp.dot(patches, w_pad, preferred_element_type=jnp.float32), 0.0)
    feats = jnp.mean(h.reshape(N, H * W, -1), axis=1)
    feats = feats.reshape(n, kshot + q, -1)
    support, query = feats[:, :kshot], feats[:, kshot:].reshape(n * q, -1)

    def l2n(v):
        return v / jnp.maximum(jnp.linalg.norm(v, axis=-1, keepdims=True), EPS)

    proto = support.mean(1)
    qn, pn = l2n(query), l2n(proto)
    pre_sim = jnp.dot(qn, pn.T, precision=HI)
    pre_label = jnp.argmax(pre_sim, axis=1)
    nq = query.shape[0]

    adapted_proto = []
    for cls in range(n):
        sel = pre_label == cls
        self_support = support[cls]
        self_sim = jnp.dot(l2n(proto[cls][None]), l2n(self_support).T,
                           precision=HI)[0]
        ref_sim = jnp.where(sel, pre_sim[:, cls], -jnp.inf)
        w = jax.nn.softmax(jnp.concatenate([ref_sim, self_sim]))
        vals = jnp.concatenate([query, self_support], axis=0)
        adapted_proto.append((w[:, None] * vals).sum(0))
    adapted_proto = jnp.stack(adapted_proto)

    query_sim = jnp.dot(qn, qn.T, precision=HI)
    _, k_ind = jax.lax.top_k(query_sim, topk)
    mask = jnp.zeros_like(query_sim).at[jnp.arange(nq)[:, None], k_ind].set(1.0)
    mask = mask + mask.T
    adapted_query = []
    for i in range(nq):
        sel = mask[i] == 2
        w = jax.nn.softmax(jnp.where(sel, query_sim[i], -jnp.inf))
        adapted_query.append((w[:, None] * query).sum(0))
    adapted_query = jnp.stack(adapted_query)

    return tao * jnp.dot(l2n(adapted_query), l2n(adapted_proto).T, precision=HI)


# --------------------------------------------------------------------------
if __name__ == "__main__":
    n, kshot, q = 3, 5, 5              # n-way, k-shot, q queries per class
    C, H, W, D = 3, 16, 16, 128
    N = n * (kshot + q)

    key = jax.random.PRNGKey(0)
    kx, kw, kb = jax.random.split(key, 3)
    x = jax.random.normal(kx, (N, C, H, W), dtype=jnp.float32)
    w_mat = jax.random.normal(kw, (9 * C, D), dtype=jnp.float32) / jnp.sqrt(9.0 * C)
    bias = jax.random.normal(kb, (1, D), dtype=jnp.float32) * 0.1
    tao = jnp.full((1, 1), 10.0, dtype=jnp.float32)   # nn.Parameter(tao=10.0)

    fwd = jax.jit(functools.partial(paper_model_forward, n=n, kshot=kshot, q=q))
    logits = jax.block_until_ready(fwd(x, w_mat, bias, tao))

    ref_fn = jax.jit(functools.partial(reference_forward, n=n, kshot=kshot, q=q))
    ref = jax.block_until_ready(ref_fn(x, w_mat, bias, 10.0))

    assert logits.shape == (n * q, n)
    assert bool(jnp.all(jnp.isfinite(logits)))
    max_err = float(jnp.max(jnp.abs(logits - ref)))
    assert bool(jnp.allclose(logits, ref, rtol=5e-2, atol=5e-2)), max_err

    print("KERNEL_OK")
</pallas_src>

<mosaic_0001>
module attributes {stable_mosaic.version = 11 : i64} {
  func.func @_paper_kernel(%arg0: memref<7680x128xbf16, #tpu.memory_space<vmem>>, %arg1: memref<128x128xbf16, #tpu.memory_space<vmem>>, %arg2: memref<1x1xf32, #tpu.memory_space<smem>>, %arg3: memref<15x3xf32, #tpu.memory_space<vmem>>) attributes {dimension_semantics = [], scalar_prefetch = 0 : i64, scratch_operands = 0 : i64, tpu.core_type = #tpu.core_type<tc>} {
    %c0 = arith.constant 0 : index
    %c0_0 = arith.constant 0 : index
    %0 = vector.load %arg0[%c0, %c0_0] : memref<7680x128xbf16, #tpu.memory_space<vmem>>, vector<7680x128xbf16>
    %c0_1 = arith.constant 0 : index
    %c0_2 = arith.constant 0 : index
    %1 = vector.load %arg1[%c0_1, %c0_2] : memref<128x128xbf16, #tpu.memory_space<vmem>>, vector<128x128xbf16>
    %cst = arith.constant dense<0.000000e+00> : vector<7680x128xf32>
    %2 = tpu.matmul %0, %1, %cst {dimension_numbers = #tpu.dot_dimension_numbers<[1], [0], [0], [1], [0, 0, 1, 1], [], []>} : vector<7680x128xbf16>, vector<128x128xbf16>, vector<7680x128xf32> -> vector<7680x128xf32>
    %cst_3 = arith.constant 0.000000e+00 : f32
    %3 = vector.broadcast %cst_3 : f32 to vector<7680x128xf32>
    %4 = arith.maximumf %2, %3 : vector<7680x128xf32>
    %5 = vector.shape_cast %4 : vector<7680x128xf32> to vector<30x256x128xf32>
    %cst_4 = arith.constant dense<0.000000e+00> : vector<30x128xf32>
    %6 = vector.multi_reduction <add>, %5, %cst_4 [1] : vector<30x256x128xf32> to vector<30x128xf32>
    %cst_5 = arith.constant 3.906250e-03 : f32
    %7 = vector.broadcast %cst_5 : f32 to vector<30x128xf32>
    %8 = arith.mulf %6, %7 : vector<30x128xf32>
    %9 = vector.extract_strided_slice %8 {offsets = [0, 0], sizes = [15, 128], strides = [1, 1]} : vector<30x128xf32> to vector<15x128xf32>
    %10 = vector.extract_strided_slice %8 {offsets = [15, 0], sizes = [15, 128], strides = [1, 1]} : vector<30x128xf32> to vector<15x128xf32>
    %11 = tpu.iota {dimensions = array<i32: 0>} : vector<3x15xi32>
    %12 = tpu.iota {dimensions = array<i32: 1>} : vector<3x15xi32>
    %c5_i32 = arith.constant 5 : i32
    %13 = vector.broadcast %c5_i32 : i32 to vector<3x15xi32>
    %14 = arith.muli %11, %13 : vector<3x15xi32>
    %15 = arith.cmpi sge, %12, %14 : vector<3x15xi32>
    %c1_i32 = arith.constant 1 : i32
    %16 = vector.broadcast %c1_i32 : i32 to vector<3x15xi32>
    %17 = arith.addi %11, %16 : vector<3x15xi32>
    %c5_i32_6 = arith.constant 5 : i32
    %18 = vector.broadcast %c5_i32_6 : i32 to vector<3x15xi32>
    %19 = arith.muli %17, %18 : vector<3x15xi32>
    %20 = arith.cmpi slt, %12, %19 : vector<3x15xi32>
    %21 = arith.andi %15, %20 : vector<3x15xi1>
    %22 = arith.extui %21 : vector<3x15xi1> to vector<3x15xi32>
    %23 = arith.sitofp %22 : vector<3x15xi32> to vector<3x15xf32>
    %cst_7 = arith.constant dense<0.000000e+00> : vector<3x128xf32>
    %24 = tpu.matmul %23, %9, %cst_7 {dimension_numbers = #tpu.dot_dimension_numbers<[1], [0], [0], [1], [0, 0, 1, 1], [], []>, precision = #tpu.contract_precision<fp32>} : vector<3x15xf32>, vector<15x128xf32>, vector<3x128xf32> -> vector<3x128xf32>
    %cst_8 = arith.constant 2.000000e-01 : f32
    %25 = vector.broadcast %cst_8 : f32 to vector<3x128xf32>
    %26 = arith.mulf %24, %25 : vector<3x128xf32>
    %27 = arith.mulf %10, %10 : vector<15x128xf32>
    %cst_9 = arith.constant dense<0.000000e+00> : vector<15xf32>
    %28 = vector.multi_reduction <add>, %27, %cst_9 [1] : vector<15x128xf32> to vector<15xf32>
    %29 = vector.shape_cast %28 : vector<15xf32> to vector<15x1xf32>
    %cst_10 = arith.constant 1.000000e-16 : f32
    %30 = vector.broadcast %cst_10 : f32 to vector<15x1xf32>
    %31 = arith.maximumf %29, %30 : vector<15x1xf32>
    %32 = math.rsqrt %31 : vector<15x1xf32>
    %33 = vector.broadcast %32 : vector<15x1xf32> to vector<15x128xf32>
    %34 = arith.mulf %10, %33 : vector<15x128xf32>
    %35 = arith.mulf %26, %26 : vector<3x128xf32>
    %cst_11 = arith.constant dense<0.000000e+00> : vector<3xf32>
    %36 = vector.multi_reduction <add>, %35, %cst_11 [1] : vector<3x128xf32> to vector<3xf32>
    %37 = vector.shape_cast %36 : vector<3xf32> to vector<3x1xf32>
    %cst_12 = arith.constant 1.000000e-16 : f32
    %38 = vector.broadcast %cst_12 : f32 to vector<3x1xf32>
    %39 = arith.maximumf %37, %38 : vector<3x1xf32>
    %40 = math.rsqrt %39 : vector<3x1xf32>
    %41 = vector.broadcast %40 : vector<3x1xf32> to vector<3x128xf32>
    %42 = arith.mulf %26, %41 : vector<3x128xf32>
    %43 = arith.mulf %9, %9 : vector<15x128xf32>
    %cst_13 = arith.constant dense<0.000000e+00> : vector<15xf32>
    %44 = vector.multi_reduction <add>, %43, %cst_13 [1] : vector<15x128xf32> to vector<15xf32>
    %45 = vector.shape_cast %44 : vector<15xf32> to vector<15x1xf32>
    %cst_14 = arith.constant 1.000000e-16 : f32
    %46 = vector.broadcast %cst_14 : f32 to vector<15x1xf32>
    %47 = arith.maximumf %45, %46 : vector<15x1xf32>
    %48 = math.rsqrt %47 : vector<15x1xf32>
    %49 = vector.broadcast %48 : vector<15x1xf32> to vector<15x128xf32>
    %50 = arith.mulf %9, %49 : vector<15x128xf32>
    %51 = tpu.transpose %42, [1, 0] : vector<3x128xf32> -> vector<128x3xf32>
    %cst_15 = arith.constant dense<0.000000e+00> : vector<15x3xf32>
    %52 = tpu.matmul %34, %51, %cst_15 {dimension_numbers = #tpu.dot_dimension_numbers<[1], [0], [0], [1], [0, 0, 1, 1], [], []>, precision = #tpu.contract_precision<fp32>} : vector<15x128xf32>, vector<128x3xf32>, vector<15x3xf32> -> vector<15x3xf32>
    %53 = tpu.iota {dimensions = array<i32: 1>} : vector<15x3xi32>
    %cst_16 = arith.constant dense<0xFF800000> : vector<15xf32>
    %54 = vector.multi_reduction <maximumf>, %52, %cst_16 [1] : vector<15x3xf32> to vector<15xf32>
    %55 = vector.shape_cast %54 : vector<15xf32> to vector<15x1xf32>
    %56 = vector.broadcast %55 : vector<15x1xf32> to vector<15x3xf32>
    %57 = arith.cmpf oge, %52, %56 : vector<15x3xf32>
    %c3_i32 = arith.constant 3 : i32
    %58 = vector.broadcast %c3_i32 : i32 to vector<15x3xi32>
    %59 = arith.select %57, %53, %58 : vector<15x3xi1>, vector<15x3xi32>
    %cst_17 = arith.constant dense<2147483647> : vector<15xi32>
    %60 = vector.multi_reduction <minsi>, %59, %cst_17 [1] : vector<15x3xi32> to vector<15xi32>
    %61 = vector.shape_cast %60 : vector<15xi32> to vector<15x1xi32>
    %62 = vector.broadcast %61 : vector<15x1xi32> to vector<15x3xi32>
    %63 = arith.cmpi eq, %53, %62 : vector<15x3xi32>
    %64 = arith.extui %63 : vector<15x3xi1> to vector<15x3xi32>
    %65 = arith.sitofp %64 : vector<15x3xi32> to vector<15x3xf32>
    %66 = tpu.transpose %50, [1, 0] : vector<15x128xf32> -> vector<128x15xf32>
    %cst_18 = arith.constant dense<0.000000e+00> : vector<3x15xf32>
    %67 = tpu.matmul %42, %66, %cst_18 {dimension_numbers = #tpu.dot_dimension_numbers<[1], [0], [0], [1], [0, 0, 1, 1], [], []>} : vector<3x128xf32>, vector<128x15xf32>, vector<3x15xf32> -> vector<3x15xf32>
    %cst_19 = arith.constant 0.000000e+00 : f32
    %68 = vector.broadcast %cst_19 : f32 to vector<15x3xf32>
    %69 = arith.cmpf ogt, %65, %68 : vector<15x3xf32>
    %cst_20 = arith.constant 0xFF800000 : f32
    %70 = vector.broadcast %cst_20 : f32 to vector<15x3xf32>
    %71 = arith.select %69, %52, %70 : vector<15x3xi1>, vector<15x3xf32>
    %cst_21 = arith.constant dense<0xFF800000> : vector<3xf32>
    %72 = vector.multi_reduction <maximumf>, %71, %cst_21 [0] : vector<15x3xf32> to vector<3xf32>
    %cst_22 = arith.constant 0.000000e+00 : f32
    %73 = vector.broadcast %cst_22 : f32 to vector<3x15xf32>
    %74 = arith.cmpf ogt, %23, %73 : vector<3x15xf32>
    %cst_23 = arith.constant 0xFF800000 : f32
    %75 = vector.broadcast %cst_23 : f32 to vector<3x15xf32>
    %76 = arith.select %74, %67, %75 : vector<3x15xi1>, vector<3x15xf32>
    %cst_24 = arith.constant dense<0xFF800000> : vector<3xf32>
    %77 = vector.multi_reduction <maximumf>, %76, %cst_24 [1] : vector<3x15xf32> to vector<3xf32>
    %78 = arith.maximumf %72, %77 : vector<3xf32>
    %79 = vector.shape_cast %78 : vector<3xf32> to vector<1x3xf32>
    %80 = vector.broadcast %79 : vector<1x3xf32> to vector<15x3xf32>
    %81 = arith.subf %52, %80 : vector<15x3xf32>
    %82 = math.exp %81 : vector<15x3xf32>
    %83 = arith.mulf %65, %82 : vector<15x3xf32>
    %84 = vector.shape_cast %78 : vector<3xf32> to vector<3x1xf32>
    %85 = vector.broadcast %84 : vector<3x1xf32> to vector<3x15xf32>
    %86 = arith.subf %67, %85 : vector<3x15xf32>
    %87 = math.exp %86 : vector<3x15xf32>
    %88 = arith.mulf %23, %87 : vector<3x15xf32>
    %cst_25 = arith.constant dense<0.000000e+00> : vector<3xf32>
    %89 = vector.multi_reduction <add>, %83, %cst_25 [0] : vector<15x3xf32> to vector<3xf32>
    %cst_26 = arith.constant dense<0.000000e+00> : vector<3xf32>
    %90 = vector.multi_reduction <add>, %88, %cst_26 [1] : vector<3x15xf32> to vector<3xf32>
    %91 = arith.addf %89, %90 : vector<3xf32>
    %92 = tpu.transpose %83, [1, 0] : vector<15x3xf32> -> vector<3x15xf32>
    %cst_27 = arith.constant dense<0.000000e+00> : vector<3x128xf32>
    %93 = tpu.matmul %92, %10, %cst_27 {dimension_numbers = #tpu.dot_dimension_numbers<[1], [0], [0], [1], [0, 0, 1, 1], [], []>} : vector<3x15xf32>, vector<15x128xf32>, vector<3x128xf32> -> vector<3x128xf32>
    %cst_28 = arith.constant dense<0.000000e+00> : vector<3x128xf32>
    %94 = tpu.matmul %88, %9, %cst_28 {dimension_numbers = #tpu.dot_dimension_numbers<[1], [0], [0], [1], [0, 0, 1, 1], [], []>} : vector<3x15xf32>, vector<15x128xf32>, vector<3x128xf32> -> vector<3x128xf32>
    %95 = arith.addf %93, %94 : vector<3x128xf32>
    %96 = vector.shape_cast %91 : vector<3xf32> to vector<3x1xf32>
    %97 = vector.broadcast %96 : vector<3x1xf32> to vector<3x128xf32>
    %98 = arith.divf %95, %97 : vector<3x128xf32>
    %99 = tpu.transpose %34, [1, 0] : vector<15x128xf32> -> vector<128x15xf32>
    %cst_29 = arith.constant dense<0.000000e+00> : vector<15x15xf32>
    %100 = tpu.matmul %34, %99, %cst_29 {dimension_numbers = #tpu.dot_dimension_numbers<[1], [0], [0], [1], [0, 0, 1, 1], [], []>, precision = #tpu.contract_precision<fp32>} : vector<15x128xf32>, vector<128x15xf32>, vector<15x15xf32> -> vector<15x15xf32>
    %101 = tpu.iota {dimensions = array<i32: 1>} : vector<15x15xi32>
    %cst_30 = arith.constant 0.000000e+00 : f32
    %102 = vector.broadcast %cst_30 : f32 to vector<15x15xf32>
    %cst_31 = arith.constant dense<0xFF800000> : vector<15xf32>
    %103 = vector.multi_reduction <maximumf>, %100, %cst_31 [1] : vector<15x15xf32> to vector<15xf32>
    %104 = vector.shape_cast %103 : vector<15xf32> to vector<15x1xf32>
    %105 = vector.broadcast %104 : vector<15x1xf32> to vector<15x15xf32>
    %106 = arith.cmpf oge, %100, %105 : vector<15x15xf32>
    %c15_i32 = arith.constant 15 : i32
    %107 = vector.broadcast %c15_i32 : i32 to vector<15x15xi32>
    %108 = arith.select %106, %101, %107 : vector<15x15xi1>, vector<15x15xi32>
    %cst_32 = arith.constant dense<2147483647> : vector<15xi32>
    %109 = vector.multi_reduction <minsi>, %108, %cst_32 [1] : vector<15x15xi32> to vector<15xi32>
    %110 = vector.shape_cast %109 : vector<15xi32> to vector<15x1xi32>
    %111 = vector.broadcast %110 : vector<15x1xi32> to vector<15x15xi32>
    %112 = arith.cmpi eq, %101, %111 : vector<15x15xi32>
    %cst_33 = arith.constant 0xFF800000 : f32
    %113 = vector.broadcast %cst_33 : f32 to vector<15x15xf32>
    %114 = arith.select %112, %113, %100 : vector<15x15xi1>, vector<15x15xf32>
    %cst_34 = arith.constant 1.000000e+00 : f32
    %115 = vector.broadcast %cst_34 : f32 to vector<15x15xf32>
    %116 = arith.select %112, %115, %102 : vector<15x15xi1>, vector<15x15xf32>
    %cst_35 = arith.constant dense<0xFF800000> : vector<15xf32>
    %117 = vector.multi_reduction <maximumf>, %114, %cst_35 [1] : vector<15x15xf32> to vector<15xf32>
    %118 = vector.shape_cast %117 : vector<15xf32> to vector<15x1xf32>
    %119 = vector.broadcast %118 : vector<15x1xf32> to vector<15x15xf32>
    %120 = arith.cmpf oge, %114, %119 : vector<15x15xf32>
    %c15_i32_36 = arith.constant 15 : i32
    %121 = vector.broadcast %c15_i32_36 : i32 to vector<15x15xi32>
    %122 = arith.select %120, %101, %121 : vector<15x15xi1>, vector<15x15xi32>
    %cst_37 = arith.constant dense<2147483647> : vector<15xi32>
    %123 = vector.multi_reduction <minsi>, %122, %cst_37 [1] : vector<15x15xi32> to vector<15xi32>
    %124 = vector.shape_cast %123 : vector<15xi32> to vector<15x1xi32>
    %125 = vector.broadcast %124 : vector<15x1xi32> to vector<15x15xi32>
    %126 = arith.cmpi eq, %101, %125 : vector<15x15xi32>
    %cst_38 = arith.constant 0xFF800000 : f32
    %127 = vector.broadcast %cst_38 : f32 to vector<15x15xf32>
    %128 = arith.select %126, %127, %114 : vector<15x15xi1>, vector<15x15xf32>
    %cst_39 = arith.constant 1.000000e+00 : f32
    %129 = vector.broadcast %cst_39 : f32 to vector<15x15xf32>
    %130 = arith.select %126, %129, %116 : vector<15x15xi1>, vector<15x15xf32>
    %cst_40 = arith.constant dense<0xFF800000> : vector<15xf32>
    %131 = vector.multi_reduction <maximumf>, %128, %cst_40 [1] : vector<15x15xf32> to vector<15xf32>
    %132 = vector.shape_cast %131 : vector<15xf32> to vector<15x1xf32>
    %133 = vector.broadcast %132 : vector<15x1xf32> to vector<15x15xf32>
    %134 = arith.cmpf oge, %128, %133 : vector<15x15xf32>
    %c15_i32_41 = arith.constant 15 : i32
    %135 = vector.broadcast %c15_i32_41 : i32 to vector<15x15xi32>
    %136 = arith.select %134, %101, %135 : vector<15x15xi1>, vector<15x15xi32>
    %cst_42 = arith.constant dense<2147483647> : vector<15xi32>
    %137 = vector.multi_reduction <minsi>, %136, %cst_42 [1] : vector<15x15xi32> to vector<15xi32>
    %138 = vector.shape_cast %137 : vector<15xi32> to vector<15x1xi32>
    %139 = vector.broadcast %138 : vector<15x1xi32> to vector<15x15xi32>
    %140 = arith.cmpi eq, %101, %139 : vector<15x15xi32>
    %cst_43 = arith.constant 0xFF800000 : f32
    %141 = vector.broadcast %cst_43 : f32 to vector<15x15xf32>
    %142 = arith.select %140, %141, %128 : vector<15x15xi1>, vector<15x15xf32>
    %cst_44 = arith.constant 1.000000e+00 : f32
    %143 = vector.broadcast %cst_44 : f32 to vector<15x15xf32>
    %144 = arith.select %140, %143, %130 : vector<15x15xi1>, vector<15x15xf32>
    %cst_45 = arith.constant dense<0xFF800000> : vector<15xf32>
    %145 = vector.multi_reduction <maximumf>, %142, %cst_45 [1] : vector<15x15xf32> to vector<15xf32>
    %146 = vector.shape_cast %145 : vector<15xf32> to vector<15x1xf32>
    %147 = vector.broadcast %146 : vector<15x1xf32> to vector<15x15xf32>
    %148 = arith.cmpf oge, %142, %147 : vector<15x15xf32>
    %c15_i32_46 = arith.constant 15 : i32
    %149 = vector.broadcast %c15_i32_46 : i32 to vector<15x15xi32>
    %150 = arith.select %148, %101, %149 : vector<15x15xi1>, vector<15x15xi32>
    %cst_47 = arith.constant dense<2147483647> : vector<15xi32>
    %151 = vector.multi_reduction <minsi>, %150, %cst_47 [1] : vector<15x15xi32> to vector<15xi32>
    %152 = vector.shape_cast %151 : vector<15xi32> to vector<15x1xi32>
    %153 = vector.broadcast %152 : vector<15x1xi32> to vector<15x15xi32>
    %154 = arith.cmpi eq, %101, %153 : vector<15x15xi32>
    %cst_48 = arith.constant 0xFF800000 : f32
    %155 = vector.broadcast %cst_48 : f32 to vector<15x15xf32>
    %156 = arith.select %154, %155, %142 : vector<15x15xi1>, vector<15x15xf32>
    %cst_49 = arith.constant 1.000000e+00 : f32
    %157 = vector.broadcast %cst_49 : f32 to vector<15x15xf32>
    %158 = arith.select %154, %157, %144 : vector<15x15xi1>, vector<15x15xf32>
    %cst_50 = arith.constant dense<0xFF800000> : vector<15xf32>
    %159 = vector.multi_reduction <maximumf>, %156, %cst_50 [1] : vector<15x15xf32> to vector<15xf32>
    %160 = vector.shape_cast %159 : vector<15xf32> to vector<15x1xf32>
    %161 = vector.broadcast %160 : vector<15x1xf32> to vector<15x15xf32>
    %162 = arith.cmpf oge, %156, %161 : vector<15x15xf32>
    %c15_i32_51 = arith.constant 15 : i32
    %163 = vector.broadcast %c15_i32_51 : i32 to vector<15x15xi32>
    %164 = arith.select %162, %101, %163 : vector<15x15xi1>, vector<15x15xi32>
    %cst_52 = arith.constant dense<2147483647> : vector<15xi32>
    %165 = vector.multi_reduction <minsi>, %164, %cst_52 [1] : vector<15x15xi32> to vector<15xi32>
    %166 = vector.shape_cast %165 : vector<15xi32> to vector<15x1xi32>
    %167 = vector.broadcast %166 : vector<15x1xi32> to vector<15x15xi32>
    %168 = arith.cmpi eq, %101, %167 : vector<15x15xi32>
    %cst_53 = arith.constant 0xFF800000 : f32
    %169 = vector.broadcast %cst_53 : f32 to vector<15x15xf32>
    %170 = arith.select %168, %169, %156 : vector<15x15xi1>, vector<15x15xf32>
    %cst_54 = arith.constant 1.000000e+00 : f32
    %171 = vector.broadcast %cst_54 : f32 to vector<15x15xf32>
    %172 = arith.select %168, %171, %158 : vector<15x15xi1>, vector<15x15xf32>
    %cst_55 = arith.constant dense<0xFF800000> : vector<15xf32>
    %173 = vector.multi_reduction <maximumf>, %170, %cst_55 [1] : vector<15x15xf32> to vector<15xf32>
    %174 = vector.shape_cast %173 : vector<15xf32> to vector<15x1xf32>
    %175 = vector.broadcast %174 : vector<15x1xf32> to vector<15x15xf32>
    %176 = arith.cmpf oge, %170, %175 : vector<15x15xf32>
    %c15_i32_56 = arith.constant 15 : i32
    %177 = vector.broadcast %c15_i32_56 : i32 to vector<15x15xi32>
    %178 = arith.select %176, %101, %177 : vector<15x15xi1>, vector<15x15xi32>
    %cst_57 = arith.constant dense<2147483647> : vector<15xi32>
    %179 = vector.multi_reduction <minsi>, %178, %cst_57 [1] : vector<15x15xi32> to vector<15xi32>
    %180 = vector.shape_cast %179 : vector<15xi32> to vector<15x1xi32>
    %181 = vector.broadcast %180 : vector<15x1xi32> to vector<15x15xi32>
    %182 = arith.cmpi eq, %101, %181 : vector<15x15xi32>
    %cst_58 = arith.constant 0xFF800000 : f32
    %183 = vector.broadcast %cst_58 : f32 to vector<15x15xf32>
    %184 = arith.select %182, %183, %170 : vector<15x15xi1>, vector<15x15xf32>
    %cst_59 = arith.constant 1.000000e+00 : f32
    %185 = vector.broadcast %cst_59 : f32 to vector<15x15xf32>
    %186 = arith.select %182, %185, %172 : vector<15x15xi1>, vector<15x15xf32>
    %cst_60 = arith.constant dense<0xFF800000> : vector<15xf32>
    %187 = vector.multi_reduction <maximumf>, %184, %cst_60 [1] : vector<15x15xf32> to vector<15xf32>
    %188 = vector.shape_cast %187 : vector<15xf32> to vector<15x1xf32>
    %189 = vector.broadcast %188 : vector<15x1xf32> to vector<15x15xf32>
    %190 = arith.cmpf oge, %184, %189 : vector<15x15xf32>
    %c15_i32_61 = arith.constant 15 : i32
    %191 = vector.broadcast %c15_i32_61 : i32 to vector<15x15xi32>
    %192 = arith.select %190, %101, %191 : vector<15x15xi1>, vector<15x15xi32>
    %cst_62 = arith.constant dense<2147483647> : vector<15xi32>
    %193 = vector.multi_reduction <minsi>, %192, %cst_62 [1] : vector<15x15xi32> to vector<15xi32>
    %194 = vector.shape_cast %193 : vector<15xi32> to vector<15x1xi32>
    %195 = vector.broadcast %194 : vector<15x1xi32> to vector<15x15xi32>
    %196 = arith.cmpi eq, %101, %195 : vector<15x15xi32>
    %cst_63 = arith.constant 0xFF800000 : f32
    %197 = vector.broadcast %cst_63 : f32 to vector<15x15xf32>
    %198 = arith.select %196, %197, %184 : vector<15x15xi1>, vector<15x15xf32>
    %cst_64 = arith.constant 1.000000e+00 : f32
    %199 = vector.broadcast %cst_64 : f32 to vector<15x15xf32>
    %200 = arith.select %196, %199, %186 : vector<15x15xi1>, vector<15x15xf32>
    %cst_65 = arith.constant dense<0xFF800000> : vector<15xf32>
    %201 = vector.multi_reduction <maximumf>, %198, %cst_65 [1] : vector<15x15xf32> to vector<15xf32>
    %202 = vector.shape_cast %201 : vector<15xf32> to vector<15x1xf32>
    %203 = vector.broadcast %202 : vector<15x1xf32> to vector<15x15xf32>
    %204 = arith.cmpf oge, %198, %203 : vector<15x15xf32>
    %c15_i32_66 = arith.constant 15 : i32
    %205 = vector.broadcast %c15_i32_66 : i32 to vector<15x15xi32>
    %206 = arith.select %204, %101, %205 : vector<15x15xi1>, vector<15x15xi32>
    %cst_67 = arith.constant dense<2147483647> : vector<15xi32>
    %207 = vector.multi_reduction <minsi>, %206, %cst_67 [1] : vector<15x15xi32> to vector<15xi32>
    %208 = vector.shape_cast %207 : vector<15xi32> to vector<15x1xi32>
    %209 = vector.broadcast %208 : vector<15x1xi32> to vector<15x15xi32>
    %210 = arith.cmpi eq, %101, %209 : vector<15x15xi32>
    %cst_68 = arith.constant 0xFF800000 : f32
    %211 = vector.broadcast %cst_68 : f32 to vector<15x15xf32>
    %212 = arith.select %210, %211, %198 : vector<15x15xi1>, vector<15x15xf32>
    %cst_69 = arith.constant 1.000000e+00 : f32
    %213 = vector.broadcast %cst_69 : f32 to vector<15x15xf32>
    %214 = arith.select %210, %213, %200 : vector<15x15xi1>, vector<15x15xf32>
    %cst_70 = arith.constant dense<0xFF800000> : vector<15xf32>
    %215 = vector.multi_reduction <maximumf>, %212, %cst_70 [1] : vector<15x15xf32> to vector<15xf32>
    %216 = vector.shape_cast %215 : vector<15xf32> to vector<15x1xf32>
    %217 = vector.broadcast %216 : vector<15x1xf32> to vector<15x15xf32>
    %218 = arith.cmpf oge, %212, %217 : vector<15x15xf32>
    %c15_i32_71 = arith.constant 15 : i32
    %219 = vector.broadcast %c15_i32_71 : i32 to vector<15x15xi32>
    %220 = arith.select %218, %101, %219 : vector<15x15xi1>, vector<15x15xi32>
    %cst_72 = arith.constant dense<2147483647> : vector<15xi32>
    %221 = vector.multi_reduction <minsi>, %220, %cst_72 [1] : vector<15x15xi32> to vector<15xi32>
    %222 = vector.shape_cast %221 : vector<15xi32> to vector<15x1xi32>
    %223 = vector.broadcast %222 : vector<15x1xi32> to vector<15x15xi32>
    %224 = arith.cmpi eq, %101, %223 : vector<15x15xi32>
    %cst_73 = arith.constant 0xFF800000 : f32
    %225 = vector.broadcast %cst_73 : f32 to vector<15x15xf32>
    %226 = arith.select %224, %225, %212 : vector<15x15xi1>, vector<15x15xf32>
    %cst_74 = arith.constant 1.000000e+00 : f32
    %227 = vector.broadcast %cst_74 : f32 to vector<15x15xf32>
    %228 = arith.select %224, %227, %214 : vector<15x15xi1>, vector<15x15xf32>
    %cst_75 = arith.constant dense<0xFF800000> : vector<15xf32>
    %229 = vector.multi_reduction <maximumf>, %226, %cst_75 [1] : vector<15x15xf32> to vector<15xf32>
    %230 = vector.shape_cast %229 : vector<15xf32> to vector<15x1xf32>
    %231 = vector.broadcast %230 : vector<15x1xf32> to vector<15x15xf32>
    %232 = arith.cmpf oge, %226, %231 : vector<15x15xf32>
    %c15_i32_76 = arith.constant 15 : i32
    %233 = vector.broadcast %c15_i32_76 : i32 to vector<15x15xi32>
    %234 = arith.select %232, %101, %233 : vector<15x15xi1>, vector<15x15xi32>
    %cst_77 = arith.constant dense<2147483647> : vector<15xi32>
    %235 = vector.multi_reduction <minsi>, %234, %cst_77 [1] : vector<15x15xi32> to vector<15xi32>
    %236 = vector.shape_cast %235 : vector<15xi32> to vector<15x1xi32>
    %237 = vector.broadcast %236 : vector<15x1xi32> to vector<15x15xi32>
    %238 = arith.cmpi eq, %101, %237 : vector<15x15xi32>
    %cst_78 = arith.constant 1.000000e+00 : f32
    %239 = vector.broadcast %cst_78 : f32 to vector<15x15xf32>
    %240 = arith.select %238, %239, %228 : vector<15x15xi1>, vector<15x15xf32>
    %241 = tpu.transpose %240, [1, 0] : vector<15x15xf32> -> vector<15x15xf32>
    %242 = arith.mulf %240, %241 : vector<15x15xf32>
    %cst_79 = arith.constant 0.000000e+00 : f32
    %243 = vector.broadcast %cst_79 : f32 to vector<15x15xf32>
    %244 = arith.cmpf ogt, %242, %243 : vector<15x15xf32>
    %cst_80 = arith.constant 0xFF800000 : f32
    %245 = vector.broadcast %cst_80 : f32 to vector<15x15xf32>
    %246 = arith.select %244, %100, %245 : vector<15x15xi1>, vector<15x15xf32>
    %cst_81 = arith.constant dense<0xFF800000> : vector<15xf32>
    %247 = vector.multi_reduction <maximumf>, %246, %cst_81 [1] : vector<15x15xf32> to vector<15xf32>
    %248 = vector.shape_cast %247 : vector<15xf32> to vector<15x1xf32>
    %cst_82 = arith.constant 0.000000e+00 : f32
    %249 = vector.broadcast %cst_82 : f32 to vector<15x15xf32>
    %250 = arith.cmpf ogt, %242, %249 : vector<15x15xf32>
    %251 = vector.broadcast %248 : vector<15x1xf32> to vector<15x15xf32>
    %252 = arith.subf %100, %251 : vector<15x15xf32>
    %253 = math.exp %252 : vector<15x15xf32>
    %cst_83 = arith.constant 0.000000e+00 : f32
    %254 = vector.broadcast %cst_83 : f32 to vector<15x15xf32>
    %255 = arith.select %250, %253, %254 : vector<15x15xi1>, vector<15x15xf32>
    %cst_84 = arith.constant dense<0.000000e+00> : vector<15xf32>
    %256 = vector.multi_reduction <add>, %255, %cst_84 [1] : vector<15x15xf32> to vector<15xf32>
    %257 = vector.shape_cast %256 : vector<15xf32> to vector<15x1xf32>
    %258 = vector.broadcast %257 : vector<15x1xf32> to vector<15x15xf32>
    %259 = arith.divf %255, %258 : vector<15x15xf32>
    %cst_85 = arith.constant dense<0.000000e+00> : vector<15x128xf32>
    %260 = tpu.matmul %259, %10, %cst_85 {dimension_numbers = #tpu.dot_dimension_numbers<[1], [0], [0], [1], [0, 0, 1, 1], [], []>} : vector<15x15xf32>, vector<15x128xf32>, vector<15x128xf32> -> vector<15x128xf32>
    %261 = arith.mulf %260, %260 : vector<15x128xf32>
    %cst_86 = arith.constant dense<0.000000e+00> : vector<15xf32>
    %262 = vector.multi_reduction <add>, %261, %cst_86 [1] : vector<15x128xf32> to vector<15xf32>
    %263 = vector.shape_cast %262 : vector<15xf32> to vector<15x1xf32>
    %cst_87 = arith.constant 1.000000e-16 : f32
    %264 = vector.broadcast %cst_87 : f32 to vector<15x1xf32>
    %265 = arith.maximumf %263, %264 : vector<15x1xf32>
    %266 = math.rsqrt %265 : vector<15x1xf32>
    %267 = vector.broadcast %266 : vector<15x1xf32> to vector<15x128xf32>
    %268 = arith.mulf %260, %267 : vector<15x128xf32>
    %269 = arith.mulf %98, %98 : vector<3x128xf32>
    %cst_88 = arith.constant dense<0.000000e+00> : vector<3xf32>
    %270 = vector.multi_reduction <add>, %269, %cst_88 [1] : vector<3x128xf32> to vector<3xf32>
    %271 = vector.shape_cast %270 : vector<3xf32> to vector<3x1xf32>
    %cst_89 = arith.constant 1.000000e-16 : f32
    %272 = vector.broadcast %cst_89 : f32 to vector<3x1xf32>
    %273 = arith.maximumf %271, %272 : vector<3x1xf32>
    %274 = math.rsqrt %273 : vector<3x1xf32>
    %275 = vector.broadcast %274 : vector<3x1xf32> to vector<3x128xf32>
    %276 = arith.mulf %98, %275 : vector<3x128xf32>
    %277 = tpu.transpose %276, [1, 0] : vector<3x128xf32> -> vector<128x3xf32>
    %cst_90 = arith.constant dense<0.000000e+00> : vector<15x3xf32>
    %278 = tpu.matmul %268, %277, %cst_90 {dimension_numbers = #tpu.dot_dimension_numbers<[1], [0], [0], [1], [0, 0, 1, 1], [], []>} : vector<15x128xf32>, vector<128x3xf32>, vector<15x3xf32> -> vector<15x3xf32>
    %c0_91 = arith.constant 0 : index
    %c0_92 = arith.constant 0 : index
    %279 = memref.load %arg2[%c0_91, %c0_92] : memref<1x1xf32, #tpu.memory_space<smem>>
    %280 = vector.broadcast %279 : f32 to vector<15x3xf32>
    %281 = arith.mulf %280, %278 : vector<15x3xf32>
    %c0_93 = arith.constant 0 : index
    %c0_94 = arith.constant 0 : index
    %282 = vector.load %arg3[%c0_93, %c0_94] : memref<15x3xf32, #tpu.memory_space<vmem>>, vector<15x3xf32>
    tpu.vector_store %arg3[%c0_93, %c0_94], %281 {strides = array<i32>} : memref<15x3xf32, #tpu.memory_space<vmem>>, vector<15x3xf32>,
    return
  }
}

</mosaic_0001>

<bundles_post_ra>
// kernel: paper_model_forward.1
= control target key start
LH: loop header
LB: loop body
LE: loop exit
PB: predicated region body
PF: predicated region fallthrough
CT: control target
= control target key end

     0   :  { %vm8455_vm0 = vcmask 1041409   ;;  %vm8457_vm1 = vcmask 1042434   ;;  %vm8459_vm2 = vcmask 1043459   ;;  %vm8461_vm3 = vcmask 1044484   ;;  %s15265_s1 = inlined_call_operand.vmem [shape: bf16[128,128], index: 1, kind: input, shape index: {}]   ;;  %s15266_s0 = inlined_call_operand.vmem [shape: bf16[7680,128], index: 0, kind: input, shape index: {}]   ;;  %s15267_s2 = inlined_call_operand.<no memory space> [shape: f32[1,1], index: 2, kind: input, shape index: {}]   ;;  %s15268_s3 = inlined_call_operand.vmem [shape: f32[15,3], index: 3, kind: output, shape index: {}]  }
   0x1   :  { %v12712_v0 = vld [vmem:[%s15265_s1 + $0x38] sm:$0xff]  ;;  %v12711_v1 = vld [vmem:[%s15265_s1 + $0x30] sm:$0xff]  ;;  %v12710_v2 = vld [vmem:[%s15265_s1 + $0x28] sm:$0xff]  ;;  %vm8463_vm4 = vcmask 1045509   ;;  %vm8465_vm5 = vcmask 1046534   ;;  %vm8480_vm6 = vcmask 1046528  }
   0x2   :  { %3919 = vmatpush.bf16.msra.mxu0 %v12712_v0  ;;  %12713 = vmatpush.bf16.msra.mxu1 %v12712_v0  ;;  %v12709_v3 = vld [vmem:[%s15265_s1 + $0x20] sm:$0xff]  ;;  %v12708_v4 = vld [vmem:[%s15265_s1 + $0x18] sm:$0xff]  ;;  %v12707_v5 = vld [vmem:[%s15265_s1 + $0x10] sm:$0xff]  ;;  %vm8467_vm7 = vcmask 1047559   ;;  %vm8476_vm11 = vcmask 121856   ;;  %vm8761_vm12 = vcmask 1042432  }
   0x3   :  { %12715 = vmatpush.bf16.msra.mxu3 %v12712_v0  ;;  %12714 = vmatpush.bf16.msra.mxu2 %v12712_v0  ;;  %v12706_v6 = vld [vmem:[%s15265_s1 + $0x8] sm:$0xff]  ;;  %v12705_v7 = vld [vmem:[%s15265_s1] sm:$0xff]  ;;  %v12468_v11 = vld [vmem:[%s15266_s0 + $0x798] sm:$0xff] }
   0x4   :  { %v12225_v8 = vld [vmem:[%s15266_s0] sm:$0xff]  ;;  %v12586_v10 = vld [vmem:[%s15266_s0 + $0xb48] sm:$0xff]  ;;  %v12587_v14 = vld [vmem:[%s15266_s0 + $0xb50] sm:$0xff] }
   0x5   :  { %v12349_v9 = vld [vmem:[%s15266_s0 + $0x3e0] sm:$0xff]  ;;  %v12226_v12 = vld [vmem:[%s15266_s0 + $0x8] sm:$0xff]  ;;  %v12227_v16 = vld [vmem:[%s15266_s0 + $0x10] sm:$0xff] }
   0x6   :  { %3920 = vmatpush.bf16.msra.mxu0 %v12711_v1  ;;  %12716 = vmatpush.bf16.msra.mxu1 %v12711_v1  ;;  %v12350_v13 = vld [vmem:[%s15266_s0 + $0x3e8] sm:$0xff]  ;;  %v12469_v15 = vld [vmem:[%s15266_s0 + $0x7a0] sm:$0xff]  ;;  %v12351_v17 = vld [vmem:[%s15266_s0 + $0x3f0] sm:$0xff] }
   0x7   :  { %12718 = vmatpush.bf16.msra.mxu3 %v12711_v1  ;;  %12717 = vmatpush.bf16.msra.mxu2 %v12711_v1  ;;  %v12588_v18 = vld [vmem:[%s15266_s0 + $0xb58] sm:$0xff]  ;;  %v12470_v19 = vld [vmem:[%s15266_s0 + $0x7a8] sm:$0xff]  ;;  %v12589_v22 = vld [vmem:[%s15266_s0 + $0xb60] sm:$0xff] }
   0x8   :  { %v12228_v20 = vld [vmem:[%s15266_s0 + $0x18] sm:$0xff]  ;;  %v12471_v23 = vld [vmem:[%s15266_s0 + $0x7b0] sm:$0xff]  ;;  %v12229_v24 = vld [vmem:[%s15266_s0 + $0x20] sm:$0xff] }
   0x9   :  { %v12352_v21 = vld [vmem:[%s15266_s0 + $0x3f8] sm:$0xff]  ;;  %v12353_v25 = vld [vmem:[%s15266_s0 + $0x400] sm:$0xff]  ;;  %v12590_v26 = vld [vmem:[%s15266_s0 + $0xb68] sm:$0xff] }
   0xa   :  { %3921 = vmatpush.bf16.msra.mxu0 %v12710_v2  ;;  %12719 = vmatpush.bf16.msra.mxu1 %v12710_v2  ;;  %v12472_v27 = vld [vmem:[%s15266_s0 + $0x7b8] sm:$0xff]  ;;  %v12230_v28 = vld [vmem:[%s15266_s0 + $0x28] sm:$0xff]  ;;  %v12591_v30 = vld [vmem:[%s15266_s0 + $0xb70] sm:$0xff] }
   0xb   :  { %12721 = vmatpush.bf16.msra.mxu3 %v12710_v2  ;;  %12720 = vmatpush.bf16.msra.mxu2 %v12710_v2  ;;  %v12354_v29 = vld [vmem:[%s15266_s0 + $0x408] sm:$0xff]  ;;  %v12473_v31 = vld [vmem:[%s15266_s0 + $0x7c0] sm:$0xff]  ;;  %v12231_v32 = vld [vmem:[%s15266_s0 + $0x30] sm:$0xff] }
   0xc   :  { %v12355_v33 = vld [vmem:[%s15266_s0 + $0x410] sm:$0xff]  ;;  %v12592_v34 = vld [vmem:[%s15266_s0 + $0xb78] sm:$0xff]  ;;  %v12474_v35 = vld [vmem:[%s15266_s0 + $0x7c8] sm:$0xff] }
   0xd   :  { %v12232_v36 = vld [vmem:[%s15266_s0 + $0x38] sm:$0xff]  ;;  %v12593_v38 = vld [vmem:[%s15266_s0 + $0xb80] sm:$0xff]  ;;  %v12475_v39 = vld [vmem:[%s15266_s0 + $0x7d0] sm:$0xff] }
   0xe   :  { %3922 = vmatpush.bf16.msra.mxu0 %v12709_v3  ;;  %12722 = vmatpush.bf16.msra.mxu1 %v12709_v3  ;;  %v12356_v37 = vld [vmem:[%s15266_s0 + $0x418] sm:$0xff]  ;;  %v12233_v40 = vld [vmem:[%s15266_s0 + $0x40] sm:$0xff]  ;;  %v12594_v44 = vld [vmem:[%s15266_s0 + $0xb88] sm:$0xff] }
   0xf   :  { %12724 = vmatpush.bf16.msra.mxu3 %v12709_v3  ;;  %12723 = vmatpush.bf16.msra.mxu2 %v12709_v3  ;;  %v12357_v41 = vld [vmem:[%s15266_s0 + $0x420] sm:$0xff]  ;;  %v12476_v45 = vld [vmem:[%s15266_s0 + $0x7d8] sm:$0xff]  ;;  %v12234_v54 = vld [vmem:[%s15266_s0 + $0x48] sm:$0xff] }
  0x10   :  { %v12358_v55 = vld [vmem:[%s15266_s0 + $0x428] sm:$0xff]  ;;  %v12595_v59 = vld [vmem:[%s15266_s0 + $0xb90] sm:$0xff]  ;;  %v12477_v60 = vld [vmem:[%s15266_s0 + $0x7e0] sm:$0xff] }
  0x12   :  { %3923 = vmatpush.bf16.msra.mxu0 %v12708_v4  ;;  %12725 = vmatpush.bf16.msra.mxu1 %v12708_v4 }
  0x13   :  { %12727 = vmatpush.bf16.msra.mxu3 %v12708_v4  ;;  %12726 = vmatpush.bf16.msra.mxu2 %v12708_v4 }
  0x16   :  { %3924 = vmatpush.bf16.msra.mxu0 %v12707_v5  ;;  %12728 = vmatpush.bf16.msra.mxu1 %v12707_v5 }
  0x17   :  { %12730 = vmatpush.bf16.msra.mxu3 %v12707_v5  ;;  %12729 = vmatpush.bf16.msra.mxu2 %v12707_v5 }
  0x1a   :  { %3925 = vmatpush.bf16.msra.mxu0 %v12706_v6  ;;  %12731 = vmatpush.bf16.msra.mxu1 %v12706_v6 }
  0x1b   :  { %12733 = vmatpush.bf16.msra.mxu3 %v12706_v6  ;;  %12732 = vmatpush.bf16.msra.mxu2 %v12706_v6  ;;  %v12235_v6 = vld [vmem:[%s15266_s0 + $0x50] sm:$0xff] }
  0x1e   :  { %3926 = vmatpush.bf16.msra.mxu0 %v12705_v7  ;;  %12734 = vmatpush.bf16.msra.mxu1 %v12705_v7 }
  0x1f   :  { %12736 = vmatpush.bf16.msra.mxu3 %v12705_v7  ;;  %12735 = vmatpush.bf16.msra.mxu2 %v12705_v7  ;;  %v12359_v7 = vld [vmem:[%s15266_s0 + $0x430] sm:$0xff] }
  0x21   :  { %3927 = vmatmul.bf16.vlgmr.msra.gmra.mxu0 %v12225_v8  ;;  %4547 = vmatmul.bf16.vlgmr.msra.gmra.mxu1 %v12349_v9 }
  0x22   :  { %5732 = vmatmul.bf16.vlgmr.msra.gmra.mxu3 %v12586_v10  ;;  %5142 = vmatmul.bf16.vlgmr.msra.gmra.mxu2 %v12468_v11  ;;  %v12596_v11 = vld [vmem:[%s15266_s0 + $0xb98] sm:$0xff] }
  0x31   :  { %3932 = vmatmul.bf16.gmra.mxu0 %v12226_v12  ;;  %4552 = vmatmul.bf16.gmra.mxu1 %v12350_v13  ;;  %v12478_v12 = vld [vmem:[%s15266_s0 + $0x7e8] sm:$0xff] }
  0x32   :  { %5737 = vmatmul.bf16.gmra.mxu3 %v12587_v14  ;;  %5147 = vmatmul.bf16.gmra.mxu2 %v12469_v15 }
  0x41   :  { %3937 = vmatmul.bf16.gmra.mxu0 %v12227_v16  ;;  %4557 = vmatmul.bf16.gmra.mxu1 %v12351_v17 }
  0x42   :  { %5742 = vmatmul.bf16.gmra.mxu3 %v12588_v18  ;;  %5152 = vmatmul.bf16.gmra.mxu2 %v12470_v19 }
  0x51   :  { %3942 = vmatmul.bf16.gmra.mxu0 %v12228_v20  ;;  %4562 = vmatmul.bf16.gmra.mxu1 %v12352_v21 }
  0x52   :  { %5747 = vmatmul.bf16.gmra.mxu3 %v12589_v22  ;;  %5157 = vmatmul.bf16.gmra.mxu2 %v12471_v23  ;;  %v12236_v22 = vld [vmem:[%s15266_s0 + $0x58] sm:$0xff] }
  0x53   :  { %v12360_v23 = vld [vmem:[%s15266_s0 + $0x438] sm:$0xff] }
  0x61   :  { %3947 = vmatmul.bf16.gmra.mxu0 %v12229_v24  ;;  %4567 = vmatmul.bf16.gmra.mxu1 %v12353_v25 }
  0x62   :  { %5752 = vmatmul.bf16.gmra.mxu3 %v12590_v26  ;;  %5162 = vmatmul.bf16.gmra.mxu2 %v12472_v27  ;;  %v12597_v27 = vld [vmem:[%s15266_s0 + $0xba0] sm:$0xff] }
  0x71   :  { %3952 = vmatmul.bf16.gmra.mxu0 %v12230_v28  ;;  %4572 = vmatmul.bf16.gmra.mxu1 %v12354_v29  ;;  %v12479_v28 = vld [vmem:[%s15266_s0 + $0x7f0] sm:$0xff] }
  0x72   :  { %5757 = vmatmul.bf16.gmra.mxu3 %v12591_v30  ;;  %5167 = vmatmul.bf16.gmra.mxu2 %v12473_v31 }
  0x81   :  { %3957 = vmatmul.bf16.gmra.mxu0 %v12231_v32  ;;  %4577 = vmatmul.bf16.gmra.mxu1 %v12355_v33 }
  0x82   :  { %5762 = vmatmul.bf16.gmra.mxu3 %v12592_v34  ;;  %5172 = vmatmul.bf16.gmra.mxu2 %v12474_v35 }
  0x91   :  { %3962 = vmatmul.bf16.gmra.mxu0 %v12232_v36  ;;  %4582 = vmatmul.bf16.gmra.mxu1 %v12356_v37 }
  0x92   :  { %5767 = vmatmul.bf16.gmra.mxu3 %v12593_v38  ;;  %5177 = vmatmul.bf16.gmra.mxu2 %v12475_v39  ;;  %v12237_v38 = vld [vmem:[%s15266_s0 + $0x60] sm:$0xff] }
  0x93   :  { %v12361_v39 = vld [vmem:[%s15266_s0 + $0x440] sm:$0xff] }
  0x9e   :  { %v3928_v42 = vpop.f32.mrf.mxu0  ;;  %v12919_v43 = vpop.f32.mrf.mxu1 }
  0x9f   :  { %15281 = vst [vmem:[#allocation3_spill] sm:$0xff] %v12919_v43  ;;  %v6328_v50 = vmax.f32 %v3928_v42, 0.0 }
  0xa1   :  { %3967 = vmatmul.bf16.gmra.mxu0 %v12233_v40  ;;  %4587 = vmatmul.bf16.gmra.mxu1 %v12357_v41 }
  0xa2   :  { %5772 = vmatmul.bf16.gmra.mxu3 %v12594_v44  ;;  %5182 = vmatmul.bf16.gmra.mxu2 %v12476_v45  ;;  %v12598_v44 = vld [vmem:[%s15266_s0 + $0xba8] sm:$0xff]  ;;  %v12480_v45 = vld [vmem:[%s15266_s0 + $0x7f8] sm:$0xff] }
  0xa5   :  { %v12927_v46 = vpop.f32.mrf.mxu3  ;;  %v12929_v47 = vpop.f32.mrf.mxu2 }
  0xa6   :  { %v3930_v48 = vpop.f32.mrf.mxu0  ;;  %v12931_v49 = vpop.f32.mrf.mxu1 }
  0xa7   :  { %15282 = vst [vmem:[#allocation4_spill] sm:$0xff] %v12931_v49  ;;  %v6329_v51 = vmax.f32 %v3930_v48, 0.0 }
  0xa9   :  { %v7288_v52 = vadd.f32 %v6329_v51, %v6328_v50 }
  0xad   :  { %v12933_v53 = vpop.f32.mrf.mxu3  ;;  %v12941_v56 = vpop.f32.mrf.mxu2 }
  0xae   :  { %v3933_v57 = vpop.f32.mrf.mxu0  ;;  %v12943_v58 = vpop.f32.mrf.mxu1 }
  0xaf   :  { %15283 = vst [vmem:[#allocation5_spill] sm:$0xff] %v12943_v58  ;;  %v6330_v61 = vmax.f32 %v3933_v57, 0.0 }
  0xb1   :  { %v7289_v62 = vadd.f32 %v7288_v52, %v6330_v61  ;;  %3972 = vmatmul.bf16.gmra.mxu0 %v12234_v54  ;;  %4592 = vmatmul.bf16.gmra.mxu1 %v12358_v55 }
  0xb2   :  { %5777 = vmatmul.bf16.gmra.mxu3 %v12595_v59  ;;  %5187 = vmatmul.bf16.gmra.mxu2 %v12477_v60 }
  0xb5   :  { %v12951_v63 = vpop.f32.mrf.mxu3  ;;  %v12953_v0 = vpop.f32.mrf.mxu2 }
  0xb6   :  { %v3935_v1 = vpop.f32.mrf.mxu0  ;;  %v12955_v2 = vpop.f32.mrf.mxu1 }
  0xb7   :  { %15284 = vst [vmem:[#allocation6_spill] sm:$0xff] %v12955_v2  ;;  %v6331_v3 = vmax.f32 %v3935_v1, 0.0 }
  0xb9   :  { %v7290_v4 = vadd.f32 %v7289_v62, %v6331_v3  ;;  %v12238_v3 = vld [vmem:[%s15266_s0 + $0x68] sm:$0xff] }
  0xbd   :  { %v12957_v5 = vpop.f32.mrf.mxu3  ;;  %v12965_v8 = vpop.f32.mrf.mxu2 }
  0xbe   :  { %15285 = vst [vmem:[#allocation7_spill] sm:$0xff] %v12965_v8  ;;  %v3938_v9 = vpop.f32.mrf.mxu0  ;;  %v12967_v10 = vpop.f32.mrf.mxu1 }
  0xbf   :  { %15286 = vst [vmem:[#allocation8_spill] sm:$0xff] %v12967_v10  ;;  %v6332_v13 = vmax.f32 %v3938_v9, 0.0 }
  0xc1   :  { %v7291_v14 = vadd.f32 %v7290_v4, %v6332_v13  ;;  %3977 = vmatmul.bf16.gmra.mxu0 %v12235_v6  ;;  %4597 = vmatmul.bf16.gmra.mxu1 %v12359_v7  ;;  %v12362_v4 = vld [vmem:[%s15266_s0 + $0x448] sm:$0xff] }
  0xc2   :  { %5782 = vmatmul.bf16.gmra.mxu3 %v12596_v11  ;;  %5192 = vmatmul.bf16.gmra.mxu2 %v12478_v12  ;;  %v12599_v11 = vld [vmem:[%s15266_s0 + $0xbb0] sm:$0xff]  ;;  %v12481_v12 = vld [vmem:[%s15266_s0 + $0x800] sm:$0xff] }
  0xc5   :  { %v12975_v15 = vpop.f32.mrf.mxu3  ;;  %v12977_v16 = vpop.f32.mrf.mxu2 }
  0xc6   :  { %15287 = vst [vmem:[#allocation9_spill] sm:$0xff] %v12977_v16  ;;  %v3940_v17 = vpop.f32.mrf.mxu0  ;;  %v12979_v18 = vpop.f32.mrf.mxu1 }
  0xc7   :  { %15288 = vst [vmem:[#allocation10_spill] sm:$0xff] %v12979_v18  ;;  %v6333_v19 = vmax.f32 %v3940_v17, 0.0 }
  0xc9   :  { %v7292_v20 = vadd.f32 %v7291_v14, %v6333_v19 }
  0xcd   :  { %v12981_v21 = vpop.f32.mrf.mxu3  ;;  %v12989_v24 = vpop.f32.mrf.mxu2 }
  0xce   :  { %15289 = vst [vmem:[#allocation11_spill] sm:$0xff] %v12989_v24  ;;  %v3943_v25 = vpop.f32.mrf.mxu0  ;;  %v12991_v26 = vpop.f32.mrf.mxu1 }
  0xcf   :  { %15290 = vst [vmem:[#allocation12_spill] sm:$0xff] %v12991_v26  ;;  %v6334_v29 = vmax.f32 %v3943_v25, 0.0 }
  0xd1   :  { %v7293_v30 = vadd.f32 %v7292_v20, %v6334_v29  ;;  %3982 = vmatmul.bf16.gmra.mxu0 %v12236_v22  ;;  %4602 = vmatmul.bf16.gmra.mxu1 %v12360_v23 }
  0xd2   :  { %5787 = vmatmul.bf16.gmra.mxu3 %v12597_v27  ;;  %5197 = vmatmul.bf16.gmra.mxu2 %v12479_v28 }
  0xd5   :  { %v12999_v31 = vpop.f32.mrf.mxu3  ;;  %v13001_v32 = vpop.f32.mrf.mxu2 }
  0xd6   :  { %15291 = vst [vmem:[#allocation13_spill] sm:$0xff] %v13001_v32  ;;  %v3945_v33 = vpop.f32.mrf.mxu0  ;;  %v13003_v34 = vpop.f32.mrf.mxu1 }
  0xd7   :  { %15292 = vst [vmem:[#allocation14_spill] sm:$0xff] %v13003_v34  ;;  %v6335_v35 = vmax.f32 %v3945_v33, 0.0 }
  0xd9   :  { %v7294_v36 = vadd.f32 %v7293_v30, %v6335_v35  ;;  %v12239_v35 = vld [vmem:[%s15266_s0 + $0x70] sm:$0xff] }
  0xdd   :  { %v13005_v37 = vpop.f32.mrf.mxu3  ;;  %v13013_v40 = vpop.f32.mrf.mxu2 }
  0xde   :  { %15293 = vst [vmem:[#allocation15_spill] sm:$0xff] %v13005_v37  ;;  %v3948_v41 = vpop.f32.mrf.mxu0  ;;  %v4568_v42 = vpop.f32.mrf.mxu1 }
  0xdf   :  { %15294 = vst [vmem:[#allocation16_spill] sm:$0xff] %v13013_v40  ;;  %v6336_v48 = vmax.f32 %v3948_v41, 0.0  ;;  %v6584_v51 = vmax.f32 %v4568_v42, 0.0  ;;  %v12600_v42 = vld [vmem:[%s15266_s0 + $0xbb8] sm:$0xff] }
  0xe1   :  { %v7295_v50 = vadd.f32 %v7294_v36, %v6336_v48  ;;  %3987 = vmatmul.bf16.gmra.mxu0 %v12237_v38  ;;  %4607 = vmatmul.bf16.gmra.mxu1 %v12361_v39  ;;  %v12363_v36 = vld [vmem:[%s15266_s0 + $0x450] sm:$0xff] }
  0xe2   :  { %5792 = vmatmul.bf16.gmra.mxu3 %v12598_v44  ;;  %5202 = vmatmul.bf16.gmra.mxu2 %v12480_v45  ;;  %v12482_v44 = vld [vmem:[%s15266_s0 + $0x808] sm:$0xff] }
  0xe5   :  { %v13021_v52 = vpop.f32.mrf.mxu3  ;;  %v13023_v54 = vpop.f32.mrf.mxu2 }
  0xe6   :  { %15295 = vst [vmem:[#allocation17_spill] sm:$0xff] %v13021_v52  ;;  %v3950_v55 = vpop.f32.mrf.mxu0  ;;  %v4570_v57 = vpop.f32.mrf.mxu1 }
  0xe7   :  { %15296 = vst [vmem:[#allocation18_spill] sm:$0xff] %v13023_v54  ;;  %v6337_v59 = vmax.f32 %v3950_v55, 0.0  ;;  %v6585_v60 = vmax.f32 %v4570_v57, 0.0 }
  0xe9   :  { %v7296_v61 = vadd.f32 %v7295_v50, %v6337_v59  ;;  %v7584_v62 = vadd.f32 %v6585_v60, %v6584_v51 }
  0xed   :  { %v13025_v1 = vpop.f32.mrf.mxu3  ;;  %v13033_v6 = vpop.f32.mrf.mxu2 }
  0xee   :  { %15297 = vst [vmem:[#allocation19_spill] sm:$0xff] %v13025_v1  ;;  %v3953_v7 = vpop.f32.mrf.mxu0  ;;  %v4573_v9 = vpop.f32.mrf.mxu1 }
  0xef   :  { %15298 = vst [vmem:[#allocation20_spill] sm:$0xff] %v13033_v6  ;;  %v6338_v13 = vmax.f32 %v3953_v7, 0.0  ;;  %v6586_v14 = vmax.f32 %v4573_v9, 0.0  ;;  %v12240_v9 = vld [vmem:[%s15266_s0 + $0x78] sm:$0xff] }
  0xf1   :  { %v7297_v17 = vadd.f32 %v7296_v61, %v6338_v13  ;;  %v7585_v19 = vadd.f32 %v7584_v62, %v6586_v14  ;;  %3992 = vmatmul.bf16.gmra.mxu0 %v12238_v3  ;;  %4612 = vmatmul.bf16.gmra.mxu1 %v12362_v4 }
  0xf2   :  { %5797 = vmatmul.bf16.gmra.mxu3 %v12599_v11  ;;  %5207 = vmatmul.bf16.gmra.mxu2 %v12481_v12  ;;  %v12364_v11 = vld [vmem:[%s15266_s0 + $0x458] sm:$0xff] }
  0xf5   :  { %v13041_v20 = vpop.f32.mrf.mxu3  ;;  %v13043_v22 = vpop.f32.mrf.mxu2 }
  0xf6   :  { %15299 = vst [vmem:[#allocation21_spill] sm:$0xff] %v13041_v20  ;;  %v3955_v23 = vpop.f32.mrf.mxu0  ;;  %v4575_v25 = vpop.f32.mrf.mxu1 }
  0xf7   :  { %15300 = vst [vmem:[#allocation22_spill] sm:$0xff] %v13043_v22  ;;  %v6339_v27 = vmax.f32 %v3955_v23, 0.0  ;;  %v6587_v28 = vmax.f32 %v4575_v25, 0.0 }
  0xf9   :  { %v7298_v29 = vadd.f32 %v7297_v17, %v6339_v27  ;;  %v7586_v30 = vadd.f32 %v7585_v19, %v6587_v28  ;;  %v12601_v17 = vld [vmem:[%s15266_s0 + $0xbc0] sm:$0xff]  ;;  %v12483_v19 = vld [vmem:[%s15266_s0 + $0x810] sm:$0xff] }
  0xfd   :  { %v13045_v33 = vpop.f32.mrf.mxu3  ;;  %v13053_v38 = vpop.f32.mrf.mxu2 }
  0xfe   :  { %15301 = vst [vmem:[#allocation23_spill] sm:$0xff] %v13045_v33  ;;  %v3958_v39 = vpop.f32.mrf.mxu0  ;;  %v4578_v41 = vpop.f32.mrf.mxu1 }
  0xff   :  { %15302 = vst [vmem:[#allocation24_spill] sm:$0xff] %v13053_v38  ;;  %v6340_v45 = vmax.f32 %v3958_v39, 0.0  ;;  %v6588_v48 = vmax.f32 %v4578_v41, 0.0 }
 0x101   :  { %v7299_v50 = vadd.f32 %v7298_v29, %v6340_v45  ;;  %v7587_v51 = vadd.f32 %v7586_v30, %v6588_v48  ;;  %3997 = vmatmul.bf16.gmra.mxu0 %v12239_v35  ;;  %4617 = vmatmul.bf16.gmra.mxu1 %v12363_v36 }
 0x102   :  { %5802 = vmatmul.bf16.gmra.mxu3 %v12600_v42  ;;  %5212 = vmatmul.bf16.gmra.mxu2 %v12482_v44 }
 0x105   :  { %v13061_v55 = vpop.f32.mrf.mxu3  ;;  %v13063_v57 = vpop.f32.mrf.mxu2 }
 0x106   :  { %15303 = vst [vmem:[#allocation25_spill] sm:$0xff] %v13061_v55  ;;  %v3960_v59 = vpop.f32.mrf.mxu0  ;;  %v4580_v60 = vpop.f32.mrf.mxu1 }
 0x107   :  { %15304 = vst [vmem:[#allocation26_spill] sm:$0xff] %v13063_v57  ;;  %v6341_v61 = vmax.f32 %v3960_v59, 0.0  ;;  %v6589_v62 = vmax.f32 %v4580_v60, 0.0 }
 0x109   :  { %v7300_v3 = vadd.f32 %v7299_v50, %v6341_v61  ;;  %v7588_v4 = vadd.f32 %v7587_v51, %v6589_v62  ;;  %v12241_v50 = vld [vmem:[%s15266_s0 + $0x80] sm:$0xff] }
 0x10a   :  { %v12365_v51 = vld [vmem:[%s15266_s0 + $0x460] sm:$0xff] }
 0x10d   :  { %v13065_v7 = vpop.f32.mrf.mxu3  ;;  %v13073_v12 = vpop.f32.mrf.mxu2 }
 0x10e   :  { %15305 = vst [vmem:[#allocation27_spill] sm:$0xff] %v13065_v7  ;;  %v3963_v13 = vpop.f32.mrf.mxu0  ;;  %v4583_v14 = vpop.f32.mrf.mxu1 }
 0x10f   :  { %15306 = vst [vmem:[#allocation28_spill] sm:$0xff] %v13073_v12  ;;  %v6342_v23 = vmax.f32 %v3963_v13, 0.0  ;;  %v6590_v25 = vmax.f32 %v4583_v14, 0.0 }
 0x111   :  { %v7301_v27 = vadd.f32 %v7300_v3, %v6342_v23  ;;  %v7589_v28 = vadd.f32 %v7588_v4, %v6590_v25  ;;  %4002 = vmatmul.bf16.gmra.mxu0 %v12240_v9  ;;  %4622 = vmatmul.bf16.gmra.mxu1 %v12364_v11  ;;  %v12602_v3 = vld [vmem:[%s15266_s0 + $0xbc8] sm:$0xff]  ;;  %v12484_v4 = vld [vmem:[%s15266_s0 + $0x818] sm:$0xff] }
 0x112   :  { %5807 = vmatmul.bf16.gmra.mxu3 %v12601_v17  ;;  %5217 = vmatmul.bf16.gmra.mxu2 %v12483_v19 }
 0x115   :  { %v5768_v29 = vpop.f32.mrf.mxu3  ;;  %v13081_v30 = vpop.f32.mrf.mxu2 }
 0x116   :  { %15307 = vst [vmem:[#allocation29_spill] sm:$0xff] %v13081_v30  ;;  %v3965_v35 = vpop.f32.mrf.mxu0  ;;  %v4585_v36 = vpop.f32.mrf.mxu1  ;;  %v7064_v45 = vmax.f32 %v5768_v29, 0.0 }
 0x117   :  { %v6343_v39 = vmax.f32 %v3965_v35, 0.0  ;;  %v6591_v41 = vmax.f32 %v4585_v36, 0.0 }
 0x119   :  { %v7302_v42 = vadd.f32 %v7301_v27, %v6343_v39  ;;  %v7590_v44 = vadd.f32 %v7589_v28, %v6591_v41 }
 0x11d   :  { %v5770_v48 = vpop.f32.mrf.mxu3  ;;  %v13089_v59 = vpop.f32.mrf.mxu2 }
 0x11e   :  { %15308 = vst [vmem:[#allocation30_spill] sm:$0xff] %v13089_v59  ;;  %v7065_v60 = vmax.f32 %v5770_v48, 0.0  ;;  %v3968_v61 = vpop.f32.mrf.mxu0  ;;  %v4588_v62 = vpop.f32.mrf.mxu1 }
 0x11f   :  { %v6344_v9 = vmax.f32 %v3968_v61, 0.0  ;;  %v6592_v11 = vmax.f32 %v4588_v62, 0.0  ;;  %v12603_v61 = vld [vmem:[%s15266_s0 + $0xbd0] sm:$0xff]  ;;  %v12485_v62 = vld [vmem:[%s15266_s0 + $0x820] sm:$0xff] }
 0x120   :  { %v8139_v13 = vadd.f32 %v7065_v60, %v7064_v45 }
 0x121   :  { %v7303_v14 = vadd.f32 %v7302_v42, %v6344_v9  ;;  %v7591_v17 = vadd.f32 %v7590_v44, %v6592_v11  ;;  %4007 = vmatmul.bf16.gmra.mxu0 %v12241_v50  ;;  %4627 = vmatmul.bf16.gmra.mxu1 %v12365_v51  ;;  %v12242_v42 = vld [vmem:[%s15266_s0 + $0x88] sm:$0xff] }
 0x122   :  { %5812 = vmatmul.bf16.gmra.mxu3 %v12602_v3  ;;  %5222 = vmatmul.bf16.gmra.mxu2 %v12484_v4  ;;  %v12366_v44 = vld [vmem:[%s15266_s0 + $0x468] sm:$0xff] }
 0x125   :  { %v5773_v19 = vpop.f32.mrf.mxu3  ;;  %v13097_v23 = vpop.f32.mrf.mxu2 }
 0x126   :  { %15309 = vst [vmem:[#allocation31_spill] sm:$0xff] %v13097_v23  ;;  %v7066_v25 = vmax.f32 %v5773_v19, 0.0  ;;  %v3970_v27 = vpop.f32.mrf.mxu0  ;;  %v4590_v28 = vpop.f32.mrf.mxu1 }
 0x127   :  { %v6345_v29 = vmax.f32 %v3970_v27, 0.0  ;;  %v6593_v35 = vmax.f32 %v4590_v28, 0.0 }
 0x128   :  { %v8140_v36 = vadd.f32 %v8139_v13, %v7066_v25 }
 0x129   :  { %v7304_v39 = vadd.f32 %v7303_v14, %v6345_v29  ;;  %v7592_v41 = vadd.f32 %v7591_v17, %v6593_v35 }
 0x12d   :  { %v5775_v48 = vpop.f32.mrf.mxu3  ;;  %v13105_v45 = vpop.f32.mrf.mxu2 }
 0x12e   :  { %15310 = vst [vmem:[#allocation32_spill] sm:$0xff] %v13105_v45  ;;  %v7067_v50 = vmax.f32 %v5775_v48, 0.0  ;;  %v3973_v51 = vpop.f32.mrf.mxu0  ;;  %v4593_v60 = vpop.f32.mrf.mxu1 }
 0x12f   :  { %v6346_v3 = vmax.f32 %v3973_v51, 0.0  ;;  %v6594_v4 = vmax.f32 %v4593_v60, 0.0  ;;  %v12604_v60 = vld [vmem:[%s15266_s0 + $0xbd8] sm:$0xff] }
 0x130   :  { %v8141_v9 = vadd.f32 %v8140_v36, %v7067_v50  ;;  %v12243_v36 = vld [vmem:[%s15266_s0 + $0x90] sm:$0xff] }
 0x131   :  { %v7305_v11 = vadd.f32 %v7304_v39, %v6346_v3  ;;  %v7593_v13 = vadd.f32 %v7592_v41, %v6594_v4  ;;  %4012 = vmatmul.bf16.gmra.mxu0 %v12242_v42  ;;  %4632 = vmatmul.bf16.gmra.mxu1 %v12366_v44  ;;  %v12367_v39 = vld [vmem:[%s15266_s0 + $0x470] sm:$0xff] }
 0x132   :  { %5817 = vmatmul.bf16.gmra.mxu3 %v12603_v61  ;;  %5227 = vmatmul.bf16.gmra.mxu2 %v12485_v62  ;;  %v12486_v61 = vld [vmem:[%s15266_s0 + $0x828] sm:$0xff] }
 0x135   :  { %v5778_v14 = vpop.f32.mrf.mxu3  ;;  %v13113_v17 = vpop.f32.mrf.mxu2 }
 0x136   :  { %15311 = vst [vmem:[#allocation33_spill] sm:$0xff] %v13113_v17  ;;  %v7068_v19 = vmax.f32 %v5778_v14, 0.0  ;;  %v3975_v25 = vpop.f32.mrf.mxu0  ;;  %v4595_v27 = vpop.f32.mrf.mxu1 }
 0x137   :  { %v6347_v28 = vmax.f32 %v3975_v25, 0.0  ;;  %v6595_v29 = vmax.f32 %v4595_v27, 0.0 }
 0x138   :  { %v8142_v35 = vadd.f32 %v8141_v9, %v7068_v19 }
 0x139   :  { %v7306_v48 = vadd.f32 %v7305_v11, %v6347_v28  ;;  %v7594_v34 = vadd.f32 %v7593_v13, %v6595_v29 }
 0x13d   :  { %v5780_v51 = vpop.f32.mrf.mxu3  ;;  %v13121_v41 = vpop.f32.mrf.mxu2 }
 0x13e   :  { %15312 = vst [vmem:[#allocation34_spill] sm:$0xff] %v13121_v41  ;;  %v7069_v42 = vmax.f32 %v5780_v51, 0.0  ;;  %v3978_v44 = vpop.f32.mrf.mxu0  ;;  %v4598_v50 = vpop.f32.mrf.mxu1 }
 0x13f   :  { %v6348_v62 = vmax.f32 %v3978_v44, 0.0  ;;  %v6596_v3 = vmax.f32 %v4598_v50, 0.0  ;;  %v12605_v50 = vld [vmem:[%s15266_s0 + $0xbe0] sm:$0xff] }
 0x140   :  { %v8143_v4 = vadd.f32 %v8142_v35, %v7069_v42  ;;  %v12368_v35 = vld [vmem:[%s15266_s0 + $0x478] sm:$0xff] }
 0x141   :  { %v7307_v9 = vadd.f32 %v7306_v48, %v6348_v62  ;;  %v7595_v11 = vadd.f32 %v7594_v34, %v6596_v3  ;;  %4017 = vmatmul.bf16.gmra.mxu0 %v12243_v36  ;;  %4637 = vmatmul.bf16.gmra.mxu1 %v12367_v39  ;;  %v12244_v34 = vld [vmem:[%s15266_s0 + $0x98] sm:$0xff] }
 0x142   :  { %5822 = vmatmul.bf16.gmra.mxu3 %v12604_v60  ;;  %5232 = vmatmul.bf16.gmra.mxu2 %v12486_v61  ;;  %v12487_v60 = vld [vmem:[%s15266_s0 + $0x830] sm:$0xff] }
 0x145   :  { %v5783_v13 = vpop.f32.mrf.mxu3  ;;  %v13129_v14 = vpop.f32.mrf.mxu2 }
 0x146   :  { %15313 = vst [vmem:[#allocation35_spill] sm:$0xff] %v13129_v14  ;;  %v7070_v19 = vmax.f32 %v5783_v13, 0.0  ;;  %v3980_v25 = vpop.f32.mrf.mxu0  ;;  %v4600_v27 = vpop.f32.mrf.mxu1 }
 0x147   :  { %v6349_v28 = vmax.f32 %v3980_v25, 0.0  ;;  %v6597_v29 = vmax.f32 %v4600_v27, 0.0 }
 0x148   :  { %v8144_v51 = vadd.f32 %v8143_v4, %v7070_v19 }
 0x149   :  { %v7308_v26 = vadd.f32 %v7307_v9, %v6349_v28  ;;  %v7596_v18 = vadd.f32 %v7595_v11, %v6597_v29 }
 0x14d   :  { %v5785_v44 = vpop.f32.mrf.mxu3  ;;  %v13137_v48 = vpop.f32.mrf.mxu2 }
 0x14e   :  { %15314 = vst [vmem:[#allocation36_spill] sm:$0xff] %v13137_v48  ;;  %v7071_v36 = vmax.f32 %v5785_v44, 0.0  ;;  %v3983_v39 = vpop.f32.mrf.mxu0  ;;  %v4603_v42 = vpop.f32.mrf.mxu1 }
 0x14f   :  { %v6350_v61 = vmax.f32 %v3983_v39, 0.0  ;;  %v6598_v62 = vmax.f32 %v4603_v42, 0.0  ;;  %v12606_v42 = vld [vmem:[%s15266_s0 + $0xbe8] sm:$0xff] }
 0x150   :  { %v8145_v3 = vadd.f32 %v8144_v51, %v7071_v36 }
 0x151   :  { %v7309_v4 = vadd.f32 %v7308_v26, %v6350_v61  ;;  %v7597_v9 = vadd.f32 %v7596_v18, %v6598_v62  ;;  %4022 = vmatmul.bf16.gmra.mxu0 %v12244_v34  ;;  %4642 = vmatmul.bf16.gmra.mxu1 %v12368_v35  ;;  %v12245_v18 = vld [vmem:[%s15266_s0 + $0xa0] sm:$0xff] }
 0x152   :  { %5827 = vmatmul.bf16.gmra.mxu3 %v12605_v50  ;;  %5237 = vmatmul.bf16.gmra.mxu2 %v12487_v60  ;;  %v12369_v26 = vld [vmem:[%s15266_s0 + $0x480] sm:$0xff]  ;;  %v12488_v50 = vld [vmem:[%s15266_s0 + $0x838] sm:$0xff] }
 0x155   :  { %v5788_v11 = vpop.f32.mrf.mxu3  ;;  %v13145_v13 = vpop.f32.mrf.mxu2 }
 0x156   :  { %15315 = vst [vmem:[#allocation37_spill] sm:$0xff] %v13145_v13  ;;  %v7072_v19 = vmax.f32 %v5788_v11, 0.0  ;;  %v3985_v25 = vpop.f32.mrf.mxu0  ;;  %v4605_v27 = vpop.f32.mrf.mxu1 }
 0x157   :  { %v6351_v28 = vmax.f32 %v3985_v25, 0.0  ;;  %v6599_v29 = vmax.f32 %v4605_v27, 0.0 }
 0x158   :  { %v8146_v44 = vadd.f32 %v8145_v3, %v7072_v19 }
 0x159   :  { %v7310_v10 = vadd.f32 %v7309_v4, %v6351_v28  ;;  %v7598_v2 = vadd.f32 %v7597_v9, %v6599_v29 }
 0x15d   :  { %v5790_v39 = vpop.f32.mrf.mxu3  ;;  %v13153_v51 = vpop.f32.mrf.mxu2 }
 0x15e   :  { %15316 = vst [vmem:[#allocation38_spill] sm:$0xff] %v13153_v51  ;;  %v7073_v34 = vmax.f32 %v5790_v39, 0.0  ;;  %v3988_v35 = vpop.f32.mrf.mxu0  ;;  %v4608_v36 = vpop.f32.mrf.mxu1 }
 0x15f   :  { %v6352_v60 = vmax.f32 %v3988_v35, 0.0  ;;  %v6600_v61 = vmax.f32 %v4608_v36, 0.0  ;;  %v12607_v36 = vld [vmem:[%s15266_s0 + $0xbf0] sm:$0xff] }
 0x160   :  { %v8147_v62 = vadd.f32 %v8146_v44, %v7073_v34 }
 0x161   :  { %v7311_v3 = vadd.f32 %v7310_v10, %v6352_v60  ;;  %v7599_v4 = vadd.f32 %v7598_v2, %v6600_v61  ;;  %4027 = vmatmul.bf16.gmra.mxu0 %v12245_v18  ;;  %4647 = vmatmul.bf16.gmra.mxu1 %v12369_v26  ;;  %v12246_v2 = vld [vmem:[%s15266_s0 + $0xa8] sm:$0xff] }
 0x162   :  { %5832 = vmatmul.bf16.gmra.mxu3 %v12606_v42  ;;  %5242 = vmatmul.bf16.gmra.mxu2 %v12488_v50  ;;  %v12370_v10 = vld [vmem:[%s15266_s0 + $0x488] sm:$0xff]  ;;  %v12489_v42 = vld [vmem:[%s15266_s0 + $0x840] sm:$0xff] }
 0x165   :  { %v5793_v9 = vpop.f32.mrf.mxu3  ;;  %v13161_v11 = vpop.f32.mrf.mxu2 }
 0x166   :  { %15317 = vst [vmem:[#allocation39_spill] sm:$0xff] %v13161_v11  ;;  %v7074_v19 = vmax.f32 %v5793_v9, 0.0  ;;  %v3990_v25 = vpop.f32.mrf.mxu0  ;;  %v4610_v27 = vpop.f32.mrf.mxu1 }
 0x167   :  { %v6353_v28 = vmax.f32 %v3990_v25, 0.0  ;;  %v6601_v29 = vmax.f32 %v4610_v27, 0.0 }
 0x168   :  { %v8148_v39 = vadd.f32 %v8147_v62, %v7074_v19 }
 0x169   :  { %v7312_v58 = vadd.f32 %v7311_v3, %v6353_v28  ;;  %v7600_v49 = vadd.f32 %v7599_v4, %v6601_v29 }
 0x16d   :  { %v5795_v35 = vpop.f32.mrf.mxu3  ;;  %v13169_v44 = vpop.f32.mrf.mxu2 }
 0x16e   :  { %15318 = vst [vmem:[#allocation40_spill] sm:$0xff] %v13169_v44  ;;  %v7075_v18 = vmax.f32 %v5795_v35, 0.0  ;;  %v3993_v26 = vpop.f32.mrf.mxu0  ;;  %v4613_v34 = vpop.f32.mrf.mxu1 }
 0x16f   :  { %v6354_v50 = vmax.f32 %v3993_v26, 0.0  ;;  %v6602_v60 = vmax.f32 %v4613_v34, 0.0  ;;  %v12608_v26 = vld [vmem:[%s15266_s0 + $0xbf8] sm:$0xff]  ;;  %v12490_v34 = vld [vmem:[%s15266_s0 + $0x848] sm:$0xff] }
 0x170   :  { %v8149_v61 = vadd.f32 %v8148_v39, %v7075_v18 }
 0x171   :  { %v7313_v62 = vadd.f32 %v7312_v58, %v6354_v50  ;;  %v7601_v3 = vadd.f32 %v7600_v49, %v6602_v60  ;;  %4032 = vmatmul.bf16.gmra.mxu0 %v12246_v2  ;;  %4652 = vmatmul.bf16.gmra.mxu1 %v12370_v10  ;;  %v12247_v58 = vld [vmem:[%s15266_s0 + $0xb0] sm:$0xff] }
 0x172   :  { %5837 = vmatmul.bf16.gmra.mxu3 %v12607_v36  ;;  %5247 = vmatmul.bf16.gmra.mxu2 %v12489_v42  ;;  %v12371_v49 = vld [vmem:[%s15266_s0 + $0x490] sm:$0xff] }
 0x175   :  { %v5798_v4 = vpop.f32.mrf.mxu3  ;;  %v5208_v9 = vpop.f32.mrf.mxu2 }
 0x176   :  { %v7076_v19 = vmax.f32 %v5798_v4, 0.0  ;;  %v3995_v25 = vpop.f32.mrf.mxu0  ;;  %v4615_v27 = vpop.f32.mrf.mxu1  ;;  %v6840_v13 = vmax.f32 %v5208_v9, 0.0  ;;  %v12609_v9 = vld [vmem:[%s15266_s0 + $0xc00] sm:$0xff] }
 0x177   :  { %v6355_v28 = vmax.f32 %v3995_v25, 0.0  ;;  %v6603_v29 = vmax.f32 %v4615_v27, 0.0 }
 0x178   :  { %v8150_v35 = vadd.f32 %v8149_v61, %v7076_v19 }
 0x179   :  { %v7314_v43 = vadd.f32 %v7313_v62, %v6355_v28  ;;  %v7602_v44 = vadd.f32 %v7601_v3, %v6603_v29 }
 0x17d   :  { %v5800_v11 = vpop.f32.mrf.mxu3  ;;  %v5210_v39 = vpop.f32.mrf.mxu2 }
 0x17e   :  { %v7077_v2 = vmax.f32 %v5800_v11, 0.0  ;;  %v3998_v10 = vpop.f32.mrf.mxu0  ;;  %v4618_v18 = vpop.f32.mrf.mxu1 }
 0x17f   :  { %v6356_v36 = vmax.f32 %v3998_v10, 0.0  ;;  %v6604_v42 = vmax.f32 %v4618_v18, 0.0  ;;  %v6841_v10 = vmax.f32 %v5210_v39, 0.0 }
 0x180   :  { %v8151_v50 = vadd.f32 %v8150_v35, %v7077_v2 }
 0x181   :  { %v7315_v60 = vadd.f32 %v7314_v43, %v6356_v36  ;;  %v7603_v61 = vadd.f32 %v7602_v44, %v6604_v42  ;;  %4037 = vmatmul.bf16.gmra.mxu0 %v12247_v58  ;;  %4657 = vmatmul.bf16.gmra.mxu1 %v12371_v49  ;;  %v7880_v35 = vadd.f32 %v6841_v10, %v6840_v13  ;;  %v12248_v44 = vld [vmem:[%s15266_s0 + $0xb8] sm:$0xff]  ;;  %v12491_v13 = vld [vmem:[%s15266_s0 + $0x850] sm:$0xff] }
 0x182   :  { %5842 = vmatmul.bf16.gmra.mxu3 %v12608_v26  ;;  %5252 = vmatmul.bf16.gmra.mxu2 %v12490_v34  ;;  %v12372_v58 = vld [vmem:[%s15266_s0 + $0x498] sm:$0xff] }
 0x185   :  { %v5803_v11 = vpop.f32.mrf.mxu3  ;;  %v5213_v62 = vpop.f32.mrf.mxu2 }
 0x186   :  { %v7078_v3 = vmax.f32 %v5803_v11, 0.0  ;;  %v4000_v4 = vpop.f32.mrf.mxu0  ;;  %v4620_v19 = vpop.f32.mrf.mxu1  ;;  %v6842_v18 = vmax.f32 %v5213_v62, 0.0 }
 0x187   :  { %v6357_v25 = vmax.f32 %v4000_v4, 0.0  ;;  %v6605_v27 = vmax.f32 %v4620_v19, 0.0 }
 0x188   :  { %v8152_v28 = vadd.f32 %v8151_v50, %v7078_v3  ;;  %v7881_v49 = vadd.f32 %v7880_v35, %v6842_v18 }
 0x189   :  { %v7316_v29 = vadd.f32 %v7315_v60, %v6357_v25  ;;  %v7604_v51 = vadd.f32 %v7603_v61, %v6605_v27 }
 0x18d   :  { %v5805_v43 = vpop.f32.mrf.mxu3  ;;  %v5215_v2 = vpop.f32.mrf.mxu2 }
 0x18e   :  { %v7079_v26 = vmax.f32 %v5805_v43, 0.0  ;;  %v4003_v34 = vpop.f32.mrf.mxu0  ;;  %v4623_v36 = vpop.f32.mrf.mxu1  ;;  %v6843_v11 = vmax.f32 %v5215_v2, 0.0 }
 0x18f   :  { %v6358_v39 = vmax.f32 %v4003_v34, 0.0  ;;  %v6606_v42 = vmax.f32 %v4623_v36, 0.0 }
 0x190   :  { %v8153_v50 = vadd.f32 %v8152_v28, %v7079_v26  ;;  %v7882_v62 = vadd.f32 %v7881_v49, %v6843_v11 }
 0x191   :  { %v7317_v60 = vadd.f32 %v7316_v29, %v6358_v39  ;;  %v7605_v61 = vadd.f32 %v7604_v51, %v6606_v42  ;;  %4042 = vmatmul.bf16.gmra.mxu0 %v12248_v44  ;;  %4662 = vmatmul.bf16.gmra.mxu1 %v12372_v58  ;;  %v12249_v44 = vld [vmem:[%s15266_s0 + $0xc0] sm:$0xff] }
 0x192   :  { %5847 = vmatmul.bf16.gmra.mxu3 %v12609_v9  ;;  %5257 = vmatmul.bf16.gmra.mxu2 %v12491_v13  ;;  %v12373_v58 = vld [vmem:[%s15266_s0 + $0x4a0] sm:$0xff]  ;;  %v12610_v9 = vld [vmem:[%s15266_s0 + $0xc08] sm:$0xff]  ;;  %v12492_v13 = vld [vmem:[%s15266_s0 + $0x858] sm:$0xff] }
 0x195   :  { %v5808_v3 = vpop.f32.mrf.mxu3  ;;  %v5218_v4 = vpop.f32.mrf.mxu2 }
 0x196   :  { %v7080_v19 = vmax.f32 %v5808_v3, 0.0  ;;  %v4005_v25 = vpop.f32.mrf.mxu0  ;;  %v4625_v27 = vpop.f32.mrf.mxu1  ;;  %v6844_v28 = vmax.f32 %v5218_v4, 0.0 }
 0x197   :  { %v6359_v10 = vmax.f32 %v4005_v25, 0.0  ;;  %v6607_v18 = vmax.f32 %v4625_v27, 0.0 }
 0x198   :  { %v8154_v35 = vadd.f32 %v8153_v50, %v7080_v19  ;;  %v7883_v29 = vadd.f32 %v7882_v62, %v6844_v28 }
 0x199   :  { %v13201_v43 = vadd.f32 %v7317_v60, %v6359_v10  ;;  %v7606_v34 = vadd.f32 %v7605_v61, %v6607_v18 }
 0x19b   :  { %15319 = vst [vmem:[#allocation41_spill] sm:$0xff] %v13201_v43 }
 0x19d   :  { %v5810_v51 = vpop.f32.mrf.mxu3  ;;  %v5220_v49 = vpop.f32.mrf.mxu2 }
 0x19e   :  { %v7081_v2 = vmax.f32 %v5810_v51, 0.0  ;;  %v4008_v26 = vpop.f32.mrf.mxu0  ;;  %v4628_v36 = vpop.f32.mrf.mxu1  ;;  %v6845_v60 = vmax.f32 %v5220_v49, 0.0 }
 0x19f   :  { %v6608_v39 = vmax.f32 %v4628_v36, 0.0  ;;  %v6360_v25 = vmax.f32 %v4008_v26, 0.0 }
 0x1a0   :  { %v8155_v42 = vadd.f32 %v8154_v35, %v7081_v2  ;;  %v7884_v61 = vadd.f32 %v7883_v29, %v6845_v60  ;;  %v12374_v29 = vld [vmem:[%s15266_s0 + $0x4a8] sm:$0xff] }
 0x1a1   :  { %v7607_v50 = vadd.f32 %v7606_v34, %v6608_v39  ;;  %4047 = vmatmul.bf16.gmra.mxu0 %v12249_v44  ;;  %4667 = vmatmul.bf16.gmra.mxu1 %v12373_v58  ;;  %v12250_v44 = vld [vmem:[%s15266_s0 + $0xc8] sm:$0xff] }
 0x1a2   :  { %5852 = vmatmul.bf16.gmra.mxu3 %v12610_v9  ;;  %5262 = vmatmul.bf16.gmra.mxu2 %v12492_v13  ;;  %v12611_v9 = vld [vmem:[%s15266_s0 + $0xc10] sm:$0xff]  ;;  %v12493_v13 = vld [vmem:[%s15266_s0 + $0x860] sm:$0xff] }
 0x1a5   :  { %v5813_v11 = vpop.f32.mrf.mxu3  ;;  %v5223_v62 = vpop.f32.mrf.mxu2 }
 0x1a6   :  { %v7082_v3 = vmax.f32 %v5813_v11, 0.0  ;;  %v4010_v4 = vpop.f32.mrf.mxu0  ;;  %v4630_v19 = vpop.f32.mrf.mxu1  ;;  %v6846_v36 = vmax.f32 %v5223_v62, 0.0 }
 0x1a7   :  { %v6361_v27 = vmax.f32 %v4010_v4, 0.0  ;;  %v6609_v10 = vmax.f32 %v4630_v19, 0.0 }
 0x1a8   :  { %v8156_v18 = vadd.f32 %v8155_v42, %v7082_v3  ;;  %v7885_v35 = vadd.f32 %v7884_v61, %v6846_v36 }
 0x1a9   :  { %v7325_v28 = vadd.f32 %v6361_v27, %v6360_v25  ;;  %v7608_v51 = vadd.f32 %v7607_v50, %v6609_v10 }
 0x1ad   :  { %v5815_v34 = vpop.f32.mrf.mxu3  ;;  %v5225_v58 = vpop.f32.mrf.mxu2 }
 0x1ae   :  { %v7083_v49 = vmax.f32 %v5815_v34, 0.0  ;;  %v4013_v2 = vpop.f32.mrf.mxu0  ;;  %v4633_v26 = vpop.f32.mrf.mxu1  ;;  %v6847_v11 = vmax.f32 %v5225_v58, 0.0  ;;  %v12612_v58 = vld [vmem:[%s15266_s0 + $0xc18] sm:$0xff] }
 0x1af   :  { %v6362_v39 = vmax.f32 %v4013_v2, 0.0  ;;  %v6610_v42 = vmax.f32 %v4633_v26, 0.0 }
 0x1b0   :  { %v8157_v50 = vadd.f32 %v8156_v18, %v7083_v49  ;;  %v7886_v62 = vadd.f32 %v7885_v35, %v6847_v11  ;;  %v12251_v18 = vld [vmem:[%s15266_s0 + $0xd0] sm:$0xff]  ;;  %v12494_v49 = vld [vmem:[%s15266_s0 + $0x868] sm:$0xff] }
 0x1b1   :  { %v7326_v60 = vadd.f32 %v7325_v28, %v6362_v39  ;;  %v7609_v61 = vadd.f32 %v7608_v51, %v6610_v42  ;;  %4052 = vmatmul.bf16.gmra.mxu0 %v12250_v44  ;;  %4672 = vmatmul.bf16.gmra.mxu1 %v12374_v29  ;;  %v12375_v28 = vld [vmem:[%s15266_s0 + $0x4b0] sm:$0xff] }
 0x1b2   :  { %5857 = vmatmul.bf16.gmra.mxu3 %v12611_v9  ;;  %5267 = vmatmul.bf16.gmra.mxu2 %v12493_v13 }
 0x1b5   :  { %v5818_v3 = vpop.f32.mrf.mxu3  ;;  %v5228_v4 = vpop.f32.mrf.mxu2 }
 0x1b6   :  { %v7084_v19 = vmax.f32 %v5818_v3, 0.0  ;;  %v4015_v25 = vpop.f32.mrf.mxu0  ;;  %v4635_v27 = vpop.f32.mrf.mxu1  ;;  %v6848_v48 = vmax.f32 %v5228_v4, 0.0  ;;  %v12613_v4 = vld [vmem:[%s15266_s0 + $0xc20] sm:$0xff] }
 0x1b7   :  { %v6363_v10 = vmax.f32 %v4015_v25, 0.0  ;;  %v6611_v36 = vmax.f32 %v4635_v27, 0.0 }
 0x1b8   :  { %v8158_v34 = vadd.f32 %v8157_v50, %v7084_v19 }
 0x1b9   :  { %v7327_v43 = vadd.f32 %v7326_v60, %v6363_v10  ;;  %v7610_v2 = vadd.f32 %v7609_v61, %v6611_v36 }
 0x1bd   :  { %v5820_v26 = vpop.f32.mrf.mxu3  ;;  %v5230_v51 = vpop.f32.mrf.mxu2 }
 0x1be   :  { %v7085_v35 = vmax.f32 %v5820_v26, 0.0  ;;  %v4018_v44 = vpop.f32.mrf.mxu0  ;;  %v4638_v29 = vpop.f32.mrf.mxu1 }
 0x1bf   :  { %v6364_v9 = vmax.f32 %v4018_v44, 0.0  ;;  %v6612_v13 = vmax.f32 %v4638_v29, 0.0  ;;  %v6849_v44 = vmax.f32 %v5230_v51, 0.0  ;;  %v7887_v29 = vadd.f32 %v7886_v62, %v6848_v48  ;;  %v12495_v48 = vld [vmem:[%s15266_s0 + $0x870] sm:$0xff] }
 0x1c0   :  { %v8159_v39 = vadd.f32 %v8158_v34, %v7085_v35 }
 0x1c1   :  { %v7328_v42 = vadd.f32 %v7327_v43, %v6364_v9  ;;  %v7611_v50 = vadd.f32 %v7610_v2, %v6612_v13  ;;  %4057 = vmatmul.bf16.gmra.mxu0 %v12251_v18  ;;  %4677 = vmatmul.bf16.gmra.mxu1 %v12375_v28  ;;  %v12252_v2 = vld [vmem:[%s15266_s0 + $0xd8] sm:$0xff]  ;;  %v7888_v28 = vadd.f32 %v7887_v29, %v6849_v44 }
 0x1c2   :  { %5862 = vmatmul.bf16.gmra.mxu3 %v12612_v58  ;;  %5272 = vmatmul.bf16.gmra.mxu2 %v12494_v49  ;;  %v12376_v18 = vld [vmem:[%s15266_s0 + $0x4b8] sm:$0xff] }
 0x1c5   :  { %v5823_v60 = vpop.f32.mrf.mxu3  ;;  %v5233_v61 = vpop.f32.mrf.mxu2 }
 0x1c6   :  { %v7086_v11 = vmax.f32 %v5823_v60, 0.0  ;;  %v4020_v3 = vpop.f32.mrf.mxu0  ;;  %v4640_v19 = vpop.f32.mrf.mxu1  ;;  %v6850_v34 = vmax.f32 %v5233_v61, 0.0 }
 0x1c7   :  { %v6365_v25 = vmax.f32 %v4020_v3, 0.0  ;;  %v6613_v27 = vmax.f32 %v4640_v19, 0.0 }
 0x1c8   :  { %v8160_v10 = vadd.f32 %v8159_v39, %v7086_v11  ;;  %v7889_v13 = vadd.f32 %v7888_v28, %v6850_v34  ;;  %v12253_v34 = vld [vmem:[%s15266_s0 + $0xe0] sm:$0xff] }
 0x1c9   :  { %v7329_v36 = vadd.f32 %v7328_v42, %v6365_v25  ;;  %v7612_v26 = vadd.f32 %v7611_v50, %v6613_v27 }
 0x1cd   :  { %v5825_v43 = vpop.f32.mrf.mxu3  ;;  %v5235_v35 = vpop.f32.mrf.mxu2 }
 0x1ce   :  { %v7087_v58 = vmax.f32 %v5825_v43, 0.0  ;;  %v4023_v49 = vpop.f32.mrf.mxu0  ;;  %v4643_v9 = vpop.f32.mrf.mxu1  ;;  %v6851_v60 = vmax.f32 %v5235_v35, 0.0 }
 0x1cf   :  { %v6366_v62 = vmax.f32 %v4023_v49, 0.0  ;;  %v6614_v51 = vmax.f32 %v4643_v9, 0.0 }
 0x1d0   :  { %v8161_v39 = vadd.f32 %v8160_v10, %v7087_v58  ;;  %v7890_v61 = vadd.f32 %v7889_v13, %v6851_v60 }
 0x1d1   :  { %v7330_v42 = vadd.f32 %v7329_v36, %v6366_v62  ;;  %v7613_v50 = vadd.f32 %v7612_v26, %v6614_v51  ;;  %4062 = vmatmul.bf16.gmra.mxu0 %v12252_v2  ;;  %4682 = vmatmul.bf16.gmra.mxu1 %v12376_v18  ;;  %v12377_v2 = vld [vmem:[%s15266_s0 + $0x4c0] sm:$0xff] }
 0x1d2   :  { %5867 = vmatmul.bf16.gmra.mxu3 %v12613_v4  ;;  %5277 = vmatmul.bf16.gmra.mxu2 %v12495_v48  ;;  %v12614_v4 = vld [vmem:[%s15266_s0 + $0xc28] sm:$0xff]  ;;  %v12496_v48 = vld [vmem:[%s15266_s0 + $0x878] sm:$0xff] }
 0x1d5   :  { %v5828_v11 = vpop.f32.mrf.mxu3  ;;  %v5238_v3 = vpop.f32.mrf.mxu2 }
 0x1d6   :  { %v7088_v19 = vmax.f32 %v5828_v11, 0.0  ;;  %v4025_v25 = vpop.f32.mrf.mxu0  ;;  %v4645_v27 = vpop.f32.mrf.mxu1  ;;  %v6852_v10 = vmax.f32 %v5238_v3, 0.0 }
 0x1d7   :  { %v6367_v44 = vmax.f32 %v4025_v25, 0.0  ;;  %v6615_v29 = vmax.f32 %v4645_v27, 0.0 }
 0x1d8   :  { %v8162_v43 = vadd.f32 %v8161_v39, %v7088_v19  ;;  %v7891_v36 = vadd.f32 %v7890_v61, %v6852_v10 }
 0x1d9   :  { %v7331_v49 = vadd.f32 %v7330_v42, %v6367_v44  ;;  %v13251_v9 = vadd.f32 %v7613_v50, %v6615_v29 }
 0x1dd   :  { %v5830_v26 = vpop.f32.mrf.mxu3  ;;  %v5240_v18 = vpop.f32.mrf.mxu2 }
 0x1de   :  { %v7089_v28 = vmax.f32 %v5830_v26, 0.0  ;;  %v4028_v35 = vpop.f32.mrf.mxu0  ;;  %v4648_v58 = vpop.f32.mrf.mxu1  ;;  %v6853_v39 = vmax.f32 %v5240_v18, 0.0 }
 0x1df   :  { %v6368_v62 = vmax.f32 %v4028_v35, 0.0  ;;  %v6616_v50 = vmax.f32 %v4648_v58, 0.0  ;;  %v12615_v58 = vld [vmem:[%s15266_s0 + $0xc30] sm:$0xff] }
 0x1e0   :  { %v8163_v51 = vadd.f32 %v8162_v43, %v7089_v28  ;;  %v7892_v42 = vadd.f32 %v7891_v36, %v6853_v39  ;;  %v12378_v36 = vld [vmem:[%s15266_s0 + $0x4c8] sm:$0xff] }
 0x1e1   :  { %v7332_v13 = vadd.f32 %v7331_v49, %v6368_v62  ;;  %4067 = vmatmul.bf16.gmra.mxu0 %v12253_v34  ;;  %4687 = vmatmul.bf16.gmra.mxu1 %v12377_v2  ;;  %v12254_v34 = vld [vmem:[%s15266_s0 + $0xe8] sm:$0xff] }
 0x1e2   :  { %5872 = vmatmul.bf16.gmra.mxu3 %v12614_v4  ;;  %5282 = vmatmul.bf16.gmra.mxu2 %v12496_v48  ;;  %v12497_v4 = vld [vmem:[%s15266_s0 + $0x880] sm:$0xff] }
 0x1e5   :  { %v5833_v60 = vpop.f32.mrf.mxu3  ;;  %v5243_v61 = vpop.f32.mrf.mxu2 }
 0x1e6   :  { %v7090_v11 = vmax.f32 %v5833_v60, 0.0  ;;  %v4030_v3 = vpop.f32.mrf.mxu0  ;;  %v4650_v19 = vpop.f32.mrf.mxu1  ;;  %v6854_v26 = vmax.f32 %v5243_v61, 0.0 }
 0x1e7   :  { %v6369_v25 = vmax.f32 %v4030_v3, 0.0  ;;  %v6617_v27 = vmax.f32 %v4650_v19, 0.0 }
 0x1e8   :  { %v8164_v44 = vadd.f32 %v8163_v51, %v7090_v11  ;;  %v7893_v43 = vadd.f32 %v7892_v42, %v6854_v26 }
 0x1e9   :  { %v7333_v29 = vadd.f32 %v7332_v13, %v6369_v25  ;;  %v7621_v10 = vadd.f32 %v6617_v27, %v6616_v50 }
 0x1ed   :  { %v5835_v49 = vpop.f32.mrf.mxu3  ;;  %v5245_v2 = vpop.f32.mrf.mxu2 }
 0x1ee   :  { %v7091_v18 = vmax.f32 %v5835_v49, 0.0  ;;  %v4033_v28 = vpop.f32.mrf.mxu0  ;;  %v4653_v35 = vpop.f32.mrf.mxu1 }
 0x1ef   :  { %v6370_v48 = vmax.f32 %v4033_v28, 0.0  ;;  %v6618_v62 = vmax.f32 %v4653_v35, 0.0  ;;  %v12616_v28 = vld [vmem:[%s15266_s0 + $0xc38] sm:$0xff]  ;;  %v12498_v35 = vld [vmem:[%s15266_s0 + $0x888] sm:$0xff] }
 0x1f0   :  { %v8165_v51 = vadd.f32 %v8164_v44, %v7091_v18  ;;  %v12255_v44 = vld [vmem:[%s15266_s0 + $0xf0] sm:$0xff] }
 0x1f1   :  { %v7334_v13 = vadd.f32 %v7333_v29, %v6370_v48  ;;  %v7622_v39 = vadd.f32 %v7621_v10, %v6618_v62  ;;  %4072 = vmatmul.bf16.gmra.mxu0 %v12254_v34  ;;  %4692 = vmatmul.bf16.gmra.mxu1 %v12378_v36  ;;  %v12379_v29 = vld [vmem:[%s15266_s0 + $0x4d0] sm:$0xff]  ;;  %v6855_v62 = vmax.f32 %v5245_v2, 0.0 }
 0x1f2   :  { %5877 = vmatmul.bf16.gmra.mxu3 %v12615_v58  ;;  %5287 = vmatmul.bf16.gmra.mxu2 %v12497_v4 }
 0x1f5   :  { %v5838_v42 = vpop.f32.mrf.mxu3  ;;  %v5248_v50 = vpop.f32.mrf.mxu2 }
 0x1f6   :  { %v7092_v60 = vmax.f32 %v5838_v42, 0.0  ;;  %v4035_v61 = vpop.f32.mrf.mxu0  ;;  %v4655_v11 = vpop.f32.mrf.mxu1  ;;  %v7894_v42 = vadd.f32 %v7893_v43, %v6855_v62  ;;  %v12256_v43 = vld [vmem:[%s15266_s0 + $0xf8] sm:$0xff] }
 0x1f7   :  { %v6371_v3 = vmax.f32 %v4035_v61, 0.0  ;;  %v6619_v19 = vmax.f32 %v4655_v11, 0.0 }
 0x1f8   :  { %v8166_v25 = vadd.f32 %v8165_v51, %v7092_v60  ;;  %v6856_v51 = vmax.f32 %v5248_v50, 0.0 }
 0x1f9   :  { %v7335_v27 = vadd.f32 %v7334_v13, %v6371_v3  ;;  %v7623_v26 = vadd.f32 %v7622_v39, %v6619_v19 }
 0x1fa   :  { %v7895_v61 = vadd.f32 %v7894_v42, %v6856_v51 }
 0x1fd   :  { %v5840_v49 = vpop.f32.mrf.mxu3  ;;  %v5250_v10 = vpop.f32.mrf.mxu2 }
 0x1fe   :  { %v7093_v34 = vmax.f32 %v5840_v49, 0.0  ;;  %v4038_v36 = vpop.f32.mrf.mxu0  ;;  %v4658_v18 = vpop.f32.mrf.mxu1  ;;  %v6857_v60 = vmax.f32 %v5250_v10, 0.0 }
 0x1ff   :  { %v6372_v58 = vmax.f32 %v4038_v36, 0.0  ;;  %v6620_v4 = vmax.f32 %v4658_v18, 0.0 }
 0x200   :  { %v8167_v48 = vadd.f32 %v8166_v25, %v7093_v34  ;;  %v7896_v41 = vadd.f32 %v7895_v61, %v6857_v60 }
 0x201   :  { %v7336_v13 = vadd.f32 %v7335_v27, %v6372_v58  ;;  %v7624_v39 = vadd.f32 %v7623_v26, %v6620_v4  ;;  %4077 = vmatmul.bf16.gmra.mxu0 %v12255_v44  ;;  %4697 = vmatmul.bf16.gmra.mxu1 %v12379_v29  ;;  %v12380_v29 = vld [vmem:[%s15266_s0 + $0x4d8] sm:$0xff] }
 0x202   :  { %5882 = vmatmul.bf16.gmra.mxu3 %v12616_v28  ;;  %5292 = vmatmul.bf16.gmra.mxu2 %v12498_v35 }
 0x205   :  { %v5843_v11 = vpop.f32.mrf.mxu3  ;;  %v5253_v3 = vpop.f32.mrf.mxu2 }
 0x206   :  { %v7094_v19 = vmax.f32 %v5843_v11, 0.0  ;;  %v4040_v49 = vpop.f32.mrf.mxu0  ;;  %v4660_v14 = vpop.f32.mrf.mxu1  ;;  %v6858_v27 = vmax.f32 %v5253_v3, 0.0 }
 0x207   :  { %v6373_v36 = vmax.f32 %v4040_v49, 0.0  ;;  %v6621_v18 = vmax.f32 %v4660_v14, 0.0  ;;  %v12617_v14 = vld [vmem:[%s15266_s0 + $0xc40] sm:$0xff] }
 0x208   :  { %v8168_v25 = vadd.f32 %v8167_v48, %v7094_v19  ;;  %v7897_v26 = vadd.f32 %v7896_v41, %v6858_v27  ;;  %v12499_v41 = vld [vmem:[%s15266_s0 + $0x890] sm:$0xff] }
 0x209   :  { %v7337_v2 = vadd.f32 %v7336_v13, %v6373_v36  ;;  %v7625_v50 = vadd.f32 %v7624_v39, %v6621_v18 }
 0x20d   :  { %v5845_v44 = vpop.f32.mrf.mxu3  ;;  %v5255_v10 = vpop.f32.mrf.mxu2 }
 0x20e   :  { %v7095_v34 = vmax.f32 %v5845_v44, 0.0  ;;  %v4043_v28 = vpop.f32.mrf.mxu0  ;;  %v4663_v35 = vpop.f32.mrf.mxu1  ;;  %v6859_v13 = vmax.f32 %v5255_v10, 0.0 }
 0x20f   :  { %v6374_v58 = vmax.f32 %v4043_v28, 0.0  ;;  %v6622_v4 = vmax.f32 %v4663_v35, 0.0  ;;  %v12500_v28 = vld [vmem:[%s15266_s0 + $0x898] sm:$0xff] }
 0x210   :  { %v13301_v48 = vadd.f32 %v8168_v25, %v7095_v34  ;;  %v7898_v39 = vadd.f32 %v7897_v26, %v6859_v13  ;;  %v12618_v34 = vld [vmem:[%s15266_s0 + $0xc48] sm:$0xff] }
 0x211   :  { %v7338_v62 = vadd.f32 %v7337_v2, %v6374_v58  ;;  %v7626_v51 = vadd.f32 %v7625_v50, %v6622_v4  ;;  %4082 = vmatmul.bf16.gmra.mxu0 %v12256_v43  ;;  %4702 = vmatmul.bf16.gmra.mxu1 %v12380_v29  ;;  %v12257_v2 = vld [vmem:[%s15266_s0 + $0x100] sm:$0xff] }
 0x212   :  { %5887 = vmatmul.bf16.gmra.mxu3 %v12617_v14  ;;  %5297 = vmatmul.bf16.gmra.mxu2 %v12499_v41  ;;  %v12381_v50 = vld [vmem:[%s15266_s0 + $0x4e0] sm:$0xff] }
 0x215   :  { %v5848_v42 = vpop.f32.mrf.mxu3  ;;  %v5258_v60 = vpop.f32.mrf.mxu2 }
 0x216   :  { %v4045_v61 = vpop.f32.mrf.mxu0  ;;  %v4665_v11 = vpop.f32.mrf.mxu1  ;;  %v6860_v18 = vmax.f32 %v5258_v60, 0.0  ;;  %v7096_v25 = vmax.f32 %v5848_v42, 0.0 }
 0x217   :  { %v6375_v3 = vmax.f32 %v4045_v61, 0.0  ;;  %v6623_v19 = vmax.f32 %v4665_v11, 0.0 }
 0x218   :  { %v7899_v27 = vadd.f32 %v7898_v39, %v6860_v18 }
 0x219   :  { %v7339_v49 = vadd.f32 %v7338_v62, %v6375_v3  ;;  %v7627_v36 = vadd.f32 %v7626_v51, %v6623_v19 }
 0x21d   :  { %v5850_v44 = vpop.f32.mrf.mxu3  ;;  %v5260_v26 = vpop.f32.mrf.mxu2 }
 0x21e   :  { %v7097_v43 = vmax.f32 %v5850_v44, 0.0  ;;  %v4048_v29 = vpop.f32.mrf.mxu0  ;;  %v4668_v10 = vpop.f32.mrf.mxu1  ;;  %v6861_v62 = vmax.f32 %v5260_v26, 0.0 }
 0x21f   :  { %v6376_v35 = vmax.f32 %v4048_v29, 0.0  ;;  %v6624_v14 = vmax.f32 %v4668_v10, 0.0  ;;  %v12619_v10 = vld [vmem:[%s15266_s0 + $0xc50] sm:$0xff] }
 0x220   :  { %v8176_v41 = vadd.f32 %v7097_v43, %v7096_v25  ;;  %v7900_v51 = vadd.f32 %v7899_v27, %v6861_v62  ;;  %v12382_v27 = vld [vmem:[%s15266_s0 + $0x4e8] sm:$0xff] }
 0x221   :  { %v7340_v58 = vadd.f32 %v7339_v49, %v6376_v35  ;;  %v7628_v4 = vadd.f32 %v7627_v36, %v6624_v14  ;;  %4087 = vmatmul.bf16.gmra.mxu0 %v12257_v2  ;;  %4707 = vmatmul.bf16.gmra.mxu1 %v12381_v50  ;;  %v12258_v36 = vld [vmem:[%s15266_s0 + $0x108] sm:$0xff] }
 0x222   :  { %5892 = vmatmul.bf16.gmra.mxu3 %v12618_v34  ;;  %5302 = vmatmul.bf16.gmra.mxu2 %v12500_v28  ;;  %v12501_v34 = vld [vmem:[%s15266_s0 + $0x8a0] sm:$0xff] }
 0x225   :  { %v5853_v13 = vpop.f32.mrf.mxu3  ;;  %v5263_v39 = vpop.f32.mrf.mxu2 }
 0x226   :  { %v7098_v42 = vmax.f32 %v5853_v13, 0.0  ;;  %v4050_v60 = vpop.f32.mrf.mxu0  ;;  %v4670_v61 = vpop.f32.mrf.mxu1  ;;  %v6862_v29 = vmax.f32 %v5263_v39, 0.0 }
 0x227   :  { %v6377_v11 = vmax.f32 %v4050_v60, 0.0  ;;  %v6625_v3 = vmax.f32 %v4670_v61, 0.0 }
 0x228   :  { %v8177_v19 = vadd.f32 %v8176_v41, %v7098_v42  ;;  %v7901_v25 = vadd.f32 %v7900_v51, %v6862_v29 }
 0x229   :  { %v7341_v18 = vadd.f32 %v7340_v58, %v6377_v11  ;;  %v7629_v44 = vadd.f32 %v7628_v4, %v6625_v3 }
 0x22d   :  { %v5855_v49 = vpop.f32.mrf.mxu3  ;;  %v5265_v2 = vpop.f32.mrf.mxu2 }
 0x22e   :  { %v7099_v50 = vmax.f32 %v5855_v49, 0.0  ;;  %v4053_v26 = vpop.f32.mrf.mxu0  ;;  %v4673_v43 = vpop.f32.mrf.mxu1  ;;  %v6863_v4 = vmax.f32 %v5265_v2, 0.0 }
 0x22f   :  { %v6378_v28 = vmax.f32 %v4053_v26, 0.0  ;;  %v6626_v35 = vmax.f32 %v4673_v43, 0.0  ;;  %v12620_v43 = vld [vmem:[%s15266_s0 + $0xc58] sm:$0xff] }
 0x230   :  { %v8178_v14 = vadd.f32 %v8177_v19, %v7099_v50  ;;  %v7902_v62 = vadd.f32 %v7901_v25, %v6863_v4  ;;  %v12383_v25 = vld [vmem:[%s15266_s0 + $0x4f0] sm:$0xff] }
 0x231   :  { %v7342_v41 = vadd.f32 %v7341_v18, %v6378_v28  ;;  %v7630_v58 = vadd.f32 %v7629_v44, %v6626_v35  ;;  %4092 = vmatmul.bf16.gmra.mxu0 %v12258_v36  ;;  %4712 = vmatmul.bf16.gmra.mxu1 %v12382_v27  ;;  %v12259_v44 = vld [vmem:[%s15266_s0 + $0x110] sm:$0xff] }
 0x232   :  { %5897 = vmatmul.bf16.gmra.mxu3 %v12619_v10  ;;  %5307 = vmatmul.bf16.gmra.mxu2 %v12501_v34  ;;  %v12502_v10 = vld [vmem:[%s15266_s0 + $0x8a8] sm:$0xff] }
 0x235   :  { %v5858_v51 = vpop.f32.mrf.mxu3  ;;  %v5268_v13 = vpop.f32.mrf.mxu2 }
 0x236   :  { %v7100_v39 = vmax.f32 %v5858_v51, 0.0  ;;  %v4055_v42 = vpop.f32.mrf.mxu0  ;;  %v4675_v60 = vpop.f32.mrf.mxu1  ;;  %v6864_v26 = vmax.f32 %v5268_v13, 0.0 }
 0x237   :  { %v6379_v61 = vmax.f32 %v4055_v42, 0.0  ;;  %v6627_v11 = vmax.f32 %v4675_v60, 0.0 }
 0x238   :  { %v8179_v3 = vadd.f32 %v8178_v14, %v7100_v39  ;;  %v7903_v19 = vadd.f32 %v7902_v62, %v6864_v26 }
 0x239   :  { %v7343_v29 = vadd.f32 %v7342_v41, %v6379_v61  ;;  %v7631_v49 = vadd.f32 %v7630_v58, %v6627_v11 }
 0x23d   :  { %v5860_v18 = vpop.f32.mrf.mxu3  ;;  %v5270_v36 = vpop.f32.mrf.mxu2 }
 0x23e   :  { %v7101_v27 = vmax.f32 %v5860_v18, 0.0  ;;  %v4058_v2 = vpop.f32.mrf.mxu0  ;;  %v4678_v50 = vpop.f32.mrf.mxu1  ;;  %v6865_v58 = vmax.f32 %v5270_v36, 0.0 }
 0x23f   :  { %v6380_v34 = vmax.f32 %v4058_v2, 0.0  ;;  %v6628_v28 = vmax.f32 %v4678_v50, 0.0  ;;  %v12621_v50 = vld [vmem:[%s15266_s0 + $0xc60] sm:$0xff] }
 0x240   :  { %v8180_v35 = vadd.f32 %v8179_v3, %v7101_v27  ;;  %v7904_v4 = vadd.f32 %v7903_v19, %v6865_v58  ;;  %v12384_v19 = vld [vmem:[%s15266_s0 + $0x4f8] sm:$0xff] }
 0x241   :  { %v7344_v14 = vadd.f32 %v7343_v29, %v6380_v34  ;;  %v7632_v41 = vadd.f32 %v7631_v49, %v6628_v28  ;;  %4097 = vmatmul.bf16.gmra.mxu0 %v12259_v44  ;;  %4717 = vmatmul.bf16.gmra.mxu1 %v12383_v25  ;;  %v12260_v49 = vld [vmem:[%s15266_s0 + $0x118] sm:$0xff] }
 0x242   :  { %5902 = vmatmul.bf16.gmra.mxu3 %v12620_v43  ;;  %5312 = vmatmul.bf16.gmra.mxu2 %v12502_v10  ;;  %v12503_v43 = vld [vmem:[%s15266_s0 + $0x8b0] sm:$0xff] }
 0x245   :  { %v5863_v62 = vpop.f32.mrf.mxu3  ;;  %v5273_v51 = vpop.f32.mrf.mxu2 }
 0x246   :  { %v7102_v13 = vmax.f32 %v5863_v62, 0.0  ;;  %v4060_v39 = vpop.f32.mrf.mxu0  ;;  %v4680_v42 = vpop.f32.mrf.mxu1  ;;  %v6866_v2 = vmax.f32 %v5273_v51, 0.0 }
 0x247   :  { %v6381_v60 = vmax.f32 %v4060_v39, 0.0  ;;  %v6629_v61 = vmax.f32 %v4680_v42, 0.0 }
 0x248   :  { %v8181_v11 = vadd.f32 %v8180_v35, %v7102_v13  ;;  %v7905_v3 = vadd.f32 %v7904_v4, %v6866_v2 }
 0x249   :  { %v7345_v26 = vadd.f32 %v7344_v14, %v6381_v60  ;;  %v7633_v18 = vadd.f32 %v7632_v41, %v6629_v61 }
 0x24d   :  { %v5865_v29 = vpop.f32.mrf.mxu3  ;;  %v5275_v44 = vpop.f32.mrf.mxu2 }
 0x24e   :  { %v7103_v25 = vmax.f32 %v5865_v29, 0.0  ;;  %v4063_v36 = vpop.f32.mrf.mxu0  ;;  %v4683_v27 = vpop.f32.mrf.mxu1  ;;  %v6867_v41 = vmax.f32 %v5275_v44, 0.0 }
 0x24f   :  { %v6382_v10 = vmax.f32 %v4063_v36, 0.0  ;;  %v6630_v34 = vmax.f32 %v4683_v27, 0.0  ;;  %v12622_v27 = vld [vmem:[%s15266_s0 + $0xc68] sm:$0xff] }
 0x250   :  { %v8182_v28 = vadd.f32 %v8181_v11, %v7103_v25  ;;  %v7906_v58 = vadd.f32 %v7905_v3, %v6867_v41  ;;  %v12385_v3 = vld [vmem:[%s15266_s0 + $0x500] sm:$0xff] }
 0x251   :  { %v7346_v35 = vadd.f32 %v7345_v26, %v6382_v10  ;;  %v7634_v14 = vadd.f32 %v7633_v18, %v6630_v34  ;;  %4102 = vmatmul.bf16.gmra.mxu0 %v12260_v49  ;;  %4722 = vmatmul.bf16.gmra.mxu1 %v12384_v19  ;;  %v12261_v18 = vld [vmem:[%s15266_s0 + $0x120] sm:$0xff] }
 0x252   :  { %5907 = vmatmul.bf16.gmra.mxu3 %v12621_v50  ;;  %5317 = vmatmul.bf16.gmra.mxu2 %v12503_v43  ;;  %v12504_v50 = vld [vmem:[%s15266_s0 + $0x8b8] sm:$0xff] }
 0x255   :  { %v5868_v4 = vpop.f32.mrf.mxu3  ;;  %v5278_v62 = vpop.f32.mrf.mxu2 }
 0x256   :  { %v7104_v51 = vmax.f32 %v5868_v4, 0.0  ;;  %v4065_v13 = vpop.f32.mrf.mxu0  ;;  %v4685_v39 = vpop.f32.mrf.mxu1  ;;  %v6868_v36 = vmax.f32 %v5278_v62, 0.0 }
 0x257   :  { %v6383_v42 = vmax.f32 %v4065_v13, 0.0  ;;  %v6631_v60 = vmax.f32 %v4685_v39, 0.0 }
 0x258   :  { %v8183_v61 = vadd.f32 %v8182_v28, %v7104_v51  ;;  %v7907_v11 = vadd.f32 %v7906_v58, %v6868_v36 }
 0x259   :  { %v7347_v2 = vadd.f32 %v7346_v35, %v6383_v42  ;;  %v7635_v29 = vadd.f32 %v7634_v14, %v6631_v60 }
 0x25d   :  { %v5870_v26 = vpop.f32.mrf.mxu3  ;;  %v5280_v49 = vpop.f32.mrf.mxu2 }
 0x25e   :  { %v7105_v19 = vmax.f32 %v5870_v26, 0.0  ;;  %v4068_v44 = vpop.f32.mrf.mxu0  ;;  %v4688_v25 = vpop.f32.mrf.mxu1  ;;  %v6869_v14 = vmax.f32 %v5280_v49, 0.0 }
 0x25f   :  { %v6384_v43 = vmax.f32 %v4068_v44, 0.0  ;;  %v6632_v10 = vmax.f32 %v4688_v25, 0.0  ;;  %v12623_v25 = vld [vmem:[%s15266_s0 + $0xc70] sm:$0xff] }
 0x260   :  { %v8184_v34 = vadd.f32 %v8183_v61, %v7105_v19  ;;  %v7908_v41 = vadd.f32 %v7907_v11, %v6869_v14  ;;  %v12386_v11 = vld [vmem:[%s15266_s0 + $0x508] sm:$0xff] }
 0x261   :  { %v7348_v28 = vadd.f32 %v7347_v2, %v6384_v43  ;;  %v7636_v35 = vadd.f32 %v7635_v29, %v6632_v10  ;;  %4107 = vmatmul.bf16.gmra.mxu0 %v12261_v18  ;;  %4727 = vmatmul.bf16.gmra.mxu1 %v12385_v3  ;;  %v12262_v29 = vld [vmem:[%s15266_s0 + $0x128] sm:$0xff] }
 0x262   :  { %5912 = vmatmul.bf16.gmra.mxu3 %v12622_v27  ;;  %5322 = vmatmul.bf16.gmra.mxu2 %v12504_v50  ;;  %v12505_v27 = vld [vmem:[%s15266_s0 + $0x8c0] sm:$0xff] }
 0x265   :  { %v5873_v58 = vpop.f32.mrf.mxu3  ;;  %v5283_v4 = vpop.f32.mrf.mxu2 }
 0x266   :  { %v7106_v62 = vmax.f32 %v5873_v58, 0.0  ;;  %v4070_v51 = vpop.f32.mrf.mxu0  ;;  %v4690_v13 = vpop.f32.mrf.mxu1  ;;  %v6870_v44 = vmax.f32 %v5283_v4, 0.0 }
 0x267   :  { %v6385_v39 = vmax.f32 %v4070_v51, 0.0  ;;  %v6633_v42 = vmax.f32 %v4690_v13, 0.0 }
 0x268   :  { %v8185_v60 = vadd.f32 %v8184_v34, %v7106_v62  ;;  %v7909_v61 = vadd.f32 %v7908_v41, %v6870_v44 }
 0x269   :  { %v7349_v36 = vadd.f32 %v7348_v28, %v6385_v39  ;;  %v7637_v26 = vadd.f32 %v7636_v35, %v6633_v42 }
 0x26d   :  { %v5875_v2 = vpop.f32.mrf.mxu3  ;;  %v5285_v18 = vpop.f32.mrf.mxu2 }
 0x26e   :  { %v7107_v3 = vmax.f32 %v5875_v2, 0.0  ;;  %v4073_v49 = vpop.f32.mrf.mxu0  ;;  %v4693_v19 = vpop.f32.mrf.mxu1  ;;  %v6871_v34 = vmax.f32 %v5285_v18, 0.0 }
 0x26f   :  { %v6386_v50 = vmax.f32 %v4073_v49, 0.0  ;;  %v6634_v43 = vmax.f32 %v4693_v19, 0.0  ;;  %v12506_v49 = vld [vmem:[%s15266_s0 + $0x8c8] sm:$0xff] }
 0x270   :  { %v8186_v10 = vadd.f32 %v8185_v60, %v7107_v3  ;;  %v13375_v14 = vadd.f32 %v7909_v61, %v6871_v34  ;;  %v12624_v3 = vld [vmem:[%s15266_s0 + $0xc78] sm:$0xff] }
 0x271   :  { %v7350_v28 = vadd.f32 %v7349_v36, %v6386_v50  ;;  %v7638_v35 = vadd.f32 %v7637_v26, %v6634_v43  ;;  %4112 = vmatmul.bf16.gmra.mxu0 %v12262_v29  ;;  %4732 = vmatmul.bf16.gmra.mxu1 %v12386_v11  ;;  %v12263_v36 = vld [vmem:[%s15266_s0 + $0x130] sm:$0xff] }
 0x272   :  { %5917 = vmatmul.bf16.gmra.mxu3 %v12623_v25  ;;  %15320 = vst [vmem:[#allocation42_spill] sm:$0xff] %v13375_v14  ;;  %5327 = vmatmul.bf16.gmra.mxu2 %v12505_v27  ;;  %v12387_v26 = vld [vmem:[%s15266_s0 + $0x510] sm:$0xff] }
 0x275   :  { %v5878_v41 = vpop.f32.mrf.mxu3  ;;  %v5288_v58 = vpop.f32.mrf.mxu2 }
 0x276   :  { %v7108_v4 = vmax.f32 %v5878_v41, 0.0  ;;  %v4075_v62 = vpop.f32.mrf.mxu0  ;;  %v4695_v51 = vpop.f32.mrf.mxu1 }
 0x277   :  { %v6387_v13 = vmax.f32 %v4075_v62, 0.0  ;;  %v6635_v39 = vmax.f32 %v4695_v51, 0.0 }
 0x278   :  { %v8187_v42 = vadd.f32 %v8186_v10, %v7108_v4 }
 0x279   :  { %v7351_v44 = vadd.f32 %v7350_v28, %v6387_v13  ;;  %v7639_v2 = vadd.f32 %v7638_v35, %v6635_v39 }
 0x27d   :  { %v5880_v60 = vpop.f32.mrf.mxu3  ;;  %v5290_v61 = vpop.f32.mrf.mxu2 }
 0x27e   :  { %v7109_v29 = vmax.f32 %v5880_v60, 0.0  ;;  %v4078_v11 = vpop.f32.mrf.mxu0  ;;  %v4698_v18 = vpop.f32.mrf.mxu1  ;;  %v6872_v60 = vmax.f32 %v5288_v58, 0.0  ;;  %v12625_v58 = vld [vmem:[%s15266_s0 + $0xc80] sm:$0xff] }
 0x27f   :  { %v6388_v19 = vmax.f32 %v4078_v11, 0.0  ;;  %v6636_v25 = vmax.f32 %v4698_v18, 0.0  ;;  %v6873_v11 = vmax.f32 %v5290_v61, 0.0  ;;  %v12507_v61 = vld [vmem:[%s15266_s0 + $0x8d0] sm:$0xff] }
 0x280   :  { %v8188_v27 = vadd.f32 %v8187_v42, %v7109_v29 }
 0x281   :  { %v7352_v50 = vadd.f32 %v7351_v44, %v6388_v19  ;;  %v7640_v43 = vadd.f32 %v7639_v2, %v6636_v25  ;;  %4117 = vmatmul.bf16.gmra.mxu0 %v12263_v36  ;;  %4737 = vmatmul.bf16.gmra.mxu1 %v12387_v26  ;;  %v7917_v42 = vadd.f32 %v6873_v11, %v6872_v60  ;;  %v12264_v2 = vld [vmem:[%s15266_s0 + $0x138] sm:$0xff] }
 0x282   :  { %5922 = vmatmul.bf16.gmra.mxu3 %v12624_v3  ;;  %5332 = vmatmul.bf16.gmra.mxu2 %v12506_v49  ;;  %v12388_v36 = vld [vmem:[%s15266_s0 + $0x518] sm:$0xff] }
 0x285   :  { %v5883_v10 = vpop.f32.mrf.mxu3  ;;  %v5293_v34 = vpop.f32.mrf.mxu2 }
 0x286   :  { %v7110_v28 = vmax.f32 %v5883_v10, 0.0  ;;  %v4080_v35 = vpop.f32.mrf.mxu0  ;;  %v4700_v41 = vpop.f32.mrf.mxu1  ;;  %v6874_v18 = vmax.f32 %v5293_v34, 0.0 }
 0x287   :  { %v6389_v4 = vmax.f32 %v4080_v35, 0.0  ;;  %v6637_v62 = vmax.f32 %v4700_v41, 0.0 }
 0x288   :  { %v8189_v51 = vadd.f32 %v8188_v27, %v7110_v28  ;;  %v7918_v26 = vadd.f32 %v7917_v42, %v6874_v18 }
 0x289   :  { %v7353_v13 = vadd.f32 %v7352_v50, %v6389_v4  ;;  %v7641_v39 = vadd.f32 %v7640_v43, %v6637_v62 }
 0x28d   :  { %v5885_v44 = vpop.f32.mrf.mxu3  ;;  %v5295_v29 = vpop.f32.mrf.mxu2 }
 0x28e   :  { %v7111_v3 = vmax.f32 %v5885_v44, 0.0  ;;  %v4083_v49 = vpop.f32.mrf.mxu0  ;;  %v4703_v19 = vpop.f32.mrf.mxu1  ;;  %v6875_v34 = vmax.f32 %v5295_v29, 0.0 }
 0x28f   :  { %v6390_v25 = vmax.f32 %v4083_v49, 0.0  ;;  %v6638_v27 = vmax.f32 %v4703_v19, 0.0 }
 0x290   :  { %v8190_v50 = vadd.f32 %v8189_v51, %v7111_v3  ;;  %v7919_v28 = vadd.f32 %v7918_v26, %v6875_v34 }
 0x291   :  { %v7354_v43 = vadd.f32 %v7353_v13, %v6390_v25  ;;  %v7642_v10 = vadd.f32 %v7641_v39, %v6638_v27  ;;  %4122 = vmatmul.bf16.gmra.mxu0 %v12264_v2  ;;  %4742 = vmatmul.bf16.gmra.mxu1 %v12388_v36  ;;  %v12265_v2 = vld [vmem:[%s15266_s0 + $0x140] sm:$0xff] }
 0x292   :  { %5927 = vmatmul.bf16.gmra.mxu3 %v12625_v58  ;;  %5337 = vmatmul.bf16.gmra.mxu2 %v12507_v61  ;;  %v12389_v36 = vld [vmem:[%s15266_s0 + $0x520] sm:$0xff]  ;;  %v12626_v58 = vld [vmem:[%s15266_s0 + $0xc88] sm:$0xff]  ;;  %v12508_v61 = vld [vmem:[%s15266_s0 + $0x8d8] sm:$0xff] }
 0x295   :  { %v5888_v35 = vpop.f32.mrf.mxu3  ;;  %v5298_v41 = vpop.f32.mrf.mxu2 }
 0x296   :  { %v7112_v4 = vmax.f32 %v5888_v35, 0.0  ;;  %v4085_v62 = vpop.f32.mrf.mxu0  ;;  %v4705_v60 = vpop.f32.mrf.mxu1  ;;  %v6876_v51 = vmax.f32 %v5298_v41, 0.0 }
 0x297   :  { %v6391_v11 = vmax.f32 %v4085_v62, 0.0  ;;  %v6639_v18 = vmax.f32 %v4705_v60, 0.0 }
 0x298   :  { %v8191_v42 = vadd.f32 %v8190_v50, %v7112_v4  ;;  %v7920_v13 = vadd.f32 %v7919_v28, %v6876_v51 }
 0x299   :  { %v13401_v44 = vadd.f32 %v7354_v43, %v6391_v11  ;;  %v7643_v49 = vadd.f32 %v7642_v10, %v6639_v18 }
 0x29b   :  { %15321 = vst [vmem:[#allocation43_spill] sm:$0xff] %v13401_v44 }
 0x29d   :  { %v5890_v39 = vpop.f32.mrf.mxu3  ;;  %v5300_v26 = vpop.f32.mrf.mxu2 }
 0x29e   :  { %v7113_v29 = vmax.f32 %v5890_v39, 0.0  ;;  %v4088_v3 = vpop.f32.mrf.mxu0  ;;  %v4708_v19 = vpop.f32.mrf.mxu1  ;;  %v6877_v43 = vmax.f32 %v5300_v26, 0.0 }
 0x29f   :  { %v6640_v25 = vmax.f32 %v4708_v19, 0.0  ;;  %v6392_v62 = vmax.f32 %v4088_v3, 0.0 }
 0x2a0   :  { %v8192_v27 = vadd.f32 %v8191_v42, %v7113_v29  ;;  %v7921_v10 = vadd.f32 %v7920_v13, %v6877_v43  ;;  %v12390_v13 = vld [vmem:[%s15266_s0 + $0x528] sm:$0xff] }
 0x2a1   :  { %v7644_v50 = vadd.f32 %v7643_v49, %v6640_v25  ;;  %4127 = vmatmul.bf16.gmra.mxu0 %v12265_v2  ;;  %4747 = vmatmul.bf16.gmra.mxu1 %v12389_v36  ;;  %v12266_v2 = vld [vmem:[%s15266_s0 + $0x148] sm:$0xff] }
 0x2a2   :  { %5932 = vmatmul.bf16.gmra.mxu3 %v12626_v58  ;;  %5342 = vmatmul.bf16.gmra.mxu2 %v12508_v61  ;;  %v12627_v58 = vld [vmem:[%s15266_s0 + $0xc90] sm:$0xff]  ;;  %v12509_v61 = vld [vmem:[%s15266_s0 + $0x8e0] sm:$0xff] }
 0x2a5   :  { %v5893_v34 = vpop.f32.mrf.mxu3  ;;  %v5303_v28 = vpop.f32.mrf.mxu2 }
 0x2a6   :  { %v7114_v35 = vmax.f32 %v5893_v34, 0.0  ;;  %v4090_v41 = vpop.f32.mrf.mxu0  ;;  %v4710_v4 = vpop.f32.mrf.mxu1  ;;  %v6878_v19 = vmax.f32 %v5303_v28, 0.0 }
 0x2a7   :  { %v6393_v60 = vmax.f32 %v4090_v41, 0.0  ;;  %v6641_v11 = vmax.f32 %v4710_v4, 0.0 }
 0x2a8   :  { %v8193_v18 = vadd.f32 %v8192_v27, %v7114_v35  ;;  %v7922_v42 = vadd.f32 %v7921_v10, %v6878_v19 }
 0x2a9   :  { %v7362_v51 = vadd.f32 %v6393_v60, %v6392_v62  ;;  %v7645_v39 = vadd.f32 %v7644_v50, %v6641_v11 }
 0x2ad   :  { %v5895_v49 = vpop.f32.mrf.mxu3  ;;  %v5305_v36 = vpop.f32.mrf.mxu2 }
 0x2ae   :  { %v7115_v26 = vmax.f32 %v5895_v49, 0.0  ;;  %v4093_v29 = vpop.f32.mrf.mxu0  ;;  %v4713_v3 = vpop.f32.mrf.mxu1  ;;  %v6879_v34 = vmax.f32 %v5305_v36, 0.0  ;;  %v12628_v36 = vld [vmem:[%s15266_s0 + $0xc98] sm:$0xff] }
 0x2af   :  { %v6394_v25 = vmax.f32 %v4093_v29, 0.0  ;;  %v6642_v27 = vmax.f32 %v4713_v3, 0.0 }
 0x2b0   :  { %v8194_v50 = vadd.f32 %v8193_v18, %v7115_v26  ;;  %v7923_v28 = vadd.f32 %v7922_v42, %v6879_v34  ;;  %v12267_v18 = vld [vmem:[%s15266_s0 + $0x150] sm:$0xff]  ;;  %v12510_v26 = vld [vmem:[%s15266_s0 + $0x8e8] sm:$0xff] }
 0x2b1   :  { %v7363_v43 = vadd.f32 %v7362_v51, %v6394_v25  ;;  %v7646_v10 = vadd.f32 %v7645_v39, %v6642_v27  ;;  %4132 = vmatmul.bf16.gmra.mxu0 %v12266_v2  ;;  %4752 = vmatmul.bf16.gmra.mxu1 %v12390_v13  ;;  %v12391_v51 = vld [vmem:[%s15266_s0 + $0x530] sm:$0xff] }
 0x2b2   :  { %5937 = vmatmul.bf16.gmra.mxu3 %v12627_v58  ;;  %5347 = vmatmul.bf16.gmra.mxu2 %v12509_v61 }
 0x2b5   :  { %v5898_v35 = vpop.f32.mrf.mxu3  ;;  %v5308_v41 = vpop.f32.mrf.mxu2 }
 0x2b6   :  { %v7116_v4 = vmax.f32 %v5898_v35, 0.0  ;;  %v4095_v62 = vpop.f32.mrf.mxu0  ;;  %v4715_v60 = vpop.f32.mrf.mxu1  ;;  %v6880_v14 = vmax.f32 %v5308_v41, 0.0  ;;  %v12629_v41 = vld [vmem:[%s15266_s0 + $0xca0] sm:$0xff] }
 0x2b7   :  { %v6395_v11 = vmax.f32 %v4095_v62, 0.0  ;;  %v6643_v19 = vmax.f32 %v4715_v60, 0.0 }
 0x2b8   :  { %v8195_v49 = vadd.f32 %v8194_v50, %v7116_v4 }
 0x2b9   :  { %v7364_v44 = vadd.f32 %v7363_v43, %v6395_v11  ;;  %v7647_v29 = vadd.f32 %v7646_v10, %v6643_v19 }
 0x2bd   :  { %v5900_v3 = vpop.f32.mrf.mxu3  ;;  %v5310_v39 = vpop.f32.mrf.mxu2 }
 0x2be   :  { %v7117_v42 = vmax.f32 %v5900_v3, 0.0  ;;  %v4098_v2 = vpop.f32.mrf.mxu0  ;;  %v4718_v13 = vpop.f32.mrf.mxu1 }
 0x2bf   :  { %v6396_v58 = vmax.f32 %v4098_v2, 0.0  ;;  %v6644_v61 = vmax.f32 %v4718_v13, 0.0  ;;  %v6881_v2 = vmax.f32 %v5310_v39, 0.0  ;;  %v7924_v13 = vadd.f32 %v7923_v28, %v6880_v14  ;;  %v12511_v14 = vld [vmem:[%s15266_s0 + $0x8f0] sm:$0xff] }
 0x2c0   :  { %v8196_v25 = vadd.f32 %v8195_v49, %v7117_v42 }
 0x2c1   :  { %v7365_v27 = vadd.f32 %v7364_v44, %v6396_v58  ;;  %v7648_v50 = vadd.f32 %v7647_v29, %v6644_v61  ;;  %4137 = vmatmul.bf16.gmra.mxu0 %v12267_v18  ;;  %4757 = vmatmul.bf16.gmra.mxu1 %v12391_v51  ;;  %v12268_v29 = vld [vmem:[%s15266_s0 + $0x158] sm:$0xff]  ;;  %v7925_v51 = vadd.f32 %v7924_v13, %v6881_v2 }
 0x2c2   :  { %5942 = vmatmul.bf16.gmra.mxu3 %v12628_v36  ;;  %5352 = vmatmul.bf16.gmra.mxu2 %v12510_v26  ;;  %v12392_v18 = vld [vmem:[%s15266_s0 + $0x538] sm:$0xff] }
 0x2c5   :  { %v5903_v43 = vpop.f32.mrf.mxu3  ;;  %v5313_v10 = vpop.f32.mrf.mxu2 }
 0x2c6   :  { %v7118_v34 = vmax.f32 %v5903_v43, 0.0  ;;  %v4100_v35 = vpop.f32.mrf.mxu0  ;;  %v4720_v4 = vpop.f32.mrf.mxu1  ;;  %v6882_v49 = vmax.f32 %v5313_v10, 0.0 }
 0x2c7   :  { %v6397_v62 = vmax.f32 %v4100_v35, 0.0  ;;  %v6645_v60 = vmax.f32 %v4720_v4, 0.0 }
 0x2c8   :  { %v8197_v11 = vadd.f32 %v8196_v25, %v7118_v34  ;;  %v7926_v61 = vadd.f32 %v7925_v51, %v6882_v49  ;;  %v12269_v49 = vld [vmem:[%s15266_s0 + $0x160] sm:$0xff] }
 0x2c9   :  { %v7366_v19 = vadd.f32 %v7365_v27, %v6397_v62  ;;  %v7649_v3 = vadd.f32 %v7648_v50, %v6645_v60 }
 0x2cd   :  { %v5905_v44 = vpop.f32.mrf.mxu3  ;;  %v5315_v42 = vpop.f32.mrf.mxu2 }
 0x2ce   :  { %v7119_v36 = vmax.f32 %v5905_v44, 0.0  ;;  %v4103_v26 = vpop.f32.mrf.mxu0  ;;  %v4723_v58 = vpop.f32.mrf.mxu1  ;;  %v6883_v43 = vmax.f32 %v5315_v42, 0.0 }
 0x2cf   :  { %v6398_v28 = vmax.f32 %v4103_v26, 0.0  ;;  %v6646_v39 = vmax.f32 %v4723_v58, 0.0 }
 0x2d0   :  { %v8198_v25 = vadd.f32 %v8197_v11, %v7119_v36  ;;  %v7927_v10 = vadd.f32 %v7926_v61, %v6883_v43 }
 0x2d1   :  { %v7367_v27 = vadd.f32 %v7366_v19, %v6398_v28  ;;  %v7650_v50 = vadd.f32 %v7649_v3, %v6646_v39  ;;  %4142 = vmatmul.bf16.gmra.mxu0 %v12268_v29  ;;  %4762 = vmatmul.bf16.gmra.mxu1 %v12392_v18  ;;  %v12393_v29 = vld [vmem:[%s15266_s0 + $0x540] sm:$0xff] }
 0x2d2   :  { %5947 = vmatmul.bf16.gmra.mxu3 %v12629_v41  ;;  %5357 = vmatmul.bf16.gmra.mxu2 %v12511_v14  ;;  %v12630_v41 = vld [vmem:[%s15266_s0 + $0xca8] sm:$0xff]  ;;  %v12512_v14 = vld [vmem:[%s15266_s0 + $0x8f8] sm:$0xff] }
 0x2d5   :  { %v5908_v34 = vpop.f32.mrf.mxu3  ;;  %v5318_v35 = vpop.f32.mrf.mxu2 }
 0x2d6   :  { %v7120_v4 = vmax.f32 %v5908_v34, 0.0  ;;  %v4105_v62 = vpop.f32.mrf.mxu0  ;;  %v4725_v60 = vpop.f32.mrf.mxu1  ;;  %v6884_v11 = vmax.f32 %v5318_v35, 0.0 }
 0x2d7   :  { %v6399_v2 = vmax.f32 %v4105_v62, 0.0  ;;  %v6647_v13 = vmax.f32 %v4725_v60, 0.0 }
 0x2d8   :  { %v8199_v44 = vadd.f32 %v8198_v25, %v7120_v4  ;;  %v7928_v19 = vadd.f32 %v7927_v10, %v6884_v11 }
 0x2d9   :  { %v7368_v26 = vadd.f32 %v7367_v27, %v6399_v2  ;;  %v13451_v58 = vadd.f32 %v7650_v50, %v6647_v13 }
 0x2dd   :  { %v5910_v3 = vpop.f32.mrf.mxu3  ;;  %v5320_v18 = vpop.f32.mrf.mxu2 }
 0x2de   :  { %v7121_v51 = vmax.f32 %v5910_v3, 0.0  ;;  %v4108_v42 = vpop.f32.mrf.mxu0  ;;  %v4728_v36 = vpop.f32.mrf.mxu1  ;;  %v6885_v25 = vmax.f32 %v5320_v18, 0.0 }
 0x2df   :  { %v6400_v28 = vmax.f32 %v4108_v42, 0.0  ;;  %v6648_v50 = vmax.f32 %v4728_v36, 0.0  ;;  %v12631_v36 = vld [vmem:[%s15266_s0 + $0xcb0] sm:$0xff] }
 0x2e0   :  { %v8200_v39 = vadd.f32 %v8199_v44, %v7121_v51  ;;  %v7929_v27 = vadd.f32 %v7928_v19, %v6885_v25  ;;  %v12394_v19 = vld [vmem:[%s15266_s0 + $0x548] sm:$0xff] }
 0x2e1   :  { %v7369_v61 = vadd.f32 %v7368_v26, %v6400_v28  ;;  %4147 = vmatmul.bf16.gmra.mxu0 %v12269_v49  ;;  %4767 = vmatmul.bf16.gmra.mxu1 %v12393_v29  ;;  %v12270_v49 = vld [vmem:[%s15266_s0 + $0x168] sm:$0xff] }
 0x2e2   :  { %5952 = vmatmul.bf16.gmra.mxu3 %v12630_v41  ;;  %5362 = vmatmul.bf16.gmra.mxu2 %v12512_v14  ;;  %v12513_v41 = vld [vmem:[%s15266_s0 + $0x900] sm:$0xff] }
 0x2e5   :  { %v5913_v43 = vpop.f32.mrf.mxu3  ;;  %v5323_v10 = vpop.f32.mrf.mxu2 }
 0x2e6   :  { %v7122_v34 = vmax.f32 %v5913_v43, 0.0  ;;  %v4110_v35 = vpop.f32.mrf.mxu0  ;;  %v4730_v4 = vpop.f32.mrf.mxu1  ;;  %v6886_v3 = vmax.f32 %v5323_v10, 0.0 }
 0x2e7   :  { %v6401_v62 = vmax.f32 %v4110_v35, 0.0  ;;  %v6649_v60 = vmax.f32 %v4730_v4, 0.0 }
 0x2e8   :  { %v8201_v2 = vadd.f32 %v8200_v39, %v7122_v34  ;;  %v7930_v44 = vadd.f32 %v7929_v27, %v6886_v3 }
 0x2e9   :  { %v7370_v13 = vadd.f32 %v7369_v61, %v6401_v62  ;;  %v7658_v11 = vadd.f32 %v6649_v60, %v6648_v50 }
 0x2ed   :  { %v5915_v26 = vpop.f32.mrf.mxu3  ;;  %v5325_v29 = vpop.f32.mrf.mxu2 }
 0x2ee   :  { %v7123_v18 = vmax.f32 %v5915_v26, 0.0  ;;  %v4113_v51 = vpop.f32.mrf.mxu0  ;;  %v4733_v42 = vpop.f32.mrf.mxu1 }
 0x2ef   :  { %v6402_v14 = vmax.f32 %v4113_v51, 0.0  ;;  %v6650_v28 = vmax.f32 %v4733_v42, 0.0  ;;  %v12632_v51 = vld [vmem:[%s15266_s0 + $0xcb8] sm:$0xff]  ;;  %v12514_v42 = vld [vmem:[%s15266_s0 + $0x908] sm:$0xff] }
 0x2f0   :  { %v8202_v39 = vadd.f32 %v8201_v2, %v7123_v18  ;;  %v12271_v2 = vld [vmem:[%s15266_s0 + $0x170] sm:$0xff] }
 0x2f1   :  { %v7371_v61 = vadd.f32 %v7370_v13, %v6402_v14  ;;  %v7659_v25 = vadd.f32 %v7658_v11, %v6650_v28  ;;  %4152 = vmatmul.bf16.gmra.mxu0 %v12270_v49  ;;  %4772 = vmatmul.bf16.gmra.mxu1 %v12394_v19  ;;  %v12395_v13 = vld [vmem:[%s15266_s0 + $0x550] sm:$0xff]  ;;  %v6887_v28 = vmax.f32 %v5325_v29, 0.0 }
 0x2f2   :  { %5957 = vmatmul.bf16.gmra.mxu3 %v12631_v36  ;;  %5367 = vmatmul.bf16.gmra.mxu2 %v12513_v41 }
 0x2f5   :  { %v5918_v27 = vpop.f32.mrf.mxu3  ;;  %v5328_v50 = vpop.f32.mrf.mxu2 }
 0x2f6   :  { %v7124_v43 = vmax.f32 %v5918_v27, 0.0  ;;  %v4115_v10 = vpop.f32.mrf.mxu0  ;;  %v4735_v34 = vpop.f32.mrf.mxu1  ;;  %v7931_v27 = vadd.f32 %v7930_v44, %v6887_v28  ;;  %v12272_v44 = vld [vmem:[%s15266_s0 + $0x178] sm:$0xff] }
 0x2f7   :  { %v6403_v35 = vmax.f32 %v4115_v10, 0.0  ;;  %v6651_v4 = vmax.f32 %v4735_v34, 0.0 }
 0x2f8   :  { %v8203_v62 = vadd.f32 %v8202_v39, %v7124_v43  ;;  %v6888_v39 = vmax.f32 %v5328_v50, 0.0 }
 0x2f9   :  { %v7372_v60 = vadd.f32 %v7371_v61, %v6403_v35  ;;  %v7660_v3 = vadd.f32 %v7659_v25, %v6651_v4 }
 0x2fa   :  { %v7932_v10 = vadd.f32 %v7931_v27, %v6888_v39 }
 0x2fd   :  { %v5920_v26 = vpop.f32.mrf.mxu3  ;;  %v5330_v11 = vpop.f32.mrf.mxu2 }
 0x2fe   :  { %v7125_v49 = vmax.f32 %v5920_v26, 0.0  ;;  %v4118_v19 = vpop.f32.mrf.mxu0  ;;  %v4738_v18 = vpop.f32.mrf.mxu1  ;;  %v6889_v43 = vmax.f32 %v5330_v11, 0.0 }
 0x2ff   :  { %v6404_v36 = vmax.f32 %v4118_v19, 0.0  ;;  %v6652_v41 = vmax.f32 %v4738_v18, 0.0 }
 0x300   :  { %v8204_v14 = vadd.f32 %v8203_v62, %v7125_v49  ;;  %v7933_v45 = vadd.f32 %v7932_v10, %v6889_v43 }
 0x301   :  { %v7373_v61 = vadd.f32 %v7372_v60, %v6404_v36  ;;  %v7661_v25 = vadd.f32 %v7660_v3, %v6652_v41  ;;  %4157 = vmatmul.bf16.gmra.mxu0 %v12271_v2  ;;  %4777 = vmatmul.bf16.gmra.mxu1 %v12395_v13  ;;  %v12396_v13 = vld [vmem:[%s15266_s0 + $0x558] sm:$0xff] }
 0x302   :  { %5962 = vmatmul.bf16.gmra.mxu3 %v12632_v51  ;;  %5372 = vmatmul.bf16.gmra.mxu2 %v12514_v42 }
 0x305   :  { %v5923_v34 = vpop.f32.mrf.mxu3  ;;  %v5333_v35 = vpop.f32.mrf.mxu2 }
 0x306   :  { %v7126_v4 = vmax.f32 %v5923_v34, 0.0  ;;  %v4120_v26 = vpop.f32.mrf.mxu0  ;;  %v4740_v17 = vpop.f32.mrf.mxu1  ;;  %v6890_v60 = vmax.f32 %v5333_v35, 0.0 }
 0x307   :  { %v6405_v19 = vmax.f32 %v4120_v26, 0.0  ;;  %v6653_v18 = vmax.f32 %v4740_v17, 0.0  ;;  %v12633_v17 = vld [vmem:[%s15266_s0 + $0xcc0] sm:$0xff] }
 0x308   :  { %v8205_v62 = vadd.f32 %v8204_v14, %v7126_v4  ;;  %v7934_v3 = vadd.f32 %v7933_v45, %v6890_v60  ;;  %v12515_v45 = vld [vmem:[%s15266_s0 + $0x910] sm:$0xff] }
 0x309   :  { %v7374_v29 = vadd.f32 %v7373_v61, %v6405_v19  ;;  %v7662_v50 = vadd.f32 %v7661_v25, %v6653_v18 }
 0x30d   :  { %v5925_v2 = vpop.f32.mrf.mxu3  ;;  %v5335_v11 = vpop.f32.mrf.mxu2 }
 0x30e   :  { %v7127_v49 = vmax.f32 %v5925_v2, 0.0  ;;  %v4123_v51 = vpop.f32.mrf.mxu0  ;;  %v4743_v42 = vpop.f32.mrf.mxu1  ;;  %v6891_v61 = vmax.f32 %v5335_v11, 0.0 }
 0x30f   :  { %v6406_v36 = vmax.f32 %v4123_v51, 0.0  ;;  %v6654_v41 = vmax.f32 %v4743_v42, 0.0  ;;  %v12516_v51 = vld [vmem:[%s15266_s0 + $0x918] sm:$0xff] }
 0x310   :  { %v13501_v14 = vadd.f32 %v8205_v62, %v7127_v49  ;;  %v7935_v25 = vadd.f32 %v7934_v3, %v6891_v61  ;;  %v12634_v49 = vld [vmem:[%s15266_s0 + $0xcc8] sm:$0xff] }
 0x311   :  { %v7375_v28 = vadd.f32 %v7374_v29, %v6406_v36  ;;  %v7663_v39 = vadd.f32 %v7662_v50, %v6654_v41  ;;  %4162 = vmatmul.bf16.gmra.mxu0 %v12272_v44  ;;  %4782 = vmatmul.bf16.gmra.mxu1 %v12396_v13  ;;  %v12273_v29 = vld [vmem:[%s15266_s0 + $0x180] sm:$0xff] }
 0x312   :  { %5967 = vmatmul.bf16.gmra.mxu3 %v12633_v17  ;;  %5377 = vmatmul.bf16.gmra.mxu2 %v12515_v45  ;;  %v12397_v50 = vld [vmem:[%s15266_s0 + $0x560] sm:$0xff] }
 0x315   :  { %v5928_v27 = vpop.f32.mrf.mxu3  ;;  %v5338_v43 = vpop.f32.mrf.mxu2 }
 0x316   :  { %v4125_v10 = vpop.f32.mrf.mxu0  ;;  %v4745_v34 = vpop.f32.mrf.mxu1  ;;  %v6892_v18 = vmax.f32 %v5338_v43, 0.0  ;;  %v7128_v62 = vmax.f32 %v5928_v27, 0.0 }
 0x317   :  { %v6407_v35 = vmax.f32 %v4125_v10, 0.0  ;;  %v6655_v4 = vmax.f32 %v4745_v34, 0.0 }
 0x318   :  { %v7936_v60 = vadd.f32 %v7935_v25, %v6892_v18 }
 0x319   :  { %v7376_v26 = vadd.f32 %v7375_v28, %v6407_v35  ;;  %v7664_v19 = vadd.f32 %v7663_v39, %v6655_v4 }
 0x31d   :  { %v5930_v2 = vpop.f32.mrf.mxu3  ;;  %v5340_v3 = vpop.f32.mrf.mxu2 }
 0x31e   :  { %v7129_v44 = vmax.f32 %v5930_v2, 0.0  ;;  %v4128_v13 = vpop.f32.mrf.mxu0  ;;  %v4748_v11 = vpop.f32.mrf.mxu1  ;;  %v6893_v28 = vmax.f32 %v5340_v3, 0.0 }
 0x31f   :  { %v6408_v42 = vmax.f32 %v4128_v13, 0.0  ;;  %v6656_v17 = vmax.f32 %v4748_v11, 0.0  ;;  %v12635_v11 = vld [vmem:[%s15266_s0 + $0xcd0] sm:$0xff] }
 0x320   :  { %v8213_v45 = vadd.f32 %v7129_v44, %v7128_v62  ;;  %v7937_v39 = vadd.f32 %v7936_v60, %v6893_v28  ;;  %v12398_v60 = vld [vmem:[%s15266_s0 + $0x568] sm:$0xff] }
 0x321   :  { %v7377_v36 = vadd.f32 %v7376_v26, %v6408_v42  ;;  %v7665_v41 = vadd.f32 %v7664_v19, %v6656_v17  ;;  %4167 = vmatmul.bf16.gmra.mxu0 %v12273_v29  ;;  %4787 = vmatmul.bf16.gmra.mxu1 %v12397_v50  ;;  %v12274_v19 = vld [vmem:[%s15266_s0 + $0x188] sm:$0xff] }
 0x322   :  { %5972 = vmatmul.bf16.gmra.mxu3 %v12634_v49  ;;  %5382 = vmatmul.bf16.gmra.mxu2 %v12516_v51  ;;  %v12517_v49 = vld [vmem:[%s15266_s0 + $0x920] sm:$0xff] }
 0x325   :  { %v5933_v61 = vpop.f32.mrf.mxu3  ;;  %v5343_v25 = vpop.f32.mrf.mxu2 }
 0x326   :  { %v7130_v27 = vmax.f32 %v5933_v61, 0.0  ;;  %v4130_v43 = vpop.f32.mrf.mxu0  ;;  %v4750_v10 = vpop.f32.mrf.mxu1  ;;  %v6894_v13 = vmax.f32 %v5343_v25, 0.0 }
 0x327   :  { %v6409_v34 = vmax.f32 %v4130_v43, 0.0  ;;  %v6657_v35 = vmax.f32 %v4750_v10, 0.0 }
 0x328   :  { %v8214_v4 = vadd.f32 %v8213_v45, %v7130_v27  ;;  %v7938_v62 = vadd.f32 %v7937_v39, %v6894_v13 }
 0x329   :  { %v7378_v18 = vadd.f32 %v7377_v36, %v6409_v34  ;;  %v7666_v2 = vadd.f32 %v7665_v41, %v6657_v35 }
 0x32d   :  { %v5935_v26 = vpop.f32.mrf.mxu3  ;;  %v5345_v29 = vpop.f32.mrf.mxu2 }
 0x32e   :  { %v7131_v50 = vmax.f32 %v5935_v26, 0.0  ;;  %v4133_v3 = vpop.f32.mrf.mxu0  ;;  %v4753_v44 = vpop.f32.mrf.mxu1  ;;  %v6895_v41 = vmax.f32 %v5345_v29, 0.0 }
 0x32f   :  { %v6410_v51 = vmax.f32 %v4133_v3, 0.0  ;;  %v6658_v42 = vmax.f32 %v4753_v44, 0.0  ;;  %v12636_v44 = vld [vmem:[%s15266_s0 + $0xcd8] sm:$0xff] }
 0x330   :  { %v8215_v17 = vadd.f32 %v8214_v4, %v7131_v50  ;;  %v7939_v28 = vadd.f32 %v7938_v62, %v6895_v41  ;;  %v12399_v62 = vld [vmem:[%s15266_s0 + $0x570] sm:$0xff] }
 0x331   :  { %v7379_v45 = vadd.f32 %v7378_v18, %v6410_v51  ;;  %v7667_v36 = vadd.f32 %v7666_v2, %v6658_v42  ;;  %4172 = vmatmul.bf16.gmra.mxu0 %v12274_v19  ;;  %4792 = vmatmul.bf16.gmra.mxu1 %v12398_v60  ;;  %v12275_v2 = vld [vmem:[%s15266_s0 + $0x190] sm:$0xff] }
 0x332   :  { %5977 = vmatmul.bf16.gmra.mxu3 %v12635_v11  ;;  %5387 = vmatmul.bf16.gmra.mxu2 %v12517_v49  ;;  %v12518_v11 = vld [vmem:[%s15266_s0 + $0x928] sm:$0xff] }
 0x335   :  { %v5938_v39 = vpop.f32.mrf.mxu3  ;;  %v5348_v61 = vpop.f32.mrf.mxu2 }
 0x336   :  { %v7132_v25 = vmax.f32 %v5938_v39, 0.0  ;;  %v4135_v27 = vpop.f32.mrf.mxu0  ;;  %v4755_v43 = vpop.f32.mrf.mxu1  ;;  %v6896_v3 = vmax.f32 %v5348_v61, 0.0 }
 0x337   :  { %v6411_v10 = vmax.f32 %v4135_v27, 0.0  ;;  %v6659_v34 = vmax.f32 %v4755_v43, 0.0 }
 0x338   :  { %v8216_v35 = vadd.f32 %v8215_v17, %v7132_v25  ;;  %v7940_v4 = vadd.f32 %v7939_v28, %v6896_v3 }
 0x339   :  { %v7380_v13 = vadd.f32 %v7379_v45, %v6411_v10  ;;  %v7668_v26 = vadd.f32 %v7667_v36, %v6659_v34 }
 0x33d   :  { %v5940_v18 = vpop.f32.mrf.mxu3  ;;  %v5350_v19 = vpop.f32.mrf.mxu2 }
 0x33e   :  { %v7133_v60 = vmax.f32 %v5940_v18, 0.0  ;;  %v4138_v29 = vpop.f32.mrf.mxu0  ;;  %v4758_v50 = vpop.f32.mrf.mxu1  ;;  %v6897_v36 = vmax.f32 %v5350_v19, 0.0 }
 0x33f   :  { %v6412_v49 = vmax.f32 %v4138_v29, 0.0  ;;  %v6660_v51 = vmax.f32 %v4758_v50, 0.0  ;;  %v12637_v50 = vld [vmem:[%s15266_s0 + $0xce0] sm:$0xff] }
 0x340   :  { %v8217_v42 = vadd.f32 %v8216_v35, %v7133_v60  ;;  %v7941_v41 = vadd.f32 %v7940_v4, %v6897_v36  ;;  %v12400_v4 = vld [vmem:[%s15266_s0 + $0x578] sm:$0xff] }
 0x341   :  { %v7381_v17 = vadd.f32 %v7380_v13, %v6412_v49  ;;  %v7669_v45 = vadd.f32 %v7668_v26, %v6660_v51  ;;  %4177 = vmatmul.bf16.gmra.mxu0 %v12275_v2  ;;  %4797 = vmatmul.bf16.gmra.mxu1 %v12399_v62  ;;  %v12276_v26 = vld [vmem:[%s15266_s0 + $0x198] sm:$0xff] }
 0x342   :  { %5982 = vmatmul.bf16.gmra.mxu3 %v12636_v44  ;;  %5392 = vmatmul.bf16.gmra.mxu2 %v12518_v11  ;;  %v12519_v44 = vld [vmem:[%s15266_s0 + $0x930] sm:$0xff] }
 0x345   :  { %v5943_v28 = vpop.f32.mrf.mxu3  ;;  %v5353_v39 = vpop.f32.mrf.mxu2 }
 0x346   :  { %v7134_v61 = vmax.f32 %v5943_v28, 0.0  ;;  %v4140_v25 = vpop.f32.mrf.mxu0  ;;  %v4760_v27 = vpop.f32.mrf.mxu1  ;;  %v6898_v29 = vmax.f32 %v5353_v39, 0.0 }
 0x347   :  { %v6413_v43 = vmax.f32 %v4140_v25, 0.0  ;;  %v6661_v10 = vmax.f32 %v4760_v27, 0.0 }
 0x348   :  { %v8218_v34 = vadd.f32 %v8217_v42, %v7134_v61  ;;  %v7942_v35 = vadd.f32 %v7941_v41, %v6898_v29 }
 0x349   :  { %v7382_v3 = vadd.f32 %v7381_v17, %v6413_v43  ;;  %v7670_v18 = vadd.f32 %v7669_v45, %v6661_v10 }
 0x34d   :  { %v5945_v13 = vpop.f32.mrf.mxu3  ;;  %v5355_v2 = vpop.f32.mrf.mxu2 }
 0x34e   :  { %v7135_v62 = vmax.f32 %v5945_v13, 0.0  ;;  %v4143_v19 = vpop.f32.mrf.mxu0  ;;  %v4763_v60 = vpop.f32.mrf.mxu1  ;;  %v6899_v45 = vmax.f32 %v5355_v2, 0.0 }
 0x34f   :  { %v6414_v11 = vmax.f32 %v4143_v19, 0.0  ;;  %v6662_v49 = vmax.f32 %v4763_v60, 0.0  ;;  %v12638_v60 = vld [vmem:[%s15266_s0 + $0xce8] sm:$0xff] }
 0x350   :  { %v8219_v51 = vadd.f32 %v8218_v34, %v7135_v62  ;;  %v7943_v36 = vadd.f32 %v7942_v35, %v6899_v45  ;;  %v12401_v35 = vld [vmem:[%s15266_s0 + $0x580] sm:$0xff] }
 0x351   :  { %v7383_v42 = vadd.f32 %v7382_v3, %v6414_v11  ;;  %v7671_v17 = vadd.f32 %v7670_v18, %v6662_v49  ;;  %4182 = vmatmul.bf16.gmra.mxu0 %v12276_v26  ;;  %4802 = vmatmul.bf16.gmra.mxu1 %v12400_v4  ;;  %v12277_v18 = vld [vmem:[%s15266_s0 + $0x1a0] sm:$0xff] }
 0x352   :  { %5987 = vmatmul.bf16.gmra.mxu3 %v12637_v50  ;;  %5397 = vmatmul.bf16.gmra.mxu2 %v12519_v44  ;;  %v12520_v50 = vld [vmem:[%s15266_s0 + $0x938] sm:$0xff] }
 0x355   :  { %v5948_v41 = vpop.f32.mrf.mxu3  ;;  %v5358_v28 = vpop.f32.mrf.mxu2 }
 0x356   :  { %v7136_v39 = vmax.f32 %v5948_v41, 0.0  ;;  %v4145_v61 = vpop.f32.mrf.mxu0  ;;  %v4765_v25 = vpop.f32.mrf.mxu1  ;;  %v6900_v19 = vmax.f32 %v5358_v28, 0.0 }
 0x357   :  { %v6415_v27 = vmax.f32 %v4145_v61, 0.0  ;;  %v6663_v43 = vmax.f32 %v4765_v25, 0.0 }
 0x358   :  { %v8220_v10 = vadd.f32 %v8219_v51, %v7136_v39  ;;  %v7944_v34 = vadd.f32 %v7943_v36, %v6900_v19 }
 0x359   :  { %v7384_v29 = vadd.f32 %v7383_v42, %v6415_v27  ;;  %v7672_v13 = vadd.f32 %v7671_v17, %v6663_v43 }
 0x35d   :  { %v5950_v3 = vpop.f32.mrf.mxu3  ;;  %v5360_v26 = vpop.f32.mrf.mxu2 }
 0x35e   :  { %v7137_v4 = vmax.f32 %v5950_v3, 0.0  ;;  %v4148_v2 = vpop.f32.mrf.mxu0  ;;  %v4768_v62 = vpop.f32.mrf.mxu1  ;;  %v6901_v17 = vmax.f32 %v5360_v26, 0.0 }
 0x35f   :  { %v6416_v44 = vmax.f32 %v4148_v2, 0.0  ;;  %v6664_v11 = vmax.f32 %v4768_v62, 0.0  ;;  %v12639_v62 = vld [vmem:[%s15266_s0 + $0xcf0] sm:$0xff] }
 0x360   :  { %v8221_v49 = vadd.f32 %v8220_v10, %v7137_v4  ;;  %v7945_v45 = vadd.f32 %v7944_v34, %v6901_v17  ;;  %v12402_v34 = vld [vmem:[%s15266_s0 + $0x588] sm:$0xff] }
 0x361   :  { %v7385_v51 = vadd.f32 %v7384_v29, %v6416_v44  ;;  %v7673_v42 = vadd.f32 %v7672_v13, %v6664_v11  ;;  %4187 = vmatmul.bf16.gmra.mxu0 %v12277_v18  ;;  %4807 = vmatmul.bf16.gmra.mxu1 %v12401_v35  ;;  %v12278_v13 = vld [vmem:[%s15266_s0 + $0x1a8] sm:$0xff] }
 0x362   :  { %5992 = vmatmul.bf16.gmra.mxu3 %v12638_v60  ;;  %5402 = vmatmul.bf16.gmra.mxu2 %v12520_v50  ;;  %v12521_v60 = vld [vmem:[%s15266_s0 + $0x940] sm:$0xff] }
 0x365   :  { %v5953_v36 = vpop.f32.mrf.mxu3  ;;  %v5363_v41 = vpop.f32.mrf.mxu2 }
 0x366   :  { %v7138_v28 = vmax.f32 %v5953_v36, 0.0  ;;  %v4150_v39 = vpop.f32.mrf.mxu0  ;;  %v4770_v61 = vpop.f32.mrf.mxu1  ;;  %v6902_v2 = vmax.f32 %v5363_v41, 0.0 }
 0x367   :  { %v6417_v25 = vmax.f32 %v4150_v39, 0.0  ;;  %v6665_v27 = vmax.f32 %v4770_v61, 0.0 }
 0x368   :  { %v8222_v43 = vadd.f32 %v8221_v49, %v7138_v28  ;;  %v7946_v10 = vadd.f32 %v7945_v45, %v6902_v2 }
 0x369   :  { %v7386_v19 = vadd.f32 %v7385_v51, %v6417_v25  ;;  %v7674_v3 = vadd.f32 %v7673_v42, %v6665_v27 }
 0x36d   :  { %v5955_v29 = vpop.f32.mrf.mxu3  ;;  %v5365_v18 = vpop.f32.mrf.mxu2 }
 0x36e   :  { %v7139_v35 = vmax.f32 %v5955_v29, 0.0  ;;  %v4153_v26 = vpop.f32.mrf.mxu0  ;;  %v4773_v4 = vpop.f32.mrf.mxu1  ;;  %v6903_v49 = vmax.f32 %v5365_v18, 0.0 }
 0x36f   :  { %v6418_v50 = vmax.f32 %v4153_v26, 0.0  ;;  %v6666_v44 = vmax.f32 %v4773_v4, 0.0  ;;  %v12522_v26 = vld [vmem:[%s15266_s0 + $0x948] sm:$0xff] }
 0x370   :  { %v8223_v11 = vadd.f32 %v8222_v43, %v7139_v35  ;;  %v13575_v17 = vadd.f32 %v7946_v10, %v6903_v49  ;;  %v12640_v35 = vld [vmem:[%s15266_s0 + $0xcf8] sm:$0xff] }
 0x371   :  { %v7387_v51 = vadd.f32 %v7386_v19, %v6418_v50  ;;  %v7675_v42 = vadd.f32 %v7674_v3, %v6666_v44  ;;  %4192 = vmatmul.bf16.gmra.mxu0 %v12278_v13  ;;  %4812 = vmatmul.bf16.gmra.mxu1 %v12402_v34  ;;  %v12279_v19 = vld [vmem:[%s15266_s0 + $0x1b0] sm:$0xff] }
 0x372   :  { %5997 = vmatmul.bf16.gmra.mxu3 %v12639_v62  ;;  %15322 = vst [vmem:[#allocation44_spill] sm:$0xff] %v13575_v17  ;;  %5407 = vmatmul.bf16.gmra.mxu2 %v12521_v60  ;;  %v12403_v3 = vld [vmem:[%s15266_s0 + $0x590] sm:$0xff] }
 0x375   :  { %v5958_v45 = vpop.f32.mrf.mxu3  ;;  %v5368_v36 = vpop.f32.mrf.mxu2 }
 0x376   :  { %v7140_v41 = vmax.f32 %v5958_v45, 0.0  ;;  %v4155_v28 = vpop.f32.mrf.mxu0  ;;  %v4775_v39 = vpop.f32.mrf.mxu1 }
 0x377   :  { %v6419_v61 = vmax.f32 %v4155_v28, 0.0  ;;  %v6667_v25 = vmax.f32 %v4775_v39, 0.0 }
 0x378   :  { %v8224_v27 = vadd.f32 %v8223_v11, %v7140_v41 }
 0x379   :  { %v7388_v2 = vadd.f32 %v7387_v51, %v6419_v61  ;;  %v7676_v29 = vadd.f32 %v7675_v42, %v6667_v25 }
 0x37d   :  { %v5960_v43 = vpop.f32.mrf.mxu3  ;;  %v5370_v10 = vpop.f32.mrf.mxu2 }
 0x37e   :  { %v7141_v13 = vmax.f32 %v5960_v43, 0.0  ;;  %v4158_v34 = vpop.f32.mrf.mxu0  ;;  %v4778_v18 = vpop.f32.mrf.mxu1  ;;  %v6904_v43 = vmax.f32 %v5368_v36, 0.0  ;;  %v12641_v36 = vld [vmem:[%s15266_s0 + $0xd00] sm:$0xff] }
 0x37f   :  { %v6420_v4 = vmax.f32 %v4158_v34, 0.0  ;;  %v6668_v62 = vmax.f32 %v4778_v18, 0.0  ;;  %v6905_v34 = vmax.f32 %v5370_v10, 0.0  ;;  %v12523_v10 = vld [vmem:[%s15266_s0 + $0x950] sm:$0xff] }
 0x380   :  { %v8225_v60 = vadd.f32 %v8224_v27, %v7141_v13 }
 0x381   :  { %v7389_v50 = vadd.f32 %v7388_v2, %v6420_v4  ;;  %v7677_v44 = vadd.f32 %v7676_v29, %v6668_v62  ;;  %4197 = vmatmul.bf16.gmra.mxu0 %v12279_v19  ;;  %4817 = vmatmul.bf16.gmra.mxu1 %v12403_v3  ;;  %v7954_v27 = vadd.f32 %v6905_v34, %v6904_v43  ;;  %v12280_v29 = vld [vmem:[%s15266_s0 + $0x1b8] sm:$0xff] }
 0x382   :  { %6002 = vmatmul.bf16.gmra.mxu3 %v12640_v35  ;;  %5412 = vmatmul.bf16.gmra.mxu2 %v12522_v26  ;;  %v12404_v19 = vld [vmem:[%s15266_s0 + $0x598] sm:$0xff] }
 0x385   :  { %v5963_v11 = vpop.f32.mrf.mxu3  ;;  %v5373_v49 = vpop.f32.mrf.mxu2 }
 0x386   :  { %v7142_v51 = vmax.f32 %v5963_v11, 0.0  ;;  %v4160_v42 = vpop.f32.mrf.mxu0  ;;  %v4780_v45 = vpop.f32.mrf.mxu1  ;;  %v6906_v18 = vmax.f32 %v5373_v49, 0.0 }
 0x387   :  { %v6421_v41 = vmax.f32 %v4160_v42, 0.0  ;;  %v6669_v28 = vmax.f32 %v4780_v45, 0.0 }
 0x388   :  { %v8226_v39 = vadd.f32 %v8225_v60, %v7142_v51  ;;  %v7955_v3 = vadd.f32 %v7954_v27, %v6906_v18 }
 0x389   :  { %v7390_v61 = vadd.f32 %v7389_v50, %v6421_v41  ;;  %v7678_v25 = vadd.f32 %v7677_v44, %v6669_v28 }
 0x38d   :  { %v5965_v2 = vpop.f32.mrf.mxu3  ;;  %v5375_v13 = vpop.f32.mrf.mxu2 }
 0x38e   :  { %v7143_v35 = vmax.f32 %v5965_v2, 0.0  ;;  %v4163_v26 = vpop.f32.mrf.mxu0  ;;  %v4783_v4 = vpop.f32.mrf.mxu1  ;;  %v6907_v49 = vmax.f32 %v5375_v13, 0.0 }
 0x38f   :  { %v6422_v62 = vmax.f32 %v4163_v26, 0.0  ;;  %v6670_v60 = vmax.f32 %v4783_v4, 0.0 }
 0x390   :  { %v8227_v50 = vadd.f32 %v8226_v39, %v7143_v35  ;;  %v7956_v51 = vadd.f32 %v7955_v3, %v6907_v49 }
 0x391   :  { %v7391_v44 = vadd.f32 %v7390_v61, %v6422_v62  ;;  %v7679_v11 = vadd.f32 %v7678_v25, %v6670_v60  ;;  %4202 = vmatmul.bf16.gmra.mxu0 %v12280_v29  ;;  %4822 = vmatmul.bf16.gmra.mxu1 %v12404_v19  ;;  %v12281_v29 = vld [vmem:[%s15266_s0 + $0x1c0] sm:$0xff] }
 0x392   :  { %6007 = vmatmul.bf16.gmra.mxu3 %v12641_v36  ;;  %5417 = vmatmul.bf16.gmra.mxu2 %v12523_v10  ;;  %v12405_v19 = vld [vmem:[%s15266_s0 + $0x5a0] sm:$0xff]  ;;  %v12642_v36 = vld [vmem:[%s15266_s0 + $0xd08] sm:$0xff]  ;;  %v12524_v10 = vld [vmem:[%s15266_s0 + $0x958] sm:$0xff] }
 0x395   :  { %v5968_v42 = vpop.f32.mrf.mxu3  ;;  %v5378_v45 = vpop.f32.mrf.mxu2 }
 0x396   :  { %v7144_v41 = vmax.f32 %v5968_v42, 0.0  ;;  %v4165_v28 = vpop.f32.mrf.mxu0  ;;  %v4785_v43 = vpop.f32.mrf.mxu1  ;;  %v6908_v39 = vmax.f32 %v5378_v45, 0.0 }
 0x397   :  { %v6423_v34 = vmax.f32 %v4165_v28, 0.0  ;;  %v6671_v18 = vmax.f32 %v4785_v43, 0.0 }
 0x398   :  { %v8228_v27 = vadd.f32 %v8227_v50, %v7144_v41  ;;  %v7957_v61 = vadd.f32 %v7956_v51, %v6908_v39 }
 0x399   :  { %v13601_v2 = vadd.f32 %v7391_v44, %v6423_v34  ;;  %v7680_v26 = vadd.f32 %v7679_v11, %v6671_v18 }
 0x39b   :  { %15323 = vst [vmem:[#allocation45_spill] sm:$0xff] %v13601_v2 }
 0x39d   :  { %v5970_v25 = vpop.f32.mrf.mxu3  ;;  %v5380_v3 = vpop.f32.mrf.mxu2 }
 0x39e   :  { %v7145_v13 = vmax.f32 %v5970_v25, 0.0  ;;  %v4168_v35 = vpop.f32.mrf.mxu0  ;;  %v4788_v4 = vpop.f32.mrf.mxu1  ;;  %v6909_v44 = vmax.f32 %v5380_v3, 0.0 }
 0x39f   :  { %v6672_v62 = vmax.f32 %v4788_v4, 0.0  ;;  %v6424_v28 = vmax.f32 %v4168_v35, 0.0 }
 0x3a0   :  { %v8229_v60 = vadd.f32 %v8228_v27, %v7145_v13  ;;  %v7958_v11 = vadd.f32 %v7957_v61, %v6909_v44  ;;  %v12406_v61 = vld [vmem:[%s15266_s0 + $0x5a8] sm:$0xff] }
 0x3a1   :  { %v7681_v50 = vadd.f32 %v7680_v26, %v6672_v62  ;;  %4207 = vmatmul.bf16.gmra.mxu0 %v12281_v29  ;;  %4827 = vmatmul.bf16.gmra.mxu1 %v12405_v19  ;;  %v12282_v29 = vld [vmem:[%s15266_s0 + $0x1c8] sm:$0xff] }
 0x3a2   :  { %6012 = vmatmul.bf16.gmra.mxu3 %v12642_v36  ;;  %5422 = vmatmul.bf16.gmra.mxu2 %v12524_v10  ;;  %v12643_v36 = vld [vmem:[%s15266_s0 + $0xd10] sm:$0xff]  ;;  %v12525_v10 = vld [vmem:[%s15266_s0 + $0x960] sm:$0xff] }
 0x3a5   :  { %v5973_v49 = vpop.f32.mrf.mxu3  ;;  %v5383_v51 = vpop.f32.mrf.mxu2 }
 0x3a6   :  { %v7146_v42 = vmax.f32 %v5973_v49, 0.0  ;;  %v4170_v45 = vpop.f32.mrf.mxu0  ;;  %v4790_v41 = vpop.f32.mrf.mxu1  ;;  %v6910_v4 = vmax.f32 %v5383_v51, 0.0 }
 0x3a7   :  { %v6425_v43 = vmax.f32 %v4170_v45, 0.0  ;;  %v6673_v34 = vmax.f32 %v4790_v41, 0.0 }
 0x3a8   :  { %v8230_v18 = vadd.f32 %v8229_v60, %v7146_v42  ;;  %v7959_v27 = vadd.f32 %v7958_v11, %v6910_v4 }
 0x3a9   :  { %v7399_v39 = vadd.f32 %v6425_v43, %v6424_v28  ;;  %v7682_v25 = vadd.f32 %v7681_v50, %v6673_v34 }
 0x3ad   :  { %v5975_v26 = vpop.f32.mrf.mxu3  ;;  %v5385_v19 = vpop.f32.mrf.mxu2 }
 0x3ae   :  { %v7147_v3 = vmax.f32 %v5975_v26, 0.0  ;;  %v4173_v13 = vpop.f32.mrf.mxu0  ;;  %v4793_v35 = vpop.f32.mrf.mxu1  ;;  %v6911_v49 = vmax.f32 %v5385_v19, 0.0  ;;  %v12644_v19 = vld [vmem:[%s15266_s0 + $0xd18] sm:$0xff] }
 0x3af   :  { %v6426_v62 = vmax.f32 %v4173_v13, 0.0  ;;  %v6674_v60 = vmax.f32 %v4793_v35, 0.0 }
 0x3b0   :  { %v8231_v50 = vadd.f32 %v8230_v18, %v7147_v3  ;;  %v7960_v51 = vadd.f32 %v7959_v27, %v6911_v49  ;;  %v12283_v18 = vld [vmem:[%s15266_s0 + $0x1d0] sm:$0xff]  ;;  %v12526_v3 = vld [vmem:[%s15266_s0 + $0x968] sm:$0xff] }
 0x3b1   :  { %v7400_v44 = vadd.f32 %v7399_v39, %v6426_v62  ;;  %v7683_v11 = vadd.f32 %v7682_v25, %v6674_v60  ;;  %4212 = vmatmul.bf16.gmra.mxu0 %v12282_v29  ;;  %4832 = vmatmul.bf16.gmra.mxu1 %v12406_v61  ;;  %v12407_v39 = vld [vmem:[%s15266_s0 + $0x5b0] sm:$0xff] }
 0x3b2   :  { %6017 = vmatmul.bf16.gmra.mxu3 %v12643_v36  ;;  %5427 = vmatmul.bf16.gmra.mxu2 %v12525_v10 }
 0x3b5   :  { %v5978_v42 = vpop.f32.mrf.mxu3  ;;  %v5388_v45 = vpop.f32.mrf.mxu2 }
 0x3b6   :  { %v7148_v41 = vmax.f32 %v5978_v42, 0.0  ;;  %v4175_v28 = vpop.f32.mrf.mxu0  ;;  %v4795_v43 = vpop.f32.mrf.mxu1  ;;  %v6912_v17 = vmax.f32 %v5388_v45, 0.0  ;;  %v12645_v45 = vld [vmem:[%s15266_s0 + $0xd20] sm:$0xff] }
 0x3b7   :  { %v6427_v34 = vmax.f32 %v4175_v28, 0.0  ;;  %v6675_v4 = vmax.f32 %v4795_v43, 0.0 }
 0x3b8   :  { %v8232_v26 = vadd.f32 %v8231_v50, %v7148_v41 }
 0x3b9   :  { %v7401_v2 = vadd.f32 %v7400_v44, %v6427_v34  ;;  %v7684_v13 = vadd.f32 %v7683_v11, %v6675_v4 }
 0x3bd   :  { %v5980_v35 = vpop.f32.mrf.mxu3  ;;  %v5390_v25 = vpop.f32.mrf.mxu2 }
 0x3be   :  { %v7149_v27 = vmax.f32 %v5980_v35, 0.0  ;;  %v4178_v29 = vpop.f32.mrf.mxu0  ;;  %v4798_v61 = vpop.f32.mrf.mxu1 }
 0x3bf   :  { %v6428_v36 = vmax.f32 %v4178_v29, 0.0  ;;  %v6676_v10 = vmax.f32 %v4798_v61, 0.0  ;;  %v6913_v29 = vmax.f32 %v5390_v25, 0.0  ;;  %v7961_v61 = vadd.f32 %v7960_v51, %v6912_v17  ;;  %v12527_v17 = vld [vmem:[%s15266_s0 + $0x970] sm:$0xff] }
 0x3c0   :  { %v8233_v62 = vadd.f32 %v8232_v26, %v7149_v27 }
 0x3c1   :  { %v7402_v60 = vadd.f32 %v7401_v2, %v6428_v36  ;;  %v7685_v50 = vadd.f32 %v7684_v13, %v6676_v10  ;;  %4217 = vmatmul.bf16.gmra.mxu0 %v12283_v18  ;;  %4837 = vmatmul.bf16.gmra.mxu1 %v12407_v39  ;;  %v12284_v13 = vld [vmem:[%s15266_s0 + $0x1d8] sm:$0xff]  ;;  %v7962_v39 = vadd.f32 %v7961_v61, %v6913_v29 }
 0x3c2   :  { %6022 = vmatmul.bf16.gmra.mxu3 %v12644_v19  ;;  %5432 = vmatmul.bf16.gmra.mxu2 %v12526_v3  ;;  %v12408_v18 = vld [vmem:[%s15266_s0 + $0x5b8] sm:$0xff] }
 0x3c5   :  { %v5983_v44 = vpop.f32.mrf.mxu3  ;;  %v5393_v11 = vpop.f32.mrf.mxu2 }
 0x3c6   :  { %v7150_v49 = vmax.f32 %v5983_v44, 0.0  ;;  %v4180_v42 = vpop.f32.mrf.mxu0  ;;  %v4800_v41 = vpop.f32.mrf.mxu1  ;;  %v6914_v26 = vmax.f32 %v5393_v11, 0.0 }
 0x3c7   :  { %v6429_v28 = vmax.f32 %v4180_v42, 0.0  ;;  %v6677_v43 = vmax.f32 %v4800_v41, 0.0 }
 0x3c8   :  { %v8234_v34 = vadd.f32 %v8233_v62, %v7150_v49  ;;  %v7963_v10 = vadd.f32 %v7962_v39, %v6914_v26  ;;  %v12285_v26 = vld [vmem:[%s15266_s0 + $0x1e0] sm:$0xff] }
 0x3c9   :  { %v7403_v4 = vadd.f32 %v7402_v60, %v6429_v28  ;;  %v7686_v35 = vadd.f32 %v7685_v50, %v6677_v43 }
 0x3cd   :  { %v5985_v2 = vpop.f32.mrf.mxu3  ;;  %v5395_v27 = vpop.f32.mrf.mxu2 }
 0x3ce   :  { %v7151_v19 = vmax.f32 %v5985_v2, 0.0  ;;  %v4183_v3 = vpop.f32.mrf.mxu0  ;;  %v4803_v36 = vpop.f32.mrf.mxu1  ;;  %v6915_v44 = vmax.f32 %v5395_v27, 0.0 }
 0x3cf   :  { %v6430_v51 = vmax.f32 %v4183_v3, 0.0  ;;  %v6678_v25 = vmax.f32 %v4803_v36, 0.0 }
 0x3d0   :  { %v8235_v62 = vadd.f32 %v8234_v34, %v7151_v19  ;;  %v7964_v11 = vadd.f32 %v7963_v10, %v6915_v44 }
 0x3d1   :  { %v7404_v60 = vadd.f32 %v7403_v4, %v6430_v51  ;;  %v7687_v50 = vadd.f32 %v7686_v35, %v6678_v25  ;;  %4222 = vmatmul.bf16.gmra.mxu0 %v12284_v13  ;;  %4842 = vmatmul.bf16.gmra.mxu1 %v12408_v18  ;;  %v12409_v13 = vld [vmem:[%s15266_s0 + $0x5c0] sm:$0xff] }
 0x3d2   :  { %6027 = vmatmul.bf16.gmra.mxu3 %v12645_v45  ;;  %5437 = vmatmul.bf16.gmra.mxu2 %v12527_v17  ;;  %v12646_v45 = vld [vmem:[%s15266_s0 + $0xd28] sm:$0xff]  ;;  %v12528_v17 = vld [vmem:[%s15266_s0 + $0x978] sm:$0xff] }
 0x3d5   :  { %v5988_v49 = vpop.f32.mrf.mxu3  ;;  %v5398_v42 = vpop.f32.mrf.mxu2 }
 0x3d6   :  { %v7152_v41 = vmax.f32 %v5988_v49, 0.0  ;;  %v4185_v28 = vpop.f32.mrf.mxu0  ;;  %v4805_v43 = vpop.f32.mrf.mxu1  ;;  %v6916_v34 = vmax.f32 %v5398_v42, 0.0 }
 0x3d7   :  { %v6431_v29 = vmax.f32 %v4185_v28, 0.0  ;;  %v6679_v61 = vmax.f32 %v4805_v43, 0.0 }
 0x3d8   :  { %v8236_v2 = vadd.f32 %v8235_v62, %v7152_v41  ;;  %v7965_v4 = vadd.f32 %v7964_v11, %v6916_v34 }
 0x3d9   :  { %v7405_v3 = vadd.f32 %v7404_v60, %v6431_v29  ;;  %v13651_v36 = vadd.f32 %v7687_v50, %v6679_v61 }
 0x3dd   :  { %v5990_v35 = vpop.f32.mrf.mxu3  ;;  %v5400_v18 = vpop.f32.mrf.mxu2 }
 0x3de   :  { %v7153_v39 = vmax.f32 %v5990_v35, 0.0  ;;  %v4188_v27 = vpop.f32.mrf.mxu0  ;;  %v4808_v19 = vpop.f32.mrf.mxu1  ;;  %v6917_v62 = vmax.f32 %v5400_v18, 0.0 }
 0x3df   :  { %v6432_v51 = vmax.f32 %v4188_v27, 0.0  ;;  %v6680_v50 = vmax.f32 %v4808_v19, 0.0  ;;  %v12647_v19 = vld [vmem:[%s15266_s0 + $0xd30] sm:$0xff] }
 0x3e0   :  { %v8237_v25 = vadd.f32 %v8236_v2, %v7153_v39  ;;  %v7966_v60 = vadd.f32 %v7965_v4, %v6917_v62  ;;  %v12410_v4 = vld [vmem:[%s15266_s0 + $0x5c8] sm:$0xff] }
 0x3e1   :  { %v7406_v10 = vadd.f32 %v7405_v3, %v6432_v51  ;;  %4227 = vmatmul.bf16.gmra.mxu0 %v12285_v26  ;;  %4847 = vmatmul.bf16.gmra.mxu1 %v12409_v13  ;;  %v12286_v26 = vld [vmem:[%s15266_s0 + $0x1e8] sm:$0xff] }
 0x3e2   :  { %6032 = vmatmul.bf16.gmra.mxu3 %v12646_v45  ;;  %5442 = vmatmul.bf16.gmra.mxu2 %v12528_v17  ;;  %v12529_v45 = vld [vmem:[%s15266_s0 + $0x980] sm:$0xff] }
 0x3e5   :  { %v5993_v44 = vpop.f32.mrf.mxu3  ;;  %v5403_v11 = vpop.f32.mrf.mxu2 }
 0x3e6   :  { %v7154_v49 = vmax.f32 %v5993_v44, 0.0  ;;  %v4190_v42 = vpop.f32.mrf.mxu0  ;;  %v4810_v41 = vpop.f32.mrf.mxu1  ;;  %v6918_v35 = vmax.f32 %v5403_v11, 0.0 }
 0x3e7   :  { %v6433_v28 = vmax.f32 %v4190_v42, 0.0  ;;  %v6681_v43 = vmax.f32 %v4810_v41, 0.0 }
 0x3e8   :  { %v8238_v29 = vadd.f32 %v8237_v25, %v7154_v49  ;;  %v7967_v2 = vadd.f32 %v7966_v60, %v6918_v35 }
 0x3e9   :  { %v7407_v61 = vadd.f32 %v7406_v10, %v6433_v28  ;;  %v7695_v34 = vadd.f32 %v6681_v43, %v6680_v50 }
 0x3ed   :  { %v5995_v3 = vpop.f32.mrf.mxu3  ;;  %v5405_v13 = vpop.f32.mrf.mxu2 }
 0x3ee   :  { %v7155_v18 = vmax.f32 %v5995_v3, 0.0  ;;  %v4193_v39 = vpop.f32.mrf.mxu0  ;;  %v4813_v27 = vpop.f32.mrf.mxu1 }
 0x3ef   :  { %v6434_v17 = vmax.f32 %v4193_v39, 0.0  ;;  %v6682_v51 = vmax.f32 %v4813_v27, 0.0  ;;  %v12648_v39 = vld [vmem:[%s15266_s0 + $0xd38] sm:$0xff]  ;;  %v6919_v27 = vmax.f32 %v5405_v13, 0.0 }
 0x3f0   :  { %v8239_v25 = vadd.f32 %v8238_v29, %v7155_v18  ;;  %v12287_v29 = vld [vmem:[%s15266_s0 + $0x1f0] sm:$0xff] }
 0x3f1   :  { %v7408_v10 = vadd.f32 %v7407_v61, %v6434_v17  ;;  %v7696_v62 = vadd.f32 %v7695_v34, %v6682_v51  ;;  %4232 = vmatmul.bf16.gmra.mxu0 %v12286_v26  ;;  %4852 = vmatmul.bf16.gmra.mxu1 %v12410_v4  ;;  %v12411_v61 = vld [vmem:[%s15266_s0 + $0x5d0] sm:$0xff] }
 0x3f2   :  { %6037 = vmatmul.bf16.gmra.mxu3 %v12647_v19  ;;  %5447 = vmatmul.bf16.gmra.mxu2 %v12529_v45  ;;  %v12530_v45 = vld [vmem:[%s15266_s0 + $0x988] sm:$0xff] }
 0x3f5   :  { %v5998_v60 = vpop.f32.mrf.mxu3  ;;  %v5408_v50 = vpop.f32.mrf.mxu2 }
 0x3f6   :  { %v7156_v44 = vmax.f32 %v5998_v60, 0.0  ;;  %v4195_v11 = vpop.f32.mrf.mxu0  ;;  %v4815_v49 = vpop.f32.mrf.mxu1  ;;  %v6920_v19 = vmax.f32 %v5408_v50, 0.0 }
 0x3f7   :  { %v6435_v42 = vmax.f32 %v4195_v11, 0.0  ;;  %v6683_v41 = vmax.f32 %v4815_v49, 0.0 }
 0x3f8   :  { %v8240_v28 = vadd.f32 %v8239_v25, %v7156_v44 }
 0x3f9   :  { %v7409_v43 = vadd.f32 %v7408_v10, %v6435_v42  ;;  %v7697_v35 = vadd.f32 %v7696_v62, %v6683_v41  ;;  %v7968_v10 = vadd.f32 %v7967_v2, %v6919_v27 }
 0x3fb   :  { %v7969_v44 = vadd.f32 %v7968_v10, %v6920_v19 }
 0x3fd   :  { %v6000_v3 = vpop.f32.mrf.mxu3  ;;  %v5410_v34 = vpop.f32.mrf.mxu2 }
 0x3fe   :  { %v7157_v26 = vmax.f32 %v6000_v3, 0.0  ;;  %v4198_v4 = vpop.f32.mrf.mxu0  ;;  %v4818_v18 = vpop.f32.mrf.mxu1  ;;  %v6921_v11 = vmax.f32 %v5410_v34, 0.0 }
 0x3ff   :  { %v6436_v17 = vmax.f32 %v4198_v4, 0.0  ;;  %v6684_v51 = vmax.f32 %v4818_v18, 0.0 }
 0x400   :  { %v8241_v25 = vadd.f32 %v8240_v28, %v7157_v26  ;;  %v7970_v49 = vadd.f32 %v7969_v44, %v6921_v11 }
 0x401   :  { %v7410_v62 = vadd.f32 %v7409_v43, %v6436_v17  ;;  %v7698_v60 = vadd.f32 %v7697_v35, %v6684_v51  ;;  %4237 = vmatmul.bf16.gmra.mxu0 %v12287_v29  ;;  %4857 = vmatmul.bf16.gmra.mxu1 %v12411_v61  ;;  %v12288_v29 = vld [vmem:[%s15266_s0 + $0x1f8] sm:$0xff] }
 0x402   :  { %6042 = vmatmul.bf16.gmra.mxu3 %v12648_v39  ;;  %5452 = vmatmul.bf16.gmra.mxu2 %v12530_v45  ;;  %v12412_v61 = vld [vmem:[%s15266_s0 + $0x5d8] sm:$0xff] }
 0x405   :  { %v6003_v42 = vpop.f32.mrf.mxu3  ;;  %v5413_v13 = vpop.f32.mrf.mxu2 }
 0x406   :  { %v7158_v50 = vmax.f32 %v6003_v42, 0.0  ;;  %v4200_v41 = vpop.f32.mrf.mxu0  ;;  %v4820_v3 = vpop.f32.mrf.mxu1  ;;  %v6922_v2 = vmax.f32 %v5413_v13, 0.0 }
 0x407   :  { %v6437_v23 = vmax.f32 %v4200_v41, 0.0  ;;  %v6685_v59 = vmax.f32 %v4820_v3, 0.0 }
 0x408   :  { %v8242_v4 = vadd.f32 %v8241_v25, %v7158_v50  ;;  %v7971_v43 = vadd.f32 %v7970_v49, %v6922_v2 }
 0x409   :  { %v7411_v18 = vadd.f32 %v7410_v62, %v6437_v23  ;;  %v7699_v28 = vadd.f32 %v7698_v60, %v6685_v59  ;;  %v12649_v23 = vld [vmem:[%s15266_s0 + $0xd40] sm:$0xff]  ;;  %v12531_v59 = vld [vmem:[%s15266_s0 + $0x990] sm:$0xff] }
 0x40d   :  { %v6005_v35 = vpop.f32.mrf.mxu3  ;;  %v5415_v34 = vpop.f32.mrf.mxu2 }
 0x40e   :  { %v7159_v26 = vmax.f32 %v6005_v35, 0.0  ;;  %v4203_v39 = vpop.f32.mrf.mxu0  ;;  %v4823_v27 = vpop.f32.mrf.mxu1  ;;  %v6923_v10 = vmax.f32 %v5415_v34, 0.0 }
 0x40f   :  { %v6438_v19 = vmax.f32 %v4203_v39, 0.0  ;;  %v6686_v45 = vmax.f32 %v4823_v27, 0.0  ;;  %v12532_v39 = vld [vmem:[%s15266_s0 + $0x998] sm:$0xff] }
 0x410   :  { %v13701_v17 = vadd.f32 %v8242_v4, %v7159_v26  ;;  %v7972_v62 = vadd.f32 %v7971_v43, %v6923_v10  ;;  %v12650_v26 = vld [vmem:[%s15266_s0 + $0xd48] sm:$0xff] }
 0x411   :  { %v7412_v51 = vadd.f32 %v7411_v18, %v6438_v19  ;;  %v7700_v25 = vadd.f32 %v7699_v28, %v6686_v45  ;;  %4242 = vmatmul.bf16.gmra.mxu0 %v12288_v29  ;;  %4862 = vmatmul.bf16.gmra.mxu1 %v12412_v61  ;;  %v12289_v18 = vld [vmem:[%s15266_s0 + $0x200] sm:$0xff] }
 0x412   :  { %6047 = vmatmul.bf16.gmra.mxu3 %v12649_v23  ;;  %5457 = vmatmul.bf16.gmra.mxu2 %v12531_v59  ;;  %v12413_v28 = vld [vmem:[%s15266_s0 + $0x5e0] sm:$0xff] }
 0x415   :  { %v6008_v60 = vpop.f32.mrf.mxu3  ;;  %v5418_v44 = vpop.f32.mrf.mxu2 }
 0x416   :  { %v4205_v11 = vpop.f32.mrf.mxu0  ;;  %v4825_v49 = vpop.f32.mrf.mxu1  ;;  %v6924_v3 = vmax.f32 %v5418_v44, 0.0  ;;  %v7160_v4 = vmax.f32 %v6008_v60, 0.0 }
 0x417   :  { %v6439_v42 = vmax.f32 %v4205_v11, 0.0  ;;  %v6687_v13 = vmax.f32 %v4825_v49, 0.0 }
 0x418   :  { %v7973_v2 = vadd.f32 %v7972_v62, %v6924_v3 }
 0x419   :  { %v7413_v50 = vadd.f32 %v7412_v51, %v6439_v42  ;;  %v7701_v41 = vadd.f32 %v7700_v25, %v6687_v13 }
 0x41d   :  { %v6010_v35 = vpop.f32.mrf.mxu3  ;;  %v5420_v43 = vpop.f32.mrf.mxu2 }
 0x41e   :  { %v7161_v29 = vmax.f32 %v6010_v35, 0.0  ;;  %v4208_v61 = vpop.f32.mrf.mxu0  ;;  %v4828_v34 = vpop.f32.mrf.mxu1  ;;  %v6925_v51 = vmax.f32 %v5420_v43, 0.0 }
 0x41f   :  { %v6440_v27 = vmax.f32 %v4208_v61, 0.0  ;;  %v6688_v23 = vmax.f32 %v4828_v34, 0.0  ;;  %v12651_v34 = vld [vmem:[%s15266_s0 + $0xd50] sm:$0xff] }
 0x420   :  { %v8250_v59 = vadd.f32 %v7161_v29, %v7160_v4  ;;  %v7974_v25 = vadd.f32 %v7973_v2, %v6925_v51  ;;  %v12414_v2 = vld [vmem:[%s15266_s0 + $0x5e8] sm:$0xff] }
 0x421   :  { %v7414_v19 = vadd.f32 %v7413_v50, %v6440_v27  ;;  %v7702_v45 = vadd.f32 %v7701_v41, %v6688_v23  ;;  %4247 = vmatmul.bf16.gmra.mxu0 %v12289_v18  ;;  %4867 = vmatmul.bf16.gmra.mxu1 %v12413_v28  ;;  %v12290_v41 = vld [vmem:[%s15266_s0 + $0x208] sm:$0xff] }
 0x422   :  { %6052 = vmatmul.bf16.gmra.mxu3 %v12650_v26  ;;  %5462 = vmatmul.bf16.gmra.mxu2 %v12532_v39  ;;  %v12533_v26 = vld [vmem:[%s15266_s0 + $0x9a0] sm:$0xff] }
 0x425   :  { %v6013_v10 = vpop.f32.mrf.mxu3  ;;  %v5423_v62 = vpop.f32.mrf.mxu2 }
 0x426   :  { %v7162_v60 = vmax.f32 %v6013_v10, 0.0  ;;  %v4210_v44 = vpop.f32.mrf.mxu0  ;;  %v4830_v11 = vpop.f32.mrf.mxu1  ;;  %v6926_v61 = vmax.f32 %v5423_v62, 0.0 }
 0x427   :  { %v6441_v49 = vmax.f32 %v4210_v44, 0.0  ;;  %v6689_v42 = vmax.f32 %v4830_v11, 0.0 }
 0x428   :  { %v8251_v13 = vadd.f32 %v8250_v59, %v7162_v60  ;;  %v7975_v4 = vadd.f32 %v7974_v25, %v6926_v61 }
 0x429   :  { %v7415_v3 = vadd.f32 %v7414_v19, %v6441_v49  ;;  %v7703_v35 = vadd.f32 %v7702_v45, %v6689_v42 }
 0x42d   :  { %v6015_v50 = vpop.f32.mrf.mxu3  ;;  %v5425_v18 = vpop.f32.mrf.mxu2 }
 0x42e   :  { %v7163_v28 = vmax.f32 %v6015_v50, 0.0  ;;  %v4213_v43 = vpop.f32.mrf.mxu0  ;;  %v4833_v29 = vpop.f32.mrf.mxu1  ;;  %v6927_v45 = vmax.f32 %v5425_v18, 0.0 }
 0x42f   :  { %v6442_v39 = vmax.f32 %v4213_v43, 0.0  ;;  %v6690_v27 = vmax.f32 %v4833_v29, 0.0  ;;  %v12652_v29 = vld [vmem:[%s15266_s0 + $0xd58] sm:$0xff] }
 0x430   :  { %v8252_v23 = vadd.f32 %v8251_v13, %v7163_v28  ;;  %v7976_v51 = vadd.f32 %v7975_v4, %v6927_v45  ;;  %v12415_v4 = vld [vmem:[%s15266_s0 + $0x5f0] sm:$0xff] }
 0x431   :  { %v7416_v59 = vadd.f32 %v7415_v3, %v6442_v39  ;;  %v7704_v19 = vadd.f32 %v7703_v35, %v6690_v27  ;;  %4252 = vmatmul.bf16.gmra.mxu0 %v12290_v41  ;;  %4872 = vmatmul.bf16.gmra.mxu1 %v12414_v2  ;;  %v12291_v35 = vld [vmem:[%s15266_s0 + $0x210] sm:$0xff] }
 0x432   :  { %6057 = vmatmul.bf16.gmra.mxu3 %v12651_v34  ;;  %5467 = vmatmul.bf16.gmra.mxu2 %v12533_v26  ;;  %v12534_v34 = vld [vmem:[%s15266_s0 + $0x9a8] sm:$0xff] }
 0x435   :  { %v6018_v25 = vpop.f32.mrf.mxu3  ;;  %v5428_v10 = vpop.f32.mrf.mxu2 }
 0x436   :  { %v7164_v62 = vmax.f32 %v6018_v25, 0.0  ;;  %v4215_v60 = vpop.f32.mrf.mxu0  ;;  %v4835_v44 = vpop.f32.mrf.mxu1  ;;  %v6928_v43 = vmax.f32 %v5428_v10, 0.0 }
 0x437   :  { %v6443_v11 = vmax.f32 %v4215_v60, 0.0  ;;  %v6691_v49 = vmax.f32 %v4835_v44, 0.0 }
 0x438   :  { %v8253_v42 = vadd.f32 %v8252_v23, %v7164_v62  ;;  %v7977_v13 = vadd.f32 %v7976_v51, %v6928_v43 }
 0x439   :  { %v7417_v61 = vadd.f32 %v7416_v59, %v6443_v11  ;;  %v7705_v50 = vadd.f32 %v7704_v19, %v6691_v49 }
 0x43d   :  { %v6020_v3 = vpop.f32.mrf.mxu3  ;;  %v5430_v41 = vpop.f32.mrf.mxu2 }
 0x43e   :  { %v7165_v2 = vmax.f32 %v6020_v3, 0.0  ;;  %v4218_v18 = vpop.f32.mrf.mxu0  ;;  %v4838_v28 = vpop.f32.mrf.mxu1  ;;  %v6929_v19 = vmax.f32 %v5430_v41, 0.0 }
 0x43f   :  { %v6444_v26 = vmax.f32 %v4218_v18, 0.0  ;;  %v6692_v39 = vmax.f32 %v4838_v28, 0.0  ;;  %v12653_v28 = vld [vmem:[%s15266_s0 + $0xd60] sm:$0xff] }
 0x440   :  { %v8254_v27 = vadd.f32 %v8253_v42, %v7165_v2  ;;  %v7978_v45 = vadd.f32 %v7977_v13, %v6929_v19  ;;  %v12416_v13 = vld [vmem:[%s15266_s0 + $0x5f8] sm:$0xff] }
 0x441   :  { %v7418_v23 = vadd.f32 %v7417_v61, %v6444_v26  ;;  %v7706_v59 = vadd.f32 %v7705_v50, %v6692_v39  ;;  %4257 = vmatmul.bf16.gmra.mxu0 %v12291_v35  ;;  %4877 = vmatmul.bf16.gmra.mxu1 %v12415_v4  ;;  %v12292_v50 = vld [vmem:[%s15266_s0 + $0x218] sm:$0xff] }
 0x442   :  { %6062 = vmatmul.bf16.gmra.mxu3 %v12652_v29  ;;  %5472 = vmatmul.bf16.gmra.mxu2 %v12534_v34  ;;  %v12535_v29 = vld [vmem:[%s15266_s0 + $0x9b0] sm:$0xff] }
 0x445   :  { %v6023_v51 = vpop.f32.mrf.mxu3  ;;  %v5433_v25 = vpop.f32.mrf.mxu2 }
 0x446   :  { %v7166_v10 = vmax.f32 %v6023_v51, 0.0  ;;  %v4220_v62 = vpop.f32.mrf.mxu0  ;;  %v4840_v60 = vpop.f32.mrf.mxu1  ;;  %v6930_v18 = vmax.f32 %v5433_v25, 0.0 }
 0x447   :  { %v6445_v44 = vmax.f32 %v4220_v62, 0.0  ;;  %v6693_v11 = vmax.f32 %v4840_v60, 0.0 }
 0x448   :  { %v8255_v49 = vadd.f32 %v8254_v27, %v7166_v10  ;;  %v7979_v42 = vadd.f32 %v7978_v45, %v6930_v18 }
 0x449   :  { %v7419_v43 = vadd.f32 %v7418_v23, %v6445_v44  ;;  %v7707_v3 = vadd.f32 %v7706_v59, %v6693_v11 }
 0x44d   :  { %v6025_v61 = vpop.f32.mrf.mxu3  ;;  %v5435_v35 = vpop.f32.mrf.mxu2 }
 0x44e   :  { %v7167_v4 = vmax.f32 %v6025_v61, 0.0  ;;  %v4223_v41 = vpop.f32.mrf.mxu0  ;;  %v4843_v2 = vpop.f32.mrf.mxu1  ;;  %v6931_v59 = vmax.f32 %v5435_v35, 0.0 }
 0x44f   :  { %v6446_v34 = vmax.f32 %v4223_v41, 0.0  ;;  %v6694_v26 = vmax.f32 %v4843_v2, 0.0  ;;  %v12654_v2 = vld [vmem:[%s15266_s0 + $0xd68] sm:$0xff] }
 0x450   :  { %v8256_v39 = vadd.f32 %v8255_v49, %v7167_v4  ;;  %v7980_v19 = vadd.f32 %v7979_v42, %v6931_v59  ;;  %v12417_v42 = vld [vmem:[%s15266_s0 + $0x600] sm:$0xff] }
 0x451   :  { %v7420_v27 = vadd.f32 %v7419_v43, %v6446_v34  ;;  %v7708_v23 = vadd.f32 %v7707_v3, %v6694_v26  ;;  %4262 = vmatmul.bf16.gmra.mxu0 %v12292_v50  ;;  %4882 = vmatmul.bf16.gmra.mxu1 %v12416_v13  ;;  %v12293_v3 = vld [vmem:[%s15266_s0 + $0x220] sm:$0xff] }
 0x452   :  { %6067 = vmatmul.bf16.gmra.mxu3 %v12653_v28  ;;  %5477 = vmatmul.bf16.gmra.mxu2 %v12535_v29  ;;  %v12536_v28 = vld [vmem:[%s15266_s0 + $0x9b8] sm:$0xff] }
 0x455   :  { %v6028_v45 = vpop.f32.mrf.mxu3  ;;  %v5438_v51 = vpop.f32.mrf.mxu2 }
 0x456   :  { %v7168_v25 = vmax.f32 %v6028_v45, 0.0  ;;  %v4225_v10 = vpop.f32.mrf.mxu0  ;;  %v4845_v62 = vpop.f32.mrf.mxu1  ;;  %v6932_v41 = vmax.f32 %v5438_v51, 0.0 }
 0x457   :  { %v6447_v60 = vmax.f32 %v4225_v10, 0.0  ;;  %v6695_v44 = vmax.f32 %v4845_v62, 0.0 }
 0x458   :  { %v8257_v11 = vadd.f32 %v8256_v39, %v7168_v25  ;;  %v7981_v49 = vadd.f32 %v7980_v19, %v6932_v41 }
 0x459   :  { %v7421_v18 = vadd.f32 %v7420_v27, %v6447_v60  ;;  %v7709_v61 = vadd.f32 %v7708_v23, %v6695_v44 }
 0x45d   :  { %v6030_v43 = vpop.f32.mrf.mxu3  ;;  %v5440_v50 = vpop.f32.mrf.mxu2 }
 0x45e   :  { %v7169_v13 = vmax.f32 %v6030_v43, 0.0  ;;  %v4228_v35 = vpop.f32.mrf.mxu0  ;;  %v4848_v4 = vpop.f32.mrf.mxu1  ;;  %v6933_v23 = vmax.f32 %v5440_v50, 0.0 }
 0x45f   :  { %v6448_v29 = vmax.f32 %v4228_v35, 0.0  ;;  %v6696_v34 = vmax.f32 %v4848_v4, 0.0  ;;  %v12655_v4 = vld [vmem:[%s15266_s0 + $0xd70] sm:$0xff] }
 0x460   :  { %v8258_v26 = vadd.f32 %v8257_v11, %v7169_v13  ;;  %v7982_v59 = vadd.f32 %v7981_v49, %v6933_v23  ;;  %v12418_v49 = vld [vmem:[%s15266_s0 + $0x608] sm:$0xff] }
 0x461   :  { %v7422_v39 = vadd.f32 %v7421_v18, %v6448_v29  ;;  %v7710_v27 = vadd.f32 %v7709_v61, %v6696_v34  ;;  %4267 = vmatmul.bf16.gmra.mxu0 %v12293_v3  ;;  %4887 = vmatmul.bf16.gmra.mxu1 %v12417_v42  ;;  %v12294_v61 = vld [vmem:[%s15266_s0 + $0x228] sm:$0xff] }
 0x462   :  { %6072 = vmatmul.bf16.gmra.mxu3 %v12654_v2  ;;  %5482 = vmatmul.bf16.gmra.mxu2 %v12536_v28  ;;  %v12537_v2 = vld [vmem:[%s15266_s0 + $0x9c0] sm:$0xff] }
 0x465   :  { %v6033_v19 = vpop.f32.mrf.mxu3  ;;  %v5443_v45 = vpop.f32.mrf.mxu2 }
 0x466   :  { %v7170_v51 = vmax.f32 %v6033_v19, 0.0  ;;  %v4230_v25 = vpop.f32.mrf.mxu0  ;;  %v4850_v10 = vpop.f32.mrf.mxu1  ;;  %v6934_v35 = vmax.f32 %v5443_v45, 0.0 }
 0x467   :  { %v6449_v62 = vmax.f32 %v4230_v25, 0.0  ;;  %v6697_v60 = vmax.f32 %v4850_v10, 0.0 }
 0x468   :  { %v8259_v44 = vadd.f32 %v8258_v26, %v7170_v51  ;;  %v7983_v11 = vadd.f32 %v7982_v59, %v6934_v35 }
 0x469   :  { %v7423_v41 = vadd.f32 %v7422_v39, %v6449_v62  ;;  %v7711_v43 = vadd.f32 %v7710_v27, %v6697_v60 }
 0x46d   :  { %v6035_v18 = vpop.f32.mrf.mxu3  ;;  %v5445_v3 = vpop.f32.mrf.mxu2 }
 0x46e   :  { %v7171_v42 = vmax.f32 %v6035_v18, 0.0  ;;  %v4233_v50 = vpop.f32.mrf.mxu0  ;;  %v4853_v13 = vpop.f32.mrf.mxu1  ;;  %v6935_v26 = vmax.f32 %v5445_v3, 0.0 }
 0x46f   :  { %v6450_v28 = vmax.f32 %v4233_v50, 0.0  ;;  %v6698_v29 = vmax.f32 %v4853_v13, 0.0  ;;  %v12538_v50 = vld [vmem:[%s15266_s0 + $0x9c8] sm:$0xff] }
 0x470   :  { %v8260_v34 = vadd.f32 %v8259_v44, %v7171_v42  ;;  %v13775_v23 = vadd.f32 %v7983_v11, %v6935_v26  ;;  %v12656_v42 = vld [vmem:[%s15266_s0 + $0xd78] sm:$0xff] }
 0x471   :  { %v7424_v39 = vadd.f32 %v7423_v41, %v6450_v28  ;;  %v7712_v27 = vadd.f32 %v7711_v43, %v6698_v29  ;;  %4272 = vmatmul.bf16.gmra.mxu0 %v12294_v61  ;;  %4892 = vmatmul.bf16.gmra.mxu1 %v12418_v49  ;;  %v12295_v41 = vld [vmem:[%s15266_s0 + $0x230] sm:$0xff] }
 0x472   :  { %6077 = vmatmul.bf16.gmra.mxu3 %v12655_v4  ;;  %15324 = vst [vmem:[#allocation46_spill] sm:$0xff] %v13775_v23  ;;  %5487 = vmatmul.bf16.gmra.mxu2 %v12537_v2  ;;  %v12419_v43 = vld [vmem:[%s15266_s0 + $0x610] sm:$0xff] }
 0x475   :  { %v6038_v59 = vpop.f32.mrf.mxu3  ;;  %v5448_v19 = vpop.f32.mrf.mxu2 }
 0x476   :  { %v7172_v45 = vmax.f32 %v6038_v59, 0.0  ;;  %v4235_v51 = vpop.f32.mrf.mxu0  ;;  %v4855_v25 = vpop.f32.mrf.mxu1 }
 0x477   :  { %v6451_v10 = vmax.f32 %v4235_v51, 0.0  ;;  %v6699_v62 = vmax.f32 %v4855_v25, 0.0 }
 0x478   :  { %v8261_v60 = vadd.f32 %v8260_v34, %v7172_v45 }
 0x479   :  { %v7425_v35 = vadd.f32 %v7424_v39, %v6451_v10  ;;  %v7713_v18 = vadd.f32 %v7712_v27, %v6699_v62 }
 0x47d   :  { %v6040_v44 = vpop.f32.mrf.mxu3  ;;  %v5450_v11 = vpop.f32.mrf.mxu2 }
 0x47e   :  { %v7173_v61 = vmax.f32 %v6040_v44, 0.0  ;;  %v4238_v49 = vpop.f32.mrf.mxu0  ;;  %v4858_v3 = vpop.f32.mrf.mxu1  ;;  %v6936_v44 = vmax.f32 %v5448_v19, 0.0  ;;  %v12657_v19 = vld [vmem:[%s15266_s0 + $0xd80] sm:$0xff] }
 0x47f   :  { %v6452_v13 = vmax.f32 %v4238_v49, 0.0  ;;  %v6700_v4 = vmax.f32 %v4858_v3, 0.0  ;;  %v6937_v49 = vmax.f32 %v5450_v11, 0.0  ;;  %v12539_v11 = vld [vmem:[%s15266_s0 + $0x9d0] sm:$0xff] }
 0x480   :  { %v8262_v2 = vadd.f32 %v8261_v60, %v7173_v61 }
 0x481   :  { %v7426_v28 = vadd.f32 %v7425_v35, %v6452_v13  ;;  %v7714_v29 = vadd.f32 %v7713_v18, %v6700_v4  ;;  %4277 = vmatmul.bf16.gmra.mxu0 %v12295_v41  ;;  %4897 = vmatmul.bf16.gmra.mxu1 %v12419_v43  ;;  %v7991_v60 = vadd.f32 %v6937_v49, %v6936_v44  ;;  %v12296_v18 = vld [vmem:[%s15266_s0 + $0x238] sm:$0xff] }
 0x482   :  { %6082 = vmatmul.bf16.gmra.mxu3 %v12656_v42  ;;  %5492 = vmatmul.bf16.gmra.mxu2 %v12538_v50  ;;  %v12420_v41 = vld [vmem:[%s15266_s0 + $0x618] sm:$0xff] }
 0x485   :  { %v6043_v34 = vpop.f32.mrf.mxu3  ;;  %v5453_v26 = vpop.f32.mrf.mxu2 }
 0x486   :  { %v7174_v39 = vmax.f32 %v6043_v34, 0.0  ;;  %v4240_v27 = vpop.f32.mrf.mxu0  ;;  %v4860_v59 = vpop.f32.mrf.mxu1  ;;  %v6938_v3 = vmax.f32 %v5453_v26, 0.0 }
 0x487   :  { %v6453_v45 = vmax.f32 %v4240_v27, 0.0  ;;  %v6701_v51 = vmax.f32 %v4860_v59, 0.0 }
 0x488   :  { %v8263_v25 = vadd.f32 %v8262_v2, %v7174_v39  ;;  %v7992_v43 = vadd.f32 %v7991_v60, %v6938_v3 }
 0x489   :  { %v7427_v10 = vadd.f32 %v7426_v28, %v6453_v45  ;;  %v7715_v62 = vadd.f32 %v7714_v29, %v6701_v51 }
 0x48d   :  { %v6045_v35 = vpop.f32.mrf.mxu3  ;;  %v5455_v61 = vpop.f32.mrf.mxu2 }
 0x48e   :  { %v7175_v42 = vmax.f32 %v6045_v35, 0.0  ;;  %v4243_v50 = vpop.f32.mrf.mxu0  ;;  %v4863_v13 = vpop.f32.mrf.mxu1  ;;  %v6939_v26 = vmax.f32 %v5455_v61, 0.0 }
 0x48f   :  { %v6454_v4 = vmax.f32 %v4243_v50, 0.0  ;;  %v6702_v2 = vmax.f32 %v4863_v13, 0.0 }
 0x490   :  { %v8264_v28 = vadd.f32 %v8263_v25, %v7175_v42  ;;  %v7993_v39 = vadd.f32 %v7992_v43, %v6939_v26 }
 0x491   :  { %v7428_v29 = vadd.f32 %v7427_v10, %v6454_v4  ;;  %v7716_v34 = vadd.f32 %v7715_v62, %v6702_v2  ;;  %4282 = vmatmul.bf16.gmra.mxu0 %v12296_v18  ;;  %4902 = vmatmul.bf16.gmra.mxu1 %v12420_v41  ;;  %v12297_v18 = vld [vmem:[%s15266_s0 + $0x240] sm:$0xff] }
 0x492   :  { %6087 = vmatmul.bf16.gmra.mxu3 %v12657_v19  ;;  %5497 = vmatmul.bf16.gmra.mxu2 %v12539_v11  ;;  %v12421_v41 = vld [vmem:[%s15266_s0 + $0x620] sm:$0xff]  ;;  %v12658_v19 = vld [vmem:[%s15266_s0 + $0xd88] sm:$0xff]  ;;  %v12540_v11 = vld [vmem:[%s15266_s0 + $0x9d8] sm:$0xff] }
 0x495   :  { %v6048_v27 = vpop.f32.mrf.mxu3  ;;  %v5458_v59 = vpop.f32.mrf.mxu2 }
 0x496   :  { %v7176_v45 = vmax.f32 %v6048_v27, 0.0  ;;  %v4245_v51 = vpop.f32.mrf.mxu0  ;;  %v4865_v44 = vpop.f32.mrf.mxu1  ;;  %v6940_v25 = vmax.f32 %v5458_v59, 0.0 }
 0x497   :  { %v6455_v49 = vmax.f32 %v4245_v51, 0.0  ;;  %v6703_v3 = vmax.f32 %v4865_v44, 0.0 }
 0x498   :  { %v8265_v60 = vadd.f32 %v8264_v28, %v7176_v45  ;;  %v7994_v10 = vadd.f32 %v7993_v39, %v6940_v25 }
 0x499   :  { %v13801_v35 = vadd.f32 %v7428_v29, %v6455_v49  ;;  %v7717_v50 = vadd.f32 %v7716_v34, %v6703_v3 }
 0x49b   :  { %15325 = vst [vmem:[#allocation47_spill] sm:$0xff] %v13801_v35 }
 0x49d   :  { %v6050_v62 = vpop.f32.mrf.mxu3  ;;  %v5460_v43 = vpop.f32.mrf.mxu2 }
 0x49e   :  { %v7177_v61 = vmax.f32 %v6050_v62, 0.0  ;;  %v4248_v42 = vpop.f32.mrf.mxu0  ;;  %v4868_v13 = vpop.f32.mrf.mxu1  ;;  %v6941_v29 = vmax.f32 %v5460_v43, 0.0 }
 0x49f   :  { %v6704_v4 = vmax.f32 %v4868_v13, 0.0  ;;  %v6456_v51 = vmax.f32 %v4248_v42, 0.0 }
 0x4a0   :  { %v8266_v2 = vadd.f32 %v8265_v60, %v7177_v61  ;;  %v7995_v34 = vadd.f32 %v7994_v10, %v6941_v29  ;;  %v12422_v10 = vld [vmem:[%s15266_s0 + $0x628] sm:$0xff] }
 0x4a1   :  { %v7718_v28 = vadd.f32 %v7717_v50, %v6704_v4  ;;  %4287 = vmatmul.bf16.gmra.mxu0 %v12297_v18  ;;  %4907 = vmatmul.bf16.gmra.mxu1 %v12421_v41  ;;  %v12298_v18 = vld [vmem:[%s15266_s0 + $0x248] sm:$0xff] }
 0x4a2   :  { %6092 = vmatmul.bf16.gmra.mxu3 %v12658_v19  ;;  %5502 = vmatmul.bf16.gmra.mxu2 %v12540_v11  ;;  %v12659_v19 = vld [vmem:[%s15266_s0 + $0xd90] sm:$0xff]  ;;  %v12541_v11 = vld [vmem:[%s15266_s0 + $0x9e0] sm:$0xff] }
 0x4a5   :  { %v6053_v26 = vpop.f32.mrf.mxu3  ;;  %v5463_v39 = vpop.f32.mrf.mxu2 }
 0x4a6   :  { %v7178_v27 = vmax.f32 %v6053_v26, 0.0  ;;  %v4250_v59 = vpop.f32.mrf.mxu0  ;;  %v4870_v45 = vpop.f32.mrf.mxu1  ;;  %v6942_v13 = vmax.f32 %v5463_v39, 0.0 }
 0x4a7   :  { %v6457_v44 = vmax.f32 %v4250_v59, 0.0  ;;  %v6705_v49 = vmax.f32 %v4870_v45, 0.0 }
 0x4a8   :  { %v8267_v3 = vadd.f32 %v8266_v2, %v7178_v27  ;;  %v7996_v60 = vadd.f32 %v7995_v34, %v6942_v13 }
 0x4a9   :  { %v7436_v25 = vadd.f32 %v6457_v44, %v6456_v51  ;;  %v7719_v62 = vadd.f32 %v7718_v28, %v6705_v49 }
 0x4ad   :  { %v6055_v50 = vpop.f32.mrf.mxu3  ;;  %v5465_v41 = vpop.f32.mrf.mxu2 }
 0x4ae   :  { %v7179_v43 = vmax.f32 %v6055_v50, 0.0  ;;  %v4253_v61 = vpop.f32.mrf.mxu0  ;;  %v4873_v42 = vpop.f32.mrf.mxu1  ;;  %v6943_v26 = vmax.f32 %v5465_v41, 0.0  ;;  %v12660_v41 = vld [vmem:[%s15266_s0 + $0xd98] sm:$0xff] }
 0x4af   :  { %v6458_v4 = vmax.f32 %v4253_v61, 0.0  ;;  %v6706_v2 = vmax.f32 %v4873_v42, 0.0 }
 0x4b0   :  { %v8268_v28 = vadd.f32 %v8267_v3, %v7179_v43  ;;  %v7997_v39 = vadd.f32 %v7996_v60, %v6943_v26  ;;  %v12299_v3 = vld [vmem:[%s15266_s0 + $0x250] sm:$0xff]  ;;  %v12542_v43 = vld [vmem:[%s15266_s0 + $0x9e8] sm:$0xff] }
 0x4b1   :  { %v7437_v29 = vadd.f32 %v7436_v25, %v6458_v4  ;;  %v7720_v34 = vadd.f32 %v7719_v62, %v6706_v2  ;;  %4292 = vmatmul.bf16.gmra.mxu0 %v12298_v18  ;;  %4912 = vmatmul.bf16.gmra.mxu1 %v12422_v10  ;;  %v12423_v25 = vld [vmem:[%s15266_s0 + $0x630] sm:$0xff] }
 0x4b2   :  { %6097 = vmatmul.bf16.gmra.mxu3 %v12659_v19  ;;  %5507 = vmatmul.bf16.gmra.mxu2 %v12541_v11 }
 0x4b5   :  { %v6058_v27 = vpop.f32.mrf.mxu3  ;;  %v5468_v59 = vpop.f32.mrf.mxu2 }
 0x4b6   :  { %v7180_v45 = vmax.f32 %v6058_v27, 0.0  ;;  %v4255_v51 = vpop.f32.mrf.mxu0  ;;  %v4875_v44 = vpop.f32.mrf.mxu1  ;;  %v6944_v23 = vmax.f32 %v5468_v59, 0.0  ;;  %v12661_v59 = vld [vmem:[%s15266_s0 + $0xda0] sm:$0xff] }
 0x4b7   :  { %v6459_v49 = vmax.f32 %v4255_v51, 0.0  ;;  %v6707_v13 = vmax.f32 %v4875_v44, 0.0 }
 0x4b8   :  { %v8269_v50 = vadd.f32 %v8268_v28, %v7180_v45 }
 0x4b9   :  { %v7438_v35 = vadd.f32 %v7437_v29, %v6459_v49  ;;  %v7721_v61 = vadd.f32 %v7720_v34, %v6707_v13 }
 0x4bd   :  { %v6060_v42 = vpop.f32.mrf.mxu3  ;;  %v5470_v62 = vpop.f32.mrf.mxu2 }
 0x4be   :  { %v7181_v60 = vmax.f32 %v6060_v42, 0.0  ;;  %v4258_v18 = vpop.f32.mrf.mxu0  ;;  %v4878_v10 = vpop.f32.mrf.mxu1 }
 0x4bf   :  { %v6460_v19 = vmax.f32 %v4258_v18, 0.0  ;;  %v6708_v11 = vmax.f32 %v4878_v10, 0.0  ;;  %v6945_v18 = vmax.f32 %v5470_v62, 0.0  ;;  %v7998_v10 = vadd.f32 %v7997_v39, %v6944_v23  ;;  %v12543_v23 = vld [vmem:[%s15266_s0 + $0x9f0] sm:$0xff] }
 0x4c0   :  { %v8270_v4 = vadd.f32 %v8269_v50, %v7181_v60 }
 0x4c1   :  { %v7439_v2 = vadd.f32 %v7438_v35, %v6460_v19  ;;  %v7722_v28 = vadd.f32 %v7721_v61, %v6708_v11  ;;  %4297 = vmatmul.bf16.gmra.mxu0 %v12299_v3  ;;  %4917 = vmatmul.bf16.gmra.mxu1 %v12423_v25  ;;  %v12300_v61 = vld [vmem:[%s15266_s0 + $0x258] sm:$0xff]  ;;  %v7999_v25 = vadd.f32 %v7998_v10, %v6945_v18 }
 0x4c2   :  { %6102 = vmatmul.bf16.gmra.mxu3 %v12660_v41  ;;  %5512 = vmatmul.bf16.gmra.mxu2 %v12542_v43  ;;  %v12424_v3 = vld [vmem:[%s15266_s0 + $0x638] sm:$0xff] }
 0x4c5   :  { %v6063_v29 = vpop.f32.mrf.mxu3  ;;  %v5473_v34 = vpop.f32.mrf.mxu2 }
 0x4c6   :  { %v7182_v26 = vmax.f32 %v6063_v29, 0.0  ;;  %v4260_v27 = vpop.f32.mrf.mxu0  ;;  %v4880_v45 = vpop.f32.mrf.mxu1  ;;  %v6946_v50 = vmax.f32 %v5473_v34, 0.0 }
 0x4c7   :  { %v6461_v51 = vmax.f32 %v4260_v27, 0.0  ;;  %v6709_v44 = vmax.f32 %v4880_v45, 0.0 }
 0x4c8   :  { %v8271_v49 = vadd.f32 %v8270_v4, %v7182_v26  ;;  %v8000_v11 = vadd.f32 %v7999_v25, %v6946_v50  ;;  %v12301_v50 = vld [vmem:[%s15266_s0 + $0x260] sm:$0xff] }
 0x4c9   :  { %v7440_v13 = vadd.f32 %v7439_v2, %v6461_v51  ;;  %v7723_v42 = vadd.f32 %v7722_v28, %v6709_v44 }
 0x4cd   :  { %v6065_v35 = vpop.f32.mrf.mxu3  ;;  %v5475_v60 = vpop.f32.mrf.mxu2 }
 0x4ce   :  { %v7183_v41 = vmax.f32 %v6065_v35, 0.0  ;;  %v4263_v43 = vpop.f32.mrf.mxu0  ;;  %v4883_v19 = vpop.f32.mrf.mxu1  ;;  %v6947_v29 = vmax.f32 %v5475_v60, 0.0 }
 0x4cf   :  { %v6462_v39 = vmax.f32 %v4263_v43, 0.0  ;;  %v6710_v62 = vmax.f32 %v4883_v19, 0.0 }
 0x4d0   :  { %v8272_v4 = vadd.f32 %v8271_v49, %v7183_v41  ;;  %v8001_v34 = vadd.f32 %v8000_v11, %v6947_v29 }
 0x4d1   :  { %v7441_v2 = vadd.f32 %v7440_v13, %v6462_v39  ;;  %v7724_v28 = vadd.f32 %v7723_v42, %v6710_v62  ;;  %4302 = vmatmul.bf16.gmra.mxu0 %v12300_v61  ;;  %4922 = vmatmul.bf16.gmra.mxu1 %v12424_v3  ;;  %v12425_v61 = vld [vmem:[%s15266_s0 + $0x640] sm:$0xff] }
 0x4d2   :  { %6107 = vmatmul.bf16.gmra.mxu3 %v12661_v59  ;;  %5517 = vmatmul.bf16.gmra.mxu2 %v12543_v23  ;;  %v12662_v59 = vld [vmem:[%s15266_s0 + $0xda8] sm:$0xff]  ;;  %v12544_v23 = vld [vmem:[%s15266_s0 + $0x9f8] sm:$0xff] }
 0x4d5   :  { %v6068_v26 = vpop.f32.mrf.mxu3  ;;  %v5478_v27 = vpop.f32.mrf.mxu2 }
 0x4d6   :  { %v7184_v45 = vmax.f32 %v6068_v26, 0.0  ;;  %v4265_v51 = vpop.f32.mrf.mxu0  ;;  %v4885_v44 = vpop.f32.mrf.mxu1  ;;  %v6948_v49 = vmax.f32 %v5478_v27, 0.0 }
 0x4d7   :  { %v6463_v18 = vmax.f32 %v4265_v51, 0.0  ;;  %v6711_v10 = vmax.f32 %v4885_v44, 0.0 }
 0x4d8   :  { %v8273_v35 = vadd.f32 %v8272_v4, %v7184_v45  ;;  %v8002_v13 = vadd.f32 %v8001_v34, %v6948_v49 }
 0x4d9   :  { %v7442_v43 = vadd.f32 %v7441_v2, %v6463_v18  ;;  %v13851_v19 = vadd.f32 %v7724_v28, %v6711_v10 }
 0x4dd   :  { %v6070_v42 = vpop.f32.mrf.mxu3  ;;  %v5480_v3 = vpop.f32.mrf.mxu2 }
 0x4de   :  { %v7185_v25 = vmax.f32 %v6070_v42, 0.0  ;;  %v4268_v60 = vpop.f32.mrf.mxu0  ;;  %v4888_v41 = vpop.f32.mrf.mxu1  ;;  %v6949_v4 = vmax.f32 %v5480_v3, 0.0 }
 0x4df   :  { %v6464_v39 = vmax.f32 %v4268_v60, 0.0  ;;  %v6712_v28 = vmax.f32 %v4888_v41, 0.0  ;;  %v12663_v41 = vld [vmem:[%s15266_s0 + $0xdb0] sm:$0xff] }
 0x4e0   :  { %v8274_v62 = vadd.f32 %v8273_v35, %v7185_v25  ;;  %v8003_v2 = vadd.f32 %v8002_v13, %v6949_v4  ;;  %v12426_v13 = vld [vmem:[%s15266_s0 + $0x648] sm:$0xff] }
 0x4e1   :  { %v7443_v11 = vadd.f32 %v7442_v43, %v6464_v39  ;;  %4307 = vmatmul.bf16.gmra.mxu0 %v12301_v50  ;;  %4927 = vmatmul.bf16.gmra.mxu1 %v12425_v61  ;;  %v12302_v50 = vld [vmem:[%s15266_s0 + $0x268] sm:$0xff] }
 0x4e2   :  { %6112 = vmatmul.bf16.gmra.mxu3 %v12662_v59  ;;  %5522 = vmatmul.bf16.gmra.mxu2 %v12544_v23  ;;  %v12545_v59 = vld [vmem:[%s15266_s0 + $0xa00] sm:$0xff] }
 0x4e5   :  { %v6073_v29 = vpop.f32.mrf.mxu3  ;;  %v5483_v34 = vpop.f32.mrf.mxu2 }
 0x4e6   :  { %v7186_v26 = vmax.f32 %v6073_v29, 0.0  ;;  %v4270_v27 = vpop.f32.mrf.mxu0  ;;  %v4890_v45 = vpop.f32.mrf.mxu1  ;;  %v6950_v42 = vmax.f32 %v5483_v34, 0.0 }
 0x4e7   :  { %v6465_v51 = vmax.f32 %v4270_v27, 0.0  ;;  %v6713_v44 = vmax.f32 %v4890_v45, 0.0 }
 0x4e8   :  { %v8275_v18 = vadd.f32 %v8274_v62, %v7186_v26  ;;  %v8004_v35 = vadd.f32 %v8003_v2, %v6950_v42 }
 0x4e9   :  { %v7444_v10 = vadd.f32 %v7443_v11, %v6465_v51  ;;  %v7732_v49 = vadd.f32 %v6713_v44, %v6712_v28 }
 0x4ed   :  { %v6075_v43 = vpop.f32.mrf.mxu3  ;;  %v5485_v61 = vpop.f32.mrf.mxu2 }
 0x4ee   :  { %v7187_v3 = vmax.f32 %v6075_v43, 0.0  ;;  %v4273_v25 = vpop.f32.mrf.mxu0  ;;  %v4893_v60 = vpop.f32.mrf.mxu1 }
 0x4ef   :  { %v6466_v23 = vmax.f32 %v4273_v25, 0.0  ;;  %v6714_v39 = vmax.f32 %v4893_v60, 0.0  ;;  %v12664_v25 = vld [vmem:[%s15266_s0 + $0xdb8] sm:$0xff]  ;;  %v6951_v60 = vmax.f32 %v5485_v61, 0.0 }
 0x4f0   :  { %v8276_v62 = vadd.f32 %v8275_v18, %v7187_v3  ;;  %v12303_v18 = vld [vmem:[%s15266_s0 + $0x270] sm:$0xff] }
 0x4f1   :  { %v7445_v11 = vadd.f32 %v7444_v10, %v6466_v23  ;;  %v7733_v4 = vadd.f32 %v7732_v49, %v6714_v39  ;;  %4312 = vmatmul.bf16.gmra.mxu0 %v12302_v50  ;;  %4932 = vmatmul.bf16.gmra.mxu1 %v12426_v13  ;;  %v12427_v10 = vld [vmem:[%s15266_s0 + $0x650] sm:$0xff] }
 0x4f2   :  { %6117 = vmatmul.bf16.gmra.mxu3 %v12663_v41  ;;  %5527 = vmatmul.bf16.gmra.mxu2 %v12545_v59  ;;  %v12546_v59 = vld [vmem:[%s15266_s0 + $0xa08] sm:$0xff] }
 0x4f5   :  { %v6078_v2 = vpop.f32.mrf.mxu3  ;;  %v5488_v28 = vpop.f32.mrf.mxu2 }
 0x4f6   :  { %v7188_v29 = vmax.f32 %v6078_v2, 0.0  ;;  %v4275_v34 = vpop.f32.mrf.mxu0  ;;  %v4895_v26 = vpop.f32.mrf.mxu1  ;;  %v6952_v41 = vmax.f32 %v5488_v28, 0.0 }
 0x4f7   :  { %v6467_v27 = vmax.f32 %v4275_v34, 0.0  ;;  %v6715_v45 = vmax.f32 %v4895_v26, 0.0 }
 0x4f8   :  { %v8277_v51 = vadd.f32 %v8276_v62, %v7188_v29 }
 0x4f9   :  { %v7446_v44 = vadd.f32 %v7445_v11, %v6467_v27  ;;  %v7734_v42 = vadd.f32 %v7733_v4, %v6715_v45  ;;  %v8005_v11 = vadd.f32 %v8004_v35, %v6951_v60 }
 0x4fb   :  { %v8006_v29 = vadd.f32 %v8005_v11, %v6952_v41 }
 0x4fd   :  { %v6080_v43 = vpop.f32.mrf.mxu3  ;;  %v5490_v49 = vpop.f32.mrf.mxu2 }
 0x4fe   :  { %v7189_v50 = vmax.f32 %v6080_v43, 0.0  ;;  %v4278_v13 = vpop.f32.mrf.mxu0  ;;  %v4898_v3 = vpop.f32.mrf.mxu1  ;;  %v6953_v34 = vmax.f32 %v5490_v49, 0.0 }
 0x4ff   :  { %v6468_v23 = vmax.f32 %v4278_v13, 0.0  ;;  %v6716_v39 = vmax.f32 %v4898_v3, 0.0 }
 0x500   :  { %v8278_v62 = vadd.f32 %v8277_v51, %v7189_v50  ;;  %v8007_v26 = vadd.f32 %v8006_v29, %v6953_v34 }
 0x501   :  { %v7447_v4 = vadd.f32 %v7446_v44, %v6468_v23  ;;  %v7735_v2 = vadd.f32 %v7734_v42, %v6716_v39  ;;  %4317 = vmatmul.bf16.gmra.mxu0 %v12303_v18  ;;  %4937 = vmatmul.bf16.gmra.mxu1 %v12427_v10  ;;  %v12304_v18 = vld [vmem:[%s15266_s0 + $0x278] sm:$0xff] }
 0x502   :  { %6122 = vmatmul.bf16.gmra.mxu3 %v12664_v25  ;;  %5532 = vmatmul.bf16.gmra.mxu2 %v12546_v59  ;;  %v12428_v10 = vld [vmem:[%s15266_s0 + $0x658] sm:$0xff] }
 0x505   :  { %v6083_v27 = vpop.f32.mrf.mxu3  ;;  %v5493_v61 = vpop.f32.mrf.mxu2 }
 0x506   :  { %v7190_v28 = vmax.f32 %v6083_v27, 0.0  ;;  %v4280_v45 = vpop.f32.mrf.mxu0  ;;  %v4900_v43 = vpop.f32.mrf.mxu1  ;;  %v6954_v35 = vmax.f32 %v5493_v61, 0.0 }
 0x507   :  { %v6469_v30 = vmax.f32 %v4280_v45, 0.0  ;;  %v6717_v12 = vmax.f32 %v4900_v43, 0.0 }
 0x508   :  { %v8279_v13 = vadd.f32 %v8278_v62, %v7190_v28  ;;  %v8008_v44 = vadd.f32 %v8007_v26, %v6954_v35 }
 0x509   :  { %v7448_v3 = vadd.f32 %v7447_v4, %v6469_v30  ;;  %v7736_v51 = vadd.f32 %v7735_v2, %v6717_v12  ;;  %v12665_v30 = vld [vmem:[%s15266_s0 + $0xdc0] sm:$0xff]  ;;  %v12547_v12 = vld [vmem:[%s15266_s0 + $0xa10] sm:$0xff] }
 0x50d   :  { %v6085_v42 = vpop.f32.mrf.mxu3  ;;  %v5495_v49 = vpop.f32.mrf.mxu2 }
 0x50e   :  { %v7191_v50 = vmax.f32 %v6085_v42, 0.0  ;;  %v4283_v25 = vpop.f32.mrf.mxu0  ;;  %v4903_v60 = vpop.f32.mrf.mxu1  ;;  %v6955_v11 = vmax.f32 %v5495_v49, 0.0 }
 0x50f   :  { %v6470_v41 = vmax.f32 %v4283_v25, 0.0  ;;  %v6718_v59 = vmax.f32 %v4903_v60, 0.0  ;;  %v12548_v25 = vld [vmem:[%s15266_s0 + $0xa18] sm:$0xff] }
 0x510   :  { %v13901_v23 = vadd.f32 %v8279_v13, %v7191_v50  ;;  %v8009_v4 = vadd.f32 %v8008_v44, %v6955_v11  ;;  %v12666_v50 = vld [vmem:[%s15266_s0 + $0xdc8] sm:$0xff] }
 0x511   :  { %v7449_v39 = vadd.f32 %v7448_v3, %v6470_v41  ;;  %v7737_v62 = vadd.f32 %v7736_v51, %v6718_v59  ;;  %4322 = vmatmul.bf16.gmra.mxu0 %v12304_v18  ;;  %4942 = vmatmul.bf16.gmra.mxu1 %v12428_v10  ;;  %v12305_v3 = vld [vmem:[%s15266_s0 + $0x280] sm:$0xff] }
 0x512   :  { %6127 = vmatmul.bf16.gmra.mxu3 %v12665_v30  ;;  %5537 = vmatmul.bf16.gmra.mxu2 %v12547_v12  ;;  %v12429_v51 = vld [vmem:[%s15266_s0 + $0x660] sm:$0xff] }
 0x515   :  { %v6088_v2 = vpop.f32.mrf.mxu3  ;;  %v5498_v29 = vpop.f32.mrf.mxu2 }
 0x516   :  { %v4285_v34 = vpop.f32.mrf.mxu0  ;;  %v4905_v26 = vpop.f32.mrf.mxu1  ;;  %v6956_v43 = vmax.f32 %v5498_v29, 0.0  ;;  %v7192_v13 = vmax.f32 %v6088_v2, 0.0 }
 0x517   :  { %v6471_v27 = vmax.f32 %v4285_v34, 0.0  ;;  %v6719_v61 = vmax.f32 %v4905_v26, 0.0 }
 0x518   :  { %v8010_v35 = vadd.f32 %v8009_v4, %v6956_v43 }
 0x519   :  { %v7450_v28 = vadd.f32 %v7449_v39, %v6471_v27  ;;  %v7738_v45 = vadd.f32 %v7737_v62, %v6719_v61 }
 0x51d   :  { %v6090_v42 = vpop.f32.mrf.mxu3  ;;  %v5500_v44 = vpop.f32.mrf.mxu2 }
 0x51e   :  { %v7193_v18 = vmax.f32 %v6090_v42, 0.0  ;;  %v4288_v10 = vpop.f32.mrf.mxu0  ;;  %v4908_v49 = vpop.f32.mrf.mxu1  ;;  %v6957_v39 = vmax.f32 %v5500_v44, 0.0 }
 0x51f   :  { %v6472_v60 = vmax.f32 %v4288_v10, 0.0  ;;  %v6720_v30 = vmax.f32 %v4908_v49, 0.0  ;;  %v12667_v49 = vld [vmem:[%s15266_s0 + $0xdd0] sm:$0xff] }
 0x520   :  { %v8287_v12 = vadd.f32 %v7193_v18, %v7192_v13  ;;  %v8011_v62 = vadd.f32 %v8010_v35, %v6957_v39  ;;  %v12430_v35 = vld [vmem:[%s15266_s0 + $0x668] sm:$0xff] }
 0x521   :  { %v7451_v41 = vadd.f32 %v7450_v28, %v6472_v60  ;;  %v7739_v59 = vadd.f32 %v7738_v45, %v6720_v30  ;;  %4327 = vmatmul.bf16.gmra.mxu0 %v12305_v3  ;;  %4947 = vmatmul.bf16.gmra.mxu1 %v12429_v51  ;;  %v12306_v45 = vld [vmem:[%s15266_s0 + $0x288] sm:$0xff] }
 0x522   :  { %6132 = vmatmul.bf16.gmra.mxu3 %v12666_v50  ;;  %5542 = vmatmul.bf16.gmra.mxu2 %v12548_v25  ;;  %v12549_v50 = vld [vmem:[%s15266_s0 + $0xa20] sm:$0xff] }
 0x525   :  { %v6093_v11 = vpop.f32.mrf.mxu3  ;;  %v5503_v4 = vpop.f32.mrf.mxu2 }
 0x526   :  { %v7194_v2 = vmax.f32 %v6093_v11, 0.0  ;;  %v4290_v29 = vpop.f32.mrf.mxu0  ;;  %v4910_v34 = vpop.f32.mrf.mxu1  ;;  %v6958_v10 = vmax.f32 %v5503_v4, 0.0 }
 0x527   :  { %v6473_v26 = vmax.f32 %v4290_v29, 0.0  ;;  %v6721_v27 = vmax.f32 %v4910_v34, 0.0 }
 0x528   :  { %v8288_v61 = vadd.f32 %v8287_v12, %v7194_v2  ;;  %v8012_v13 = vadd.f32 %v8011_v62, %v6958_v10 }
 0x529   :  { %v7452_v43 = vadd.f32 %v7451_v41, %v6473_v26  ;;  %v7740_v42 = vadd.f32 %v7739_v59, %v6721_v27 }
 0x52d   :  { %v6095_v28 = vpop.f32.mrf.mxu3  ;;  %v5505_v3 = vpop.f32.mrf.mxu2 }
 0x52e   :  { %v7195_v51 = vmax.f32 %v6095_v28, 0.0  ;;  %v4293_v44 = vpop.f32.mrf.mxu0  ;;  %v4913_v18 = vpop.f32.mrf.mxu1  ;;  %v6959_v59 = vmax.f32 %v5505_v3, 0.0 }
 0x52f   :  { %v6474_v25 = vmax.f32 %v4293_v44, 0.0  ;;  %v6722_v60 = vmax.f32 %v4913_v18, 0.0  ;;  %v12668_v18 = vld [vmem:[%s15266_s0 + $0xdd8] sm:$0xff] }
 0x530   :  { %v8289_v30 = vadd.f32 %v8288_v61, %v7195_v51  ;;  %v8013_v39 = vadd.f32 %v8012_v13, %v6959_v59  ;;  %v12431_v13 = vld [vmem:[%s15266_s0 + $0x670] sm:$0xff] }
 0x531   :  { %v7453_v12 = vadd.f32 %v7452_v43, %v6474_v25  ;;  %v7741_v41 = vadd.f32 %v7740_v42, %v6722_v60  ;;  %4332 = vmatmul.bf16.gmra.mxu0 %v12306_v45  ;;  %4952 = vmatmul.bf16.gmra.mxu1 %v12430_v35  ;;  %v12307_v42 = vld [vmem:[%s15266_s0 + $0x290] sm:$0xff] }
 0x532   :  { %6137 = vmatmul.bf16.gmra.mxu3 %v12667_v49  ;;  %5547 = vmatmul.bf16.gmra.mxu2 %v12549_v50  ;;  %v12550_v49 = vld [vmem:[%s15266_s0 + $0xa28] sm:$0xff] }
 0x535   :  { %v6098_v62 = vpop.f32.mrf.mxu3  ;;  %v5508_v11 = vpop.f32.mrf.mxu2 }
 0x536   :  { %v7196_v4 = vmax.f32 %v6098_v62, 0.0  ;;  %v4295_v2 = vpop.f32.mrf.mxu0  ;;  %v4915_v29 = vpop.f32.mrf.mxu1  ;;  %v6960_v44 = vmax.f32 %v5508_v11, 0.0 }
 0x537   :  { %v6475_v34 = vmax.f32 %v4295_v2, 0.0  ;;  %v6723_v26 = vmax.f32 %v4915_v29, 0.0 }
 0x538   :  { %v8290_v27 = vadd.f32 %v8289_v30, %v7196_v4  ;;  %v8014_v61 = vadd.f32 %v8013_v39, %v6960_v44 }
 0x539   :  { %v7454_v10 = vadd.f32 %v7453_v12, %v6475_v34  ;;  %v7742_v28 = vadd.f32 %v7741_v41, %v6723_v26 }
 0x53d   :  { %v6100_v43 = vpop.f32.mrf.mxu3  ;;  %v5510_v45 = vpop.f32.mrf.mxu2 }
 0x53e   :  { %v7197_v35 = vmax.f32 %v6100_v43, 0.0  ;;  %v4298_v3 = vpop.f32.mrf.mxu0  ;;  %v4918_v51 = vpop.f32.mrf.mxu1  ;;  %v6961_v41 = vmax.f32 %v5510_v45, 0.0 }
 0x53f   :  { %v6476_v50 = vmax.f32 %v4298_v3, 0.0  ;;  %v6724_v25 = vmax.f32 %v4918_v51, 0.0  ;;  %v12669_v51 = vld [vmem:[%s15266_s0 + $0xde0] sm:$0xff] }
 0x540   :  { %v8291_v60 = vadd.f32 %v8290_v27, %v7197_v35  ;;  %v8015_v59 = vadd.f32 %v8014_v61, %v6961_v41  ;;  %v12432_v61 = vld [vmem:[%s15266_s0 + $0x678] sm:$0xff] }
 0x541   :  { %v7455_v30 = vadd.f32 %v7454_v10, %v6476_v50  ;;  %v7743_v12 = vadd.f32 %v7742_v28, %v6724_v25  ;;  %4337 = vmatmul.bf16.gmra.mxu0 %v12307_v42  ;;  %4957 = vmatmul.bf16.gmra.mxu1 %v12431_v13  ;;  %v12308_v28 = vld [vmem:[%s15266_s0 + $0x298] sm:$0xff] }
 0x542   :  { %6142 = vmatmul.bf16.gmra.mxu3 %v12668_v18  ;;  %5552 = vmatmul.bf16.gmra.mxu2 %v12550_v49  ;;  %v12551_v18 = vld [vmem:[%s15266_s0 + $0xa30] sm:$0xff] }
 0x545   :  { %v6103_v39 = vpop.f32.mrf.mxu3  ;;  %v5513_v62 = vpop.f32.mrf.mxu2 }
 0x546   :  { %v7198_v11 = vmax.f32 %v6103_v39, 0.0  ;;  %v4300_v4 = vpop.f32.mrf.mxu0  ;;  %v4920_v2 = vpop.f32.mrf.mxu1  ;;  %v6962_v3 = vmax.f32 %v5513_v62, 0.0 }
 0x547   :  { %v6477_v29 = vmax.f32 %v4300_v4, 0.0  ;;  %v6725_v34 = vmax.f32 %v4920_v2, 0.0 }
 0x548   :  { %v8292_v26 = vadd.f32 %v8291_v60, %v7198_v11  ;;  %v8016_v27 = vadd.f32 %v8015_v59, %v6962_v3 }
 0x549   :  { %v7456_v44 = vadd.f32 %v7455_v30, %v6477_v29  ;;  %v7744_v43 = vadd.f32 %v7743_v12, %v6725_v34 }
 0x54d   :  { %v6105_v10 = vpop.f32.mrf.mxu3  ;;  %v5515_v42 = vpop.f32.mrf.mxu2 }
 0x54e   :  { %v7199_v13 = vmax.f32 %v6105_v10, 0.0  ;;  %v4303_v45 = vpop.f32.mrf.mxu0  ;;  %v4923_v35 = vpop.f32.mrf.mxu1  ;;  %v6963_v12 = vmax.f32 %v5515_v42, 0.0 }
 0x54f   :  { %v6478_v49 = vmax.f32 %v4303_v45, 0.0  ;;  %v6726_v50 = vmax.f32 %v4923_v35, 0.0  ;;  %v12670_v35 = vld [vmem:[%s15266_s0 + $0xde8] sm:$0xff] }
 0x550   :  { %v8293_v25 = vadd.f32 %v8292_v26, %v7199_v13  ;;  %v8017_v41 = vadd.f32 %v8016_v27, %v6963_v12  ;;  %v12433_v27 = vld [vmem:[%s15266_s0 + $0x680] sm:$0xff] }
 0x551   :  { %v7457_v60 = vadd.f32 %v7456_v44, %v6478_v49  ;;  %v7745_v30 = vadd.f32 %v7744_v43, %v6726_v50  ;;  %4342 = vmatmul.bf16.gmra.mxu0 %v12308_v28  ;;  %4962 = vmatmul.bf16.gmra.mxu1 %v12432_v61  ;;  %v12309_v43 = vld [vmem:[%s15266_s0 + $0x2a0] sm:$0xff] }
 0x552   :  { %6147 = vmatmul.bf16.gmra.mxu3 %v12669_v51  ;;  %5557 = vmatmul.bf16.gmra.mxu2 %v12551_v18  ;;  %v12552_v51 = vld [vmem:[%s15266_s0 + $0xa38] sm:$0xff] }
 0x555   :  { %v6108_v59 = vpop.f32.mrf.mxu3  ;;  %v5518_v39 = vpop.f32.mrf.mxu2 }
 0x556   :  { %v7200_v62 = vmax.f32 %v6108_v59, 0.0  ;;  %v4305_v11 = vpop.f32.mrf.mxu0  ;;  %v4925_v4 = vpop.f32.mrf.mxu1  ;;  %v6964_v45 = vmax.f32 %v5518_v39, 0.0 }
 0x557   :  { %v6479_v2 = vmax.f32 %v4305_v11, 0.0  ;;  %v6727_v29 = vmax.f32 %v4925_v4, 0.0 }
 0x558   :  { %v8294_v34 = vadd.f32 %v8293_v25, %v7200_v62  ;;  %v8018_v26 = vadd.f32 %v8017_v41, %v6964_v45 }
 0x559   :  { %v7458_v3 = vadd.f32 %v7457_v60, %v6479_v2  ;;  %v7746_v10 = vadd.f32 %v7745_v30, %v6727_v29 }
 0x55d   :  { %v6110_v44 = vpop.f32.mrf.mxu3  ;;  %v5520_v28 = vpop.f32.mrf.mxu2 }
 0x55e   :  { %v7201_v61 = vmax.f32 %v6110_v44, 0.0  ;;  %v4308_v42 = vpop.f32.mrf.mxu0  ;;  %v4928_v13 = vpop.f32.mrf.mxu1  ;;  %v6965_v30 = vmax.f32 %v5520_v28, 0.0 }
 0x55f   :  { %v6480_v18 = vmax.f32 %v4308_v42, 0.0  ;;  %v6728_v49 = vmax.f32 %v4928_v13, 0.0  ;;  %v12671_v13 = vld [vmem:[%s15266_s0 + $0xdf0] sm:$0xff] }
 0x560   :  { %v8295_v50 = vadd.f32 %v8294_v34, %v7201_v61  ;;  %v8019_v12 = vadd.f32 %v8018_v26, %v6965_v30  ;;  %v12434_v26 = vld [vmem:[%s15266_s0 + $0x688] sm:$0xff] }
 0x561   :  { %v7459_v25 = vadd.f32 %v7458_v3, %v6480_v18  ;;  %v7747_v60 = vadd.f32 %v7746_v10, %v6728_v49  ;;  %4347 = vmatmul.bf16.gmra.mxu0 %v12309_v43  ;;  %4967 = vmatmul.bf16.gmra.mxu1 %v12433_v27  ;;  %v12310_v10 = vld [vmem:[%s15266_s0 + $0x2a8] sm:$0xff] }
 0x562   :  { %6152 = vmatmul.bf16.gmra.mxu3 %v12670_v35  ;;  %5562 = vmatmul.bf16.gmra.mxu2 %v12552_v51  ;;  %v12553_v35 = vld [vmem:[%s15266_s0 + $0xa40] sm:$0xff] }
 0x565   :  { %v6113_v41 = vpop.f32.mrf.mxu3  ;;  %v5523_v59 = vpop.f32.mrf.mxu2 }
 0x566   :  { %v7202_v39 = vmax.f32 %v6113_v41, 0.0  ;;  %v4310_v62 = vpop.f32.mrf.mxu0  ;;  %v4930_v11 = vpop.f32.mrf.mxu1  ;;  %v6966_v42 = vmax.f32 %v5523_v59, 0.0 }
 0x567   :  { %v6481_v4 = vmax.f32 %v4310_v62, 0.0  ;;  %v6729_v2 = vmax.f32 %v4930_v11, 0.0 }
 0x568   :  { %v8296_v29 = vadd.f32 %v8295_v50, %v7202_v39  ;;  %v8020_v34 = vadd.f32 %v8019_v12, %v6966_v42 }
 0x569   :  { %v7460_v45 = vadd.f32 %v7459_v25, %v6481_v4  ;;  %v7748_v44 = vadd.f32 %v7747_v60, %v6729_v2 }
 0x56d   :  { %v6115_v3 = vpop.f32.mrf.mxu3  ;;  %v5525_v43 = vpop.f32.mrf.mxu2 }
 0x56e   :  { %v7203_v27 = vmax.f32 %v6115_v3, 0.0  ;;  %v4313_v28 = vpop.f32.mrf.mxu0  ;;  %v4933_v61 = vpop.f32.mrf.mxu1  ;;  %v6967_v50 = vmax.f32 %v5525_v43, 0.0 }
 0x56f   :  { %v6482_v51 = vmax.f32 %v4313_v28, 0.0  ;;  %v6730_v18 = vmax.f32 %v4933_v61, 0.0  ;;  %v12554_v28 = vld [vmem:[%s15266_s0 + $0xa48] sm:$0xff] }
 0x570   :  { %v8297_v49 = vadd.f32 %v8296_v29, %v7203_v27  ;;  %v13975_v30 = vadd.f32 %v8020_v34, %v6967_v50  ;;  %v12672_v27 = vld [vmem:[%s15266_s0 + $0xdf8] sm:$0xff] }
 0x571   :  { %v7461_v25 = vadd.f32 %v7460_v45, %v6482_v51  ;;  %v7749_v60 = vadd.f32 %v7748_v44, %v6730_v18  ;;  %4352 = vmatmul.bf16.gmra.mxu0 %v12310_v10  ;;  %4972 = vmatmul.bf16.gmra.mxu1 %v12434_v26  ;;  %v12311_v45 = vld [vmem:[%s15266_s0 + $0x2b0] sm:$0xff] }
 0x572   :  { %6157 = vmatmul.bf16.gmra.mxu3 %v12671_v13  ;;  %15326 = vst [vmem:[#allocation48_spill] sm:$0xff] %v13975_v30  ;;  %5567 = vmatmul.bf16.gmra.mxu2 %v12553_v35  ;;  %v12435_v44 = vld [vmem:[%s15266_s0 + $0x690] sm:$0xff] }
 0x575   :  { %v6118_v12 = vpop.f32.mrf.mxu3  ;;  %v5528_v41 = vpop.f32.mrf.mxu2 }
 0x576   :  { %v7204_v59 = vmax.f32 %v6118_v12, 0.0  ;;  %v4315_v39 = vpop.f32.mrf.mxu0  ;;  %v4935_v62 = vpop.f32.mrf.mxu1 }
 0x577   :  { %v6483_v11 = vmax.f32 %v4315_v39, 0.0  ;;  %v6731_v4 = vmax.f32 %v4935_v62, 0.0 }
 0x578   :  { %v8298_v2 = vadd.f32 %v8297_v49, %v7204_v59 }
 0x579   :  { %v7462_v42 = vadd.f32 %v7461_v25, %v6483_v11  ;;  %v7750_v3 = vadd.f32 %v7749_v60, %v6731_v4 }
 0x57d   :  { %v6120_v29 = vpop.f32.mrf.mxu3  ;;  %v5530_v34 = vpop.f32.mrf.mxu2 }
 0x57e   :  { %v7205_v10 = vmax.f32 %v6120_v29, 0.0  ;;  %v4318_v26 = vpop.f32.mrf.mxu0  ;;  %v4938_v43 = vpop.f32.mrf.mxu1  ;;  %v6968_v29 = vmax.f32 %v5528_v41, 0.0  ;;  %v12673_v41 = vld [vmem:[%s15266_s0 + $0xe00] sm:$0xff] }
 0x57f   :  { %v6484_v61 = vmax.f32 %v4318_v26, 0.0  ;;  %v6732_v13 = vmax.f32 %v4938_v43, 0.0  ;;  %v6969_v26 = vmax.f32 %v5530_v34, 0.0  ;;  %v12555_v34 = vld [vmem:[%s15266_s0 + $0xa50] sm:$0xff] }
 0x580   :  { %v8299_v35 = vadd.f32 %v8298_v2, %v7205_v10 }
 0x581   :  { %v7463_v51 = vadd.f32 %v7462_v42, %v6484_v61  ;;  %v7751_v18 = vadd.f32 %v7750_v3, %v6732_v13  ;;  %4357 = vmatmul.bf16.gmra.mxu0 %v12311_v45  ;;  %4977 = vmatmul.bf16.gmra.mxu1 %v12435_v44  ;;  %v8028_v2 = vadd.f32 %v6969_v26, %v6968_v29  ;;  %v12312_v3 = vld [vmem:[%s15266_s0 + $0x2b8] sm:$0xff] }
 0x582   :  { %6162 = vmatmul.bf16.gmra.mxu3 %v12672_v27  ;;  %5572 = vmatmul.bf16.gmra.mxu2 %v12554_v28  ;;  %v12436_v45 = vld [vmem:[%s15266_s0 + $0x698] sm:$0xff] }
 0x585   :  { %v6123_v49 = vpop.f32.mrf.mxu3  ;;  %v5533_v50 = vpop.f32.mrf.mxu2 }
 0x586   :  { %v7206_v25 = vmax.f32 %v6123_v49, 0.0  ;;  %v4320_v60 = vpop.f32.mrf.mxu0  ;;  %v4940_v12 = vpop.f32.mrf.mxu1  ;;  %v6970_v43 = vmax.f32 %v5533_v50, 0.0 }
 0x587   :  { %v6485_v59 = vmax.f32 %v4320_v60, 0.0  ;;  %v6733_v39 = vmax.f32 %v4940_v12, 0.0 }
 0x588   :  { %v8300_v62 = vadd.f32 %v8299_v35, %v7206_v25  ;;  %v8029_v44 = vadd.f32 %v8028_v2, %v6970_v43 }
 0x589   :  { %v7464_v11 = vadd.f32 %v7463_v51, %v6485_v59  ;;  %v7752_v4 = vadd.f32 %v7751_v18, %v6733_v39 }
 0x58d   :  { %v6125_v42 = vpop.f32.mrf.mxu3  ;;  %v5535_v10 = vpop.f32.mrf.mxu2 }
 0x58e   :  { %v7207_v27 = vmax.f32 %v6125_v42, 0.0  ;;  %v4323_v28 = vpop.f32.mrf.mxu0  ;;  %v4943_v61 = vpop.f32.mrf.mxu1  ;;  %v6971_v50 = vmax.f32 %v5535_v10, 0.0 }
 0x58f   :  { %v6486_v13 = vmax.f32 %v4323_v28, 0.0  ;;  %v6734_v35 = vmax.f32 %v4943_v61, 0.0 }
 0x590   :  { %v8301_v51 = vadd.f32 %v8300_v62, %v7207_v27  ;;  %v8030_v25 = vadd.f32 %v8029_v44, %v6971_v50 }
 0x591   :  { %v7465_v18 = vadd.f32 %v7464_v11, %v6486_v13  ;;  %v7753_v49 = vadd.f32 %v7752_v4, %v6734_v35  ;;  %4362 = vmatmul.bf16.gmra.mxu0 %v12312_v3  ;;  %4982 = vmatmul.bf16.gmra.mxu1 %v12436_v45  ;;  %v12313_v3 = vld [vmem:[%s15266_s0 + $0x2c0] sm:$0xff] }
 0x592   :  { %6167 = vmatmul.bf16.gmra.mxu3 %v12673_v41  ;;  %5577 = vmatmul.bf16.gmra.mxu2 %v12555_v34  ;;  %v12437_v45 = vld [vmem:[%s15266_s0 + $0x6a0] sm:$0xff]  ;;  %v12674_v41 = vld [vmem:[%s15266_s0 + $0xe08] sm:$0xff]  ;;  %v12556_v34 = vld [vmem:[%s15266_s0 + $0xa58] sm:$0xff] }
 0x595   :  { %v6128_v60 = vpop.f32.mrf.mxu3  ;;  %v5538_v12 = vpop.f32.mrf.mxu2 }
 0x596   :  { %v7208_v59 = vmax.f32 %v6128_v60, 0.0  ;;  %v4325_v39 = vpop.f32.mrf.mxu0  ;;  %v4945_v29 = vpop.f32.mrf.mxu1  ;;  %v6972_v62 = vmax.f32 %v5538_v12, 0.0 }
 0x597   :  { %v6487_v26 = vmax.f32 %v4325_v39, 0.0  ;;  %v6735_v43 = vmax.f32 %v4945_v29, 0.0 }
 0x598   :  { %v8302_v2 = vadd.f32 %v8301_v51, %v7208_v59  ;;  %v8031_v11 = vadd.f32 %v8030_v25, %v6972_v62 }
 0x599   :  { %v14001_v42 = vadd.f32 %v7465_v18, %v6487_v26  ;;  %v7754_v28 = vadd.f32 %v7753_v49, %v6735_v43 }
 0x59b   :  { %15327 = vst [vmem:[#allocation49_spill] sm:$0xff] %v14001_v42 }
 0x59d   :  { %v6130_v4 = vpop.f32.mrf.mxu3  ;;  %v5540_v44 = vpop.f32.mrf.mxu2 }
 0x59e   :  { %v7209_v10 = vmax.f32 %v6130_v4, 0.0  ;;  %v4328_v27 = vpop.f32.mrf.mxu0  ;;  %v4948_v61 = vpop.f32.mrf.mxu1  ;;  %v6973_v18 = vmax.f32 %v5540_v44, 0.0 }
 0x59f   :  { %v6736_v13 = vmax.f32 %v4948_v61, 0.0  ;;  %v6488_v39 = vmax.f32 %v4328_v27, 0.0 }
 0x5a0   :  { %v8303_v35 = vadd.f32 %v8302_v2, %v7209_v10  ;;  %v8032_v49 = vadd.f32 %v8031_v11, %v6973_v18  ;;  %v12438_v11 = vld [vmem:[%s15266_s0 + $0x6a8] sm:$0xff] }
 0x5a1   :  { %v7755_v51 = vadd.f32 %v7754_v28, %v6736_v13  ;;  %4367 = vmatmul.bf16.gmra.mxu0 %v12313_v3  ;;  %4987 = vmatmul.bf16.gmra.mxu1 %v12437_v45  ;;  %v12314_v3 = vld [vmem:[%s15266_s0 + $0x2c8] sm:$0xff] }
 0x5a2   :  { %6172 = vmatmul.bf16.gmra.mxu3 %v12674_v41  ;;  %5582 = vmatmul.bf16.gmra.mxu2 %v12556_v34  ;;  %v12675_v41 = vld [vmem:[%s15266_s0 + $0xe10] sm:$0xff]  ;;  %v12557_v34 = vld [vmem:[%s15266_s0 + $0xa60] sm:$0xff] }
 0x5a5   :  { %v6133_v50 = vpop.f32.mrf.mxu3  ;;  %v5543_v25 = vpop.f32.mrf.mxu2 }
 0x5a6   :  { %v7210_v60 = vmax.f32 %v6133_v50, 0.0  ;;  %v4330_v12 = vpop.f32.mrf.mxu0  ;;  %v4950_v59 = vpop.f32.mrf.mxu1  ;;  %v6974_v61 = vmax.f32 %v5543_v25, 0.0 }
 0x5a7   :  { %v6489_v29 = vmax.f32 %v4330_v12, 0.0  ;;  %v6737_v26 = vmax.f32 %v4950_v59, 0.0 }
 0x5a8   :  { %v8304_v43 = vadd.f32 %v8303_v35, %v7210_v60  ;;  %v8033_v2 = vadd.f32 %v8032_v49, %v6974_v61 }
 0x5a9   :  { %v7473_v62 = vadd.f32 %v6489_v29, %v6488_v39  ;;  %v7756_v4 = vadd.f32 %v7755_v51, %v6737_v26 }
 0x5ad   :  { %v6135_v28 = vpop.f32.mrf.mxu3  ;;  %v5545_v45 = vpop.f32.mrf.mxu2 }
 0x5ae   :  { %v7211_v44 = vmax.f32 %v6135_v28, 0.0  ;;  %v4333_v10 = vpop.f32.mrf.mxu0  ;;  %v4953_v27 = vpop.f32.mrf.mxu1  ;;  %v6975_v50 = vmax.f32 %v5545_v45, 0.0  ;;  %v12676_v45 = vld [vmem:[%s15266_s0 + $0xe18] sm:$0xff] }
 0x5af   :  { %v6490_v13 = vmax.f32 %v4333_v10, 0.0  ;;  %v6738_v35 = vmax.f32 %v4953_v27, 0.0 }
 0x5b0   :  { %v8305_v51 = vadd.f32 %v8304_v43, %v7211_v44  ;;  %v8034_v25 = vadd.f32 %v8033_v2, %v6975_v50  ;;  %v12315_v43 = vld [vmem:[%s15266_s0 + $0x2d0] sm:$0xff]  ;;  %v12558_v44 = vld [vmem:[%s15266_s0 + $0xa68] sm:$0xff] }
 0x5b1   :  { %v7474_v18 = vadd.f32 %v7473_v62, %v6490_v13  ;;  %v7757_v49 = vadd.f32 %v7756_v4, %v6738_v35  ;;  %4372 = vmatmul.bf16.gmra.mxu0 %v12314_v3  ;;  %4992 = vmatmul.bf16.gmra.mxu1 %v12438_v11  ;;  %v12439_v62 = vld [vmem:[%s15266_s0 + $0x6b0] sm:$0xff] }
 0x5b2   :  { %6177 = vmatmul.bf16.gmra.mxu3 %v12675_v41  ;;  %5587 = vmatmul.bf16.gmra.mxu2 %v12557_v34 }
 0x5b5   :  { %v6138_v60 = vpop.f32.mrf.mxu3  ;;  %v5548_v12 = vpop.f32.mrf.mxu2 }
 0x5b6   :  { %v7212_v59 = vmax.f32 %v6138_v60, 0.0  ;;  %v4335_v39 = vpop.f32.mrf.mxu0  ;;  %v4955_v29 = vpop.f32.mrf.mxu1 }
 0x5b7   :  { %v6491_v26 = vmax.f32 %v4335_v39, 0.0  ;;  %v6739_v61 = vmax.f32 %v4955_v29, 0.0 }
 0x5b8   :  { %v8306_v28 = vadd.f32 %v8305_v51, %v7212_v59 }
 0x5b9   :  { %v7475_v42 = vadd.f32 %v7474_v18, %v6491_v26  ;;  %v7758_v10 = vadd.f32 %v7757_v49, %v6739_v61  ;;  %v6976_v26 = vmax.f32 %v5548_v12, 0.0 }
 0x5bd   :  { %v6140_v27 = vpop.f32.mrf.mxu3  ;;  %v5550_v4 = vpop.f32.mrf.mxu2 }
 0x5be   :  { %v7213_v2 = vmax.f32 %v6140_v27, 0.0  ;;  %v4338_v3 = vpop.f32.mrf.mxu0  ;;  %v4958_v11 = vpop.f32.mrf.mxu1  ;;  %v6977_v61 = vmax.f32 %v5550_v4, 0.0 }
 0x5bf   :  { %v6492_v41 = vmax.f32 %v4338_v3, 0.0  ;;  %v6740_v34 = vmax.f32 %v4958_v11, 0.0  ;;  %v8035_v11 = vadd.f32 %v8034_v25, %v6976_v26  ;;  %v12677_v25 = vld [vmem:[%s15266_s0 + $0xe20] sm:$0xff] }
 0x5c0   :  { %v8307_v13 = vadd.f32 %v8306_v28, %v7213_v2 }
 0x5c1   :  { %v7476_v35 = vadd.f32 %v7475_v42, %v6492_v41  ;;  %v7759_v51 = vadd.f32 %v7758_v10, %v6740_v34  ;;  %4377 = vmatmul.bf16.gmra.mxu0 %v12315_v43  ;;  %4997 = vmatmul.bf16.gmra.mxu1 %v12439_v62  ;;  %v8036_v42 = vadd.f32 %v8035_v11, %v6977_v61  ;;  %v12316_v43 = vld [vmem:[%s15266_s0 + $0x2d8] sm:$0xff]  ;;  %v12559_v41 = vld [vmem:[%s15266_s0 + $0xa70] sm:$0xff] }
 0x5c2   :  { %6182 = vmatmul.bf16.gmra.mxu3 %v12676_v45  ;;  %5592 = vmatmul.bf16.gmra.mxu2 %v12558_v44  ;;  %v12440_v62 = vld [vmem:[%s15266_s0 + $0x6b8] sm:$0xff] }
 0x5c5   :  { %v6143_v18 = vpop.f32.mrf.mxu3  ;;  %v5553_v49 = vpop.f32.mrf.mxu2 }
 0x5c6   :  { %v7214_v50 = vmax.f32 %v6143_v18, 0.0  ;;  %v4340_v60 = vpop.f32.mrf.mxu0  ;;  %v4960_v59 = vpop.f32.mrf.mxu1  ;;  %v6978_v28 = vmax.f32 %v5553_v49, 0.0 }
 0x5c7   :  { %v6493_v39 = vmax.f32 %v4340_v60, 0.0  ;;  %v6741_v29 = vmax.f32 %v4960_v59, 0.0 }
 0x5c8   :  { %v8308_v27 = vadd.f32 %v8307_v13, %v7214_v50  ;;  %v8037_v2 = vadd.f32 %v8036_v42, %v6978_v28 }
 0x5c9   :  { %v7477_v30 = vadd.f32 %v7476_v35, %v6493_v39  ;;  %v7760_v3 = vadd.f32 %v7759_v51, %v6741_v29 }
 0x5cd   :  { %v6145_v10 = vpop.f32.mrf.mxu3  ;;  %v5555_v45 = vpop.f32.mrf.mxu2 }
 0x5ce   :  { %v7215_v44 = vmax.f32 %v6145_v10, 0.0  ;;  %v4343_v12 = vpop.f32.mrf.mxu0  ;;  %v4963_v4 = vpop.f32.mrf.mxu1  ;;  %v6979_v49 = vmax.f32 %v5555_v45, 0.0 }
 0x5cf   :  { %v6494_v34 = vmax.f32 %v4343_v12, 0.0  ;;  %v6742_v13 = vmax.f32 %v4963_v4, 0.0  ;;  %v12678_v4 = vld [vmem:[%s15266_s0 + $0xe28] sm:$0xff] }
 0x5d0   :  { %v8309_v35 = vadd.f32 %v8308_v27, %v7215_v44  ;;  %v8038_v50 = vadd.f32 %v8037_v2, %v6979_v49 }
 0x5d1   :  { %v7478_v51 = vadd.f32 %v7477_v30, %v6494_v34  ;;  %v7761_v18 = vadd.f32 %v7760_v3, %v6742_v13  ;;  %4382 = vmatmul.bf16.gmra.mxu0 %v12316_v43  ;;  %5002 = vmatmul.bf16.gmra.mxu1 %v12440_v62  ;;  %v12317_v43 = vld [vmem:[%s15266_s0 + $0x2e0] sm:$0xff] }
 0x5d2   :  { %6187 = vmatmul.bf16.gmra.mxu3 %v12677_v25  ;;  %5597 = vmatmul.bf16.gmra.mxu2 %v12559_v41  ;;  %v12441_v62 = vld [vmem:[%s15266_s0 + $0x6c0] sm:$0xff]  ;;  %v12560_v25 = vld [vmem:[%s15266_s0 + $0xa78] sm:$0xff] }
 0x5d5   :  { %v6148_v60 = vpop.f32.mrf.mxu3  ;;  %v5558_v59 = vpop.f32.mrf.mxu2 }
 0x5d6   :  { %v7216_v39 = vmax.f32 %v6148_v60, 0.0  ;;  %v4345_v29 = vpop.f32.mrf.mxu0  ;;  %v4965_v26 = vpop.f32.mrf.mxu1  ;;  %v6980_v27 = vmax.f32 %v5558_v59, 0.0 }
 0x5d7   :  { %v6495_v61 = vmax.f32 %v4345_v29, 0.0  ;;  %v6743_v11 = vmax.f32 %v4965_v26, 0.0 }
 0x5d8   :  { %v8310_v28 = vadd.f32 %v8309_v35, %v7216_v39  ;;  %v8039_v30 = vadd.f32 %v8038_v50, %v6980_v27 }
 0x5d9   :  { %v7479_v42 = vadd.f32 %v7478_v51, %v6495_v61  ;;  %v14051_v10 = vadd.f32 %v7761_v18, %v6743_v11 }
 0x5dd   :  { %v6150_v3 = vpop.f32.mrf.mxu3  ;;  %v5560_v2 = vpop.f32.mrf.mxu2 }
 0x5de   :  { %v7217_v45 = vmax.f32 %v6150_v3, 0.0  ;;  %v4348_v44 = vpop.f32.mrf.mxu0  ;;  %v4968_v12 = vpop.f32.mrf.mxu1  ;;  %v6981_v35 = vmax.f32 %v5560_v2, 0.0 }
 0x5df   :  { %v6496_v41 = vmax.f32 %v4348_v44, 0.0  ;;  %v6744_v18 = vmax.f32 %v4968_v12, 0.0  ;;  %v12679_v12 = vld [vmem:[%s15266_s0 + $0xe30] sm:$0xff] }
 0x5e0   :  { %v8311_v34 = vadd.f32 %v8310_v28, %v7217_v45  ;;  %v8040_v51 = vadd.f32 %v8039_v30, %v6981_v35  ;;  %v12442_v30 = vld [vmem:[%s15266_s0 + $0x6c8] sm:$0xff] }
 0x5e1   :  { %v7480_v13 = vadd.f32 %v7479_v42, %v6496_v41  ;;  %4387 = vmatmul.bf16.gmra.mxu0 %v12317_v43  ;;  %5007 = vmatmul.bf16.gmra.mxu1 %v12441_v62  ;;  %v12318_v43 = vld [vmem:[%s15266_s0 + $0x2e8] sm:$0xff] }
 0x5e2   :  { %6192 = vmatmul.bf16.gmra.mxu3 %v12678_v4  ;;  %5602 = vmatmul.bf16.gmra.mxu2 %v12560_v25  ;;  %v12561_v4 = vld [vmem:[%s15266_s0 + $0xa80] sm:$0xff] }
 0x5e5   :  { %v6153_v49 = vpop.f32.mrf.mxu3  ;;  %v5563_v50 = vpop.f32.mrf.mxu2 }
 0x5e6   :  { %v7218_v60 = vmax.f32 %v6153_v49, 0.0  ;;  %v4350_v59 = vpop.f32.mrf.mxu0  ;;  %v4970_v39 = vpop.f32.mrf.mxu1  ;;  %v6982_v3 = vmax.f32 %v5563_v50, 0.0 }
 0x5e7   :  { %v6497_v29 = vmax.f32 %v4350_v59, 0.0  ;;  %v6745_v26 = vmax.f32 %v4970_v39, 0.0 }
 0x5e8   :  { %v8312_v61 = vadd.f32 %v8311_v34, %v7218_v60  ;;  %v8041_v28 = vadd.f32 %v8040_v51, %v6982_v3 }
 0x5e9   :  { %v7481_v11 = vadd.f32 %v7480_v13, %v6497_v29  ;;  %v7769_v27 = vadd.f32 %v6745_v26, %v6744_v18 }
 0x5ed   :  { %v6155_v42 = vpop.f32.mrf.mxu3  ;;  %v5565_v62 = vpop.f32.mrf.mxu2 }
 0x5ee   :  { %v7219_v2 = vmax.f32 %v6155_v42, 0.0  ;;  %v4353_v45 = vpop.f32.mrf.mxu0  ;;  %v4973_v44 = vpop.f32.mrf.mxu1 }
 0x5ef   :  { %v6498_v25 = vmax.f32 %v4353_v45, 0.0  ;;  %v6746_v41 = vmax.f32 %v4973_v44, 0.0  ;;  %v12680_v45 = vld [vmem:[%s15266_s0 + $0xe38] sm:$0xff]  ;;  %v6983_v44 = vmax.f32 %v5565_v62, 0.0 }
 0x5f0   :  { %v8313_v34 = vadd.f32 %v8312_v61, %v7219_v2  ;;  %v12319_v61 = vld [vmem:[%s15266_s0 + $0x2f0] sm:$0xff] }
 0x5f1   :  { %v7482_v13 = vadd.f32 %v7481_v11, %v6498_v25  ;;  %v7770_v35 = vadd.f32 %v7769_v27, %v6746_v41  ;;  %4392 = vmatmul.bf16.gmra.mxu0 %v12318_v43  ;;  %5012 = vmatmul.bf16.gmra.mxu1 %v12442_v30  ;;  %v12443_v11 = vld [vmem:[%s15266_s0 + $0x6d0] sm:$0xff] }
 0x5f2   :  { %6197 = vmatmul.bf16.gmra.mxu3 %v12679_v12  ;;  %5607 = vmatmul.bf16.gmra.mxu2 %v12561_v4  ;;  %v12562_v4 = vld [vmem:[%s15266_s0 + $0xa88] sm:$0xff] }
 0x5f5   :  { %v6158_v51 = vpop.f32.mrf.mxu3  ;;  %v5568_v18 = vpop.f32.mrf.mxu2 }
 0x5f6   :  { %v7220_v49 = vmax.f32 %v6158_v51, 0.0  ;;  %v4355_v50 = vpop.f32.mrf.mxu0  ;;  %v4975_v60 = vpop.f32.mrf.mxu1  ;;  %v6984_v12 = vmax.f32 %v5568_v18, 0.0 }
 0x5f7   :  { %v6499_v59 = vmax.f32 %v4355_v50, 0.0  ;;  %v6747_v39 = vmax.f32 %v4975_v60, 0.0 }
 0x5f8   :  { %v8314_v29 = vadd.f32 %v8313_v34, %v7220_v49 }
 0x5f9   :  { %v7483_v26 = vadd.f32 %v7482_v13, %v6499_v59  ;;  %v7771_v3 = vadd.f32 %v7770_v35, %v6747_v39  ;;  %v8042_v13 = vadd.f32 %v8041_v28, %v6983_v44 }
 0x5fb   :  { %v8043_v49 = vadd.f32 %v8042_v13, %v6984_v12 }
 0x5fd   :  { %v6160_v42 = vpop.f32.mrf.mxu3  ;;  %v5570_v27 = vpop.f32.mrf.mxu2 }
 0x5fe   :  { %v7221_v43 = vmax.f32 %v6160_v42, 0.0  ;;  %v4358_v30 = vpop.f32.mrf.mxu0  ;;  %v4978_v2 = vpop.f32.mrf.mxu1  ;;  %v6985_v50 = vmax.f32 %v5570_v27, 0.0 }
 0x5ff   :  { %v6500_v25 = vmax.f32 %v4358_v30, 0.0  ;;  %v6748_v41 = vmax.f32 %v4978_v2, 0.0 }
 0x600   :  { %v8315_v34 = vadd.f32 %v8314_v29, %v7221_v43  ;;  %v8044_v60 = vadd.f32 %v8043_v49, %v6985_v50 }
 0x601   :  { %v7484_v35 = vadd.f32 %v7483_v26, %v6500_v25  ;;  %v7772_v51 = vadd.f32 %v7771_v3, %v6748_v41  ;;  %4397 = vmatmul.bf16.gmra.mxu0 %v12319_v61  ;;  %5017 = vmatmul.bf16.gmra.mxu1 %v12443_v11  ;;  %v12320_v61 = vld [vmem:[%s15266_s0 + $0x2f8] sm:$0xff] }
 0x602   :  { %6202 = vmatmul.bf16.gmra.mxu3 %v12680_v45  ;;  %5612 = vmatmul.bf16.gmra.mxu2 %v12562_v4  ;;  %v12444_v11 = vld [vmem:[%s15266_s0 + $0x6d8] sm:$0xff] }
 0x605   :  { %v6163_v59 = vpop.f32.mrf.mxu3  ;;  %v5573_v62 = vpop.f32.mrf.mxu2 }
 0x606   :  { %v7222_v18 = vmax.f32 %v6163_v59, 0.0  ;;  %v4360_v39 = vpop.f32.mrf.mxu0  ;;  %v4980_v42 = vpop.f32.mrf.mxu1  ;;  %v6986_v28 = vmax.f32 %v5573_v62, 0.0 }
 0x607   :  { %v6501_v57 = vmax.f32 %v4360_v39, 0.0  ;;  %v6749_v38 = vmax.f32 %v4980_v42, 0.0 }
 0x608   :  { %v8316_v30 = vadd.f32 %v8315_v34, %v7222_v18  ;;  %v8045_v26 = vadd.f32 %v8044_v60, %v6986_v28 }
 0x609   :  { %v7485_v2 = vadd.f32 %v7484_v35, %v6501_v57  ;;  %v7773_v29 = vadd.f32 %v7772_v51, %v6749_v38  ;;  %v12681_v57 = vld [vmem:[%s15266_s0 + $0xe40] sm:$0xff]  ;;  %v12563_v38 = vld [vmem:[%s15266_s0 + $0xa90] sm:$0xff] }
 0x60d   :  { %v6165_v3 = vpop.f32.mrf.mxu3  ;;  %v5575_v27 = vpop.f32.mrf.mxu2 }
 0x60e   :  { %v7223_v43 = vmax.f32 %v6165_v3, 0.0  ;;  %v4363_v45 = vpop.f32.mrf.mxu0  ;;  %v4983_v44 = vpop.f32.mrf.mxu1  ;;  %v6987_v13 = vmax.f32 %v5575_v27, 0.0 }
 0x60f   :  { %v6502_v12 = vmax.f32 %v4363_v45, 0.0  ;;  %v6750_v4 = vmax.f32 %v4983_v44, 0.0  ;;  %v12564_v45 = vld [vmem:[%s15266_s0 + $0xa98] sm:$0xff] }
 0x610   :  { %v14101_v25 = vadd.f32 %v8316_v30, %v7223_v43  ;;  %v8046_v35 = vadd.f32 %v8045_v26, %v6987_v13  ;;  %v12682_v43 = vld [vmem:[%s15266_s0 + $0xe48] sm:$0xff] }
 0x611   :  { %v7486_v41 = vadd.f32 %v7485_v2, %v6502_v12  ;;  %v7774_v34 = vadd.f32 %v7773_v29, %v6750_v4  ;;  %4402 = vmatmul.bf16.gmra.mxu0 %v12320_v61  ;;  %5022 = vmatmul.bf16.gmra.mxu1 %v12444_v11  ;;  %v12321_v2 = vld [vmem:[%s15266_s0 + $0x300] sm:$0xff] }
 0x612   :  { %6207 = vmatmul.bf16.gmra.mxu3 %v12681_v57  ;;  %5617 = vmatmul.bf16.gmra.mxu2 %v12563_v38  ;;  %v12445_v29 = vld [vmem:[%s15266_s0 + $0x6e0] sm:$0xff] }
 0x615   :  { %v6168_v51 = vpop.f32.mrf.mxu3  ;;  %v5578_v49 = vpop.f32.mrf.mxu2 }
 0x616   :  { %v4365_v50 = vpop.f32.mrf.mxu0  ;;  %v4985_v60 = vpop.f32.mrf.mxu1  ;;  %v6988_v42 = vmax.f32 %v5578_v49, 0.0  ;;  %v7224_v30 = vmax.f32 %v6168_v51, 0.0 }
 0x617   :  { %v6503_v59 = vmax.f32 %v4365_v50, 0.0  ;;  %v6751_v62 = vmax.f32 %v4985_v60, 0.0 }
 0x618   :  { %v8047_v28 = vadd.f32 %v8046_v35, %v6988_v42 }
 0x619   :  { %v7487_v18 = vadd.f32 %v7486_v41, %v6503_v59  ;;  %v7775_v39 = vadd.f32 %v7774_v34, %v6751_v62 }
 0x61d   :  { %v6170_v3 = vpop.f32.mrf.mxu3  ;;  %v5580_v26 = vpop.f32.mrf.mxu2 }
 0x61e   :  { %v7225_v61 = vmax.f32 %v6170_v3, 0.0  ;;  %v4368_v11 = vpop.f32.mrf.mxu0  ;;  %v4988_v27 = vpop.f32.mrf.mxu1  ;;  %v6989_v41 = vmax.f32 %v5580_v26, 0.0 }
 0x61f   :  { %v6504_v44 = vmax.f32 %v4368_v11, 0.0  ;;  %v6752_v57 = vmax.f32 %v4988_v27, 0.0  ;;  %v12683_v27 = vld [vmem:[%s15266_s0 + $0xe50] sm:$0xff] }
 0x620   :  { %v8324_v38 = vadd.f32 %v7225_v61, %v7224_v30  ;;  %v8048_v34 = vadd.f32 %v8047_v28, %v6989_v41  ;;  %v12446_v28 = vld [vmem:[%s15266_s0 + $0x6e8] sm:$0xff] }
 0x621   :  { %v7488_v12 = vadd.f32 %v7487_v18, %v6504_v44  ;;  %v7776_v4 = vadd.f32 %v7775_v39, %v6752_v57  ;;  %4407 = vmatmul.bf16.gmra.mxu0 %v12321_v2  ;;  %5027 = vmatmul.bf16.gmra.mxu1 %v12445_v29  ;;  %v12322_v39 = vld [vmem:[%s15266_s0 + $0x308] sm:$0xff] }
 0x622   :  { %6212 = vmatmul.bf16.gmra.mxu3 %v12682_v43  ;;  %5622 = vmatmul.bf16.gmra.mxu2 %v12564_v45  ;;  %v12565_v43 = vld [vmem:[%s15266_s0 + $0xaa0] sm:$0xff] }
 0x625   :  { %v6173_v13 = vpop.f32.mrf.mxu3  ;;  %v5583_v35 = vpop.f32.mrf.mxu2 }
 0x626   :  { %v7226_v51 = vmax.f32 %v6173_v13, 0.0  ;;  %v4370_v49 = vpop.f32.mrf.mxu0  ;;  %v4990_v50 = vpop.f32.mrf.mxu1  ;;  %v6990_v11 = vmax.f32 %v5583_v35, 0.0 }
 0x627   :  { %v6505_v60 = vmax.f32 %v4370_v49, 0.0  ;;  %v6753_v59 = vmax.f32 %v4990_v50, 0.0 }
 0x628   :  { %v8325_v62 = vadd.f32 %v8324_v38, %v7226_v51  ;;  %v8049_v30 = vadd.f32 %v8048_v34, %v6990_v11 }
 0x629   :  { %v7489_v42 = vadd.f32 %v7488_v12, %v6505_v60  ;;  %v7777_v3 = vadd.f32 %v7776_v4, %v6753_v59 }
 0x62d   :  { %v6175_v18 = vpop.f32.mrf.mxu3  ;;  %v5585_v2 = vpop.f32.mrf.mxu2 }
 0x62e   :  { %v7227_v29 = vmax.f32 %v6175_v18, 0.0  ;;  %v4373_v26 = vpop.f32.mrf.mxu0  ;;  %v4993_v61 = vpop.f32.mrf.mxu1  ;;  %v6991_v4 = vmax.f32 %v5585_v2, 0.0 }
 0x62f   :  { %v6506_v45 = vmax.f32 %v4373_v26, 0.0  ;;  %v6754_v44 = vmax.f32 %v4993_v61, 0.0  ;;  %v12684_v61 = vld [vmem:[%s15266_s0 + $0xe58] sm:$0xff] }
 0x630   :  { %v8326_v57 = vadd.f32 %v8325_v62, %v7227_v29  ;;  %v8050_v41 = vadd.f32 %v8049_v30, %v6991_v4  ;;  %v12447_v30 = vld [vmem:[%s15266_s0 + $0x6f0] sm:$0xff] }
 0x631   :  { %v7490_v38 = vadd.f32 %v7489_v42, %v6506_v45  ;;  %v7778_v12 = vadd.f32 %v7777_v3, %v6754_v44  ;;  %4412 = vmatmul.bf16.gmra.mxu0 %v12322_v39  ;;  %5032 = vmatmul.bf16.gmra.mxu1 %v12446_v28  ;;  %v12323_v3 = vld [vmem:[%s15266_s0 + $0x310] sm:$0xff] }
 0x632   :  { %6217 = vmatmul.bf16.gmra.mxu3 %v12683_v27  ;;  %5627 = vmatmul.bf16.gmra.mxu2 %v12565_v43  ;;  %v12566_v27 = vld [vmem:[%s15266_s0 + $0xaa8] sm:$0xff] }
 0x635   :  { %v6178_v34 = vpop.f32.mrf.mxu3  ;;  %v5588_v13 = vpop.f32.mrf.mxu2 }
 0x636   :  { %v7228_v35 = vmax.f32 %v6178_v34, 0.0  ;;  %v4375_v51 = vpop.f32.mrf.mxu0  ;;  %v4995_v49 = vpop.f32.mrf.mxu1  ;;  %v6992_v26 = vmax.f32 %v5588_v13, 0.0 }
 0x637   :  { %v6507_v50 = vmax.f32 %v4375_v51, 0.0  ;;  %v6755_v60 = vmax.f32 %v4995_v49, 0.0 }
 0x638   :  { %v8327_v59 = vadd.f32 %v8326_v57, %v7228_v35  ;;  %v8051_v62 = vadd.f32 %v8050_v41, %v6992_v26 }
 0x639   :  { %v7491_v11 = vadd.f32 %v7490_v38, %v6507_v50  ;;  %v7779_v18 = vadd.f32 %v7778_v12, %v6755_v60 }
 0x63d   :  { %v6180_v42 = vpop.f32.mrf.mxu3  ;;  %v5590_v39 = vpop.f32.mrf.mxu2 }
 0x63e   :  { %v7229_v28 = vmax.f32 %v6180_v42, 0.0  ;;  %v4378_v2 = vpop.f32.mrf.mxu0  ;;  %v4998_v29 = vpop.f32.mrf.mxu1  ;;  %v6993_v12 = vmax.f32 %v5590_v39, 0.0 }
 0x63f   :  { %v6508_v43 = vmax.f32 %v4378_v2, 0.0  ;;  %v6756_v45 = vmax.f32 %v4998_v29, 0.0  ;;  %v12685_v29 = vld [vmem:[%s15266_s0 + $0xe60] sm:$0xff] }
 0x640   :  { %v8328_v44 = vadd.f32 %v8327_v59, %v7229_v28  ;;  %v8052_v4 = vadd.f32 %v8051_v62, %v6993_v12  ;;  %v12448_v62 = vld [vmem:[%s15266_s0 + $0x6f8] sm:$0xff] }
 0x641   :  { %v7492_v57 = vadd.f32 %v7491_v11, %v6508_v43  ;;  %v7780_v38 = vadd.f32 %v7779_v18, %v6756_v45  ;;  %4417 = vmatmul.bf16.gmra.mxu0 %v12323_v3  ;;  %5037 = vmatmul.bf16.gmra.mxu1 %v12447_v30  ;;  %v12324_v18 = vld [vmem:[%s15266_s0 + $0x318] sm:$0xff] }
 0x642   :  { %6222 = vmatmul.bf16.gmra.mxu3 %v12684_v61  ;;  %5632 = vmatmul.bf16.gmra.mxu2 %v12566_v27  ;;  %v12567_v61 = vld [vmem:[%s15266_s0 + $0xab0] sm:$0xff] }
 0x645   :  { %v6183_v41 = vpop.f32.mrf.mxu3  ;;  %v5593_v34 = vpop.f32.mrf.mxu2 }
 0x646   :  { %v7230_v13 = vmax.f32 %v6183_v41, 0.0  ;;  %v4380_v35 = vpop.f32.mrf.mxu0  ;;  %v5000_v51 = vpop.f32.mrf.mxu1  ;;  %v6994_v2 = vmax.f32 %v5593_v34, 0.0 }
 0x647   :  { %v6509_v49 = vmax.f32 %v4380_v35, 0.0  ;;  %v6757_v50 = vmax.f32 %v5000_v51, 0.0 }
 0x648   :  { %v8329_v60 = vadd.f32 %v8328_v44, %v7230_v13  ;;  %v8053_v59 = vadd.f32 %v8052_v4, %v6994_v2 }
 0x649   :  { %v7493_v26 = vadd.f32 %v7492_v57, %v6509_v49  ;;  %v7781_v42 = vadd.f32 %v7780_v38, %v6757_v50 }
 0x64d   :  { %v6185_v11 = vpop.f32.mrf.mxu3  ;;  %v5595_v3 = vpop.f32.mrf.mxu2 }
 0x64e   :  { %v7231_v30 = vmax.f32 %v6185_v11, 0.0  ;;  %v4383_v39 = vpop.f32.mrf.mxu0  ;;  %v5003_v28 = vpop.f32.mrf.mxu1  ;;  %v6995_v38 = vmax.f32 %v5595_v3, 0.0 }
 0x64f   :  { %v6510_v27 = vmax.f32 %v4383_v39, 0.0  ;;  %v6758_v43 = vmax.f32 %v5003_v28, 0.0  ;;  %v12686_v28 = vld [vmem:[%s15266_s0 + $0xe68] sm:$0xff] }
 0x650   :  { %v8330_v45 = vadd.f32 %v8329_v60, %v7231_v30  ;;  %v8054_v12 = vadd.f32 %v8053_v59, %v6995_v38  ;;  %v12449_v59 = vld [vmem:[%s15266_s0 + $0x700] sm:$0xff] }
 0x651   :  { %v7494_v44 = vadd.f32 %v7493_v26, %v6510_v27  ;;  %v7782_v57 = vadd.f32 %v7781_v42, %v6758_v43  ;;  %4422 = vmatmul.bf16.gmra.mxu0 %v12324_v18  ;;  %5042 = vmatmul.bf16.gmra.mxu1 %v12448_v62  ;;  %v12325_v42 = vld [vmem:[%s15266_s0 + $0x320] sm:$0xff] }
 0x652   :  { %6227 = vmatmul.bf16.gmra.mxu3 %v12685_v29  ;;  %5637 = vmatmul.bf16.gmra.mxu2 %v12567_v61  ;;  %v12568_v29 = vld [vmem:[%s15266_s0 + $0xab8] sm:$0xff] }
 0x655   :  { %v6188_v4 = vpop.f32.mrf.mxu3  ;;  %v5598_v41 = vpop.f32.mrf.mxu2 }
 0x656   :  { %v7232_v34 = vmax.f32 %v6188_v4, 0.0  ;;  %v4385_v13 = vpop.f32.mrf.mxu0  ;;  %v5005_v35 = vpop.f32.mrf.mxu1  ;;  %v6996_v39 = vmax.f32 %v5598_v41, 0.0 }
 0x657   :  { %v6511_v51 = vmax.f32 %v4385_v13, 0.0  ;;  %v6759_v49 = vmax.f32 %v5005_v35, 0.0 }
 0x658   :  { %v8331_v50 = vadd.f32 %v8330_v45, %v7232_v34  ;;  %v8055_v60 = vadd.f32 %v8054_v12, %v6996_v39 }
 0x659   :  { %v7495_v2 = vadd.f32 %v7494_v44, %v6511_v51  ;;  %v7783_v11 = vadd.f32 %v7782_v57, %v6759_v49 }
 0x65d   :  { %v6190_v26 = vpop.f32.mrf.mxu3  ;;  %v5600_v18 = vpop.f32.mrf.mxu2 }
 0x65e   :  { %v7233_v62 = vmax.f32 %v6190_v26, 0.0  ;;  %v4388_v3 = vpop.f32.mrf.mxu0  ;;  %v5008_v30 = vpop.f32.mrf.mxu1  ;;  %v6997_v57 = vmax.f32 %v5600_v18, 0.0 }
 0x65f   :  { %v6512_v61 = vmax.f32 %v4388_v3, 0.0  ;;  %v6760_v27 = vmax.f32 %v5008_v30, 0.0  ;;  %v12687_v30 = vld [vmem:[%s15266_s0 + $0xe70] sm:$0xff] }
 0x660   :  { %v8332_v43 = vadd.f32 %v8331_v50, %v7233_v62  ;;  %v8056_v38 = vadd.f32 %v8055_v60, %v6997_v57  ;;  %v12450_v60 = vld [vmem:[%s15266_s0 + $0x708] sm:$0xff] }
 0x661   :  { %v7496_v45 = vadd.f32 %v7495_v2, %v6512_v61  ;;  %v7784_v44 = vadd.f32 %v7783_v11, %v6760_v27  ;;  %4427 = vmatmul.bf16.gmra.mxu0 %v12325_v42  ;;  %5047 = vmatmul.bf16.gmra.mxu1 %v12449_v59  ;;  %v12326_v11 = vld [vmem:[%s15266_s0 + $0x328] sm:$0xff] }
 0x662   :  { %6232 = vmatmul.bf16.gmra.mxu3 %v12686_v28  ;;  %5642 = vmatmul.bf16.gmra.mxu2 %v12568_v29  ;;  %v12569_v28 = vld [vmem:[%s15266_s0 + $0xac0] sm:$0xff] }
 0x665   :  { %v6193_v12 = vpop.f32.mrf.mxu3  ;;  %v5603_v4 = vpop.f32.mrf.mxu2 }
 0x666   :  { %v7234_v41 = vmax.f32 %v6193_v12, 0.0  ;;  %v4390_v34 = vpop.f32.mrf.mxu0  ;;  %v5010_v13 = vpop.f32.mrf.mxu1  ;;  %v6998_v3 = vmax.f32 %v5603_v4, 0.0 }
 0x667   :  { %v6513_v35 = vmax.f32 %v4390_v34, 0.0  ;;  %v6761_v51 = vmax.f32 %v5010_v13, 0.0 }
 0x668   :  { %v8333_v49 = vadd.f32 %v8332_v43, %v7234_v41  ;;  %v8057_v50 = vadd.f32 %v8056_v38, %v6998_v3 }
 0x669   :  { %v7497_v39 = vadd.f32 %v7496_v45, %v6513_v35  ;;  %v7785_v26 = vadd.f32 %v7784_v44, %v6761_v51 }
 0x66d   :  { %v6195_v2 = vpop.f32.mrf.mxu3  ;;  %v5605_v42 = vpop.f32.mrf.mxu2 }
 0x66e   :  { %v7235_v59 = vmax.f32 %v6195_v2, 0.0  ;;  %v4393_v18 = vpop.f32.mrf.mxu0  ;;  %v5013_v62 = vpop.f32.mrf.mxu1  ;;  %v6999_v43 = vmax.f32 %v5605_v42, 0.0 }
 0x66f   :  { %v6514_v29 = vmax.f32 %v4393_v18, 0.0  ;;  %v6762_v61 = vmax.f32 %v5013_v62, 0.0  ;;  %v12570_v18 = vld [vmem:[%s15266_s0 + $0xac8] sm:$0xff] }
 0x670   :  { %v8334_v27 = vadd.f32 %v8333_v49, %v7235_v59  ;;  %v14175_v57 = vadd.f32 %v8057_v50, %v6999_v43  ;;  %v12688_v59 = vld [vmem:[%s15266_s0 + $0xe78] sm:$0xff] }
 0x671   :  { %v7498_v45 = vadd.f32 %v7497_v39, %v6514_v29  ;;  %v7786_v44 = vadd.f32 %v7785_v26, %v6762_v61  ;;  %4432 = vmatmul.bf16.gmra.mxu0 %v12326_v11  ;;  %5052 = vmatmul.bf16.gmra.mxu1 %v12450_v60  ;;  %v12327_v39 = vld [vmem:[%s15266_s0 + $0x330] sm:$0xff] }
 0x672   :  { %6237 = vmatmul.bf16.gmra.mxu3 %v12687_v30  ;;  %15328 = vst [vmem:[#allocation50_spill] sm:$0xff] %v14175_v57  ;;  %5647 = vmatmul.bf16.gmra.mxu2 %v12569_v28  ;;  %v12451_v26 = vld [vmem:[%s15266_s0 + $0x710] sm:$0xff] }
 0x675   :  { %v6198_v38 = vpop.f32.mrf.mxu3  ;;  %v5608_v12 = vpop.f32.mrf.mxu2 }
 0x676   :  { %v7236_v4 = vmax.f32 %v6198_v38, 0.0  ;;  %v4395_v41 = vpop.f32.mrf.mxu0  ;;  %v5015_v34 = vpop.f32.mrf.mxu1 }
 0x677   :  { %v6515_v13 = vmax.f32 %v4395_v41, 0.0  ;;  %v6763_v35 = vmax.f32 %v5015_v34, 0.0  ;;  %v7000_v34 = vmax.f32 %v5608_v12, 0.0 }
 0x678   :  { %v8335_v51 = vadd.f32 %v8334_v27, %v7236_v4 }
 0x679   :  { %v7499_v3 = vadd.f32 %v7498_v45, %v6515_v13  ;;  %v7787_v2 = vadd.f32 %v7786_v44, %v6763_v35 }
 0x67d   :  { %v6200_v49 = vpop.f32.mrf.mxu3  ;;  %v5610_v50 = vpop.f32.mrf.mxu2 }
 0x67e   :  { %v7237_v11 = vmax.f32 %v6200_v49, 0.0  ;;  %v4398_v60 = vpop.f32.mrf.mxu0  ;;  %v5018_v42 = vpop.f32.mrf.mxu1  ;;  %v7001_v13 = vmax.f32 %v5610_v50, 0.0  ;;  %v12689_v50 = vld [vmem:[%s15266_s0 + $0xe80] sm:$0xff] }
 0x67f   :  { %v6516_v62 = vmax.f32 %v4398_v60, 0.0  ;;  %v6764_v30 = vmax.f32 %v5018_v42, 0.0 }
 0x680   :  { %v8336_v28 = vadd.f32 %v8335_v51, %v7237_v11  ;;  %v8065_v42 = vadd.f32 %v7001_v13, %v7000_v34 }
 0x681   :  { %v7500_v29 = vadd.f32 %v7499_v3, %v6516_v62  ;;  %v7788_v61 = vadd.f32 %v7787_v2, %v6764_v30  ;;  %4437 = vmatmul.bf16.gmra.mxu0 %v12327_v39  ;;  %5057 = vmatmul.bf16.gmra.mxu1 %v12451_v26  ;;  %v12328_v39 = vld [vmem:[%s15266_s0 + $0x338] sm:$0xff]  ;;  %v12571_v62 = vld [vmem:[%s15266_s0 + $0xad0] sm:$0xff] }
 0x682   :  { %6242 = vmatmul.bf16.gmra.mxu3 %v12688_v59  ;;  %5652 = vmatmul.bf16.gmra.mxu2 %v12570_v18  ;;  %v12452_v26 = vld [vmem:[%s15266_s0 + $0x718] sm:$0xff] }
 0x685   :  { %v6203_v27 = vpop.f32.mrf.mxu3  ;;  %v5613_v43 = vpop.f32.mrf.mxu2 }
 0x686   :  { %v7238_v45 = vmax.f32 %v6203_v27, 0.0  ;;  %v4400_v44 = vpop.f32.mrf.mxu0  ;;  %v5020_v38 = vpop.f32.mrf.mxu1  ;;  %v7002_v51 = vmax.f32 %v5613_v43, 0.0 }
 0x687   :  { %v6517_v4 = vmax.f32 %v4400_v44, 0.0  ;;  %v6765_v41 = vmax.f32 %v5020_v38, 0.0 }
 0x688   :  { %v8337_v35 = vadd.f32 %v8336_v28, %v7238_v45  ;;  %v8066_v3 = vadd.f32 %v8065_v42, %v7002_v51 }
 0x689   :  { %v7501_v49 = vadd.f32 %v7500_v29, %v6517_v4  ;;  %v7789_v60 = vadd.f32 %v7788_v61, %v6765_v41 }
 0x68d   :  { %v6205_v2 = vpop.f32.mrf.mxu3  ;;  %v5615_v11 = vpop.f32.mrf.mxu2 }
 0x68e   :  { %v7239_v59 = vmax.f32 %v6205_v2, 0.0  ;;  %v4403_v18 = vpop.f32.mrf.mxu0  ;;  %v5023_v12 = vpop.f32.mrf.mxu1  ;;  %v7003_v43 = vmax.f32 %v5615_v11, 0.0 }
 0x68f   :  { %v6518_v30 = vmax.f32 %v4403_v18, 0.0  ;;  %v6766_v28 = vmax.f32 %v5023_v12, 0.0 }
 0x690   :  { %v8338_v29 = vadd.f32 %v8337_v35, %v7239_v59  ;;  %v8067_v45 = vadd.f32 %v8066_v3, %v7003_v43  ;;  %v12453_v3 = vld [vmem:[%s15266_s0 + $0x720] sm:$0xff] }
 0x691   :  { %v7502_v61 = vadd.f32 %v7501_v49, %v6518_v30  ;;  %v7790_v27 = vadd.f32 %v7789_v60, %v6766_v28  ;;  %4442 = vmatmul.bf16.gmra.mxu0 %v12328_v39  ;;  %5062 = vmatmul.bf16.gmra.mxu1 %v12452_v26  ;;  %v12329_v39 = vld [vmem:[%s15266_s0 + $0x340] sm:$0xff] }
 0x692   :  { %6247 = vmatmul.bf16.gmra.mxu3 %v12689_v50  ;;  %5657 = vmatmul.bf16.gmra.mxu2 %v12571_v62  ;;  %v12690_v50 = vld [vmem:[%s15266_s0 + $0xe88] sm:$0xff]  ;;  %v12572_v62 = vld [vmem:[%s15266_s0 + $0xad8] sm:$0xff] }
 0x695   :  { %v6208_v44 = vpop.f32.mrf.mxu3  ;;  %v5618_v38 = vpop.f32.mrf.mxu2 }
 0x696   :  { %v7240_v4 = vmax.f32 %v6208_v44, 0.0  ;;  %v4405_v41 = vpop.f32.mrf.mxu0  ;;  %v5025_v34 = vpop.f32.mrf.mxu1  ;;  %v7004_v35 = vmax.f32 %v5618_v38, 0.0 }
 0x697   :  { %v6519_v13 = vmax.f32 %v4405_v41, 0.0  ;;  %v6767_v42 = vmax.f32 %v5025_v34, 0.0 }
 0x698   :  { %v8339_v51 = vadd.f32 %v8338_v29, %v7240_v4  ;;  %v8068_v49 = vadd.f32 %v8067_v45, %v7004_v35 }
 0x699   :  { %v14201_v2 = vadd.f32 %v7502_v61, %v6519_v13  ;;  %v7791_v18 = vadd.f32 %v7790_v27, %v6767_v42 }
 0x69b   :  { %15329 = vst [vmem:[#allocation51_spill] sm:$0xff] %v14201_v2 }
 0x69d   :  { %v6210_v60 = vpop.f32.mrf.mxu3  ;;  %v5620_v26 = vpop.f32.mrf.mxu2 }
 0x69e   :  { %v7241_v11 = vmax.f32 %v6210_v60, 0.0  ;;  %v4408_v59 = vpop.f32.mrf.mxu0  ;;  %v5028_v12 = vpop.f32.mrf.mxu1  ;;  %v7005_v61 = vmax.f32 %v5620_v26, 0.0 }
 0x69f   :  { %v6768_v30 = vmax.f32 %v5028_v12, 0.0  ;;  %v6520_v41 = vmax.f32 %v4408_v59, 0.0 }
 0x6a0   :  { %v8340_v28 = vadd.f32 %v8339_v51, %v7241_v11  ;;  %v8069_v27 = vadd.f32 %v8068_v49, %v7005_v61  ;;  %v12454_v49 = vld [vmem:[%s15266_s0 + $0x728] sm:$0xff] }
 0x6a1   :  { %v7792_v29 = vadd.f32 %v7791_v18, %v6768_v30  ;;  %4447 = vmatmul.bf16.gmra.mxu0 %v12329_v39  ;;  %5067 = vmatmul.bf16.gmra.mxu1 %v12453_v3  ;;  %v12330_v39 = vld [vmem:[%s15266_s0 + $0x348] sm:$0xff] }
 0x6a2   :  { %6252 = vmatmul.bf16.gmra.mxu3 %v12690_v50  ;;  %5662 = vmatmul.bf16.gmra.mxu2 %v12572_v62  ;;  %v12691_v50 = vld [vmem:[%s15266_s0 + $0xe90] sm:$0xff]  ;;  %v12573_v62 = vld [vmem:[%s15266_s0 + $0xae0] sm:$0xff] }
 0x6a5   :  { %v6213_v43 = vpop.f32.mrf.mxu3  ;;  %v5623_v45 = vpop.f32.mrf.mxu2 }
 0x6a6   :  { %v7242_v44 = vmax.f32 %v6213_v43, 0.0  ;;  %v4410_v38 = vpop.f32.mrf.mxu0  ;;  %v5030_v4 = vpop.f32.mrf.mxu1  ;;  %v7006_v12 = vmax.f32 %v5623_v45, 0.0 }
 0x6a7   :  { %v6521_v34 = vmax.f32 %v4410_v38, 0.0  ;;  %v6769_v13 = vmax.f32 %v5030_v4, 0.0 }
 0x6a8   :  { %v8341_v42 = vadd.f32 %v8340_v28, %v7242_v44  ;;  %v8070_v51 = vadd.f32 %v8069_v27, %v7006_v12 }
 0x6a9   :  { %v7510_v35 = vadd.f32 %v6521_v34, %v6520_v41  ;;  %v7793_v60 = vadd.f32 %v7792_v29, %v6769_v13 }
 0x6ad   :  { %v6215_v18 = vpop.f32.mrf.mxu3  ;;  %v5625_v3 = vpop.f32.mrf.mxu2 }
 0x6ae   :  { %v7243_v26 = vmax.f32 %v6215_v18, 0.0  ;;  %v4413_v11 = vpop.f32.mrf.mxu0  ;;  %v5033_v59 = vpop.f32.mrf.mxu1  ;;  %v7007_v43 = vmax.f32 %v5625_v3, 0.0  ;;  %v12692_v3 = vld [vmem:[%s15266_s0 + $0xe98] sm:$0xff] }
 0x6af   :  { %v6522_v30 = vmax.f32 %v4413_v11, 0.0  ;;  %v6770_v28 = vmax.f32 %v5033_v59, 0.0 }
 0x6b0   :  { %v8342_v29 = vadd.f32 %v8341_v42, %v7243_v26  ;;  %v8071_v45 = vadd.f32 %v8070_v51, %v7007_v43  ;;  %v12331_v42 = vld [vmem:[%s15266_s0 + $0x350] sm:$0xff]  ;;  %v12574_v26 = vld [vmem:[%s15266_s0 + $0xae8] sm:$0xff] }
 0x6b1   :  { %v7511_v61 = vadd.f32 %v7510_v35, %v6522_v30  ;;  %v7794_v27 = vadd.f32 %v7793_v60, %v6770_v28  ;;  %4452 = vmatmul.bf16.gmra.mxu0 %v12330_v39  ;;  %5072 = vmatmul.bf16.gmra.mxu1 %v12454_v49  ;;  %v12455_v35 = vld [vmem:[%s15266_s0 + $0x730] sm:$0xff] }
 0x6b2   :  { %6257 = vmatmul.bf16.gmra.mxu3 %v12691_v50  ;;  %5667 = vmatmul.bf16.gmra.mxu2 %v12573_v62 }
 0x6b5   :  { %v6218_v44 = vpop.f32.mrf.mxu3  ;;  %v5628_v38 = vpop.f32.mrf.mxu2 }
 0x6b6   :  { %v7244_v4 = vmax.f32 %v6218_v44, 0.0  ;;  %v4415_v41 = vpop.f32.mrf.mxu0  ;;  %v5035_v34 = vpop.f32.mrf.mxu1 }
 0x6b7   :  { %v6523_v13 = vmax.f32 %v4415_v41, 0.0  ;;  %v6771_v12 = vmax.f32 %v5035_v34, 0.0 }
 0x6b8   :  { %v8343_v18 = vadd.f32 %v8342_v29, %v7244_v4 }
 0x6b9   :  { %v7512_v2 = vadd.f32 %v7511_v61, %v6523_v13  ;;  %v7795_v11 = vadd.f32 %v7794_v27, %v6771_v12  ;;  %v7008_v13 = vmax.f32 %v5628_v38, 0.0 }
 0x6bd   :  { %v6220_v59 = vpop.f32.mrf.mxu3  ;;  %v5630_v60 = vpop.f32.mrf.mxu2 }
 0x6be   :  { %v7245_v51 = vmax.f32 %v6220_v59, 0.0  ;;  %v4418_v39 = vpop.f32.mrf.mxu0  ;;  %v5038_v49 = vpop.f32.mrf.mxu1  ;;  %v7009_v12 = vmax.f32 %v5630_v60, 0.0 }
 0x6bf   :  { %v6524_v50 = vmax.f32 %v4418_v39, 0.0  ;;  %v6772_v62 = vmax.f32 %v5038_v49, 0.0  ;;  %v8072_v49 = vadd.f32 %v8071_v45, %v7008_v13  ;;  %v12693_v45 = vld [vmem:[%s15266_s0 + $0xea0] sm:$0xff] }
 0x6c0   :  { %v8344_v30 = vadd.f32 %v8343_v18, %v7245_v51 }
 0x6c1   :  { %v7513_v28 = vadd.f32 %v7512_v2, %v6524_v50  ;;  %v7796_v29 = vadd.f32 %v7795_v11, %v6772_v62  ;;  %4457 = vmatmul.bf16.gmra.mxu0 %v12331_v42  ;;  %5077 = vmatmul.bf16.gmra.mxu1 %v12455_v35  ;;  %v8073_v2 = vadd.f32 %v8072_v49, %v7009_v12  ;;  %v12332_v42 = vld [vmem:[%s15266_s0 + $0x358] sm:$0xff]  ;;  %v12575_v50 = vld [vmem:[%s15266_s0 + $0xaf0] sm:$0xff] }
 0x6c2   :  { %6262 = vmatmul.bf16.gmra.mxu3 %v12692_v3  ;;  %5672 = vmatmul.bf16.gmra.mxu2 %v12574_v26  ;;  %v12456_v35 = vld [vmem:[%s15266_s0 + $0x738] sm:$0xff] }
 0x6c5   :  { %v6223_v61 = vpop.f32.mrf.mxu3  ;;  %v5633_v27 = vpop.f32.mrf.mxu2 }
 0x6c6   :  { %v7246_v43 = vmax.f32 %v6223_v61, 0.0  ;;  %v4420_v44 = vpop.f32.mrf.mxu0  ;;  %v5040_v4 = vpop.f32.mrf.mxu1  ;;  %v7010_v18 = vmax.f32 %v5633_v27, 0.0 }
 0x6c7   :  { %v6525_v41 = vmax.f32 %v4420_v44, 0.0  ;;  %v6773_v34 = vmax.f32 %v5040_v4, 0.0 }
 0x6c8   :  { %v8345_v59 = vadd.f32 %v8344_v30, %v7246_v43  ;;  %v8074_v51 = vadd.f32 %v8073_v2, %v7010_v18 }
 0x6c9   :  { %v7514_v57 = vadd.f32 %v7513_v28, %v6525_v41  ;;  %v7797_v39 = vadd.f32 %v7796_v29, %v6773_v34 }
 0x6cd   :  { %v6225_v11 = vpop.f32.mrf.mxu3  ;;  %v5635_v3 = vpop.f32.mrf.mxu2 }
 0x6ce   :  { %v7247_v26 = vmax.f32 %v6225_v11, 0.0  ;;  %v4423_v38 = vpop.f32.mrf.mxu0  ;;  %v5043_v60 = vpop.f32.mrf.mxu1  ;;  %v7011_v27 = vmax.f32 %v5635_v3, 0.0 }
 0x6cf   :  { %v6526_v62 = vmax.f32 %v4423_v38, 0.0  ;;  %v6774_v30 = vmax.f32 %v5043_v60, 0.0  ;;  %v12694_v60 = vld [vmem:[%s15266_s0 + $0xea8] sm:$0xff] }
 0x6d0   :  { %v8346_v28 = vadd.f32 %v8345_v59, %v7247_v26  ;;  %v8075_v43 = vadd.f32 %v8074_v51, %v7011_v27 }
 0x6d1   :  { %v7515_v29 = vadd.f32 %v7514_v57, %v6526_v62  ;;  %v7798_v61 = vadd.f32 %v7797_v39, %v6774_v30  ;;  %4462 = vmatmul.bf16.gmra.mxu0 %v12332_v42  ;;  %5082 = vmatmul.bf16.gmra.mxu1 %v12456_v35  ;;  %v12333_v42 = vld [vmem:[%s15266_s0 + $0x360] sm:$0xff] }
 0x6d2   :  { %6267 = vmatmul.bf16.gmra.mxu3 %v12693_v45  ;;  %5677 = vmatmul.bf16.gmra.mxu2 %v12575_v50  ;;  %v12457_v35 = vld [vmem:[%s15266_s0 + $0x740] sm:$0xff]  ;;  %v12576_v45 = vld [vmem:[%s15266_s0 + $0xaf8] sm:$0xff] }
 0x6d5   :  { %v6228_v44 = vpop.f32.mrf.mxu3  ;;  %v5638_v4 = vpop.f32.mrf.mxu2 }
 0x6d6   :  { %v7248_v41 = vmax.f32 %v6228_v44, 0.0  ;;  %v4425_v34 = vpop.f32.mrf.mxu0  ;;  %v5045_v13 = vpop.f32.mrf.mxu1  ;;  %v7012_v59 = vmax.f32 %v5638_v4, 0.0 }
 0x6d7   :  { %v6527_v12 = vmax.f32 %v4425_v34, 0.0  ;;  %v6775_v49 = vmax.f32 %v5045_v13, 0.0 }
 0x6d8   :  { %v8347_v18 = vadd.f32 %v8346_v28, %v7248_v41  ;;  %v8076_v57 = vadd.f32 %v8075_v43, %v7012_v59 }
 0x6d9   :  { %v7516_v2 = vadd.f32 %v7515_v29, %v6527_v12  ;;  %v14251_v11 = vadd.f32 %v7798_v61, %v6775_v49 }
 0x6dd   :  { %v6230_v39 = vpop.f32.mrf.mxu3  ;;  %v5640_v51 = vpop.f32.mrf.mxu2 }
 0x6de   :  { %v7249_v3 = vmax.f32 %v6230_v39, 0.0  ;;  %v4428_v26 = vpop.f32.mrf.mxu0  ;;  %v5048_v38 = vpop.f32.mrf.mxu1  ;;  %v7013_v28 = vmax.f32 %v5640_v51, 0.0 }
 0x6df   :  { %v6528_v50 = vmax.f32 %v4428_v26, 0.0  ;;  %v6776_v61 = vmax.f32 %v5048_v38, 0.0  ;;  %v12695_v38 = vld [vmem:[%s15266_s0 + $0xeb0] sm:$0xff] }
 0x6e0   :  { %v8348_v62 = vadd.f32 %v8347_v18, %v7249_v3  ;;  %v8077_v29 = vadd.f32 %v8076_v57, %v7013_v28  ;;  %v12458_v57 = vld [vmem:[%s15266_s0 + $0x748] sm:$0xff] }
 0x6e1   :  { %v7517_v30 = vadd.f32 %v7516_v2, %v6528_v50  ;;  %4467 = vmatmul.bf16.gmra.mxu0 %v12333_v42  ;;  %5087 = vmatmul.bf16.gmra.mxu1 %v12457_v35  ;;  %v12334_v42 = vld [vmem:[%s15266_s0 + $0x368] sm:$0xff] }
 0x6e2   :  { %6272 = vmatmul.bf16.gmra.mxu3 %v12694_v60  ;;  %5682 = vmatmul.bf16.gmra.mxu2 %v12576_v45  ;;  %v12577_v60 = vld [vmem:[%s15266_s0 + $0xb00] sm:$0xff] }
 0x6e5   :  { %v6233_v27 = vpop.f32.mrf.mxu3  ;;  %v5643_v43 = vpop.f32.mrf.mxu2 }
 0x6e6   :  { %v7250_v44 = vmax.f32 %v6233_v27, 0.0  ;;  %v4430_v4 = vpop.f32.mrf.mxu0  ;;  %v5050_v41 = vpop.f32.mrf.mxu1  ;;  %v7014_v39 = vmax.f32 %v5643_v43, 0.0 }
 0x6e7   :  { %v6529_v34 = vmax.f32 %v4430_v4, 0.0  ;;  %v6777_v13 = vmax.f32 %v5050_v41, 0.0 }
 0x6e8   :  { %v8349_v12 = vadd.f32 %v8348_v62, %v7250_v44  ;;  %v8078_v18 = vadd.f32 %v8077_v29, %v7014_v39 }
 0x6e9   :  { %v7518_v49 = vadd.f32 %v7517_v30, %v6529_v34  ;;  %v7806_v59 = vadd.f32 %v6777_v13, %v6776_v61 }
 0x6ed   :  { %v6235_v2 = vpop.f32.mrf.mxu3  ;;  %v5645_v35 = vpop.f32.mrf.mxu2 }
 0x6ee   :  { %v7251_v51 = vmax.f32 %v6235_v2, 0.0  ;;  %v4433_v3 = vpop.f32.mrf.mxu0  ;;  %v5053_v26 = vpop.f32.mrf.mxu1 }
 0x6ef   :  { %v6530_v45 = vmax.f32 %v4433_v3, 0.0  ;;  %v6778_v50 = vmax.f32 %v5053_v26, 0.0  ;;  %v12696_v3 = vld [vmem:[%s15266_s0 + $0xeb8] sm:$0xff]  ;;  %v7015_v26 = vmax.f32 %v5645_v35, 0.0 }
 0x6f0   :  { %v8350_v62 = vadd.f32 %v8349_v12, %v7251_v51  ;;  %v12335_v12 = vld [vmem:[%s15266_s0 + $0x370] sm:$0xff] }
 0x6f1   :  { %v7519_v30 = vadd.f32 %v7518_v49, %v6530_v45  ;;  %v7807_v28 = vadd.f32 %v7806_v59, %v6778_v50  ;;  %4472 = vmatmul.bf16.gmra.mxu0 %v12334_v42  ;;  %5092 = vmatmul.bf16.gmra.mxu1 %v12458_v57  ;;  %v12459_v49 = vld [vmem:[%s15266_s0 + $0x750] sm:$0xff] }
 0x6f2   :  { %6277 = vmatmul.bf16.gmra.mxu3 %v12695_v38  ;;  %5687 = vmatmul.bf16.gmra.mxu2 %v12577_v60  ;;  %v12578_v60 = vld [vmem:[%s15266_s0 + $0xb08] sm:$0xff] }
 0x6f5   :  { %v6238_v29 = vpop.f32.mrf.mxu3  ;;  %v5648_v61 = vpop.f32.mrf.mxu2 }
 0x6f6   :  { %v7252_v27 = vmax.f32 %v6238_v29, 0.0  ;;  %v4435_v43 = vpop.f32.mrf.mxu0  ;;  %v5055_v44 = vpop.f32.mrf.mxu1  ;;  %v7016_v38 = vmax.f32 %v5648_v61, 0.0 }
 0x6f7   :  { %v6531_v4 = vmax.f32 %v4435_v43, 0.0  ;;  %v6779_v41 = vmax.f32 %v5055_v44, 0.0 }
 0x6f8   :  { %v8351_v34 = vadd.f32 %v8350_v62, %v7252_v27 }
 0x6f9   :  { %v7520_v13 = vadd.f32 %v7519_v30, %v6531_v4  ;;  %v7808_v39 = vadd.f32 %v7807_v28, %v6779_v41  ;;  %v8079_v30 = vadd.f32 %v8078_v18, %v7015_v26 }
 0x6fb   :  { %v8080_v27 = vadd.f32 %v8079_v30, %v7016_v38 }
 0x6fd   :  { %v6240_v2 = vpop.f32.mrf.mxu3  ;;  %v5650_v59 = vpop.f32.mrf.mxu2 }
 0x6fe   :  { %v7253_v42 = vmax.f32 %v6240_v2, 0.0  ;;  %v4438_v57 = vpop.f32.mrf.mxu0  ;;  %v5058_v51 = vpop.f32.mrf.mxu1  ;;  %v7017_v43 = vmax.f32 %v5650_v59, 0.0 }
 0x6ff   :  { %v6532_v45 = vmax.f32 %v4438_v57, 0.0  ;;  %v6780_v50 = vmax.f32 %v5058_v51, 0.0 }
 0x700   :  { %v8352_v62 = vadd.f32 %v8351_v34, %v7253_v42  ;;  %v8081_v44 = vadd.f32 %v8080_v27, %v7017_v43 }
 0x701   :  { %v7521_v28 = vadd.f32 %v7520_v13, %v6532_v45  ;;  %v7809_v29 = vadd.f32 %v7808_v39, %v6780_v50  ;;  %4477 = vmatmul.bf16.gmra.mxu0 %v12335_v12  ;;  %5097 = vmatmul.bf16.gmra.mxu1 %v12459_v49  ;;  %v12336_v12 = vld [vmem:[%s15266_s0 + $0x378] sm:$0xff] }
 0x702   :  { %6282 = vmatmul.bf16.gmra.mxu3 %v12696_v3  ;;  %5692 = vmatmul.bf16.gmra.mxu2 %v12578_v60  ;;  %v12460_v49 = vld [vmem:[%s15266_s0 + $0x758] sm:$0xff] }
 0x705   :  { %v6243_v4 = vpop.f32.mrf.mxu3  ;;  %v5653_v35 = vpop.f32.mrf.mxu2 }
 0x706   :  { %v7254_v61 = vmax.f32 %v6243_v4, 0.0  ;;  %v4440_v41 = vpop.f32.mrf.mxu0  ;;  %v5060_v2 = vpop.f32.mrf.mxu1  ;;  %v7018_v18 = vmax.f32 %v5653_v35, 0.0 }
 0x707   :  { %v6533_v22 = vmax.f32 %v4440_v41, 0.0  ;;  %v6781_v6 = vmax.f32 %v5060_v2, 0.0 }
 0x708   :  { %v8353_v57 = vadd.f32 %v8352_v62, %v7254_v61  ;;  %v8082_v13 = vadd.f32 %v8081_v44, %v7018_v18 }
 0x709   :  { %v7522_v51 = vadd.f32 %v7521_v28, %v6533_v22  ;;  %v7810_v34 = vadd.f32 %v7809_v29, %v6781_v6  ;;  %v12697_v22 = vld [vmem:[%s15266_s0 + $0xec0] sm:$0xff]  ;;  %v12579_v6 = vld [vmem:[%s15266_s0 + $0xb10] sm:$0xff] }
 0x70d   :  { %v6245_v39 = vpop.f32.mrf.mxu3  ;;  %v5655_v59 = vpop.f32.mrf.mxu2 }
 0x70e   :  { %v7255_v42 = vmax.f32 %v6245_v39, 0.0  ;;  %v4443_v3 = vpop.f32.mrf.mxu0  ;;  %v5063_v26 = vpop.f32.mrf.mxu1  ;;  %v7019_v30 = vmax.f32 %v5655_v59, 0.0 }
 0x70f   :  { %v6534_v38 = vmax.f32 %v4443_v3, 0.0  ;;  %v6782_v60 = vmax.f32 %v5063_v26, 0.0  ;;  %v12580_v3 = vld [vmem:[%s15266_s0 + $0xb18] sm:$0xff] }
 0x710   :  { %v14301_v45 = vadd.f32 %v8353_v57, %v7255_v42  ;;  %v8083_v28 = vadd.f32 %v8082_v13, %v7019_v30  ;;  %v12698_v42 = vld [vmem:[%s15266_s0 + $0xec8] sm:$0xff] }
 0x711   :  { %v7523_v50 = vadd.f32 %v7522_v51, %v6534_v38  ;;  %v7811_v62 = vadd.f32 %v7810_v34, %v6782_v60  ;;  %4482 = vmatmul.bf16.gmra.mxu0 %v12336_v12  ;;  %5102 = vmatmul.bf16.gmra.mxu1 %v12460_v49  ;;  %v12337_v51 = vld [vmem:[%s15266_s0 + $0x380] sm:$0xff] }
 0x712   :  { %6287 = vmatmul.bf16.gmra.mxu3 %v12697_v22  ;;  %5697 = vmatmul.bf16.gmra.mxu2 %v12579_v6  ;;  %v12461_v34 = vld [vmem:[%s15266_s0 + $0x760] sm:$0xff] }
 0x715   :  { %v6248_v29 = vpop.f32.mrf.mxu3  ;;  %v5658_v27 = vpop.f32.mrf.mxu2 }
 0x716   :  { %v4445_v43 = vpop.f32.mrf.mxu0  ;;  %v5065_v44 = vpop.f32.mrf.mxu1  ;;  %v7020_v2 = vmax.f32 %v5658_v27, 0.0  ;;  %v7256_v57 = vmax.f32 %v6248_v29, 0.0 }
 0x717   :  { %v6535_v4 = vmax.f32 %v4445_v43, 0.0  ;;  %v6783_v35 = vmax.f32 %v5065_v44, 0.0 }
 0x718   :  { %v8084_v18 = vadd.f32 %v8083_v28, %v7020_v2 }
 0x719   :  { %v7524_v61 = vadd.f32 %v7523_v50, %v6535_v4  ;;  %v7812_v41 = vadd.f32 %v7811_v62, %v6783_v35 }
 0x71d   :  { %v6250_v39 = vpop.f32.mrf.mxu3  ;;  %v5660_v13 = vpop.f32.mrf.mxu2 }
 0x71e   :  { %v7257_v12 = vmax.f32 %v6250_v39, 0.0  ;;  %v4448_v49 = vpop.f32.mrf.mxu0  ;;  %v5068_v59 = vpop.f32.mrf.mxu1  ;;  %v7021_v50 = vmax.f32 %v5660_v13, 0.0 }
 0x71f   :  { %v6536_v26 = vmax.f32 %v4448_v49, 0.0  ;;  %v6784_v22 = vmax.f32 %v5068_v59, 0.0  ;;  %v12699_v59 = vld [vmem:[%s15266_s0 + $0xed0] sm:$0xff] }
 0x720   :  { %v8361_v6 = vadd.f32 %v7257_v12, %v7256_v57  ;;  %v8085_v62 = vadd.f32 %v8084_v18, %v7021_v50  ;;  %v12462_v18 = vld [vmem:[%s15266_s0 + $0x768] sm:$0xff] }
 0x721   :  { %v7525_v38 = vadd.f32 %v7524_v61, %v6536_v26  ;;  %v7813_v60 = vadd.f32 %v7812_v41, %v6784_v22  ;;  %4487 = vmatmul.bf16.gmra.mxu0 %v12337_v51  ;;  %5107 = vmatmul.bf16.gmra.mxu1 %v12461_v34  ;;  %v12338_v41 = vld [vmem:[%s15266_s0 + $0x388] sm:$0xff] }
 0x722   :  { %6292 = vmatmul.bf16.gmra.mxu3 %v12698_v42  ;;  %5702 = vmatmul.bf16.gmra.mxu2 %v12580_v3  ;;  %v12581_v42 = vld [vmem:[%s15266_s0 + $0xb20] sm:$0xff] }
 0x725   :  { %v6253_v30 = vpop.f32.mrf.mxu3  ;;  %v5663_v28 = vpop.f32.mrf.mxu2 }
 0x726   :  { %v7258_v29 = vmax.f32 %v6253_v30, 0.0  ;;  %v4450_v27 = vpop.f32.mrf.mxu0  ;;  %v5070_v43 = vpop.f32.mrf.mxu1  ;;  %v7022_v49 = vmax.f32 %v5663_v28, 0.0 }
 0x727   :  { %v6537_v44 = vmax.f32 %v4450_v27, 0.0  ;;  %v6785_v4 = vmax.f32 %v5070_v43, 0.0 }
 0x728   :  { %v8362_v35 = vadd.f32 %v8361_v6, %v7258_v29  ;;  %v8086_v57 = vadd.f32 %v8085_v62, %v7022_v49 }
 0x729   :  { %v7526_v2 = vadd.f32 %v7525_v38, %v6537_v44  ;;  %v7814_v39 = vadd.f32 %v7813_v60, %v6785_v4 }
 0x72d   :  { %v6255_v61 = vpop.f32.mrf.mxu3  ;;  %v5665_v51 = vpop.f32.mrf.mxu2 }
 0x72e   :  { %v7259_v34 = vmax.f32 %v6255_v61, 0.0  ;;  %v4453_v13 = vpop.f32.mrf.mxu0  ;;  %v5073_v12 = vpop.f32.mrf.mxu1  ;;  %v7023_v60 = vmax.f32 %v5665_v51, 0.0 }
 0x72f   :  { %v6538_v3 = vmax.f32 %v4453_v13, 0.0  ;;  %v6786_v26 = vmax.f32 %v5073_v12, 0.0  ;;  %v12700_v12 = vld [vmem:[%s15266_s0 + $0xed8] sm:$0xff] }
 0x730   :  { %v8363_v22 = vadd.f32 %v8362_v35, %v7259_v34  ;;  %v8087_v50 = vadd.f32 %v8086_v57, %v7023_v60  ;;  %v12463_v57 = vld [vmem:[%s15266_s0 + $0x770] sm:$0xff] }
 0x731   :  { %v7527_v6 = vadd.f32 %v7526_v2, %v6538_v3  ;;  %v7815_v38 = vadd.f32 %v7814_v39, %v6786_v26  ;;  %4492 = vmatmul.bf16.gmra.mxu0 %v12338_v41  ;;  %5112 = vmatmul.bf16.gmra.mxu1 %v12462_v18  ;;  %v12339_v39 = vld [vmem:[%s15266_s0 + $0x390] sm:$0xff] }
 0x732   :  { %6297 = vmatmul.bf16.gmra.mxu3 %v12699_v59  ;;  %5707 = vmatmul.bf16.gmra.mxu2 %v12581_v42  ;;  %v12582_v59 = vld [vmem:[%s15266_s0 + $0xb28] sm:$0xff] }
 0x735   :  { %v6258_v62 = vpop.f32.mrf.mxu3  ;;  %v5668_v30 = vpop.f32.mrf.mxu2 }
 0x736   :  { %v7260_v28 = vmax.f32 %v6258_v62, 0.0  ;;  %v4455_v29 = vpop.f32.mrf.mxu0  ;;  %v5075_v27 = vpop.f32.mrf.mxu1  ;;  %v7024_v13 = vmax.f32 %v5668_v30, 0.0 }
 0x737   :  { %v6539_v43 = vmax.f32 %v4455_v29, 0.0  ;;  %v6787_v44 = vmax.f32 %v5075_v27, 0.0 }
 0x738   :  { %v8364_v4 = vadd.f32 %v8363_v22, %v7260_v28  ;;  %v8088_v35 = vadd.f32 %v8087_v50, %v7024_v13 }
 0x739   :  { %v7528_v49 = vadd.f32 %v7527_v6, %v6539_v43  ;;  %v7816_v61 = vadd.f32 %v7815_v38, %v6787_v44 }
 0x73d   :  { %v6260_v2 = vpop.f32.mrf.mxu3  ;;  %v5670_v41 = vpop.f32.mrf.mxu2 }
 0x73e   :  { %v7261_v18 = vmax.f32 %v6260_v2, 0.0  ;;  %v4458_v51 = vpop.f32.mrf.mxu0  ;;  %v5078_v34 = vpop.f32.mrf.mxu1  ;;  %v7025_v38 = vmax.f32 %v5670_v41, 0.0 }
 0x73f   :  { %v6540_v42 = vmax.f32 %v4458_v51, 0.0  ;;  %v6788_v3 = vmax.f32 %v5078_v34, 0.0  ;;  %v12583_v51 = vld [vmem:[%s15266_s0 + $0xb30] sm:$0xff] }
 0x740   :  { %v8365_v26 = vadd.f32 %v8364_v4, %v7261_v18  ;;  %v14339_v60 = vadd.f32 %v8088_v35, %v7025_v38  ;;  %v12464_v35 = vld [vmem:[%s15266_s0 + $0x778] sm:$0xff]  ;;  %v12701_v18 = vld [vmem:[%s15266_s0 + $0xee0] sm:$0xff] }
 0x741   :  { %v7529_v22 = vadd.f32 %v7528_v49, %v6540_v42  ;;  %v7817_v6 = vadd.f32 %v7816_v61, %v6788_v3  ;;  %4497 = vmatmul.bf16.gmra.mxu0 %v12339_v39  ;;  %5117 = vmatmul.bf16.gmra.mxu1 %v12463_v57  ;;  %v12340_v61 = vld [vmem:[%s15266_s0 + $0x398] sm:$0xff] }
 0x742   :  { %6302 = vmatmul.bf16.gmra.mxu3 %v12700_v12  ;;  %5712 = vmatmul.bf16.gmra.mxu2 %v12582_v59  ;;  %15330 = vst [vmem:[#allocation52_spill] sm:$0xff] %v14339_v60 }
 0x745   :  { %v6263_v50 = vpop.f32.mrf.mxu3  ;;  %v14341_v62 = vpop.f32.mrf.mxu2 }
 0x746   :  { %15331 = vst [vmem:[#allocation53_spill] sm:$0xff] %v14341_v62  ;;  %v7262_v30 = vmax.f32 %v6263_v50, 0.0  ;;  %v4460_v28 = vpop.f32.mrf.mxu0  ;;  %v5080_v29 = vpop.f32.mrf.mxu1 }
 0x747   :  { %v6541_v27 = vmax.f32 %v4460_v28, 0.0  ;;  %v6789_v43 = vmax.f32 %v5080_v29, 0.0  ;;  %v12465_v28 = vld [vmem:[%s15266_s0 + $0x780] sm:$0xff] }
 0x748   :  { %v8366_v44 = vadd.f32 %v8365_v26, %v7262_v30  ;;  %v12341_v30 = vld [vmem:[%s15266_s0 + $0x3a0] sm:$0xff] }
 0x749   :  { %v7530_v13 = vadd.f32 %v7529_v22, %v6541_v27  ;;  %v14343_v4 = vadd.f32 %v7817_v6, %v6789_v43 }
 0x74d   :  { %v6265_v49 = vpop.f32.mrf.mxu3  ;;  %v14351_v2 = vpop.f32.mrf.mxu2 }
 0x74e   :  { %15332 = vst [vmem:[#allocation54_spill] sm:$0xff] %v14351_v2  ;;  %v7263_v39 = vmax.f32 %v6265_v49, 0.0  ;;  %v4463_v57 = vpop.f32.mrf.mxu0  ;;  %v14353_v41 = vpop.f32.mrf.mxu1  ;;  %v12343_v2 = vld [vmem:[%s15266_s0 + $0x3b0] sm:$0xff] }
 0x74f   :  { %v6542_v34 = vmax.f32 %v4463_v57, 0.0 }
 0x750   :  { %v14361_v12 = vadd.f32 %v8366_v44, %v7263_v39  ;;  %v12702_v44 = vld [vmem:[%s15266_s0 + $0xee8] sm:$0xff] }
 0x751   :  { %v7531_v59 = vadd.f32 %v7530_v13, %v6542_v34  ;;  %4502 = vmatmul.bf16.gmra.mxu0 %v12340_v61  ;;  %5122 = vmatmul.bf16.gmra.mxu1 %v12464_v35  ;;  %v12584_v13 = vld [vmem:[%s15266_s0 + $0xb38] sm:$0xff] }
 0x752   :  { %6307 = vmatmul.bf16.gmra.mxu3 %v12701_v18  ;;  %5717 = vmatmul.bf16.gmra.mxu2 %v12583_v51 }
 0x755   :  { %v6268_v42 = vpop.f32.mrf.mxu3  ;;  %v14363_v3 = vpop.f32.mrf.mxu2 }
 0x756   :  { %15333 = vst [vmem:[#allocation55_spill] sm:$0xff] %v14363_v3  ;;  %v4465_v26 = vpop.f32.mrf.mxu0  ;;  %v14365_v22 = vpop.f32.mrf.mxu1 }
 0x757   :  { %v6543_v6 = vmax.f32 %v4465_v26, 0.0  ;;  %v12342_v26 = vld [vmem:[%s15266_s0 + $0x3a8] sm:$0xff] }
 0x759   :  { %v7532_v38 = vadd.f32 %v7531_v59, %v6543_v6  ;;  %v12466_v6 = vld [vmem:[%s15266_s0 + $0x788] sm:$0xff] }
 0x75d   :  { %v6270_v50 = vpop.f32.mrf.mxu3  ;;  %v14373_v29 = vpop.f32.mrf.mxu2 }
 0x75e   :  { %15334 = vst [vmem:[#allocation56_spill] sm:$0xff] %v14373_v29  ;;  %v4468_v27 = vpop.f32.mrf.mxu0  ;;  %v14375_v43 = vpop.f32.mrf.mxu1 }
 0x75f   :  { %v6544_v49 = vmax.f32 %v4468_v27, 0.0  ;;  %v12703_v27 = vld [vmem:[%s15266_s0 + $0xef0] sm:$0xff] }
 0x761   :  { %v7533_v61 = vadd.f32 %v7532_v38, %v6544_v49  ;;  %4507 = vmatmul.bf16.gmra.mxu0 %v12341_v30  ;;  %5127 = vmatmul.bf16.gmra.mxu1 %v12465_v28 }
 0x762   :  { %6312 = vmatmul.bf16.gmra.mxu3 %v12702_v44  ;;  %5722 = vmatmul.bf16.gmra.mxu2 %v12584_v13  ;;  %v12585_v44 = vld [vmem:[%s15266_s0 + $0xb40] sm:$0xff] }
 0x765   :  { %v6273_v35 = vpop.f32.mrf.mxu3  ;;  %v14383_v39 = vpop.f32.mrf.mxu2 }
 0x766   :  { %15335 = vst [vmem:[#allocation57_spill] sm:$0xff] %v14383_v39  ;;  %v4470_v57 = vpop.f32.mrf.mxu0  ;;  %v14385_v18 = vpop.f32.mrf.mxu1  ;;  %v7266_v40 = vmax.f32 %v6273_v35, 0.0 }
 0x767   :  { %v6545_v51 = vmax.f32 %v4470_v57, 0.0 }
 0x769   :  { %v7534_v34 = vadd.f32 %v7533_v61, %v6545_v51 }
 0x76d   :  { %v6275_v59 = vpop.f32.mrf.mxu3  ;;  %v14393_v38 = vpop.f32.mrf.mxu2 }
 0x76e   :  { %15336 = vst [vmem:[#allocation58_spill] sm:$0xff] %v14393_v38  ;;  %v4473_v30 = vpop.f32.mrf.mxu0  ;;  %v14395_v28 = vpop.f32.mrf.mxu1 }
 0x76f   :  { %v6546_v13 = vmax.f32 %v4473_v30, 0.0 }
 0x771   :  { %v7535_v49 = vadd.f32 %v7534_v34, %v6546_v13  ;;  %4512 = vmatmul.bf16.gmra.mxu0 %v12342_v26  ;;  %5132 = vmatmul.bf16.gmra.mxu1 %v12466_v6  ;;  %v12467_v34 = vld [vmem:[%s15266_s0 + $0x790] sm:$0xff] }
 0x772   :  { %6317 = vmatmul.bf16.gmra.mxu3 %v12703_v27  ;;  %5727 = vmatmul.bf16.gmra.mxu2 %v12585_v44  ;;  %v12704_v27 = vld [vmem:[%s15266_s0 + $0xef8] sm:$0xff] }
 0x775   :  { %v6278_v61 = vpop.f32.mrf.mxu3  ;;  %v14403_v57 = vpop.f32.mrf.mxu2 }
 0x776   :  { %v4475_v51 = vpop.f32.mrf.mxu0  ;;  %v14405_v38 = vpop.f32.mrf.mxu1 }
 0x777   :  { %v6547_v39 = vmax.f32 %v4475_v51, 0.0  ;;  %v7265_v51 = vmax.f32 %v6270_v50, 0.0 }
 0x779   :  { %v7536_v29 = vadd.f32 %v7535_v49, %v6547_v39  ;;  %v7264_v39 = vmax.f32 %v6268_v42, 0.0 }
 0x77b   :  { %v8368_v49 = vadd.f32 %v14361_v12, %v7264_v39 }
 0x77d   :  { %v6280_v3 = vpop.f32.mrf.mxu3  ;;  %v14413_v26 = vpop.f32.mrf.mxu2  ;;  %v8369_v33 = vadd.f32 %v8368_v49, %v7265_v51 }
 0x77e   :  { %v4478_v6 = vpop.f32.mrf.mxu0  ;;  %v14415_v30 = vpop.f32.mrf.mxu1  ;;  %v7269_v35 = vmax.f32 %v6280_v3, 0.0 }
 0x77f   :  { %v6548_v44 = vmax.f32 %v4478_v6, 0.0  ;;  %v8370_v32 = vadd.f32 %v8369_v33, %v7266_v40  ;;  %v7267_v6 = vmax.f32 %v6275_v59, 0.0 }
 0x781   :  { %v7537_v13 = vadd.f32 %v7536_v29, %v6548_v44  ;;  %4517 = vmatmul.bf16.gmra.mxu0 %v12343_v2  ;;  %5137 = vmatmul.bf16.gmra.mxu1 %v12467_v34  ;;  %v12344_v2 = vld [vmem:[%s15266_s0 + $0x3b8] sm:$0xff]  ;;  %v7268_v44 = vmax.f32 %v6278_v61, 0.0 }
 0x782   :  { %6322 = vmatmul.bf16.gmra.mxu3 %v12704_v27  ;;  %v8371_v27 = vadd.f32 %v8370_v32, %v7267_v6  ;;  %v12345_v32 = vld [vmem:[%s15266_s0 + $0x3c0] sm:$0xff] }
 0x785   :  { %v6283_v60 = vpop.f32.mrf.mxu3  ;;  %v14421_v62 = vpop.f32.mrf.mxu2 }
 0x786   :  { %v4480_v7 = vpop.f32.mrf.mxu0  ;;  %v14423_v55 = vpop.f32.mrf.mxu1  ;;  %v7270_v51 = vmax.f32 %v6283_v60, 0.0 }
 0x787   :  { %v6549_v54 = vmax.f32 %v4480_v7, 0.0  ;;  %v8372_v7 = vadd.f32 %v8371_v27, %v7268_v44 }
 0x789   :  { %v7538_v20 = vadd.f32 %v7537_v13, %v6549_v54  ;;  %v8373_v49 = vadd.f32 %v8372_v7, %v7269_v35 }
 0x78b   :  { %v8374_v24 = vadd.f32 %v8373_v49, %v7270_v51 }
 0x78d   :  { %v6285_v42 = vpop.f32.mrf.mxu3  ;;  %v14428_v29 = vpop.f32.mrf.mxu2 }
 0x78e   :  { %v4483_v12 = vpop.f32.mrf.mxu0  ;;  %v14430_v50 = vpop.f32.mrf.mxu1  ;;  %v7271_v52 = vmax.f32 %v6285_v42, 0.0  ;;  %v6791_v42 = vmax.f32 %v14365_v22, 0.0  ;;  %v12346_v22 = vld [vmem:[%s15266_s0 + $0x3c8] sm:$0xff] }
 0x78f   :  { %v6550_v34 = vmax.f32 %v4483_v12, 0.0 }
 0x790   :  { %v8375_v6 = vadd.f32 %v8374_v24, %v7271_v52  ;;  %v6792_v24 = vmax.f32 %v14375_v43, 0.0 }
 0x791   :  { %v7539_v39 = vadd.f32 %v7538_v20, %v6550_v34  ;;  %4522 = vmatmul.bf16.gmra.mxu0 %v12344_v2  ;;  %v6790_v34 = vmax.f32 %v14353_v41, 0.0 }
 0x793   :  { %v7819_v44 = vadd.f32 %v14343_v4, %v6790_v34 }
 0x795   :  { %v6288_v54 = vpop.f32.mrf.mxu3  ;;  %v14432_v40 = vpop.f32.mrf.mxu2  ;;  %v7820_v51 = vadd.f32 %v7819_v44, %v6791_v42 }
 0x796   :  { %v4485_v33 = vpop.f32.mrf.mxu0  ;;  %v14434_v59 = vpop.f32.mrf.mxu1  ;;  %v7272_v2 = vmax.f32 %v6288_v54, 0.0 }
 0x797   :  { %v6551_v13 = vmax.f32 %v4485_v33, 0.0  ;;  %v7821_v54 = vadd.f32 %v7820_v51, %v6792_v24 }
 0x798   :  { %v8376_v60 = vadd.f32 %v8375_v6, %v7272_v2 }
 0x799   :  { %v14436_v1 = vadd.f32 %v7539_v39, %v6551_v13 }
 0x79b   :  { %15337 = vst [vmem:[#allocation59_spill] sm:$0xff] %v14436_v1 }
 0x79d   :  { %v6290_v12 = vpop.f32.mrf.mxu3  ;;  %v14441_v20 = vpop.f32.mrf.mxu2 }
 0x79e   :  { %v4488_v3 = vpop.f32.mrf.mxu0  ;;  %v14443_v61 = vpop.f32.mrf.mxu1  ;;  %v7273_v27 = vmax.f32 %v6290_v12, 0.0  ;;  %v6793_v12 = vmax.f32 %v14385_v18, 0.0 }
 0x7a0   :  { %v8377_v13 = vadd.f32 %v8376_v60, %v7273_v27  ;;  %v7822_v42 = vadd.f32 %v7821_v54, %v6793_v12  ;;  %v7033_v12 = vmax.f32 %v14413_v26, 0.0  ;;  %v6798_v26 = vmax.f32 %v14430_v50, 0.0 }
 0x7a1   :  { %4527 = vmatmul.bf16.gmra.mxu0 %v12345_v32  ;;  %v6552_v32 = vmax.f32 %v4488_v3, 0.0  ;;  %v6795_v3 = vmax.f32 %v14405_v38, 0.0  ;;  %v6797_v38 = vmax.f32 %v14423_v55, 0.0  ;;  %v7652_v55 = vrot.slane %v13451_v58, 4 }
 0x7a5   :  { %v6293_v39 = vpop.f32.mrf.mxu3  ;;  %v14448_v7 = vpop.f32.mrf.mxu2 }
 0x7a6   :  { %v4490_v35 = vpop.f32.mrf.mxu0  ;;  %v14450_v33 = vpop.f32.mrf.mxu1  ;;  %v7274_v49 = vmax.f32 %v6293_v39, 0.0  ;;  %v6794_v39 = vmax.f32 %v14395_v28, 0.0  ;;  %v7032_v28 = vmax.f32 %v14403_v57, 0.0  ;;  %v7034_v57 = vmax.f32 %v14421_v62, 0.0 }
 0x7a7   :  { %v6553_v52 = vmax.f32 %v4490_v35, 0.0  ;;  %v7689_v62 = vrot.slane %v13651_v36, 4 }
 0x7a8   :  { %v8378_v41 = vadd.f32 %v8377_v13, %v7274_v49  ;;  %v7823_v18 = vadd.f32 %v7822_v42, %v6794_v39 }
 0x7a9   :  { %v7547_v27 = vadd.f32 %v6553_v52, %v6552_v32 }
 0x7aa   :  { %v7824_v52 = vadd.f32 %v7823_v18, %v6795_v3  ;;  %v6799_v3 = vmax.f32 %v14434_v59, 0.0  ;;  %v7036_v59 = vmax.f32 %v14432_v40, 0.0  ;;  %v7037_v40 = vmax.f32 %v14441_v20, 0.0 }
 0x7ad   :  { %v6295_v4 = vpop.f32.mrf.mxu3  ;;  %v14457_v6 = vpop.f32.mrf.mxu2 }
 0x7ae   :  { %v7275_v2 = vmax.f32 %v6295_v4, 0.0  ;;  %v4493_v34 = vpop.f32.mrf.mxu0  ;;  %v14459_v60 = vpop.f32.mrf.mxu1 }
 0x7af   :  { %v6554_v44 = vmax.f32 %v4493_v34, 0.0 }
 0x7b0   :  { %v8379_v43 = vadd.f32 %v8378_v41, %v7275_v2  ;;  %v6796_v41 = vmax.f32 %v14415_v30, 0.0  ;;  %v12347_v2 = vld [vmem:[%s15266_s0 + $0x3d0] sm:$0xff] }
 0x7b1   :  { %v7548_v35 = vadd.f32 %v7547_v27, %v6554_v44  ;;  %4532 = vmatmul.bf16.gmra.mxu0 %v12346_v22 }
 0x7b2   :  { %v7825_v32 = vadd.f32 %v7824_v52, %v6796_v41  ;;  %v7726_v41 = vrot.slane %v13851_v19, 4 }
 0x7b5   :  { %v6298_v13 = vpop.f32.mrf.mxu3  ;;  %v14463_v49 = vpop.f32.mrf.mxu2 }
 0x7b6   :  { %v7276_v51 = vmax.f32 %v6298_v13, 0.0  ;;  %v4495_v24 = vpop.f32.mrf.mxu0  ;;  %v14465_v4 = vpop.f32.mrf.mxu1 }
 0x7b7   :  { %v6555_v1 = vmax.f32 %v4495_v24, 0.0  ;;  %v7615_v24 = vrot.slane %v13251_v9, 4 }
 0x7b8   :  { %v14467_v16 = vadd.f32 %v8379_v43, %v7276_v51  ;;  %v7826_v43 = vadd.f32 %v7825_v32, %v6797_v38  ;;  %v7763_v32 = vrot.slane %v14051_v10, 4 }
 0x7b9   :  { %v7549_v54 = vadd.f32 %v7548_v35, %v6555_v1  ;;  %v8102_v1 = vadd.f32 %v7033_v12, %v7032_v28  ;;  %v7035_v35 = vmax.f32 %v14428_v29, 0.0  ;;  %v7653_v29 = vadd.f32 %v7652_v55, %v13451_v58 }
 0x7ba   :  { %v7827_v18 = vadd.f32 %v7826_v43, %v6798_v26  ;;  %v6802_v58 = vmax.f32 %v14459_v60, 0.0 }
 0x7bb   :  { %v8103_v39 = vadd.f32 %v8102_v1, %v7034_v57  ;;  %v7690_v1 = vadd.f32 %v7689_v62, %v13651_v36  ;;  %v7800_v57 = vrot.slane %v14251_v11, 4  ;;  %v7654_v26 = vrot.slane %v7653_v29, 2 }
 0x7bc   :  { %v7828_v38 = vadd.f32 %v7827_v18, %v6799_v3 }
 0x7bd   :  { %v14473_v22 = vpop.f32.mrf.mxu3  ;;  %v14478_v34 = vpop.f32.mrf.mxu2  ;;  %v8104_v12 = vadd.f32 %v8103_v39, %v7035_v35  ;;  %v7764_v39 = vadd.f32 %v7763_v32, %v14051_v10  ;;  %v7691_v18 = vrot.slane %v7690_v1, 2  ;;  %v7801_v60 = vadd.f32 %v7800_v57, %v14251_v11 }
 0x7be   :  { %v4498_v27 = vpop.f32.mrf.mxu0  ;;  %v14480_v44 = vpop.f32.mrf.mxu1 }
 0x7bf   :  { %v6556_v30 = vmax.f32 %v4498_v27, 0.0  ;;  %v8105_v55 = vadd.f32 %v8104_v12, %v7036_v59  ;;  %v6804_v10 = vmax.f32 %v14480_v44, 0.0  ;;  %v7039_v44 = vmax.f32 %v14457_v6, 0.0 }
 0x7c1   :  { %v7550_v42 = vadd.f32 %v7549_v54, %v6556_v30  ;;  %4537 = vmatmul.bf16.gmra.mxu0 %v12347_v2  ;;  %v6800_v54 = vmax.f32 %v14443_v61, 0.0  ;;  %v6801_v2 = vmax.f32 %v14450_v33, 0.0  ;;  %v7616_v30 = vadd.f32 %v7615_v24, %v13251_v9  ;;  %v12348_v9 = vld [vmem:[%s15266_s0 + $0x3d8] sm:$0xff] }
 0x7c2   :  { %v7727_v61 = vadd.f32 %v7726_v41, %v13851_v19  ;;  %v6803_v33 = vmax.f32 %v14465_v4, 0.0  ;;  %v7655_v4 = vadd.f32 %v7654_v26, %v7653_v29  ;;  %v8106_v41 = vadd.f32 %v8105_v55, %v7037_v40 }
 0x7c3   :  { %v7829_v43 = vadd.f32 %v7828_v38, %v6800_v54  ;;  %v7617_v19 = vrot.slane %v7616_v30, 2  ;;  %v7038_v54 = vmax.f32 %v14448_v7, 0.0 }
 0x7c4   :  { %v7728_v20 = vrot.slane %v7727_v61, 2  ;;  %v7656_v8 = vrot.slane %v7655_v4, 1 }
 0x7c5   :  { %v14487_v13 = vpop.f32.mrf.mxu3  ;;  %v14489_v51 = vpop.f32.mrf.mxu2  ;;  %v7830_v35 = vadd.f32 %v7829_v43, %v6801_v2  ;;  %v7618_v38 = vadd.f32 %v7617_v19, %v7616_v30  ;;  %v7692_v2 = vadd.f32 %v7691_v18, %v7690_v1  ;;  %v7802_v43 = vrot.slane %v7801_v60, 2 }
 0x7c6   :  { %v4500_v52 = vpop.f32.mrf.mxu0  ;;  %v5120_v50 = vpop.f32.mrf.mxu1  ;;  %v7729_v11 = vadd.f32 %v7728_v20, %v7727_v61  ;;  %v7657_v19 = vadd.f32 %v7656_v8, %v7655_v4 }
 0x7c7   :  { %v6557_v28 = vmax.f32 %v4500_v52, 0.0  ;;  %v7831_v62 = vadd.f32 %v7830_v35, %v6802_v58  ;;  %v6805_v59 = vmax.f32 %v5120_v50, 0.0  ;;  %v8107_v58 = vadd.f32 %v8106_v41, %v7038_v54 }
 0x7c8   :  { %v7619_v55 = vrot.slane %v7618_v38, 1  ;;  %v7693_v50 = vrot.slane %v7692_v2, 1  ;;  %v7730_v1 = vrot.slane %v7729_v11, 1  ;;  %v14523_v54 = vmul.f32 0.00390625, %v7657_v19 }
 0x7c9   :  { %v7551_v27 = vadd.f32 %v7550_v42, %v6557_v28  ;;  %v7765_v28 = vrot.slane %v7764_v39, 2  ;;  %v7832_v12 = vadd.f32 %v7831_v62, %v6803_v33  ;;  %v8108_v18 = vadd.f32 %v8107_v58, %v7039_v44 }
 0x7ca   :  { %v7620_v20 = vadd.f32 %v7619_v55, %v7618_v38  ;;  %v7694_v62 = vadd.f32 %v7693_v50, %v7692_v2  ;;  %v7042_v44 = vmax.f32 %v14489_v51, 0.0 }
 0x7cb   :  { %v7833_v57 = vadd.f32 %v7832_v12, %v6804_v10  ;;  %v7766_v35 = vadd.f32 %v7765_v28, %v7764_v39  ;;  %v7041_v28 = vmax.f32 %v14478_v34, 0.0 }
 0x7cc   :  { %v14532_v4 = vmul.f32 0.00390625, %v7694_v62 }
 0x7cd   :  { %v14507_v42 = vpop.f32.mrf.mxu3  ;;  %v14512_v36 = vpop.f32.mrf.mxu2  ;;  %v7834_v29 = vadd.f32 %v7833_v57, %v6805_v59  ;;  %v7767_v6 = vrot.slane %v7766_v35, 1 }
 0x7ce   :  { %v4503_v3 = vpop.f32.mrf.mxu0  ;;  %v5123_v24 = vpop.f32.mrf.mxu1  ;;  %v7043_v51 = vmax.f32 %v14512_v36, 0.0  ;;  %v7278_v36 = vmax.f32 %v14487_v13, 0.0 }
 0x7cf   :  { %v6558_v52 = vmax.f32 %v4503_v3, 0.0  ;;  %v6806_v37 = vmax.f32 %v5123_v24, 0.0  ;;  %v7040_v3 = vmax.f32 %v14463_v49, 0.0  ;;  %v14530_v49 = vmul.f32 0.00390625, %v7620_v20 }
 0x7d1   :  { %v7552_v32 = vadd.f32 %v7551_v27, %v6558_v52  ;;  %4542 = vmatmul.bf16.gmra.mxu0 %v12348_v9  ;;  %v7803_v27 = vadd.f32 %v7802_v43, %v7801_v60  ;;  %v7835_v33 = vadd.f32 %v7834_v29, %v6806_v37  ;;  %v7731_v52 = vadd.f32 %v7730_v1, %v7729_v11 }
 0x7d2   :  { %v8109_v60 = vadd.f32 %v8108_v18, %v7040_v3  ;;  %v7768_v37 = vadd.f32 %v7767_v6, %v7766_v35  ;;  %v8469_v34 = vsel %vm8455_vm0, %v14523_v54, %v14530_v49  ;;  %v7277_v1 = vmax.f32 %v14473_v22, 0.0 }
 0x7d3   :  { %v7804_v10 = vrot.slane %v7803_v27, 1  ;;  %v14536_v43 = vmul.f32 0.00390625, %v7731_v52  ;;  %v8470_v50 = vsel %vm8457_vm1, %v14532_v4, %v8469_v34 }
 0x7d4   :  { %v8110_v58 = vadd.f32 %v8109_v60, %v7041_v28  ;;  %v14542_v35 = vmul.f32 0.00390625, %v7768_v37  ;;  %v8381_v22 = vadd.f32 %v14467_v16, %v7277_v1 }
 0x7d5   :  { %v14518_v26 = vpop.f32.mrf.mxu3  ;;  %v14520_v7 = vpop.f32.mrf.mxu2 }
 0x7d6   :  { %v4505_v40 = vpop.f32.mrf.mxu0  ;;  %v5125_v30 = vpop.f32.mrf.mxu1  ;;  %v8382_v37 = vadd.f32 %v8381_v22, %v7278_v36 }
 0x7d7   :  { %v6559_v61 = vmax.f32 %v4505_v40, 0.0  ;;  %v6807_v9 = vmax.f32 %v5125_v30, 0.0  ;;  %v8471_v40 = vsel %vm8459_vm2, %v14536_v43, %v8470_v50 }
 0x7d8   :  { %v8472_v19 = vsel %vm8461_vm3, %v14542_v35, %v8471_v40 }
 0x7d9   :  { %v7553_v39 = vadd.f32 %v7552_v32, %v6559_v61  ;;  %v7836_v24 = vadd.f32 %v7835_v33, %v6807_v9  ;;  %v7805_v32 = vadd.f32 %v7804_v10, %v7803_v27  ;;  %v8111_v33 = vadd.f32 %v8110_v58, %v7042_v44 }
 0x7da   :  { %v7044_v10 = vmax.f32 %v14520_v7, 0.0  ;;  %v7280_v44 = vmax.f32 %v14518_v26, 0.0 }
 0x7db   :  { %v7837_v41 = vrot.slane %v7836_v24, 4  ;;  %v14546_v27 = vmul.f32 0.00390625, %v7805_v32  ;;  %v8112_v62 = vadd.f32 %v8111_v33, %v7043_v51 }
 0x7dd   :  { %v7838_v12 = vadd.f32 %v7837_v41, %v7836_v24  ;;  %v14526_v59 = vpop.f32.mrf.mxu3  ;;  %v14528_v8 = vpop.f32.mrf.mxu2  ;;  %v8113_v32 = vadd.f32 %v8112_v62, %v7044_v10 }
 0x7de   :  { %v4508_v38 = vpop.f32.mrf.mxu0  ;;  %v14534_v2 = vpop.f32.mrf.mxu1  ;;  %v7045_v16 = vmax.f32 %v14528_v8, 0.0  ;;  %v7281_v1 = vmax.f32 %v14526_v59, 0.0  ;;  %v8207_v59 = vrot.slane %v13501_v14, 4 }
 0x7df   :  { %v7839_v11 = vrot.slane %v7838_v12, 2  ;;  %v6560_v57 = vmax.f32 %v4508_v38, 0.0 }
 0x7e0   :  { %v8114_v8 = vadd.f32 %v8113_v32, %v7045_v16 }
 0x7e1   :  { %v7840_v29 = vadd.f32 %v7839_v11, %v7838_v12  ;;  %v7554_v55 = vadd.f32 %v7553_v39, %v6560_v57  ;;  %v8473_v39 = vsel %vm8463_vm4, %v14546_v27, %v8472_v19  ;;  %v7279_v12 = vmax.f32 %v14507_v42, 0.0 }
 0x7e3   :  { %v7841_v30 = vrot.slane %v7840_v29, 1  ;;  %v8383_v42 = vadd.f32 %v8382_v37, %v7279_v12 }
 0x7e5   :  { %v7842_v61 = vadd.f32 %v7841_v30, %v7840_v29  ;;  %v6313_v9 = vpop.f32.mrf.mxu3  ;;  %v5723_v18 = vpop.f32.mrf.mxu2  ;;  %v8384_v30 = vadd.f32 %v8383_v42, %v7280_v44  ;;  %v8244_v42 = vrot.slane %v13701_v17, 4 }
 0x7e6   :  { %v4510_v3 = vpop.f32.mrf.mxu0  ;;  %v5130_v6 = vpop.f32.mrf.mxu1  ;;  %v7046_v29 = vmax.f32 %v5723_v18, 0.0  ;;  %v7282_v36 = vmax.f32 %v6313_v9, 0.0 }
 0x7e7   :  { %v14556_v24 = vmul.f32 0.00390625, %v7842_v61  ;;  %v6561_v20 = vmax.f32 %v4510_v3, 0.0  ;;  %v6808_v61 = vmax.f32 %v14534_v2, 0.0  ;;  %v6809_v19 = vmax.f32 %v5130_v6, 0.0 }
 0x7e8   :  { %v8115_v33 = vadd.f32 %v8114_v8, %v7046_v29  ;;  %v8385_v22 = vadd.f32 %v8384_v30, %v7281_v1  ;;  %v8170_v29 = vrot.slane %v13301_v48, 4 }
 0x7e9   :  { %v7555_v52 = vadd.f32 %v7554_v55, %v6561_v20  ;;  %v14563_v41 = vsel %vm8465_vm5, %v14556_v24, %v8473_v39 }
 0x7ea   :  { %v8481_v60 = vsel %vm8480_vm6, %v14563_v41, 0  ;;  %v8386_v12 = vadd.f32 %v8385_v22, %v7282_v36 }
 0x7eb   :  { %v14567_v28 = vand.u32 4294901760, %v8481_v60 }
 0x7ed   :  { %v6315_v13 = vpop.f32.mrf.mxu3  ;;  %8498 = vmatpush.msrb.mxu0 %v14567_v28  ;;  %8582 = vmatpush.msrb.mxu1 %v14567_v28  ;;  %v14574_v7 = vsub.f32 %v8481_v60, %v14567_v28  ;;  %v5725_v38 = vpop.f32.mrf.mxu2 }
 0x7ee   :  { %v4513_v11 = vpop.f32.mrf.mxu0  ;;  %v5133_v57 = vpop.f32.mrf.mxu1  ;;  %v7047_v51 = vmax.f32 %v5725_v38, 0.0  ;;  %v7283_v32 = vmax.f32 %v6315_v13, 0.0  ;;  %v8318_v13 = vrot.slane %v14101_v25, 4 }
 0x7ef   :  { %v6562_v34 = vmax.f32 %v4513_v11, 0.0  ;;  %8557 = vmatpush.msrb.mxu3 %v14574_v7  ;;  %v8526_v58 = vand.u32 4294901760, %v14574_v7  ;;  %v6810_v60 = vmax.f32 %v5133_v57, 0.0  ;;  %v8208_v57 = vadd.f32 %v8207_v59, %v13501_v14 }
 0x7f0   :  { %v8116_v62 = vadd.f32 %v8115_v33, %v7047_v51  ;;  %v8355_v33 = vrot.slane %v14301_v45, 4  ;;  %v7052_v14 = vmax.f32 %v12951_v63, 0.0 }
 0x7f1   :  { %v7556_v55 = vadd.f32 %v7555_v52, %v6562_v34  ;;  %v8527_v50 = vsub.f32 %v14574_v7, %v8526_v58  ;;  %v7843_v52 = vadd.f32 %v6809_v19, %v6808_v61  ;;  %v7050_v34 = vmax.f32 %v12927_v46, 0.0 }
 0x7f2   :  { %v7051_v19 = vmax.f32 %v12933_v53, 0.0  ;;  %v7053_v53 = vmax.f32 %v12957_v5, 0.0  ;;  %v7055_v5 = vmax.f32 %v12981_v21, 0.0 }
 0x7f3   :  { %v8528_v40 = vand.u32 4294901760, %v8527_v50  ;;  %v7844_v2 = vadd.f32 %v7843_v52, %v6810_v60  ;;  %v8356_v52 = vadd.f32 %v8355_v33, %v14301_v45  ;;  %v6814_v45 = vmax.f32 %v12929_v47, 0.0  ;;  %v15338_v47 = vld [vmem:[#allocation7_spill] sm:$0xff] }
 0x7f5   :  { %v6318_v3 = vpop.f32.mrf.mxu3  ;;  %8529 = vmatpush.msrb.mxu2 %v8528_v40  ;;  %v5728_v39 = vpop.f32.mrf.mxu2  ;;  %v8387_v40 = vadd.f32 %v8386_v12, %v7283_v32 }
 0x7f6   :  { %v4515_v26 = vpop.f32.mrf.mxu0  ;;  %v5135_v20 = vpop.f32.mrf.mxu1  ;;  %v7048_v10 = vmax.f32 %v5728_v39, 0.0  ;;  %v7284_v30 = vmax.f32 %v6318_v3, 0.0  ;;  %v8245_v39 = vadd.f32 %v8244_v42, %v13701_v17  ;;  %v8319_v3 = vadd.f32 %v8318_v13, %v14101_v25 }
 0x7f7   :  { %v6563_v18 = vmax.f32 %v4515_v26, 0.0  ;;  %v6811_v6 = vmax.f32 %v5135_v20, 0.0  ;;  %v8171_v20 = vadd.f32 %v8170_v29, %v13301_v48  ;;  %v7054_v48 = vmax.f32 %v12975_v15, 0.0 }
 0x7f8   :  { %v8117_v16 = vadd.f32 %v8116_v62, %v7048_v10  ;;  %v8388_v22 = vadd.f32 %v8387_v40, %v7284_v30  ;;  %v8209_v10 = vrot.slane %v8208_v57, 2  ;;  %v8246_v17 = vrot.slane %v8245_v39, 2 }
 0x7f9   :  { %v7557_v37 = vadd.f32 %v7556_v55, %v6563_v18  ;;  %v8281_v55 = vrot.slane %v13901_v23, 4  ;;  %v7845_v46 = vadd.f32 %v7844_v2, %v6811_v6  ;;  %v6816_v15 = vmax.f32 %v12953_v0, 0.0 }
 0x7fa   :  { %v7056_v13 = vmax.f32 %v12999_v31, 0.0 }
 0x7fb   :  { %v8282_v18 = vadd.f32 %v8281_v55, %v13901_v23  ;;  %v8172_v23 = vrot.slane %v8171_v20, 2 }
 0x7fd   :  { %v6320_v38 = vpop.f32.mrf.mxu3  ;;  %v5730_v11 = vpop.f32.mrf.mxu2  ;;  %v8283_v32 = vrot.slane %v8282_v18, 2  ;;  %v8173_v29 = vadd.f32 %v8172_v23, %v8171_v20  ;;  %v15340_v20 = vld [vmem:[#allocation9_spill] sm:$0xff] }
 0x7fe   :  { %v4518_v44 = vpop.f32.mrf.mxu0  ;;  %v5138_v9 = vpop.f32.mrf.mxu1  ;;  %v7049_v8 = vmax.f32 %v5730_v11, 0.0  ;;  %v7285_v36 = vmax.f32 %v6320_v38, 0.0  ;;  %v8210_v11 = vadd.f32 %v8209_v10, %v8208_v57  ;;  %v6817_v57 = vmax.f32 %v15338_v47, 0.0  ;;  %v15347_v47 = vld [vmem:[#allocation23_spill] sm:$0xff] }
 0x7ff   :  { %v6564_v50 = vmax.f32 %v4518_v44, 0.0  ;;  %v6812_v61 = vmax.f32 %v5138_v9, 0.0  ;;  %v6815_v44 = vmax.f32 %v12941_v56, 0.0  ;;  %v8247_v9 = vadd.f32 %v8246_v17, %v8245_v39 }
 0x800   :  { %v8118_v1 = vadd.f32 %v8117_v16, %v7049_v8  ;;  %v8320_v16 = vrot.slane %v8319_v3, 2  ;;  %v8389_v2 = vadd.f32 %v8388_v22, %v7285_v36  ;;  %v8284_v55 = vadd.f32 %v8283_v32, %v8282_v18  ;;  %v15341_v36 = vld [vmem:[#allocation17_spill] sm:$0xff] }
 0x801   :  { %v14592_v51 = vadd.f32 %v7557_v37, %v6564_v50  ;;  %v7846_v60 = vadd.f32 %v7845_v46, %v6812_v61  ;;  %v8211_v33 = vrot.slane %v8210_v11, 1  ;;  %v8248_v39 = vrot.slane %v8247_v9, 1 }
 0x802   :  { %v8119_v26 = vadd.f32 %v8118_v1, %v7050_v34  ;;  %v8357_v34 = vrot.slane %v8356_v52, 2  ;;  %v8321_v40 = vadd.f32 %v8320_v16, %v8319_v3  ;;  %v6818_v18 = vmax.f32 %v15340_v20, 0.0 }
 0x803   :  { %v8174_v22 = vrot.slane %v8173_v29, 1  ;;  %v8285_v31 = vrot.slane %v8284_v55, 1  ;;  %v8212_v17 = vadd.f32 %v8211_v33, %v8210_v11  ;;  %v8249_v32 = vadd.f32 %v8248_v39, %v8247_v9  ;;  %v15349_v39 = vld [vmem:[#allocation25_spill] sm:$0xff] }
 0x804   :  { %v8120_v62 = vadd.f32 %v8119_v26, %v7051_v19  ;;  %v8358_v46 = vadd.f32 %v8357_v34, %v8356_v52  ;;  %v15339_v19 = vld [vmem:[#allocation15_spill] sm:$0xff]  ;;  %v8322_v10 = vrot.slane %v8321_v40, 1  ;;  %v7061_v9 = vmax.f32 %v15347_v47, 0.0 }
 0x805   :  { %v6323_v37 = vpop.f32.mrf.mxu3  ;;  %v7057_v56 = vmax.f32 %v15339_v19, 0.0  ;;  %v15342_v52 = vld [vmem:[#allocation11_spill] sm:$0xff]  ;;  %v14621_v11 = vmul.f32 0.00390625, %v8212_v17 }
 0x806   :  { %v14602_v59 = vpop.f32.mrf.mxu0  ;;  %v5140_v63 = vpop.f32.mrf.mxu1  ;;  %v8121_v12 = vadd.f32 %v8120_v62, %v7052_v14  ;;  %v7286_v6 = vmax.f32 %v6323_v37, 0.0  ;;  %v7058_v62 = vmax.f32 %v15341_v36, 0.0 }
 0x807   :  { %v6813_v25 = vmax.f32 %v5140_v63, 0.0  ;;  %v8359_v63 = vrot.slane %v8358_v46, 1 }
 0x808   :  { %v8122_v38 = vadd.f32 %v8121_v12, %v7053_v53  ;;  %v8390_v30 = vadd.f32 %v8389_v2, %v7286_v6  ;;  %v6819_v53 = vmax.f32 %v15342_v52, 0.0  ;;  %v15344_v2 = vld [vmem:[#allocation13_spill] sm:$0xff] }
 0x809   :  { %v7847_v42 = vadd.f32 %v7846_v60, %v6813_v25  ;;  %v6820_v6 = vmax.f32 %v15344_v2, 0.0 }
 0x80a   :  { %v8123_v8 = vadd.f32 %v8122_v38, %v7054_v48  ;;  %v15343_v48 = vld [vmem:[#allocation19_spill] sm:$0xff]  ;;  %v8175_v38 = vadd.f32 %v8174_v22, %v8173_v29 }
 0x80b   :  { %v7848_v50 = vadd.f32 %v7847_v42, %v6814_v45  ;;  %v7059_v23 = vmax.f32 %v15343_v48, 0.0  ;;  %v8286_v45 = vadd.f32 %v8285_v31, %v8284_v55  ;;  %v15345_v42 = vld [vmem:[#allocation21_spill] sm:$0xff]  ;;  %v15348_v55 = vld [vmem:[#allocation18_spill] sm:$0xff]  ;;  %v8652_v31 = vmul.f32 %v14621_v11, %v14621_v11 }
 0x80c   :  { %v8124_v1 = vadd.f32 %v8123_v8, %v7055_v5  ;;  %v7060_v5 = vmax.f32 %v15345_v42, 0.0  ;;  %v14629_v19 = vmul.f32 0.00390625, %v8175_v38 }
 0x80d   :  { %v7849_v61 = vadd.f32 %v7848_v50, %v6815_v44  ;;  %v6325_v21 = vpop.f32.mrf.mxu3  ;;  %v8323_v44 = vadd.f32 %v8322_v10, %v8321_v40  ;;  %v15346_v50 = vld [vmem:[#allocation16_spill] sm:$0xff]  ;;  %v14631_v40 = vmul.f32 0.00390625, %v8286_v45 }
 0x80e   :  { %v7287_v26 = vmax.f32 %v6325_v21, 0.0  ;;  %v14612_v14 = vpop.f32.mrf.mxu0  ;;  %v8125_v0 = vadd.f32 %v8124_v1, %v7056_v13  ;;  %v6821_v13 = vmax.f32 %v15346_v50, 0.0  ;;  %v6822_v21 = vmax.f32 %v15348_v55, 0.0  ;;  %v15358_v55 = vld [vmem:[#allocation28_spill] sm:$0xff] }
 0x80f   :  { %v7850_v3 = vadd.f32 %v7849_v61, %v6816_v15  ;;  %v8654_v48 = vmul.f32 %v14631_v40, %v14631_v40 }
 0x810   :  { %v8391_v60 = vadd.f32 %v8390_v30, %v7287_v26  ;;  %v8126_v37 = vadd.f32 %v8125_v0, %v7057_v56  ;;  %v8360_v30 = vadd.f32 %v8359_v63, %v8358_v46  ;;  %v7062_v26 = vmax.f32 %v15349_v39, 0.0 }
 0x811   :  { %v7851_v12 = vadd.f32 %v7850_v3, %v6817_v57  ;;  %v14624_v57 = vmul.f32 0.00390625, %v8249_v32  ;;  %v14634_v0 = vmul.f32 0.00390625, %v8323_v44  ;;  %v8651_v63 = vmul.f32 %v14629_v19, %v14629_v19 }
 0x812   :  { %v8392_v25 = vrot.slane %v8391_v60, 4  ;;  %v8127_v16 = vadd.f32 %v8126_v37, %v7058_v62  ;;  %v14639_v3 = vmul.f32 0.00390625, %v8360_v30  ;;  %v15351_v62 = vld [vmem:[#allocation53_spill] sm:$0xff] }
 0x813   :  { %v7852_v34 = vadd.f32 %v7851_v12, %v6818_v18  ;;  %v15350_v18 = vld [vmem:[#allocation27_spill] sm:$0xff]  ;;  %v7026_v10 = vmax.f32 %v15351_v62, 0.0  ;;  %v8653_v37 = vmul.f32 %v14624_v57, %v14624_v57  ;;  %v8680_v42 = vsel %vm8455_vm0, %v8652_v31, %v8651_v63 }
 0x814   :  { %v8393_v8 = vadd.f32 %v8392_v25, %v8391_v60  ;;  %v8128_v15 = vadd.f32 %v8127_v16, %v7059_v23  ;;  %v7063_v22 = vmax.f32 %v15350_v18, 0.0  ;;  %v15353_v23 = vld [vmem:[#allocation22_spill] sm:$0xff]  ;;  %v8655_v16 = vmul.f32 %v14634_v0, %v14634_v0 }
 0x815   :  { %v7853_v1 = vadd.f32 %v7852_v34, %v6819_v53  ;;  %v15352_v53 = vld [vmem:[#allocation20_spill] sm:$0xff]  ;;  %v6824_v32 = vmax.f32 %v15353_v23, 0.0  ;;  %v8656_v34 = vmul.f32 %v14639_v3, %v14639_v3  ;;  %v8681_v30 = vsel %vm8457_vm1, %v8653_v37, %v8680_v42  ;;  %v15362_v42 = vld [vmem:[#allocation30_spill] sm:$0xff] }
 0x816   :  { %v8394_v33 = vrot.slane %v8393_v8, 2  ;;  %v14626_v61 = vpop.f32.mrf.mxu0  ;;  %v8129_v29 = vadd.f32 %v8128_v15, %v7060_v5  ;;  %v6823_v17 = vmax.f32 %v15352_v53, 0.0  ;;  %v15355_v5 = vld [vmem:[#allocation52_spill] sm:$0xff]  ;;  %v8790_v53 = vmul.f32 %v14546_v27, %v14546_v27 }
 0x817   :  { %v7854_v56 = vadd.f32 %v7853_v1, %v6820_v6  ;;  %v15354_v6 = vld [vmem:[#allocation24_spill] sm:$0xff]  ;;  %v8090_v44 = vadd.f32 %v15355_v5, %v7026_v10  ;;  %v15357_v1 = vld [vmem:[#allocation26_spill] sm:$0xff]  ;;  %v8791_v63 = vmul.f32 %v14556_v24, %v14556_v24  ;;  %v6829_v5 = vmax.f32 %v15362_v42, 0.0 }
 0x818   :  { %v8395_v46 = vadd.f32 %v8394_v33, %v8393_v8  ;;  %v8130_v20 = vadd.f32 %v8129_v29, %v7061_v9  ;;  %v6825_v38 = vmax.f32 %v15354_v6, 0.0  ;;  %v15356_v8 = vld [vmem:[#allocation54_spill] sm:$0xff]  ;;  %v6826_v47 = vmax.f32 %v15357_v1, 0.0  ;;  %v15361_v6 = vld [vmem:[#allocation56_spill] sm:$0xff] }
 0x819   :  { %v7855_v36 = vadd.f32 %v7854_v56, %v6821_v13  ;;  %v7027_v15 = vmax.f32 %v15356_v8, 0.0  ;;  %v8786_v9 = vmul.f32 %v14523_v54, %v14523_v54  ;;  %v8682_v29 = vsel %vm8459_vm2, %v8654_v48, %v8681_v30  ;;  %v15360_v48 = vld [vmem:[#allocation29_spill] sm:$0xff]  ;;  %v15363_v30 = vld [vmem:[#allocation31_spill] sm:$0xff]  ;;  %v15374_v42 = vld [vmem:[#allocation48_spill] sm:$0xff] }
 0x81a   :  { %v8396_v60 = vrot.slane %v8395_v46, 1  ;;  %v8131_v52 = vadd.f32 %v8130_v20, %v7062_v26  ;;  %v8787_v56 = vmul.f32 %v14532_v4, %v14532_v4  ;;  %v8683_v26 = vsel %vm8461_vm3, %v8655_v16, %v8682_v29 }
 0x81b   :  { %v7856_v12 = vadd.f32 %v7855_v36, %v6822_v21  ;;  %v6827_v21 = vmax.f32 %v15358_v55, 0.0  ;;  %v8684_v18 = vsel %vm8463_vm4, %v8656_v34, %v8683_v26  ;;  %v8091_v31 = vadd.f32 %v8090_v44, %v7027_v15  ;;  %v15359_v36 = vld [vmem:[#allocation55_spill] sm:$0xff]  ;;  %v15365_v55 = vld [vmem:[#allocation32_spill] sm:$0xff]  ;;  %v15366_v26 = vld [vmem:[#allocation33_spill] sm:$0xff] }
 0x81c   :  { %v8397_v25 = vadd.f32 %v8396_v60, %v8395_v46  ;;  %v14652_v2 = vadd.f32 %v8131_v52, %v7063_v22  ;;  %v8785_v46 = vmul.f32 %v14530_v49, %v14530_v49  ;;  %v8788_v22 = vmul.f32 %v14536_v43, %v14536_v43 }
 0x81d   :  { %v7857_v45 = vadd.f32 %v7856_v12, %v6823_v17  ;;  %v7028_v62 = vmax.f32 %v15359_v36, 0.0  ;;  %v8789_v60 = vmul.f32 %v14542_v35, %v14542_v35  ;;  %v6828_v23 = vmax.f32 %v15360_v48, 0.0 }
 0x81e   :  { %v14660_v50 = vmul.f32 0.00390625, %v8397_v25  ;;  %v14662_v13 = vpop.f32.mrf.mxu0  ;;  %v8814_v17 = vsel %vm8455_vm0, %v8786_v9, %v8785_v46  ;;  %v6830_v1 = vmax.f32 %v15363_v30, 0.0  ;;  %v6832_v46 = vmax.f32 %v15366_v26, 0.0 }
 0x81f   :  { %v7858_v33 = vadd.f32 %v7857_v45, %v6824_v32  ;;  %v8815_v12 = vsel %vm8457_vm1, %v8787_v56, %v8814_v17  ;;  %v8092_v16 = vadd.f32 %v8091_v31, %v7028_v62  ;;  %v15368_v62 = vld [vmem:[#allocation34_spill] sm:$0xff] }
 0x820   :  { %v8657_v39 = vmul.f32 %v14660_v50, %v14660_v50  ;;  %v8816_v25 = vsel %vm8459_vm2, %v8788_v22, %v8815_v12  ;;  %v15367_v22 = vld [vmem:[#allocation58_spill] sm:$0xff]  ;;  %v15371_v12 = vld [vmem:[#allocation44_spill] sm:$0xff] }
 0x821   :  { %v7859_v20 = vadd.f32 %v7858_v33, %v6825_v38  ;;  %v7029_v38 = vmax.f32 %v15361_v6, 0.0  ;;  %v8817_v34 = vsel %vm8461_vm3, %v8789_v60, %v8816_v25  ;;  %v15364_v33 = vld [vmem:[#allocation57_spill] sm:$0xff]  ;;  %v7031_v31 = vmax.f32 %v15367_v22, 0.0 }
 0x822   :  { %v8685_v10 = vsel %vm8465_vm5, %v8657_v39, %v8684_v18  ;;  %v8818_v8 = vsel %vm8463_vm4, %v8790_v53, %v8817_v34  ;;  %v7030_v29 = vmax.f32 %v15364_v33, 0.0  ;;  %v15370_v53 = vld [vmem:[#allocation35_spill] sm:$0xff]  ;;  %v7948_v48 = vrot.slane %v15371_v12, 4 }
 0x823   :  { %v7860_v37 = vadd.f32 %v7859_v20, %v6826_v47  ;;  %v8690_v52 = vsel %vm8480_vm6, %v8685_v10, 0.0  ;;  %v8819_v15 = vsel %vm8465_vm5, %v8791_v63, %v8818_v8  ;;  %v8093_v9 = vadd.f32 %v8092_v16, %v7029_v38  ;;  %v15373_v16 = vld [vmem:[#allocation36_spill] sm:$0xff] }
 0x824   :  { %8691 = vadd.xlane.f32.xlu1 %v8690_v52  ;;  %v8824_v39 = vsel %vm8480_vm6, %v8819_v15, 0.0  ;;  %v6833_v10 = vmax.f32 %v15368_v62, 0.0  ;;  %v6834_v17 = vmax.f32 %v15370_v53, 0.0  ;;  %v6835_v6 = vmax.f32 %v15373_v16, 0.0  ;;  %v15376_v15 = vld [vmem:[#allocation50_spill] sm:$0xff] }
 0x825   :  { %v7861_v32 = vadd.f32 %v7860_v37, %v6827_v21  ;;  %v6831_v21 = vmax.f32 %v15365_v55, 0.0  ;;  %v8094_v18 = vadd.f32 %v8093_v9, %v7030_v29  ;;  %v15369_v37 = vld [vmem:[#allocation42_spill] sm:$0xff]  ;;  %v8059_v30 = vrot.slane %v15376_v15, 4 }
 0x826   :  { %v14694_v45 = vpop.f32.mrf.mxu0  ;;  %v7911_v52 = vrot.slane %v15369_v37, 4  ;;  %v15377_v55 = vld [vmem:[#allocation38_spill] sm:$0xff] }
 0x827   :  { %v7862_v44 = vadd.f32 %v7861_v32, %v6828_v23  ;;  %v15372_v23 = vld [vmem:[#allocation46_spill] sm:$0xff]  ;;  %v8095_v25 = vadd.f32 %v8094_v18, %v7031_v31  ;;  %v8060_v22 = vadd.f32 %v8059_v30, %v15376_v15 }
 0x828   :  { %v7985_v32 = vrot.slane %v15372_v23, 4  ;;  %v7912_v34 = vadd.f32 %v7911_v52, %v15369_v37  ;;  %v15379_v37 = vld [vmem:[#allocation40_spill] sm:$0xff] }
 0x829   :  { %v7863_v47 = vadd.f32 %v7862_v44, %v6829_v5  ;;  %v8022_v5 = vrot.slane %v15374_v42, 4  ;;  %v15375_v44 = vld [vmem:[#allocation37_spill] sm:$0xff]  ;;  %v8096_v33 = vrot.slane %v8095_v25, 4  ;;  %v6839_v52 = vmax.f32 %v15379_v37, 0.0 }
 0x82a   :  { %v6836_v8 = vmax.f32 %v15375_v44, 0.0  ;;  %v7986_v9 = vadd.f32 %v7985_v32, %v15372_v23  ;;  %v7913_v26 = vrot.slane %v7912_v34, 2 }
 0x82b   :  { %v7864_v56 = vadd.f32 %v7863_v47, %v6830_v1  ;;  %v7949_v47 = vadd.f32 %v7948_v48, %v15371_v12  ;;  %v8061_v48 = vrot.slane %v8060_v22, 2 }
 0x82c   :  { %8825 = vadd.xlane.f32.xlu1 %v8824_v39  ;;  %v8133_v39 = vrot.slane %v14652_v2, 4 }
 0x82d   :  { %v7865_v20 = vadd.f32 %v7864_v56, %v6831_v21  ;;  %v6837_v21 = vmax.f32 %v15377_v55, 0.0  ;;  %v7950_v62 = vrot.slane %v7949_v47, 2  ;;  %v8062_v15 = vadd.f32 %v8061_v48, %v8060_v22 }
 0x82e   :  { %v14706_v36 = vpop.f32.mrf.mxu0 }
 0x82f   :  { %v7866_v60 = vadd.f32 %v7865_v20, %v6832_v46  ;;  %v8023_v46 = vadd.f32 %v8022_v5, %v15374_v42  ;;  %v15378_v20 = vld [vmem:[#allocation39_spill] sm:$0xff]  ;;  %v7951_v32 = vadd.f32 %v7950_v62, %v7949_v47  ;;  %v6568_v62 = vmax.f32 %v14662_v13, 0.0 }
 0x830   :  { %v6838_v18 = vmax.f32 %v15378_v20, 0.0 }
 0x831   :  { %v7867_v63 = vadd.f32 %v7866_v60, %v6833_v10  ;;  %v7987_v10 = vrot.slane %v7986_v9, 2  ;;  %v8097_v60 = vadd.f32 %v8096_v33, %v8095_v25  ;;  %v8024_v12 = vrot.slane %v8023_v46, 2 }
 0x832   :  { %v6565_v25 = vmax.f32 %v14602_v59, 0.0 }
 0x833   :  { %v7868_v38 = vadd.f32 %v7867_v63, %v6834_v17  ;;  %v8134_v17 = vadd.f32 %v8133_v39, %v14652_v2  ;;  %v7914_v63 = vadd.f32 %v7913_v26, %v7912_v34  ;;  %v7988_v16 = vadd.f32 %v7987_v10, %v7986_v9 }
 0x834   :  { %v6566_v34 = vmax.f32 %v14612_v14, 0.0  ;;  %v7559_v39 = vadd.f32 %v14592_v51, %v6565_v25  ;;  %v6567_v26 = vmax.f32 %v14626_v61, 0.0 }
 0x835   :  { %v7869_v1 = vadd.f32 %v7868_v38, %v6835_v6  ;;  %v8098_v6 = vrot.slane %v8097_v60, 2  ;;  %v8135_v5 = vrot.slane %v8134_v17, 2  ;;  %v7915_v44 = vrot.slane %v7914_v63, 1 }
 0x836   :  { %v14720_v29 = vpop.f32.mrf.mxu0  ;;  %v7989_v33 = vrot.slane %v7988_v16, 1 }
 0x837   :  { %v7870_v56 = vadd.f32 %v7869_v1, %v6836_v8  ;;  %v8025_v8 = vadd.f32 %v8024_v12, %v8023_v46  ;;  %v7952_v1 = vrot.slane %v7951_v32, 1  ;;  %v8099_v2 = vadd.f32 %v8098_v6, %v8097_v60 }
 0x838   :  { %v7916_v47 = vadd.f32 %v7915_v44, %v7914_v63 }
 0x839   :  { %v7871_v31 = vadd.f32 %v7870_v56, %v6837_v21  ;;  %v8136_v21 = vadd.f32 %v8135_v5, %v8134_v17  ;;  %v8026_v9 = vrot.slane %v8025_v8, 1  ;;  %v8063_v56 = vrot.slane %v8062_v15, 1 }
 0x83a   :  { %v7953_v46 = vadd.f32 %v7952_v1, %v7951_v32  ;;  %v8100_v22 = vrot.slane %v8099_v2, 1  ;;  %v14736_v14 = vmul.f32 0.00390625, %v7916_v47  ;;  %v6569_v17 = vmax.f32 %v14694_v45, 0.0 }
 0x83b   :  { %v7872_v53 = vadd.f32 %v7871_v31, %v6838_v18  ;;  %v7990_v18 = vadd.f32 %v7989_v33, %v7988_v16  ;;  %v7560_v31 = vadd.f32 %v7559_v39, %v6566_v34  ;;  %v8137_v60 = vrot.slane %v8136_v21, 1 }
 0x83c   :  { %v8027_v37 = vadd.f32 %v8026_v9, %v8025_v8  ;;  %v14739_v63 = vmul.f32 0.00390625, %v7953_v46  ;;  %v8101_v12 = vadd.f32 %v8100_v22, %v8099_v2  ;;  %v8644_v16 = vmul.f32 %v14736_v14, %v14736_v14 }
 0x83d   :  { %v7873_v23 = vadd.f32 %v7872_v53, %v6839_v52  ;;  %v8064_v52 = vadd.f32 %v8063_v56, %v8062_v15  ;;  %v7561_v53 = vadd.f32 %v7560_v31, %v6567_v26  ;;  %v14741_v61 = vmul.f32 0.00390625, %v7990_v18  ;;  %v15380_v18 = vld [vmem:[#allocation43_spill] sm:$0xff]  ;;  %v15381_v31 = vld [vmem:[#allocation41_spill] sm:$0xff] }
 0x83e   :  { %v14729_v38 = vpop.f32.mrf.mxu0  ;;  %v8138_v32 = vadd.f32 %v8137_v60, %v8136_v21  ;;  %v14748_v6 = vmul.f32 0.00390625, %v8027_v37  ;;  %v6571_v5 = vmax.f32 %v14720_v29, 0.0  ;;  %v8645_v8 = vmul.f32 %v14739_v63, %v14739_v63 }
 0x83f   :  { %v7874_v42 = vrot.slane %v7873_v23, 4  ;;  %v7562_v48 = vadd.f32 %v7561_v53, %v6568_v62  ;;  %v8646_v25 = vmul.f32 %v14741_v61, %v14741_v61  ;;  %v6572_v1 = vmax.f32 %v14729_v38, 0.0 }
 0x840   :  { %v14762_v33 = vmul.f32 0.00390625, %v8138_v32  ;;  %v8647_v29 = vmul.f32 %v14748_v6, %v14748_v6  ;;  %v7356_v22 = vrot.slane %v15380_v18, 4  ;;  %v7319_v62 = vrot.slane %v15381_v31, 4 }
 0x841   :  { %v7875_v30 = vadd.f32 %v7874_v42, %v7873_v23  ;;  %v6570_v23 = vmax.f32 %v14706_v36, 0.0  ;;  %v14750_v42 = vmul.f32 0.00390625, %v8064_v52  ;;  %v7563_v45 = vadd.f32 %v7562_v48, %v6569_v17  ;;  %v15383_v17 = vld [vmem:[#allocation47_spill] sm:$0xff] }
 0x842   :  { %v14757_v36 = vmul.f32 0.00390625, %v8101_v12 }
 0x843   :  { %v7876_v55 = vrot.slane %v7875_v30, 2  ;;  %v8648_v47 = vmul.f32 %v14750_v42, %v14750_v42 }
 0x844   :  { %v8649_v56 = vmul.f32 %v14757_v36, %v14757_v36 }
 0x845   :  { %v7877_v20 = vadd.f32 %v7876_v55, %v7875_v30  ;;  %v7564_v30 = vadd.f32 %v7563_v45, %v6570_v23  ;;  %v15384_v23 = vld [vmem:[#allocation3_spill] sm:$0xff]  ;;  %v15385_v45 = vld [vmem:[#allocation49_spill] sm:$0xff] }
 0x846   :  { %v4540_v59 = vpop.f32.mrf.mxu0  ;;  %v6576_v32 = vmax.f32 %v15384_v23, 0.0 }
 0x847   :  { %v7878_v10 = vrot.slane %v7877_v20, 1  ;;  %v7565_v55 = vadd.f32 %v7564_v30, %v6571_v5  ;;  %v6573_v21 = vmax.f32 %v4540_v59, 0.0  ;;  %v7467_v5 = vrot.slane %v15385_v45, 4 }
 0x849   :  { %v7879_v51 = vadd.f32 %v7878_v10, %v7877_v20  ;;  %v7566_v39 = vadd.f32 %v7565_v55, %v6572_v1  ;;  %v8650_v20 = vmul.f32 %v14762_v33, %v14762_v33  ;;  %v15382_v10 = vld [vmem:[#allocation45_spill] sm:$0xff]  ;;  %v15388_v55 = vld [vmem:[#allocation4_spill] sm:$0xff] }
 0x84a   :  { %v7393_v60 = vrot.slane %v15382_v10, 4 }
 0x84b   :  { %v14744_v13 = vmul.f32 0.00390625, %v7879_v51  ;;  %v7567_v37 = vadd.f32 %v7566_v39, %v6573_v21  ;;  %v7430_v51 = vrot.slane %v15383_v17, 4  ;;  %v6577_v21 = vmax.f32 %v15388_v55, 0.0 }
 0x84d   :  { %v8643_v44 = vmul.f32 %v14744_v13, %v14744_v13 }
 0x84e   :  { %v4543_v15 = vpop.f32.mrf.mxu0 }
 0x84f   :  { %v8673_v2 = vsel %vm8455_vm0, %v8644_v16, %v8643_v44  ;;  %v6574_v26 = vmax.f32 %v4543_v15, 0.0  ;;  %v7357_v16 = vadd.f32 %v7356_v22, %v15380_v18  ;;  %v8428_v44 = vlaneseq }
 0x850   :  { %v8674_v34 = vsel %vm8457_vm1, %v8645_v8, %v8673_v2  ;;  %v7320_v8 = vadd.f32 %v7319_v62, %v15381_v31  ;;  %v7394_v15 = vadd.f32 %v7393_v60, %v15382_v10  ;;  %v15387_v2 = vld [vmem:[#allocation59_spill] sm:$0xff] }
 0x851   :  { %v8675_v9 = vsel %vm8459_vm2, %v8646_v25, %v8674_v34  ;;  %v7568_v12 = vadd.f32 %v7567_v37, %v6574_v26  ;;  %v15386_v25 = vld [vmem:[#allocation51_spill] sm:$0xff]  ;;  %v8429_v34 = vshrl.u32 %v8428_v44, 7  ;;  %v7358_v39 = vrot.slane %v7357_v16, 2  ;;  %v15390_v37 = vld [vmem:[#allocation6_spill] sm:$0xff] }
 0x852   :  { %v8676_v38 = vsel %vm8461_vm3, %v8647_v29, %v8675_v9  ;;  %v7504_v30 = vrot.slane %v15386_v25, 4  ;;  %v7541_v29 = vrot.slane %v15387_v2, 4  ;;  %v7468_v26 = vadd.f32 %v7467_v5, %v15385_v45 }
 0x853   :  { %v8677_v46 = vsel %vm8463_vm4, %v8648_v47, %v8676_v38  ;;  %v7431_v47 = vadd.f32 %v7430_v51, %v15383_v17  ;;  %12738 = vset.pattern.permute.xlu0 %v8429_v34  ;;  %12739 = vset.pattern.permute.xlu2 %v8429_v34  ;;  %v7395_v18 = vrot.slane %v7394_v15, 2  ;;  %v14796_v62 = vand.u32 127, %v8428_v44  ;;  %v15391_v51 = vld [vmem:[#allocation8_spill] sm:$0xff] }
 0x854   :  { %v8678_v59 = vsel %vm8465_vm5, %v8649_v56, %v8677_v46  ;;  %v15389_v56 = vld [vmem:[#allocation5_spill] sm:$0xff]  ;;  %v7321_v46 = vrot.slane %v7320_v8, 2  ;;  %v7505_v22 = vadd.f32 %v7504_v30, %v15386_v25  ;;  %v7542_v31 = vadd.f32 %v7541_v29, %v15387_v2  ;;  %v15396_v2 = vld [vmem:[#allocation10_spill] sm:$0xff] }
 0x855   :  { %v8679_v52 = vsel %vm8467_vm7, %v8650_v20, %v8678_v59  ;;  %v6578_v38 = vmax.f32 %v15389_v56, 0.0  ;;  %v8434_v20 = vadd.s32 1, %v8429_v34  ;;  %v8432_v10 = vmul.u32 5, %v8429_v34 }
 0x856   :  { %8688 = vadd.xlane.f32.xlu0 %v8679_v52  ;;  %v4545_v53 = vpop.f32.mrf.mxu0  ;;  %v6579_v52 = vmax.f32 %v15390_v37, 0.0  ;;  %v7469_v23 = vrot.slane %v7468_v26, 2  ;;  %v7322_v25 = vadd.f32 %v7321_v46, %v7320_v8  ;;  %v7396_v30 = vadd.f32 %v7395_v18, %v7394_v15 }
 0x857   :  { %v6575_v48 = vmax.f32 %v4545_v53, 0.0  ;;  %v8435_v60 = vmul.u32 5, %v8434_v20  ;;  %v7432_v53 = vrot.slane %v7431_v47, 2  ;;  %vm14801_vm8 = vcmp.ge.s32.totalorder %v14796_v62, %v8432_v10  ;;  %v15398_v20 = vld [vmem:[#allocation14_spill] sm:$0xff] }
 0x858   :  { %v6581_v29 = vmax.f32 %v15396_v2, 0.0  ;;  %v7323_v8 = vrot.slane %v7322_v25, 1  ;;  %v7397_v15 = vrot.slane %v7396_v30, 1 }
 0x859   :  { %v7569_v1 = vadd.f32 %v7568_v12, %v6575_v48  ;;  %v6580_v12 = vmax.f32 %v15391_v51, 0.0  ;;  %v7359_v48 = vadd.f32 %v7358_v39, %v7357_v16  ;;  %vm14806_vm9 = vcmp.lt.s32.totalorder %v14796_v62, %v8435_v60 }
 0x85a   :  { %v7433_v34 = vadd.f32 %v7432_v53, %v7431_v47  ;;  %vm8437_vm10 = vmand %vm14801_vm8, %vm14806_vm9  ;;  %v12772_v47 = vmov 0.0   ;;  %v7398_v51 = vadd.f32 %v7397_v15, %v7396_v30 }
 0x85b   :  { %v7570_v9 = vadd.f32 %v7569_v1, %v6576_v32  ;;  %v7506_v32 = vrot.slane %v7505_v22, 2  ;;  %v7543_v1 = vrot.slane %v7542_v31, 2  ;;  %v7360_v55 = vrot.slane %v7359_v48, 1 }
 0x85c   :  { %v7434_v18 = vrot.slane %v7433_v34, 1  ;;  %v14818_v60 = vsel %vm8437_vm10, 1.0, %v12772_v47 }
 0x85d   :  { %v7571_v59 = vadd.f32 %v7570_v9, %v6577_v21  ;;  %v7470_v21 = vadd.f32 %v7469_v23, %v7468_v26  ;;  %v15397_v9 = vld [vmem:[#allocation12_spill] sm:$0xff]  ;;  %v7544_v46 = vadd.f32 %v7543_v1, %v7542_v31  ;;  %v7361_v26 = vadd.f32 %v7360_v55, %v7359_v48 }
 0x85e   :  { %v6582_v56 = vmax.f32 %v15397_v9, 0.0  ;;  %v7435_v23 = vadd.f32 %v7434_v18, %v7433_v34  ;;  %v14826_v48 = vmul.f32 0.00390625, %v7398_v51 }
 0x85f   :  { %v7572_v17 = vadd.f32 %v7571_v59, %v6578_v38  ;;  %v7507_v38 = vadd.f32 %v7506_v32, %v7505_v22  ;;  %v6583_v59 = vmax.f32 %v15398_v20, 0.0  ;;  %v7471_v37 = vrot.slane %v7470_v21, 1 }
 0x860   :  { %v7545_v22 = vrot.slane %v7544_v46, 1  ;;  %v14822_v31 = vmul.f32 0.00390625, %v7361_v26 }
 0x861   :  { %v7573_v45 = vadd.f32 %v7572_v17, %v6579_v52  ;;  %v7508_v52 = vrot.slane %v7507_v38, 1  ;;  %v7324_v17 = vadd.f32 %v7323_v8, %v7322_v25 }
 0x862   :  { %v8778_v30 = vmul.f32 %v14822_v31, %v14822_v31 }
 0x863   :  { %v7574_v16 = vadd.f32 %v7573_v45, %v6580_v12  ;;  %v8478_v12 = vsel %vm8476_vm11, %v14818_v60, 0  ;;  %v7472_v45 = vadd.f32 %v7471_v37, %v7470_v21  ;;  %v7509_v5 = vadd.f32 %v7508_v52, %v7507_v38 }
 0x864   :  { %v8502_v1 = vsub.f32 %v8478_v12, %v8478_v12  ;;  %v14824_v2 = vmul.f32 0.00390625, %v7324_v17  ;;  %v8779_v38 = vmul.f32 %v14826_v48, %v14826_v48 }
 0x865   :  { %v7575_v39 = vadd.f32 %v7574_v16, %v6581_v29  ;;  %v7546_v29 = vadd.f32 %v7545_v22, %v7544_v46  ;;  %v14828_v16 = vmul.f32 0.00390625, %v7435_v23  ;;  %v14832_v55 = vmul.f32 0.00390625, %v7472_v45 }
 0x866   :  { %v14834_v34 = vmul.f32 0.00390625, %v7509_v5  ;;  %v8503_v21 = vand.u32 4294901760, %v8502_v1  ;;  %v8456_v20 = vsel %vm8455_vm0, %v14822_v31, %v14824_v2 }
 0x867   :  { %v7576_v10 = vadd.f32 %v7575_v39, %v6582_v56  ;;  %v8777_v56 = vmul.f32 %v14824_v2, %v14824_v2  ;;  %v14840_v39 = vmul.f32 0.00390625, %v7546_v29  ;;  %v8780_v8 = vmul.f32 %v14828_v16, %v14828_v16 }
 0x868   :  { %v8458_v15 = vsel %vm8457_vm1, %v14826_v48, %v8456_v20  ;;  %v8781_v46 = vmul.f32 %v14832_v55, %v14832_v55  ;;  %v8782_v37 = vmul.f32 %v14834_v34, %v14834_v34  ;;  %v8504_v52 = vsub.f32 %v8502_v1, %v8503_v21 }
 0x869   :  { %v7577_v53 = vadd.f32 %v7576_v10, %v6583_v59  ;;  %v8807_v18 = vsel %vm8455_vm0, %v8778_v30, %v8777_v56  ;;  %v8460_v10 = vsel %vm8459_vm2, %v14828_v16, %v8458_v15  ;;  %v8783_v17 = vmul.f32 %v14840_v39, %v14840_v39 }
 0x86a   :  { %v8808_v51 = vsel %vm8457_vm1, %v8779_v38, %v8807_v18 }
 0x86b   :  { %v7578_v32 = vrot.slane %v7577_v53, 4  ;;  %v8809_v12 = vsel %vm8459_vm2, %v8780_v8, %v8808_v51 }
 0x86d   :  { %v7579_v44 = vadd.f32 %v7578_v32, %v7577_v53  ;;  %v8462_v53 = vsel %vm8461_vm3, %v14832_v55, %v8460_v10  ;;  %v8810_v32 = vsel %vm8461_vm3, %v8781_v46, %v8809_v12 }
 0x86e   :  { %v8464_v23 = vsel %vm8463_vm4, %v14834_v34, %v8462_v53 }
 0x86f   :  { %v7580_v25 = vrot.slane %v7579_v44, 2  ;;  %v8466_v45 = vsel %vm8465_vm5, %v14840_v39, %v8464_v23 }
 0x871   :  { %v7581_v9 = vadd.f32 %v7580_v25, %v7579_v44  ;;  %v8811_v44 = vsel %vm8463_vm4, %v8782_v37, %v8810_v32  ;;  %v8505_v25 = vand.u32 4294901760, %v8504_v52 }
 0x872   :  { %v8812_v30 = vsel %vm8465_vm5, %v8783_v17, %v8811_v44 }
 0x873   :  { %v7582_v59 = vrot.slane %v7581_v9, 1 }
 0x875   :  { %v7583_v26 = vadd.f32 %v7582_v59, %v7581_v9 }
 0x877   :  { %v14861_v22 = vmul.f32 0.00390625, %v7583_v26 }
 0x879   :  { %v8784_v5 = vmul.f32 %v14861_v22, %v14861_v22  ;;  %v14874_v29 = vsel %vm8467_vm7, %v14861_v22, %v8466_v45 }
 0x87a   :  { %v8499_v9 = vand.u32 4294901760, %v14874_v29 }
 0x87b   :  { %v8813_v56 = vsel %vm8467_vm7, %v8784_v5, %v8812_v30 }
 0x87c   :  { %8822 = vadd.xlane.f32.xlu2 %v8813_v56  ;;  %8500 = vmatpush.msrb.mxu0 %v8499_v9  ;;  %v8531_v38 = vsub.f32 %v14874_v29, %v8499_v9 }
 0x87d   :  { %8584 = vmatpush.msrb.mxu1 %v8499_v9  ;;  %8506 = vmatmul.f32.vlgmr.msrb.gmra.mxu0 %v8505_v25 }
 0x87e   :  { %8560 = vmatpush.msrb.mxu3 %v8531_v38  ;;  %v8532_v20 = vand.u32 4294901760, %v8531_v38  ;;  %8588 = vmatmul.f32.vlgmr.msrb.gmra.mxu1 %v8503_v21 }
 0x87f   :  { %8563 = vmatmul.f32.vlgmr.msrb.gmra.mxu3 %v8502_v1 }
 0x880   :  { %8634 = vmatpush.msra.mxu3 %v14567_v28  ;;  %v8533_v59 = vsub.f32 %v8531_v38, %v8532_v20 }
 0x882   :  { %8636 = vmatpush.msra.mxu3 %v8499_v9  ;;  %v8534_v8 = vand.u32 4294901760, %v8533_v59 }
 0x884   :  { %8535 = vmatpush.msrb.mxu2 %v8534_v8 }
 0x885   :  { %12213 = vmatmul.msk.f32.vlgmr.msrb.gmra.mxu2 %vm8476_vm11, %v14818_v60 }
 0x886   :  { %8609 = vmatpush.msra.mxu2 %v8526_v58 }
 0x887   :  { %12215 = vmatmul.msk.f32.vlgmr.msra.gmra.mxu3 %vm8476_vm11, %v14818_v60 }
 0x888   :  { %8613 = vmatpush.msra.mxu2 %v8532_v20 }
 0x88d   :  { %12214 = vmatmul.msk.f32.vlgmr.msra.gmra.mxu2 %vm8476_vm11, %v14818_v60 }
 0x897   :  { %v8692_v23 = vpop.xlane.xlu1 %8691 }
 0x898   :  { %v8694_v32 = vmax.f32 %v8692_v23, 1e-16 }
 0x89a   :  { %vm8711_vm9 = vweird.f32 %v8694_v32 }
 0x89f   :  { %v8826_v9 = vpop.xlane.xlu1 %8825 }
 0x8a0   :  { %v14894_v20 = vmax.f32 %v8826_v9, 1e-16 }
 0x8c9   :  { %v8689_v51 = vpop.xlane.xlu0 %8688 }
 0x8ca   :  { %v8693_v12 = vmax.f32 %v8689_v51, 1e-16 }
 0x8cc   :  { %12740 = vrsqrt.f32 %v8693_v12  ;;  %vm8701_vm14 = vweird.f32 %v8693_v12 }
 0x8cd   :  { %12742 = vrsqrt.f32 %v8694_v32 }
 0x8ce   :  { %12744 = vrsqrt.f32 %v14894_v20 }
 0x8d2   :  { %v12741_v45 = vpop.eup %12740 }
 0x8d3   :  { %v8696_v5 = vmul.f32 %v12741_v45, %v8693_v12  ;;  %v12743_v25 = vpop.eup %12742  ;;  %vm8702_vm13 = vweird.f32 %v12741_v45 }
 0x8d4   :  { %v8706_v30 = vmul.f32 %v12743_v25, %v8694_v32  ;;  %vm8703_vm15 = vmor %vm8701_vm14, %vm8702_vm13  ;;  %vm8712_vm8 = vweird.f32 %v12743_v25  ;;  %vm8845_vm13 = vweird.f32 %v14894_v20 }
 0x8d5   :  { %v8697_v44 = vmul.f32 %v12741_v45, %v8696_v5  ;;  %vm8713_vm10 = vmor %vm8711_vm9, %vm8712_vm8 }
 0x8d6   :  { %v8707_v59 = vmul.f32 %v12743_v25, %v8706_v30 }
 0x8d7   :  { %v8698_v56 = vmul.f32 0.5, %v8697_v44 }
 0x8d9   :  { %v8699_v8 = vsub.f32 1.5, %v8698_v56 }
 0x8ef   :  { %v8823_v38 = vpop.xlane.xlu2 %8822 }
 0x8fa   :  { %v8507_v21 = vpop.f32.mrf.mxu0 }
 0x8fb   :  { %v8589_v18 = vpop.f32.mrf.mxu1 }
 0x902   :  { %v8564_v28 = vpop.f32.mrf.mxu3 }
 0x908   :  { %v8538_v15 = vpop.f32.mrf.mxu2 }
 0x909   :  { %v8539_v1 = vadd.f32 %v8538_v15, %v8507_v21  ;;  %v14896_v21 = vmax.f32 %v8823_v38, 1e-16  ;;  %v8700_v15 = vmul.f32 %v12741_v45, %v8699_v8 }
 0x90a   :  { %v8639_v37 = vpop.f32.mrf.mxu3 }
 0x90b   :  { %v8565_v46 = vadd.f32 %v8564_v28, %v8539_v1  ;;  %v8708_v28 = vmul.f32 0.5, %v8707_v59  ;;  %12746 = vrsqrt.f32 %v14896_v21  ;;  %vm8835_vm9 = vweird.f32 %v14896_v21 }
 0x90d   :  { %v8590_v10 = vadd.f32 %v8589_v18, %v8565_v46  ;;  %v8709_v1 = vsub.f32 1.5, %v8708_v28  ;;  %v14900_v46 = vsel %vm8703_vm15, %v12741_v45, %v8700_v15  ;;  %v12745_v18 = vpop.eup %12744 }
 0x90e   :  { %v8719_v44 = vrot.slane %v14900_v46, 3  ;;  %v8745_v32 = vmul.f32 %v14900_v46, %v14744_v13  ;;  %v8720_v59 = vrot.slane %v14900_v46, 4  ;;  %vm8846_vm14 = vweird.f32 %v12745_v18 }
 0x90f   :  { %vm8847_vm8 = vmor %vm8845_vm13, %vm8846_vm14 }
 0x910   :  { %v8616_v26 = vpop.f32.mrf.mxu2  ;;  %v8748_v28 = vmul.f32 %v8719_v44, %v14741_v61  ;;  %v8722_v44 = vrot.slane %v14900_v46, 6 }
 0x911   :  { %v8617_v52 = vadd.f32 %v8616_v26, %v8590_v10  ;;  %v12747_v10 = vpop.eup %12746  ;;  %v8717_v26 = vrot.slane %v14900_v46, 1 }
 0x912   :  { %vm8836_vm15 = vweird.f32 %v12747_v10 }
 0x913   :  { %v8640_v53 = vadd.f32 %v8639_v37, %v8617_v52  ;;  %v8710_v37 = vmul.f32 %v12743_v25, %v8709_v1  ;;  %v8840_v52 = vmul.f32 %v12745_v18, %v14894_v20 }
 0x915   :  { %v14889_v7 = vmul.f32 0.2, %v8640_v53  ;;  %v8830_v53 = vmul.f32 %v12747_v10, %v14896_v21  ;;  %v14907_v51 = vsel %vm8713_vm10, %v12743_v25, %v8710_v37  ;;  %v8841_v12 = vmul.f32 %v12745_v18, %v8840_v52  ;;  %vm8837_vm10 = vmor %vm8835_vm9, %vm8836_vm15 }
 0x916   :  { %v8724_v5 = vrot.slane %v14907_v51, 1  ;;  %v8725_v38 = vrot.slane %v14907_v51, 2  ;;  %v8726_v52 = vrot.slane %v14907_v51, 3 }
 0x917   :  { %v8760_v58 = vmul.f32 %v14889_v7, %v14889_v7  ;;  %v8831_v23 = vmul.f32 %v12747_v10, %v8830_v53  ;;  %v8842_v9 = vmul.f32 0.5, %v8841_v12 }
 0x918   :  { %v8754_v8 = vmul.f32 %v8724_v5, %v14621_v11  ;;  %v8755_v53 = vmul.f32 %v8725_v38, %v14624_v57  ;;  %v8756_v38 = vmul.f32 %v8726_v52, %v14631_v40 }
 0x919   :  { %v8762_v17 = vsel %vm8761_vm12, %v8760_v58, 0.0  ;;  %v8718_v58 = vrot.slane %v14900_v46, 2  ;;  %v8832_v56 = vmul.f32 0.5, %v8831_v23  ;;  %v8843_v1 = vsub.f32 1.5, %v8842_v9 }
 0x91a   :  { %8763 = vadd.xlane.f32.xlu0 %v8762_v17  ;;  %v8746_v17 = vmul.f32 %v8717_v26, %v14736_v14  ;;  %v8721_v26 = vrot.slane %v14900_v46, 5  ;;  %v8923_v12 = vrot.slane %v8754_v8, 7  ;;  %v8913_v23 = vrot.slane %v8748_v28, 5 }
 0x91b   :  { %v8747_v45 = vmul.f32 %v8718_v58, %v14739_v63  ;;  %v8833_v37 = vsub.f32 1.5, %v8832_v56  ;;  %v8749_v58 = vmul.f32 %v8720_v59, %v14748_v6  ;;  %v8844_v5 = vmul.f32 %v12745_v18, %v8843_v1 }
 0x91c   :  { %v8909_v30 = vrot.slane %v8746_v17, 7  ;;  %v8727_v56 = vrot.slane %v14907_v51, 4  ;;  %v8925_v59 = vrot.slane %v8755_v53, 6  ;;  %v8723_v28 = vrot.slane %v14900_v46, 7 }
 0x91d   :  { %v8911_v25 = vrot.slane %v8747_v45, 6  ;;  %v8753_v45 = vmul.f32 %v14907_v51, %v14629_v19  ;;  %v8751_v1 = vmul.f32 %v8722_v44, %v14757_v36  ;;  %v8927_v20 = vrot.slane %v8756_v38, 5 }
 0x91e   :  { %v8910_v15 = vsel %vm8455_vm0, %v8909_v30, %v8745_v32  ;;  %v8750_v30 = vmul.f32 %v8721_v26, %v14750_v42  ;;  %v8834_v32 = vmul.f32 %v12747_v10, %v8833_v37  ;;  %v8728_v37 = vrot.slane %v14907_v51, 5 }
 0x91f   :  { %v8912_v17 = vsel %vm8457_vm1, %v8911_v25, %v8910_v15  ;;  %v8915_v25 = vrot.slane %v8749_v58, 4  ;;  %v8924_v8 = vsel %vm8455_vm0, %v8923_v12, %v8753_v45  ;;  %v14937_v15 = vsel %vm8847_vm8, %v12745_v18, %v8844_v5 }
 0x920   :  { %v8914_v9 = vsel %vm8459_vm2, %v8913_v23, %v8912_v17  ;;  %v8917_v52 = vrot.slane %v8750_v30, 3  ;;  %v14942_v53 = vsel %vm8837_vm10, %v12747_v10, %v8834_v32  ;;  %v8757_v58 = vmul.f32 %v8727_v56, %v14634_v0 }
 0x921   :  { %v8916_v26 = vsel %vm8461_vm3, %v8915_v25, %v8914_v9  ;;  %v8926_v46 = vsel %vm8457_vm1, %v8925_v59, %v8924_v8  ;;  %v8858_v21 = vrot.slane %v14937_v15, 1  ;;  %v8752_v18 = vmul.f32 %v8723_v28, %v14762_v33 }
 0x922   :  { %v8918_v23 = vsel %vm8463_vm4, %v8917_v52, %v8916_v26  ;;  %v8919_v45 = vrot.slane %v8751_v1, 2  ;;  %v8851_v5 = vrot.slane %v14942_v53, 1  ;;  %v8729_v44 = vrot.slane %v14907_v51, 6 }
 0x923   :  { %v8758_v10 = vmul.f32 %v8728_v37, %v14639_v3  ;;  %v8928_v30 = vsel %vm8459_vm2, %v8927_v20, %v8926_v46  ;;  %v8929_v9 = vrot.slane %v8757_v58, 4  ;;  %v8859_v56 = vrot.slane %v14937_v15, 2 }
 0x924   :  { %v8920_v32 = vsel %vm8465_vm5, %v8919_v45, %v8918_v23  ;;  %v8921_v38 = vrot.slane %v8752_v18, 1  ;;  %v8888_v59 = vmul.f32 %v8858_v21, %v14523_v54  ;;  %v8852_v25 = vrot.slane %v14942_v53, 2 }
 0x925   :  { %v8880_v8 = vmul.f32 %v8851_v5, %v14822_v31  ;;  %v8930_v28 = vsel %vm8461_vm3, %v8929_v9, %v8928_v30  ;;  %v8759_v51 = vmul.f32 %v8729_v44, %v14660_v50  ;;  %v8931_v1 = vrot.slane %v8758_v10, 3 }
 0x926   :  { %v8922_v26 = vsel %vm8467_vm7, %v8921_v38, %v8920_v32  ;;  %v8860_v37 = vrot.slane %v14937_v15, 3  ;;  %v8889_v52 = vmul.f32 %v8859_v56, %v14532_v4  ;;  %v9191_v20 = vrot.slane %v8888_v59, 7 }
 0x927   :  { %v8932_v54 = vsel %vm8463_vm4, %v8931_v1, %v8930_v28  ;;  %v14965_v21 = vand.u32 4294901760, %v8922_v26  ;;  %v8853_v31 = vrot.slane %v14942_v53, 3  ;;  %v9177_v18 = vrot.slane %v8880_v8, 7 }
 0x928   :  { %v8861_v23 = vrot.slane %v14937_v15, 4  ;;  %v8887_v45 = vmul.f32 %v14937_v15, %v14530_v49  ;;  %v9353_v4 = vsel %vm8455_vm0, %v14736_v14, %v14744_v13  ;;  %v8933_v5 = vrot.slane %v8759_v51, 2 }
 0x929   :  { %v9193_v10 = vrot.slane %v8889_v52, 6  ;;  %v8879_v30 = vmul.f32 %v14942_v53, %v14824_v2  ;;  %v8854_v32 = vrot.slane %v14942_v53, 4  ;;  %v14981_v59 = vsub.f32 %v8922_v26, %v14965_v21 }
 0x92a   :  { %v9192_v9 = vsel %vm8455_vm0, %v9191_v20, %v8887_v45  ;;  %v8934_v38 = vsel %vm8465_vm5, %v8933_v5, %v8932_v54  ;;  %v8882_v14 = vmul.f32 %v8853_v31, %v14828_v16  ;;  %v8891_v2 = vmul.f32 %v8861_v23, %v14542_v35 }
 0x92b   :  { %v9178_v13 = vsel %vm8455_vm0, %v9177_v18, %v8879_v30  ;;  %v9354_v8 = vsel %vm8457_vm1, %v14739_v63, %v9353_v4  ;;  %v9194_v51 = vsel %vm8457_vm1, %v9193_v10, %v9192_v9  ;;  %v8855_v1 = vrot.slane %v14942_v53, 5 }
 0x92c   :  { %v8883_v16 = vmul.f32 %v8854_v32, %v14832_v55  ;;  %v14994_v52 = vand.u32 4294901760, %v8934_v38  ;;  %v14997_v35 = vand.u32 4294901760, %v14981_v59  ;;  %v8856_v54 = vrot.slane %v14942_v53, 6 }
 0x92d   :  { %v9197_v31 = vrot.slane %v8891_v2, 4  ;;  %v8884_v55 = vmul.f32 %v8855_v1, %v14834_v34  ;;  %v9355_v4 = vsel %vm8459_vm2, %v14741_v61, %v9354_v8  ;;  %v9360_v61 = vsel %vm8455_vm0, %v14621_v11, %v14629_v19 }
 0x92e   :  { %v9183_v45 = vrot.slane %v8883_v16, 4  ;;  %v15015_v34 = vsub.f32 %v8934_v38, %v14994_v52  ;;  %v9356_v30 = vsel %vm8461_vm3, %v14748_v6, %v9355_v4  ;;  %vm9114_vm0 = vcmask 23552  }
 0x92f   :  { %v9185_v10 = vrot.slane %v8884_v55, 3 }
 0x930   :  { %v15032_v11 = vand.u32 4294901760, %v15015_v34 }
 0x98d   :  { %v8764_v17 = vpop.xlane.xlu0 %8763 }
 0x98e   :  { %v8765_v12 = vmax.f32 %v8764_v17, 1e-16  ;;  %v8881_v17 = vmul.f32 %v8852_v25, %v14826_v48  ;;  %v8890_v48 = vmul.f32 %v8860_v37, %v14536_v43  ;;  %v8862_v43 = vrot.slane %v14937_v15, 5 }
 0x98f   :  { %v8863_v25 = vrot.slane %v14937_v15, 6  ;;  %v9181_v15 = vrot.slane %v8882_v14, 5 }
 0x990   :  { %12748 = vrsqrt.f32 %v8765_v12  ;;  %v9179_v56 = vrot.slane %v8881_v17, 6  ;;  %v9195_v26 = vrot.slane %v8890_v48, 5  ;;  %vm8772_vm14 = vweird.f32 %v8765_v12 }
 0x991   :  { %v8892_v63 = vmul.f32 %v8862_v43, %v14546_v27  ;;  %v8957_v27 = vsub.f32 %v14981_v59, %v14997_v35  ;;  %v8885_v48 = vmul.f32 %v8856_v54, %v14840_v39 }
 0x992   :  { %v9180_v37 = vsel %vm8457_vm1, %v9179_v56, %v9178_v13  ;;  %v9196_v17 = vsel %vm8459_vm2, %v9195_v26, %v9194_v51  ;;  %v9361_v56 = vsel %vm8457_vm1, %v14624_v57, %v9360_v61  ;;  %v9357_v13 = vsel %vm8463_vm4, %v14750_v42, %v9356_v30 }
 0x993   :  { %v9182_v18 = vsel %vm8459_vm2, %v9181_v15, %v9180_v37  ;;  %v9198_v5 = vsel %vm8461_vm3, %v9197_v31, %v9196_v17  ;;  %v8958_v39 = vand.u32 4294901760, %v8957_v27  ;;  %v9362_v19 = vsel %vm8459_vm2, %v14631_v40, %v9361_v56 }
 0x994   :  { %v9187_v14 = vrot.slane %v8885_v48, 2  ;;  %v9358_v8 = vsel %vm8465_vm5, %v14757_v36, %v9357_v13  ;;  %vm9118_vm1 = vcmask 22528  }
 0x995   :  { %v9359_v51 = vsel %vm8467_vm7, %v14762_v33, %v9358_v8 }
 0x996   :  { %v12749_v58 = vpop.eup %12748 }
 0x997   :  { %v8767_v46 = vmul.f32 %v12749_v58, %v8765_v12  ;;  %vm8773_vm13 = vweird.f32 %v12749_v58  ;;  %v8893_v12 = vmul.f32 %v8863_v25, %v14556_v24  ;;  %v9184_v24 = vsel %vm8461_vm3, %v9183_v45, %v9182_v18 }
 0x998   :  { %vm8774_vm15 = vmor %vm8772_vm14, %vm8773_vm13 }
 0x999   :  { %v8768_v44 = vmul.f32 %v12749_v58, %v8767_v46  ;;  %v9201_v32 = vrot.slane %v8893_v12, 2 }
 0x99b   :  { %v8769_v49 = vmul.f32 0.5, %v8768_v44 }
 0x99d   :  { %v8770_v28 = vsub.f32 1.5, %v8769_v49  ;;  %v9186_v49 = vsel %vm8463_vm4, %v9185_v10, %v9184_v24 }
 0x99e   :  { %v9188_v2 = vsel %vm8465_vm5, %v9187_v14, %v9186_v49 }
 0x99f   :  { %v8771_v20 = vmul.f32 %v12749_v58, %v8770_v28  ;;  %v8965_v28 = vsub.f32 %v15015_v34, %v15032_v11 }
 0x9a1   :  { %v8775_v46 = vsel %vm8774_vm15, %v12749_v58, %v8771_v20  ;;  %v8857_v58 = vrot.slane %v14942_v53, 7  ;;  %v8966_v1 = vand.u32 4294901760, %v8965_v28  ;;  %vm9607_vm15 = vcmask 120832  }
 0x9a2   :  { %v15005_v23 = vmul.f32 %v8775_v46, %v14889_v7  ;;  %v9199_v7 = vrot.slane %v8892_v63, 3 }
 0x9a3   :  { %v8886_v38 = vmul.f32 %v8857_v58, %v14861_v22  ;;  %v9363_v22 = vsel %vm8461_vm3, %v14634_v0, %v9362_v19 }
 0x9a4   :  { %v8952_v44 = vand.u32 4294901760, %v15005_v23  ;;  %v9200_v9 = vsel %vm8463_vm4, %v9199_v7, %v9198_v5  ;;  %v9364_v43 = vsel %vm8463_vm4, %v14639_v3, %v9363_v22  ;;  %vm9238_vm4 = vcmp.gt.f32.partialorder %v14818_v60, 0.0 }
 0x9a5   :  { %v9202_v57 = vsel %vm8465_vm5, %v9201_v32, %v9200_v9  ;;  %v9365_v40 = vsel %vm8465_vm5, %v14660_v50, %v9364_v43  ;;  %v9189_v42 = vrot.slane %v8886_v38, 1  ;;  %vm9240_vm5 = vcmask 116736  }
 0x9a6   :  { %8953 = vmatpush.xpose.msra.mxu1 %v8952_v44  ;;  %v8987_v53 = vsub.f32 %v15005_v23, %v8952_v44 }
 0x9a7   :  { %v9190_v3 = vsel %vm8467_vm7, %v9189_v42, %v9188_v2 }
 0x9a8   :  { %9018 = vmatpush.xpose.msrb.mxu3 %v8987_v53  ;;  %v8988_v6 = vand.u32 4294901760, %v8987_v53 }
 0x9a9   :  { %8959 = vmatmul.f32.vlgmr.msra.gmra.mxu1 %v8958_v39 }
 0x9aa   :  { %9046 = vmatpush.xpose.msrb.mxu1 %v8952_v44  ;;  %v8989_v25 = vsub.f32 %v8987_v53, %v8988_v6 }
 0x9ab   :  { %9021 = vmatmul.f32.vlgmr.msrb.gmra.mxu3 %v14981_v59 }
 0x9ac   :  { %9104 = vmatpush.xpose.msra.mxu3 %v8952_v44  ;;  %v8990_v0 = vand.u32 4294901760, %v8989_v25 }
 0x9ae   :  { %9219 = vmatpush.xpose.msra.mxu1 %v9202_v57  ;;  %8991 = vmatpush.xpose.msrb.mxu2 %v8990_v0 }
 0x9b0   :  { %12220 = vmatpush.msk.msrb.mxu3 %vm8480_vm6, %v9365_v40 }
 0x9b1   :  { %8967 = vmatmul.f32.gmra.mxu1 %v8966_v1  ;;  %8993 = vmatmul.f32.vlgmr.msrb.gmra.mxu2 %v14965_v21 }
 0x9b2   :  { %9220 = vmatpush.xpose.msra.mxu1 %v9190_v3  ;;  %9387 = vmatpush.msrb.mxu3 %v9359_v51 }
 0x9b3   :  { %9078 = vmatpush.xpose.msra.mxu2 %v8988_v6  ;;  %9026 = vmatmul.f32.gmra.mxu3 %v15015_v34 }
 0x9b7   :  { %12218 = vmatpush.msk.msrb.mxu2 %vm8480_vm6, %v14563_v41 }
 0x9b9   :  { %9333 = vmatpush.msrb.mxu2 %v14874_v29  ;;  %9050 = vmatmul.f32.vlgmr.msrb.gmra.mxu1 %v14997_v35 }
 0x9ba   :  { %8997 = vmatmul.f32.gmra.mxu2 %v14994_v52  ;;  %9429 = vmatpush.xpose.msrb.mxu1 %v14994_v52 }
 0x9bb   :  { %9106 = vmatmul.f32.vlgmr.msra.gmra.mxu3 %v14965_v21 }
 0x9bc   :  { %9500 = vmatpush.xpose.msra.mxu3 %v15015_v34 }
 0x9be   :  { %9431 = vmatpush.xpose.msrb.mxu1 %v14965_v21 }
 0x9c0   :  { %9503 = vmatpush.xpose.msra.mxu3 %v14981_v59 }
 0x9c1   :  { %9056 = vmatmul.f32.gmra.mxu1 %v15032_v11 }
 0x9c2   :  { %9080 = vmatmul.f32.vlgmr.msra.gmra.mxu2 %v14965_v21 }
 0x9c3   :  { %9468 = vmatpush.xpose.msra.mxu2 %v8966_v1  ;;  %9110 = vmatmul.f32.gmra.mxu3 %v14994_v52 }
 0x9c7   :  { %9474 = vmatpush.xpose.msra.mxu2 %v8958_v39 }
 0x9c9   :  { %9221 = vmatmul.f32.vlgmr.msra.gmra.mxu1 %v15005_v23 }
 0x9ca   :  { %9084 = vmatmul.f32.gmra.mxu2 %v14994_v52  ;;  %9530 = vmatpush.xpose.msra.mxu1 %v14994_v52 }
 0x9ce   :  { %9532 = vmatpush.xpose.msra.mxu1 %v14965_v21 }
 0x9d1   :  { %9437 = vmatmul.f32.vlgmr.msrb.gmra.mxu1 %v8958_v39 }
 0x9d2   :  { %12222 = vmatpush.msk.msrb.mxu1 %vm8480_vm6, %v9365_v40 }
 0x9d4   :  { %10172 = vmatpush.msrb.mxu1 %v9359_v51 }
 0x9d9   :  { %9445 = vmatmul.f32.gmra.mxu1 %v8966_v1 }
 0x9e1   :  { %9536 = vmatmul.f32.vlgmr.msra.gmra.mxu1 %v14997_v35 }
 0x9e9   :  { %9542 = vmatmul.f32.gmra.mxu1 %v15032_v11 }
 0xa26   :  { %v8960_v41 = vpop.f32.mrf.mxu1 }
 0xa2e   :  { %v9022_v50 = vpop.f32.mrf.mxu3  ;;  %v8968_v33 = vpop.f32.mrf.mxu1 }
 0xa34   :  { %v8994_v36 = vpop.f32.mrf.mxu2 }
 0xa35   :  { %v8995_v26 = vadd.f32 %v8994_v36, %v8960_v41 }
 0xa36   :  { %v9027_v29 = vpop.f32.mrf.mxu3  ;;  %v9051_v20 = vpop.f32.mrf.mxu1 }
 0xa37   :  { %v9023_v37 = vadd.f32 %v9022_v50, %v8995_v26 }
 0xa39   :  { %v9052_v15 = vadd.f32 %v9051_v20, %v9023_v37 }
 0xa3d   :  { %v8998_v16 = vpop.f32.mrf.mxu2 }
 0xa3e   :  { %v8999_v63 = vadd.f32 %v8998_v16, %v8968_v33  ;;  %v9107_v17 = vpop.f32.mrf.mxu3  ;;  %v9057_v23 = vpop.f32.mrf.mxu1 }
 0xa40   :  { %v9028_v31 = vadd.f32 %v9027_v29, %v8999_v63 }
 0xa42   :  { %v9058_v12 = vadd.f32 %v9057_v23, %v9028_v31 }
 0xa45   :  { %v9081_v54 = vpop.f32.mrf.mxu2 }
 0xa46   :  { %v9082_v46 = vadd.f32 %v9081_v54, %v9052_v15  ;;  %v9111_v27 = vpop.f32.mrf.mxu3  ;;  %v15091_v56 = vpop.f32.mrf.mxu1 }
 0xa47   :  { %v9239_v39 = vsel %vm9238_vm4, %v15091_v56, -inf }
 0xa48   :  { %v15077_v55 = vadd.f32 %v9107_v17, %v9082_v46  ;;  %v9241_v38 = vsel %vm9240_vm5, %v9239_v39, -inf }
 0xa4a   :  { %v9115_v18 = vsel %vm9114_vm0, %v15077_v55, -inf }
 0xa4b   :  { %9116 = vmax.xlane.f32.xlu2 %v9115_v18 }
 0xa4d   :  { %v9085_v45 = vpop.f32.mrf.mxu2 }
 0xa4e   :  { %v9086_v4 = vadd.f32 %v9085_v45, %v9058_v12 }
 0xa50   :  { %v15081_v5 = vadd.f32 %v9111_v27, %v9086_v4 }
 0xa52   :  { %v9119_v58 = vsel %vm9118_vm1, %v15081_v5, -inf }
 0xa53   :  { %9120 = vmax.xlane.f32.xlu0 %v9119_v58 }
 0xabe   :  { %v9117_v44 = vpop.xlane.xlu2 %9116 }
 0xabf   :  { %vm9122_vm2 = vcmp.ge.f32.partialorder %v15077_v55, %v9117_v44 }
 0xac0   :  { %v9124_v7 = vsel %vm9122_vm2, %v14796_v62, 3 }
 0xac1   :  { %v9126_v48 = vsel %vm9114_vm0, %v9124_v7, 2147483647 }
 0xac2   :  { %v9128_v24 = vshra.s32 %v9126_v48, 16  ;;  %v9127_v49 = vand.u32 65535, %v9126_v48 }
 0xac4   :  { %v9130_v61 = vcvt.s32.f32 %v9128_v24  ;;  %v9129_v6 = vcvt.s32.f32 %v9127_v49 }
 0xac6   :  { %9131 = vmin.xlane.f32.xlu1 %v9130_v61  ;;  %v9121_v10 = vpop.xlane.xlu0 %9120 }
 0xac7   :  { %vm9123_vm3 = vcmp.ge.f32.partialorder %v15081_v5, %v9121_v10 }
 0xac8   :  { %v9125_v30 = vsel %vm9123_vm3, %v14796_v62, 3 }
 0xac9   :  { %v9141_v53 = vsel %vm9118_vm1, %v9125_v30, 2147483647 }
 0xaca   :  { %v9143_v9 = vshra.s32 %v9141_v53, 16  ;;  %v9142_v13 = vand.u32 65535, %v9141_v53 }
 0xacc   :  { %v9145_v32 = vcvt.s32.f32 %v9143_v9  ;;  %v9144_v22 = vcvt.s32.f32 %v9142_v13 }
 0xace   :  { %9146 = vmin.xlane.f32.xlu2 %v9145_v32 }
 0xad6   :  { %9242 = vmax.xlane.f32.xlu2 %v9241_v38 }
 0xb39   :  { %v9132_v19 = vpop.xlane.xlu1 %9131 }
 0xb3a   :  { %vm9133_vm7 = vcmp.eq.f32.partialorder %v9130_v61, %v9132_v19  ;;  %v9138_v25 = vcvt.f32.s32 %v9132_v19 }
 0xb3b   :  { %v9134_v14 = vsel %vm9133_vm7, %v9129_v6, inf }
 0xb3c   :  { %9135 = vmin.xlane.f32.xlu0 %v9134_v14  ;;  %v9139_v40 = vshll.u32 %v9138_v25, 16 }
 0xb41   :  { %v9147_v57 = vpop.xlane.xlu2 %9146 }
 0xb42   :  { %vm9148_vm8 = vcmp.eq.f32.partialorder %v9145_v32, %v9147_v57  ;;  %v9153_v28 = vcvt.f32.s32 %v9147_v57 }
 0xb43   :  { %v9149_v43 = vsel %vm9148_vm8, %v9144_v22, inf }
 0xb44   :  { %9150 = vmin.xlane.f32.xlu1 %v9149_v43  ;;  %v9154_v51 = vshll.u32 %v9153_v28, 16 }
 0xb49   :  { %v9243_v17 = vpop.xlane.xlu2 %9242 }
 0xb4a   :  { %v9245_v31 = vperm.slane %v9243_v17, %v14796_v62 }
 0xbaf   :  { %v9136_v2 = vpop.xlane.xlu0 %9135 }
 0xbb0   :  { %v9137_v42 = vcvt.f32.s32 %v9136_v2 }
 0xbb2   :  { %v9140_v8 = vadd.s32 %v9139_v40, %v9137_v42 }
 0xbb4   :  { %vm9156_vm9 = vcmp.eq.s32.totalorder %v14796_v62, %v9140_v8 }
 0xbb5   :  { %v12216_v0 = vsel %vm9156_vm9, 1.0, %v12772_v47 }
 0xbb6   :  { %vm9225_vm10 = vcmp.gt.f32.partialorder %v12216_v0, 0.0 }
 0xbb7   :  { %v9151_v3 = vpop.xlane.xlu1 %9150  ;;  %v9227_v50 = vsel %vm9225_vm10, %v15077_v55, -inf }
 0xbb8   :  { %v9152_v1 = vcvt.f32.s32 %v9151_v3  ;;  %v9229_v29 = vsel %vm9114_vm0, %v9227_v50, -inf }
 0xbba   :  { %v9155_v41 = vadd.s32 %v9154_v51, %v9152_v1 }
 0xbbc   :  { %vm9157_vm13 = vcmp.eq.s32.totalorder %v14796_v62, %v9155_v41 }
 0xbbd   :  { %v12217_v36 = vsel %vm9157_vm13, 1.0, %v12772_v47 }
 0xbbe   :  { %vm9226_vm14 = vcmp.gt.f32.partialorder %v12217_v36, 0.0 }
 0xbbf   :  { %v9228_v33 = vsel %vm9226_vm14, %v15081_v5, -inf }
 0xbc0   :  { %v9230_v26 = vsel %vm9118_vm1, %v9228_v33, -inf }
 0xbc1   :  { %v9231_v16 = vmax.f32 %v9229_v29, %v9230_v26 }
 0xbc3   :  { %v9232_v37 = vrot.slane %v9231_v16, 4 }
 0xbc5   :  { %v9233_v20 = vmax.f32 %v9231_v16, %v9232_v37 }
 0xbc7   :  { %v9234_v15 = vrot.slane %v9233_v20, 2 }
 0xbc9   :  { %v9235_v63 = vmax.f32 %v9233_v20, %v9234_v15 }
 0xbcb   :  { %v9236_v54 = vrot.slane %v9235_v63, 1 }
 0xbcd   :  { %v9237_v46 = vmax.f32 %v9235_v63, %v9236_v54 }
 0xbcf   :  { %v9247_v18 = vmax.f32 %v9237_v46, %v9245_v31 }
 0xbd1   :  { %v9248_v23 = vperm.slane %v9247_v18, 0 }
 0xbd3   :  { %v9249_v12 = vsub.f32 %v15077_v55, %v9248_v23  ;;  %v9250_v45 = vsub.f32 %v15081_v5, %v9248_v23  ;;  %9261 = vperm.xlu0 %12738, %v9248_v23  }
 0xbd5   :  { %v9251_v4 = vmul.f32 1.442695, %v9249_v12  ;;  %v9253_v27 = vmul.f32 1.442695, %v9250_v45 }
 0xbd7   :  { %12750 = vpow2.f32 %v9253_v27 }
 0xbd8   :  { %12752 = vpow2.f32 %v9251_v4 }
 0xbdd   :  { %v12751_v58 = vpop.eup %12750 }
 0xbde   :  { %v12753_v44 = vpop.eup %12752  ;;  %v9256_v7 = vmul.f32 %v12751_v58, %v12217_v36 }
 0xbdf   :  { %v9255_v48 = vmul.f32 %v12753_v44, %v12216_v0 }
 0xbe0   :  { %v9268_v24 = vsel %vm9118_vm1, %v9256_v7, 0.0 }
 0xbe1   :  { %9283 = vxpose.xlu1.b32.start [1/2] (short) (narrow) %v9255_v48, 8  ;;  %v9267_v61 = vsel %vm9114_vm0, %v9255_v48, 0.0 }
 0xbe2   :  { %v15109_v10 = vadd.f32 %v9268_v24, %v9267_v61 }
 0xbe9   :  { %9284 = vxpose.xlu1.b32.end [2/2] (short) (narrow) %v9256_v7, 8 }
 0xc45   :  { %v9262_v55 = vpop.permute.xlu0 %9261 }
 0xc46   :  { %v9263_v5 = vsub.f32 %v15091_v56, %v9262_v55 }
 0xc48   :  { %v9264_v30 = vmul.f32 1.442695, %v9263_v5 }
 0xc4a   :  { %12754 = vpow2.f32 %v9264_v30 }
 0xc50   :  { %v12755_v53 = vpop.eup %12754 }
 0xc51   :  { %v15113_v9 = vmul.f32 %v12755_v53, %v14818_v60 }
 0xc53   :  { %12219 = vmatmul.msk.f32.vlgmr.msrb.gmra.mxu2 %vm8476_vm11, %v15113_v9 }
 0xc54   :  { %9563 = vmatpush.xpose.msrb.mxu2 %v15032_v11 }
 0xc58   :  { %9567 = vmatpush.xpose.msrb.mxu2 %v14997_v35  ;;  %v9438_v35 = vpop.f32.mrf.mxu1 }
 0xc5b   :  { %9476 = vmatmul.f32.vlgmr.msra.gmra.mxu2 %v14965_v21 }
 0xc60   :  { %v9446_v38 = vpop.f32.mrf.mxu1 }
 0xc63   :  { %9480 = vmatmul.f32.gmra.mxu2 %v14994_v52 }
 0xc68   :  { %v9537_v13 = vpop.f32.mrf.mxu1 }
 0xc6b   :  { %9569 = vmatmul.f32.vlgmr.msrb.gmra.mxu2 %v14965_v21 }
 0xc70   :  { %v9543_v2 = vpop.f32.mrf.mxu1 }
 0xc73   :  { %9573 = vmatmul.f32.gmra.mxu2 %v14994_v52 }
 0xc85   :  { %v9299_v32 = vpop.trf.xlu1 }
 0xc86   :  { %12221 = vmatmul.msk.f32.vlgmr.msrb.gmra.mxu3 %vm8476_vm11, %v9299_v32 }
 0xc87   :  { %9592 = vmatpush.xpose.msrb.mxu3 %v14994_v52 }
 0xc8b   :  { %9594 = vmatpush.xpose.msrb.mxu3 %v14965_v21 }
 0xc8e   :  { %9506 = vmatmul.f32.vlgmr.msra.gmra.mxu3 %v14981_v59 }
 0xc96   :  { %9511 = vmatmul.f32.gmra.mxu3 %v15015_v34 }
 0xc9e   :  { %9596 = vmatmul.f32.vlgmr.msrb.gmra.mxu3 %v14965_v21 }
 0xca6   :  { %9600 = vmatmul.f32.gmra.mxu3 %v14994_v52 }
 0xcd6   :  { %v9335_v60 = vpop.f32.mrf.mxu2 }
 0xcde   :  { %v9477_v11 = vpop.f32.mrf.mxu2 }
 0xcdf   :  { %v9478_v6 = vadd.f32 %v9477_v11, %v9438_v35 }
 0xce6   :  { %v9481_v19 = vpop.f32.mrf.mxu2 }
 0xce7   :  { %v9482_v34 = vadd.f32 %v9481_v19, %v9446_v38 }
 0xcee   :  { %v9570_v22 = vpop.f32.mrf.mxu2 }
 0xcf6   :  { %v9574_v8 = vpop.f32.mrf.mxu2 }
 0xd09   :  { %v9389_v56 = vpop.f32.mrf.mxu3 }
 0xd0a   :  { %v15130_v39 = vadd.f32 %v9389_v56, %v9335_v60 }
 0xd11   :  { %v9507_v49 = vpop.f32.mrf.mxu3 }
 0xd12   :  { %v9508_v14 = vadd.f32 %v9507_v49, %v9478_v6 }
 0xd14   :  { %v9538_v59 = vadd.f32 %v9537_v13, %v9508_v14 }
 0xd16   :  { %v9571_v21 = vadd.f32 %v9570_v22, %v9538_v59 }
 0xd19   :  { %v9512_v57 = vpop.f32.mrf.mxu3 }
 0xd1a   :  { %v9513_v43 = vadd.f32 %v9512_v57, %v9482_v34 }
 0xd1c   :  { %v9544_v40 = vadd.f32 %v9543_v2, %v9513_v43 }
 0xd1e   :  { %v9575_v28 = vadd.f32 %v9574_v8, %v9544_v40 }
 0xd21   :  { %v9597_v25 = vpop.f32.mrf.mxu3 }
 0xd22   :  { %v15132_v52 = vadd.f32 %v9597_v25, %v9571_v21 }
 0xd24   :  { %v9604_v42 = vsel %vm8476_vm11, %v15132_v52, -inf }
 0xd25   :  { %9605 = vmax.xlane.f32.xlu2 %v9604_v42 }
 0xd29   :  { %v9601_v0 = vpop.f32.mrf.mxu3 }
 0xd2a   :  { %v15136_v3 = vadd.f32 %v9601_v0, %v9575_v28 }
 0xd2c   :  { %v9608_v51 = vsel %vm9607_vm15, %v15136_v3, -inf }
 0xd2d   :  { %9609 = vmax.xlane.f32.xlu2 %v9608_v51 }
 0xd98   :  { %v9606_v1 = vpop.xlane.xlu2 %9605 }
 0xd99   :  { %vm9611_vm2 = vcmp.ge.f32.partialorder %v15132_v52, %v9606_v1 }
 0xd9a   :  { %v9613_v41 = vsel %vm9611_vm2, %v14796_v62, 15 }
 0xd9b   :  { %v9615_v50 = vsel %vm8476_vm11, %v9613_v41, 2147483647 }
 0xd9c   :  { %v9617_v36 = vshra.s32 %v9615_v50, 16  ;;  %v9616_v15 = vand.u32 65535, %v9615_v50 }
 0xd9e   :  { %v9619_v33 = vcvt.s32.f32 %v9617_v36  ;;  %v9618_v17 = vcvt.s32.f32 %v9616_v15 }
 0xda0   :  { %9620 = vmin.xlane.f32.xlu2 %v9619_v33  ;;  %v9610_v29 = vpop.xlane.xlu2 %9609 }
 0xda1   :  { %vm9612_vm3 = vcmp.ge.f32.partialorder %v15136_v3, %v9610_v29 }
 0xda2   :  { %v9614_v26 = vsel %vm9612_vm3, %v14796_v62, 15 }
 0xda3   :  { %v9630_v16 = vsel %vm9607_vm15, %v9614_v26, 2147483647 }
 0xda4   :  { %v9632_v37 = vshra.s32 %v9630_v16, 16  ;;  %v9631_v46 = vand.u32 65535, %v9630_v16 }
 0xda6   :  { %v9634_v20 = vcvt.s32.f32 %v9632_v37  ;;  %v9633_v18 = vcvt.s32.f32 %v9631_v46 }
 0xda8   :  { %9635 = vmin.xlane.f32.xlu2 %v9634_v20 }
 0xe13   :  { %v9621_v63 = vpop.xlane.xlu2 %9620 }
 0xe14   :  { %vm9622_vm4 = vcmp.eq.f32.partialorder %v9619_v33, %v9621_v63  ;;  %v9627_v12 = vcvt.f32.s32 %v9621_v63 }
 0xe15   :  { %v9623_v54 = vsel %vm9622_vm4, %v9618_v17, inf }
 0xe16   :  { %9624 = vmin.xlane.f32.xlu2 %v9623_v54  ;;  %v9628_v4 = vshll.u32 %v9627_v12, 16 }
 0xe1b   :  { %v9636_v31 = vpop.xlane.xlu2 %9635 }
 0xe1c   :  { %vm9637_vm7 = vcmp.eq.f32.partialorder %v9634_v20, %v9636_v31  ;;  %v9642_v44 = vcvt.f32.s32 %v9636_v31 }
 0xe1d   :  { %v9638_v23 = vsel %vm9637_vm7, %v9633_v18, inf }
 0xe1e   :  { %9639 = vmin.xlane.f32.xlu0 %v9638_v23  ;;  %v9643_v61 = vshll.u32 %v9642_v44, 16 }
 0xe89   :  { %v9625_v45 = vpop.xlane.xlu2 %9624 }
 0xe8a   :  { %v9626_v27 = vcvt.f32.s32 %v9625_v45 }
 0xe8c   :  { %v9629_v58 = vadd.s32 %v9628_v4, %v9626_v27 }
 0xe8e   :  { %vm9645_vm8 = vcmp.eq.s32.totalorder %v14796_v62, %v9629_v58 }
 0xe8f   :  { %v9647_v7 = vsel %vm9645_vm8, -inf, %v15132_v52  ;;  %v9649_v0 = vsel %vm9645_vm8, 1.0, %v12772_v47 }
 0xe90   :  { %v9651_v48 = vsel %vm8476_vm11, %v9647_v7, -inf }
 0xe91   :  { %v9640_v24 = vpop.xlane.xlu0 %9639  ;;  %9652 = vmax.xlane.f32.xlu2 %v9651_v48 }
 0xe92   :  { %v9641_v55 = vcvt.f32.s32 %v9640_v24 }
 0xe94   :  { %v9644_v5 = vadd.s32 %v9643_v61, %v9641_v55 }
 0xe96   :  { %vm9646_vm9 = vcmp.eq.s32.totalorder %v14796_v62, %v9644_v5 }
 0xe97   :  { %v9648_v30 = vsel %vm9646_vm9, -inf, %v15136_v3  ;;  %v9650_v16 = vsel %vm9646_vm9, 1.0, %v12772_v47 }
 0xe98   :  { %v9654_v53 = vsel %vm9607_vm15, %v9648_v30, -inf }
 0xe99   :  { %9655 = vmax.xlane.f32.xlu2 %v9654_v53 }
 0xf04   :  { %v9653_v32 = vpop.xlane.xlu2 %9652 }
 0xf05   :  { %vm9657_vm10 = vcmp.ge.f32.partialorder %v9647_v7, %v9653_v32 }
 0xf06   :  { %v9659_v60 = vsel %vm9657_vm10, %v14796_v62, 15 }
 0xf07   :  { %v9661_v35 = vsel %vm8476_vm11, %v9659_v60, 2147483647 }
 0xf08   :  { %v9663_v11 = vshra.s32 %v9661_v35, 16  ;;  %v9662_v13 = vand.u32 65535, %v9661_v35 }
 0xf0a   :  { %v9665_v56 = vcvt.s32.f32 %v9663_v11  ;;  %v9664_v59 = vcvt.s32.f32 %v9662_v13 }
 0xf0c   :  { %9666 = vmin.xlane.f32.xlu2 %v9665_v56  ;;  %v9656_v38 = vpop.xlane.xlu2 %9655 }
 0xf0d   :  { %vm9658_vm13 = vcmp.ge.f32.partialorder %v9648_v30, %v9656_v38 }
 0xf0e   :  { %v9660_v49 = vsel %vm9658_vm13, %v14796_v62, 15 }
 0xf0f   :  { %v9676_v19 = vsel %vm9607_vm15, %v9660_v49, 2147483647 }
 0xf10   :  { %v9678_v6 = vshra.s32 %v9676_v19, 16  ;;  %v9677_v34 = vand.u32 65535, %v9676_v19 }
 0xf12   :  { %v9680_v14 = vcvt.s32.f32 %v9678_v6  ;;  %v9679_v21 = vcvt.s32.f32 %v9677_v34 }
 0xf14   :  { %9681 = vmin.xlane.f32.xlu2 %v9680_v14 }
 0xf7f   :  { %v9667_v57 = vpop.xlane.xlu2 %9666 }
 0xf80   :  { %vm9668_vm14 = vcmp.eq.f32.partialorder %v9665_v56, %v9667_v57  ;;  %v9673_v2 = vcvt.f32.s32 %v9667_v57 }
 0xf81   :  { %v9669_v22 = vsel %vm9668_vm14, %v9664_v59, inf }
 0xf82   :  { %9670 = vmin.xlane.f32.xlu1 %v9669_v22  ;;  %v9674_v42 = vshll.u32 %v9673_v2, 16 }
 0xf87   :  { %v9682_v43 = vpop.xlane.xlu2 %9681 }
 0xf88   :  { %vm9683_vm2 = vcmp.eq.f32.partialorder %v9680_v14, %v9682_v43  ;;  %v9688_v51 = vcvt.f32.s32 %v9682_v43 }
 0xf89   :  { %v9684_v25 = vsel %vm9683_vm2, %v9679_v21, inf }
 0xf8a   :  { %9685 = vmin.xlane.f32.xlu2 %v9684_v25  ;;  %v9689_v33 = vshll.u32 %v9688_v51, 16 }
 0xff5   :  { %v9671_v40 = vpop.xlane.xlu1 %9670 }
 0xff6   :  { %v9672_v8 = vcvt.f32.s32 %v9671_v40 }
 0xff8   :  { %v9675_v28 = vadd.s32 %v9674_v42, %v9672_v8 }
 0xffa   :  { %vm9691_vm3 = vcmp.eq.s32.totalorder %v14796_v62, %v9675_v28 }
 0xffb   :  { %v9693_v1 = vsel %vm9691_vm3, -inf, %v9647_v7  ;;  %v9695_v41 = vsel %vm9691_vm3, 1.0, %v9649_v0 }
 0xffc   :  { %v9697_v50 = vsel %vm8476_vm11, %v9693_v1, -inf }
 0xffd   :  { %9698 = vmax.xlane.f32.xlu2 %v9697_v50  ;;  %v9686_v36 = vpop.xlane.xlu2 %9685 }
 0xffe   :  { %v9687_v29 = vcvt.f32.s32 %v9686_v36 }
0x1000   :  { %v9690_v26 = vadd.s32 %v9689_v33, %v9687_v29 }
0x1002   :  { %vm9692_vm4 = vcmp.eq.s32.totalorder %v14796_v62, %v9690_v26 }
0x1003   :  { %v9694_v37 = vsel %vm9692_vm4, -inf, %v9648_v30  ;;  %v9696_v20 = vsel %vm9692_vm4, 1.0, %v9650_v16 }
0x1004   :  { %v9700_v15 = vsel %vm9607_vm15, %v9694_v37, -inf }
0x1005   :  { %9701 = vmax.xlane.f32.xlu0 %v9700_v15 }
0x1070   :  { %v9699_v63 = vpop.xlane.xlu2 %9698 }
0x1071   :  { %vm9703_vm7 = vcmp.ge.f32.partialorder %v9693_v1, %v9699_v63 }
0x1072   :  { %v9705_v17 = vsel %vm9703_vm7, %v14796_v62, 15 }
0x1073   :  { %v9707_v54 = vsel %vm8476_vm11, %v9705_v17, 2147483647 }
0x1074   :  { %v9709_v46 = vshra.s32 %v9707_v54, 16  ;;  %v9708_v4 = vand.u32 65535, %v9707_v54 }
0x1076   :  { %v9711_v31 = vcvt.s32.f32 %v9709_v46  ;;  %v9710_v58 = vcvt.s32.f32 %v9708_v4 }
0x1078   :  { %v9702_v18 = vpop.xlane.xlu0 %9701  ;;  %9712 = vmin.xlane.f32.xlu2 %v9711_v31 }
0x1079   :  { %vm9704_vm8 = vcmp.ge.f32.partialorder %v9694_v37, %v9702_v18 }
0x107a   :  { %v9706_v47 = vsel %vm9704_vm8, %v14796_v62, 15 }
0x107b   :  { %v9722_v23 = vsel %vm9607_vm15, %v9706_v47, 2147483647 }
0x107c   :  { %v9724_v12 = vshra.s32 %v9722_v23, 16  ;;  %v9723_v7 = vand.u32 65535, %v9722_v23 }
0x107e   :  { %v9726_v45 = vcvt.s32.f32 %v9724_v12  ;;  %v9725_v24 = vcvt.s32.f32 %v9723_v7 }
0x1080   :  { %9727 = vmin.xlane.f32.xlu0 %v9726_v45 }
0x10eb   :  { %v9713_v27 = vpop.xlane.xlu2 %9712 }
0x10ec   :  { %vm9714_vm9 = vcmp.eq.f32.partialorder %v9711_v31, %v9713_v27  ;;  %v9719_v55 = vcvt.f32.s32 %v9713_v27 }
0x10ed   :  { %v9715_v44 = vsel %vm9714_vm9, %v9710_v58, inf }
0x10ee   :  { %9716 = vmin.xlane.f32.xlu2 %v9715_v44  ;;  %v9720_v30 = vshll.u32 %v9719_v55, 16 }
0x10f3   :  { %v9728_v48 = vpop.xlane.xlu0 %9727 }
0x10f4   :  { %vm9729_vm10 = vcmp.eq.f32.partialorder %v9726_v45, %v9728_v48  ;;  %v9734_v60 = vcvt.f32.s32 %v9728_v48 }
0x10f5   :  { %v9730_v61 = vsel %vm9729_vm10, %v9725_v24, inf }
0x10f6   :  { %9731 = vmin.xlane.f32.xlu0 %v9730_v61  ;;  %v9735_v49 = vshll.u32 %v9734_v60, 16 }
0x1161   :  { %v9717_v5 = vpop.xlane.xlu2 %9716 }
0x1162   :  { %v9718_v53 = vcvt.f32.s32 %v9717_v5 }
0x1164   :  { %v9721_v32 = vadd.s32 %v9720_v30, %v9718_v53 }
0x1166   :  { %vm9737_vm13 = vcmp.eq.s32.totalorder %v14796_v62, %v9721_v32 }
0x1167   :  { %v9739_v35 = vsel %vm9737_vm13, -inf, %v9693_v1  ;;  %v9741_v11 = vsel %vm9737_vm13, 1.0, %v9695_v41 }
0x1168   :  { %v9743_v56 = vsel %vm8476_vm11, %v9739_v35, -inf }
0x1169   :  { %v9732_v38 = vpop.xlane.xlu0 %9731  ;;  %9744 = vmax.xlane.f32.xlu2 %v9743_v56 }
0x116a   :  { %v9733_v19 = vcvt.f32.s32 %v9732_v38 }
0x116c   :  { %v9736_v6 = vadd.s32 %v9735_v49, %v9733_v19 }
0x116e   :  { %vm9738_vm14 = vcmp.eq.s32.totalorder %v14796_v62, %v9736_v6 }
0x116f   :  { %v9740_v14 = vsel %vm9738_vm14, -inf, %v9694_v37  ;;  %v9742_v13 = vsel %vm9738_vm14, 1.0, %v9696_v20 }
0x1170   :  { %v9746_v57 = vsel %vm9607_vm15, %v9740_v14, -inf }
0x1171   :  { %9747 = vmax.xlane.f32.xlu0 %v9746_v57 }
0x11dc   :  { %v9745_v59 = vpop.xlane.xlu2 %9744 }
0x11dd   :  { %vm9749_vm2 = vcmp.ge.f32.partialorder %v9739_v35, %v9745_v59 }
0x11de   :  { %v9751_v22 = vsel %vm9749_vm2, %v14796_v62, 15 }
0x11df   :  { %v9753_v34 = vsel %vm8476_vm11, %v9751_v22, 2147483647 }
0x11e0   :  { %v9755_v43 = vshra.s32 %v9753_v34, 16  ;;  %v9754_v28 = vand.u32 65535, %v9753_v34 }
0x11e2   :  { %v9757_v21 = vcvt.s32.f32 %v9755_v43  ;;  %v9756_v51 = vcvt.s32.f32 %v9754_v28 }
0x11e4   :  { %v9748_v25 = vpop.xlane.xlu0 %9747  ;;  %9758 = vmin.xlane.f32.xlu2 %v9757_v21 }
0x11e5   :  { %vm9750_vm3 = vcmp.ge.f32.partialorder %v9740_v14, %v9748_v25 }
0x11e6   :  { %v9752_v2 = vsel %vm9750_vm3, %v14796_v62, 15 }
0x11e7   :  { %v9768_v40 = vsel %vm9607_vm15, %v9752_v2, 2147483647 }
0x11e8   :  { %v9770_v42 = vshra.s32 %v9768_v40, 16  ;;  %v9769_v41 = vand.u32 65535, %v9768_v40 }
0x11ea   :  { %v9772_v8 = vcvt.s32.f32 %v9770_v42  ;;  %v9771_v36 = vcvt.s32.f32 %v9769_v41 }
0x11ec   :  { %9773 = vmin.xlane.f32.xlu0 %v9772_v8 }
0x1257   :  { %v9759_v0 = vpop.xlane.xlu2 %9758 }
0x1258   :  { %vm9760_vm4 = vcmp.eq.f32.partialorder %v9757_v21, %v9759_v0  ;;  %v9765_v29 = vcvt.f32.s32 %v9759_v0 }
0x1259   :  { %v9761_v1 = vsel %vm9760_vm4, %v9756_v51, inf }
0x125a   :  { %9762 = vmin.xlane.f32.xlu2 %v9761_v1  ;;  %v9766_v16 = vshll.u32 %v9765_v29, 16 }
0x125f   :  { %v9774_v50 = vpop.xlane.xlu0 %9773 }
0x1260   :  { %vm9775_vm7 = vcmp.eq.f32.partialorder %v9772_v8, %v9774_v50  ;;  %v9780_v15 = vcvt.f32.s32 %v9774_v50 }
0x1261   :  { %v9776_v33 = vsel %vm9775_vm7, %v9771_v36, inf }
0x1262   :  { %9777 = vmin.xlane.f32.xlu0 %v9776_v33  ;;  %v9781_v31 = vshll.u32 %v9780_v15, 16 }
0x12cd   :  { %v9763_v26 = vpop.xlane.xlu2 %9762 }
0x12ce   :  { %v9764_v37 = vcvt.f32.s32 %v9763_v26 }
0x12d0   :  { %v9767_v20 = vadd.s32 %v9766_v16, %v9764_v37 }
0x12d2   :  { %vm9783_vm8 = vcmp.eq.s32.totalorder %v14796_v62, %v9767_v20 }
0x12d3   :  { %v9785_v63 = vsel %vm9783_vm8, -inf, %v9739_v35  ;;  %v9787_v17 = vsel %vm9783_vm8, 1.0, %v9741_v11 }
0x12d4   :  { %v9789_v54 = vsel %vm8476_vm11, %v9785_v63, -inf }
0x12d5   :  { %v9778_v46 = vpop.xlane.xlu0 %9777  ;;  %9790 = vmax.xlane.f32.xlu2 %v9789_v54 }
0x12d6   :  { %v9779_v18 = vcvt.f32.s32 %v9778_v46 }
0x12d8   :  { %v9782_v47 = vadd.s32 %v9781_v31, %v9779_v18 }
0x12da   :  { %vm9784_vm9 = vcmp.eq.s32.totalorder %v14796_v62, %v9782_v47 }
0x12db   :  { %v9786_v23 = vsel %vm9784_vm9, -inf, %v9740_v14  ;;  %v9788_v12 = vsel %vm9784_vm9, 1.0, %v9742_v13 }
0x12dc   :  { %v9792_v45 = vsel %vm9607_vm15, %v9786_v23, -inf }
0x12dd   :  { %9793 = vmax.xlane.f32.xlu0 %v9792_v45 }
0x1348   :  { %v9791_v4 = vpop.xlane.xlu2 %9790 }
0x1349   :  { %vm9795_vm10 = vcmp.ge.f32.partialorder %v9785_v63, %v9791_v4 }
0x134a   :  { %v9797_v27 = vsel %vm9795_vm10, %v14796_v62, 15 }
0x134b   :  { %v9799_v58 = vsel %vm8476_vm11, %v9797_v27, 2147483647 }
0x134c   :  { %v9801_v44 = vshra.s32 %v9799_v58, 16  ;;  %v9800_v30 = vand.u32 65535, %v9799_v58 }
0x134e   :  { %v9803_v7 = vcvt.s32.f32 %v9801_v44  ;;  %v9802_v32 = vcvt.s32.f32 %v9800_v30 }
0x1350   :  { %v9794_v48 = vpop.xlane.xlu0 %9793  ;;  %9804 = vmin.xlane.f32.xlu2 %v9803_v7 }
0x1351   :  { %vm9796_vm13 = vcmp.ge.f32.partialorder %v9786_v23, %v9794_v48 }
0x1352   :  { %v9798_v24 = vsel %vm9796_vm13, %v14796_v62, 15 }
0x1353   :  { %v9814_v61 = vsel %vm9607_vm15, %v9798_v24, 2147483647 }
0x1354   :  { %v9816_v55 = vshra.s32 %v9814_v61, 16  ;;  %v9815_v35 = vand.u32 65535, %v9814_v61 }
0x1356   :  { %v9818_v5 = vcvt.s32.f32 %v9816_v55  ;;  %v9817_v56 = vcvt.s32.f32 %v9815_v35 }
0x1358   :  { %9819 = vmin.xlane.f32.xlu0 %v9818_v5 }
0x13c3   :  { %v9805_v53 = vpop.xlane.xlu2 %9804 }
0x13c4   :  { %vm9806_vm14 = vcmp.eq.f32.partialorder %v9803_v7, %v9805_v53  ;;  %v9811_v49 = vcvt.f32.s32 %v9805_v53 }
0x13c5   :  { %v9807_v60 = vsel %vm9806_vm14, %v9802_v32, inf }
0x13c6   :  { %9808 = vmin.xlane.f32.xlu2 %v9807_v60  ;;  %v9812_v6 = vshll.u32 %v9811_v49, 16 }
0x13cb   :  { %v9820_v11 = vpop.xlane.xlu0 %9819 }
0x13cc   :  { %vm9821_vm2 = vcmp.eq.f32.partialorder %v9818_v5, %v9820_v11  ;;  %v9826_v57 = vcvt.f32.s32 %v9820_v11 }
0x13cd   :  { %v9822_v38 = vsel %vm9821_vm2, %v9817_v56, inf }
0x13ce   :  { %9823 = vmin.xlane.f32.xlu0 %v9822_v38  ;;  %v9827_v21 = vshll.u32 %v9826_v57, 16 }
0x1439   :  { %v9809_v19 = vpop.xlane.xlu2 %9808 }
0x143a   :  { %v9810_v14 = vcvt.f32.s32 %v9809_v19 }
0x143c   :  { %v9813_v13 = vadd.s32 %v9812_v6, %v9810_v14 }
0x143e   :  { %vm9829_vm3 = vcmp.eq.s32.totalorder %v14796_v62, %v9813_v13 }
0x143f   :  { %v9831_v59 = vsel %vm9829_vm3, -inf, %v9785_v63  ;;  %v9833_v22 = vsel %vm9829_vm3, 1.0, %v9787_v17 }
0x1440   :  { %v9835_v34 = vsel %vm8476_vm11, %v9831_v59, -inf }
0x1441   :  { %v9824_v43 = vpop.xlane.xlu0 %9823  ;;  %9836 = vmax.xlane.f32.xlu2 %v9835_v34 }
0x1442   :  { %v9825_v25 = vcvt.f32.s32 %v9824_v43 }
0x1444   :  { %v9828_v2 = vadd.s32 %v9827_v21, %v9825_v25 }
0x1446   :  { %vm9830_vm4 = vcmp.eq.s32.totalorder %v14796_v62, %v9828_v2 }
0x1447   :  { %v9832_v40 = vsel %vm9830_vm4, -inf, %v9786_v23  ;;  %v9834_v42 = vsel %vm9830_vm4, 1.0, %v9788_v12 }
0x1448   :  { %v9838_v8 = vsel %vm9607_vm15, %v9832_v40, -inf }
0x1449   :  { %9839 = vmax.xlane.f32.xlu0 %v9838_v8 }
0x14b4   :  { %v9837_v28 = vpop.xlane.xlu2 %9836 }
0x14b5   :  { %vm9841_vm7 = vcmp.ge.f32.partialorder %v9831_v59, %v9837_v28 }
0x14b6   :  { %v9843_v0 = vsel %vm9841_vm7, %v14796_v62, 15 }
0x14b7   :  { %v9845_v51 = vsel %vm8476_vm11, %v9843_v0, 2147483647 }
0x14b8   :  { %v9847_v1 = vshra.s32 %v9845_v51, 16  ;;  %v9846_v16 = vand.u32 65535, %v9845_v51 }
0x14ba   :  { %v9849_v41 = vcvt.s32.f32 %v9847_v1  ;;  %v9848_v20 = vcvt.s32.f32 %v9846_v16 }
0x14bc   :  { %v9840_v50 = vpop.xlane.xlu0 %9839  ;;  %9850 = vmin.xlane.f32.xlu2 %v9849_v41 }
0x14bd   :  { %vm9842_vm8 = vcmp.ge.f32.partialorder %v9832_v40, %v9840_v50 }
0x14be   :  { %v9844_v36 = vsel %vm9842_vm8, %v14796_v62, 15 }
0x14bf   :  { %v9860_v33 = vsel %vm9607_vm15, %v9844_v36, 2147483647 }
0x14c0   :  { %v9862_v29 = vshra.s32 %v9860_v33, 16  ;;  %v9861_v63 = vand.u32 65535, %v9860_v33 }
0x14c2   :  { %v9864_v26 = vcvt.s32.f32 %v9862_v29  ;;  %v9863_v54 = vcvt.s32.f32 %v9861_v63 }
0x14c4   :  { %9865 = vmin.xlane.f32.xlu0 %v9864_v26 }
0x152f   :  { %v9851_v37 = vpop.xlane.xlu2 %9850 }
0x1530   :  { %vm9852_vm9 = vcmp.eq.f32.partialorder %v9849_v41, %v9851_v37  ;;  %v9857_v31 = vcvt.f32.s32 %v9851_v37 }
0x1531   :  { %v9853_v15 = vsel %vm9852_vm9, %v9848_v20, inf }
0x1532   :  { %9854 = vmin.xlane.f32.xlu1 %v9853_v15  ;;  %v9858_v47 = vshll.u32 %v9857_v31, 16 }
0x1537   :  { %v9866_v17 = vpop.xlane.xlu0 %9865 }
0x1538   :  { %vm9867_vm10 = vcmp.eq.f32.partialorder %v9864_v26, %v9866_v17  ;;  %v9872_v45 = vcvt.f32.s32 %v9866_v17 }
0x1539   :  { %v9868_v46 = vsel %vm9867_vm10, %v9863_v54, inf }
0x153a   :  { %9869 = vmin.xlane.f32.xlu2 %v9868_v46  ;;  %v9873_v7 = vshll.u32 %v9872_v45, 16 }
0x15a5   :  { %v9855_v18 = vpop.xlane.xlu1 %9854 }
0x15a6   :  { %v9856_v23 = vcvt.f32.s32 %v9855_v18 }
0x15a8   :  { %v9859_v12 = vadd.s32 %v9858_v47, %v9856_v23 }
0x15aa   :  { %vm9875_vm13 = vcmp.eq.s32.totalorder %v14796_v62, %v9859_v12 }
0x15ab   :  { %v9877_v4 = vsel %vm9875_vm13, -inf, %v9831_v59  ;;  %v9879_v27 = vsel %vm9875_vm13, 1.0, %v9833_v22 }
0x15ac   :  { %v9881_v58 = vsel %vm8476_vm11, %v9877_v4, -inf }
0x15ad   :  { %v9870_v44 = vpop.xlane.xlu2 %9869  ;;  %9882 = vmax.xlane.f32.xlu0 %v9881_v58 }
0x15ae   :  { %v9871_v48 = vcvt.f32.s32 %v9870_v44 }
0x15b0   :  { %v9874_v24 = vadd.s32 %v9873_v7, %v9871_v48 }
0x15b2   :  { %vm9876_vm14 = vcmp.eq.s32.totalorder %v14796_v62, %v9874_v24 }
0x15b3   :  { %v9878_v61 = vsel %vm9876_vm14, -inf, %v9832_v40  ;;  %v9880_v55 = vsel %vm9876_vm14, 1.0, %v9834_v42 }
0x15b4   :  { %v9884_v5 = vsel %vm9607_vm15, %v9878_v61, -inf }
0x15b5   :  { %9885 = vmax.xlane.f32.xlu1 %v9884_v5 }
0x1620   :  { %v9883_v30 = vpop.xlane.xlu0 %9882 }
0x1621   :  { %vm9887_vm2 = vcmp.ge.f32.partialorder %v9877_v4, %v9883_v30 }
0x1622   :  { %v9889_v53 = vsel %vm9887_vm2, %v14796_v62, 15 }
0x1623   :  { %v9891_v32 = vsel %vm8476_vm11, %v9889_v53, 2147483647 }
0x1624   :  { %v9893_v60 = vshra.s32 %v9891_v32, 16  ;;  %v9892_v6 = vand.u32 65535, %v9891_v32 }
0x1626   :  { %v9895_v35 = vcvt.s32.f32 %v9893_v60  ;;  %v9894_v13 = vcvt.s32.f32 %v9892_v6 }
0x1628   :  { %9896 = vmin.xlane.f32.xlu2 %v9895_v35  ;;  %v9886_v11 = vpop.xlane.xlu1 %9885 }
0x1629   :  { %vm9888_vm3 = vcmp.ge.f32.partialorder %v9878_v61, %v9886_v11 }
0x162a   :  { %v9890_v56 = vsel %vm9888_vm3, %v14796_v62, 15 }
0x162b   :  { %v9906_v38 = vsel %vm9607_vm15, %v9890_v56, 2147483647 }
0x162c   :  { %v9908_v49 = vshra.s32 %v9906_v38, 16  ;;  %v9907_v59 = vand.u32 65535, %v9906_v38 }
0x162e   :  { %v9910_v19 = vcvt.s32.f32 %v9908_v49  ;;  %v9909_v34 = vcvt.s32.f32 %v9907_v59 }
0x1630   :  { %9911 = vmin.xlane.f32.xlu0 %v9910_v19 }
0x169b   :  { %v9897_v14 = vpop.xlane.xlu2 %9896 }
0x169c   :  { %vm9898_vm4 = vcmp.eq.f32.partialorder %v9895_v35, %v9897_v14  ;;  %v9903_v21 = vcvt.f32.s32 %v9897_v14 }
0x169d   :  { %v9899_v57 = vsel %vm9898_vm4, %v9894_v13, inf }
0x169e   :  { %9900 = vmin.xlane.f32.xlu1 %v9899_v57  ;;  %v9904_v2 = vshll.u32 %v9903_v21, 16 }
0x16a3   :  { %v9912_v22 = vpop.xlane.xlu0 %9911 }
0x16a4   :  { %vm9913_vm7 = vcmp.eq.f32.partialorder %v9910_v19, %v9912_v22  ;;  %v9918_v8 = vcvt.f32.s32 %v9912_v22 }
0x16a5   :  { %v9914_v43 = vsel %vm9913_vm7, %v9909_v34, inf }
0x16a6   :  { %9915 = vmin.xlane.f32.xlu2 %v9914_v43  ;;  %v9919_v41 = vshll.u32 %v9918_v8, 16 }
0x1711   :  { %v9901_v25 = vpop.xlane.xlu1 %9900 }
0x1712   :  { %v9902_v40 = vcvt.f32.s32 %v9901_v25 }
0x1714   :  { %v9905_v42 = vadd.s32 %v9904_v2, %v9902_v40 }
0x1716   :  { %vm9921_vm8 = vcmp.eq.s32.totalorder %v14796_v62, %v9905_v42 }
0x1717   :  { %v9923_v28 = vsel %vm9921_vm8, -inf, %v9877_v4  ;;  %v9925_v0 = vsel %vm9921_vm8, 1.0, %v9879_v27 }
0x1718   :  { %v9927_v51 = vsel %vm8476_vm11, %v9923_v28, -inf }
0x1719   :  { %v9916_v1 = vpop.xlane.xlu2 %9915  ;;  %9928 = vmax.xlane.f32.xlu0 %v9927_v51 }
0x171a   :  { %v9917_v50 = vcvt.f32.s32 %v9916_v1 }
0x171c   :  { %v9920_v36 = vadd.s32 %v9919_v41, %v9917_v50 }
0x171e   :  { %vm9922_vm9 = vcmp.eq.s32.totalorder %v14796_v62, %v9920_v36 }
0x171f   :  { %v9924_v33 = vsel %vm9922_vm9, -inf, %v9878_v61  ;;  %v9926_v29 = vsel %vm9922_vm9, 1.0, %v9880_v55 }
0x1720   :  { %v9930_v26 = vsel %vm9607_vm15, %v9924_v33, -inf }
0x1721   :  { %9931 = vmax.xlane.f32.xlu1 %v9930_v26 }
0x178c   :  { %v9929_v16 = vpop.xlane.xlu0 %9928 }
0x178d   :  { %vm9933_vm10 = vcmp.ge.f32.partialorder %v9923_v28, %v9929_v16 }
0x178e   :  { %v9935_v37 = vsel %vm9933_vm10, %v14796_v62, 15 }
0x178f   :  { %v9937_v20 = vsel %vm8476_vm11, %v9935_v37, 2147483647 }
0x1790   :  { %v9939_v15 = vshra.s32 %v9937_v20, 16  ;;  %v9938_v47 = vand.u32 65535, %v9937_v20 }
0x1792   :  { %v9941_v63 = vcvt.s32.f32 %v9939_v15  ;;  %v9940_v12 = vcvt.s32.f32 %v9938_v47 }
0x1794   :  { %9942 = vmin.xlane.f32.xlu2 %v9941_v63  ;;  %v9932_v17 = vpop.xlane.xlu1 %9931 }
0x1795   :  { %vm9934_vm13 = vcmp.ge.f32.partialorder %v9924_v33, %v9932_v17 }
0x1796   :  { %v9936_v54 = vsel %vm9934_vm13, %v14796_v62, 15 }
0x1797   :  { %v9952_v46 = vsel %vm9607_vm15, %v9936_v54, 2147483647 }
0x1798   :  { %v9954_v31 = vshra.s32 %v9952_v46, 16  ;;  %v9953_v4 = vand.u32 65535, %v9952_v46 }
0x179a   :  { %v9956_v18 = vcvt.s32.f32 %v9954_v31  ;;  %v9955_v58 = vcvt.s32.f32 %v9953_v4 }
0x179c   :  { %9957 = vmin.xlane.f32.xlu0 %v9956_v18 }
0x1807   :  { %v9943_v23 = vpop.xlane.xlu2 %9942 }
0x1808   :  { %vm9944_vm14 = vcmp.eq.f32.partialorder %v9941_v63, %v9943_v23  ;;  %v9949_v7 = vcvt.f32.s32 %v9943_v23 }
0x1809   :  { %v9945_v45 = vsel %vm9944_vm14, %v9940_v12, inf }
0x180a   :  { %9946 = vmin.xlane.f32.xlu1 %v9945_v45  ;;  %v9950_v24 = vshll.u32 %v9949_v7, 16 }
0x180f   :  { %v9958_v27 = vpop.xlane.xlu0 %9957 }
0x1810   :  { %vm9959_vm2 = vcmp.eq.f32.partialorder %v9956_v18, %v9958_v27  ;;  %v9964_v5 = vcvt.f32.s32 %v9958_v27 }
0x1811   :  { %v9960_v44 = vsel %vm9959_vm2, %v9955_v58, inf }
0x1812   :  { %9961 = vmin.xlane.f32.xlu2 %v9960_v44  ;;  %v9965_v35 = vshll.u32 %v9964_v5, 16 }
0x187d   :  { %v9947_v48 = vpop.xlane.xlu1 %9946 }
0x187e   :  { %v9948_v61 = vcvt.f32.s32 %v9947_v48 }
0x1880   :  { %v9951_v55 = vadd.s32 %v9950_v24, %v9948_v61 }
0x1882   :  { %vm9967_vm3 = vcmp.eq.s32.totalorder %v14796_v62, %v9951_v55 }
0x1883   :  { %v9969_v30 = vsel %vm9967_vm3, -inf, %v9923_v28  ;;  %v9971_v53 = vsel %vm9967_vm3, 1.0, %v9925_v0 }
0x1884   :  { %v9973_v32 = vsel %vm8476_vm11, %v9969_v30, -inf }
0x1885   :  { %v9962_v60 = vpop.xlane.xlu2 %9961  ;;  %9974 = vmax.xlane.f32.xlu0 %v9973_v32 }
0x1886   :  { %v9963_v11 = vcvt.f32.s32 %v9962_v60 }
0x1888   :  { %v9966_v56 = vadd.s32 %v9965_v35, %v9963_v11 }
0x188a   :  { %vm9968_vm4 = vcmp.eq.s32.totalorder %v14796_v62, %v9966_v56 }
0x188b   :  { %v9970_v38 = vsel %vm9968_vm4, -inf, %v9924_v33  ;;  %v9972_v49 = vsel %vm9968_vm4, 1.0, %v9926_v29 }
0x188c   :  { %v9976_v19 = vsel %vm9607_vm15, %v9970_v38, -inf }
0x188d   :  { %9977 = vmax.xlane.f32.xlu1 %v9976_v19 }
0x18f8   :  { %v9975_v6 = vpop.xlane.xlu0 %9974 }
0x18f9   :  { %vm9979_vm7 = vcmp.ge.f32.partialorder %v9969_v30, %v9975_v6 }
0x18fa   :  { %v9981_v14 = vsel %vm9979_vm7, %v14796_v62, 15 }
0x18fb   :  { %v9983_v13 = vsel %vm8476_vm11, %v9981_v14, 2147483647 }
0x18fc   :  { %v9985_v57 = vshra.s32 %v9983_v13, 16  ;;  %v9984_v2 = vand.u32 65535, %v9983_v13 }
0x18fe   :  { %v9987_v59 = vcvt.s32.f32 %v9985_v57  ;;  %v9986_v42 = vcvt.s32.f32 %v9984_v2 }
0x1900   :  { %9988 = vmin.xlane.f32.xlu2 %v9987_v59  ;;  %v9978_v22 = vpop.xlane.xlu1 %9977 }
0x1901   :  { %vm9980_vm8 = vcmp.ge.f32.partialorder %v9970_v38, %v9978_v22 }
0x1902   :  { %v9982_v34 = vsel %vm9980_vm8, %v14796_v62, 15 }
0x1903   :  { %v9998_v43 = vsel %vm9607_vm15, %v9982_v34, 2147483647 }
0x1904   :  { %v10000_v21 = vshra.s32 %v9998_v43, 16  ;;  %v9999_v28 = vand.u32 65535, %v9998_v43 }
0x1906   :  { %v10002_v25 = vcvt.s32.f32 %v10000_v21  ;;  %v10001_v51 = vcvt.s32.f32 %v9999_v28 }
0x1908   :  { %10003 = vmin.xlane.f32.xlu0 %v10002_v25 }
0x1973   :  { %v9989_v40 = vpop.xlane.xlu2 %9988 }
0x1974   :  { %vm9990_vm9 = vcmp.eq.f32.partialorder %v9987_v59, %v9989_v40  ;;  %v9995_v41 = vcvt.f32.s32 %v9989_v40 }
0x1975   :  { %v9991_v8 = vsel %vm9990_vm9, %v9986_v42, inf }
0x1976   :  { %9992 = vmin.xlane.f32.xlu1 %v9991_v8  ;;  %v9996_v36 = vshll.u32 %v9995_v41, 16 }
0x197b   :  { %v10004_v0 = vpop.xlane.xlu0 %10003 }
0x197c   :  { %vm10005_vm10 = vcmp.eq.f32.partialorder %v10002_v25, %v10004_v0  ;;  %v10010_v26 = vcvt.f32.s32 %v10004_v0 }
0x197d   :  { %v10006_v1 = vsel %vm10005_vm10, %v10001_v51, inf }
0x197e   :  { %10007 = vmin.xlane.f32.xlu2 %v10006_v1  ;;  %v10011_v63 = vshll.u32 %v10010_v26, 16 }
0x19e9   :  { %v9993_v50 = vpop.xlane.xlu1 %9992 }
0x19ea   :  { %v9994_v33 = vcvt.f32.s32 %v9993_v50 }
0x19ec   :  { %v9997_v29 = vadd.s32 %v9996_v36, %v9994_v33 }
0x19ee   :  { %vm10013_vm13 = vcmp.eq.s32.totalorder %v14796_v62, %v9997_v29 }
0x19ef   :  { %v10015_v16 = vsel %vm10013_vm13, -inf, %v9969_v30  ;;  %v10017_v37 = vsel %vm10013_vm13, 1.0, %v9971_v53 }
0x19f0   :  { %v10019_v20 = vsel %vm8476_vm11, %v10015_v16, -inf }
0x19f1   :  { %v10008_v15 = vpop.xlane.xlu2 %10007  ;;  %10020 = vmax.xlane.f32.xlu0 %v10019_v20 }
0x19f2   :  { %v10009_v17 = vcvt.f32.s32 %v10008_v15 }
0x19f4   :  { %v10012_v54 = vadd.s32 %v10011_v63, %v10009_v17 }
0x19f6   :  { %vm10014_vm14 = vcmp.eq.s32.totalorder %v14796_v62, %v10012_v54 }
0x19f7   :  { %v10016_v46 = vsel %vm10014_vm14, -inf, %v9970_v38  ;;  %v10018_v31 = vsel %vm10014_vm14, 1.0, %v9972_v49 }
0x19f8   :  { %v10022_v18 = vsel %vm9607_vm15, %v10016_v46, -inf }
0x19f9   :  { %10023 = vmax.xlane.f32.xlu1 %v10022_v18 }
0x1a64   :  { %v10021_v47 = vpop.xlane.xlu0 %10020 }
0x1a65   :  { %vm10025_vm2 = vcmp.ge.f32.partialorder %v10015_v16, %v10021_v47 }
0x1a66   :  { %v10027_v23 = vsel %vm10025_vm2, %v14796_v62, 15 }
0x1a67   :  { %v10029_v12 = vsel %vm8476_vm11, %v10027_v23, 2147483647 }
0x1a68   :  { %v10031_v45 = vshra.s32 %v10029_v12, 16  ;;  %v10030_v24 = vand.u32 65535, %v10029_v12 }
0x1a6a   :  { %v10033_v4 = vcvt.s32.f32 %v10031_v45  ;;  %v10032_v55 = vcvt.s32.f32 %v10030_v24 }
0x1a6c   :  { %10034 = vmin.xlane.f32.xlu2 %v10033_v4  ;;  %v10024_v27 = vpop.xlane.xlu1 %10023 }
0x1a6d   :  { %vm10026_vm3 = vcmp.ge.f32.partialorder %v10016_v46, %v10024_v27 }
0x1a6e   :  { %v10028_v58 = vsel %vm10026_vm3, %v14796_v62, 15 }
0x1a6f   :  { %v10044_v44 = vsel %vm9607_vm15, %v10028_v58, 2147483647 }
0x1a70   :  { %v10046_v7 = vshra.s32 %v10044_v44, 16  ;;  %v10045_v30 = vand.u32 65535, %v10044_v44 }
0x1a72   :  { %v10048_v48 = vcvt.s32.f32 %v10046_v7  ;;  %v10047_v32 = vcvt.s32.f32 %v10045_v30 }
0x1a74   :  { %10049 = vmin.xlane.f32.xlu0 %v10048_v48 }
0x1adf   :  { %v10035_v61 = vpop.xlane.xlu2 %10034 }
0x1ae0   :  { %vm10036_vm4 = vcmp.eq.f32.partialorder %v10033_v4, %v10035_v61  ;;  %v10041_v35 = vcvt.f32.s32 %v10035_v61 }
0x1ae1   :  { %v10037_v5 = vsel %vm10036_vm4, %v10032_v55, inf }
0x1ae2   :  { %10038 = vmin.xlane.f32.xlu1 %v10037_v5  ;;  %v10042_v56 = vshll.u32 %v10041_v35, 16 }
0x1ae7   :  { %v10050_v53 = vpop.xlane.xlu0 %10049 }
0x1ae8   :  { %vm10051_vm7 = vcmp.eq.f32.partialorder %v10048_v48, %v10050_v53  ;;  %v10056_v19 = vcvt.f32.s32 %v10050_v53 }
0x1ae9   :  { %v10052_v60 = vsel %vm10051_vm7, %v10047_v32, inf }
0x1aea   :  { %10053 = vmin.xlane.f32.xlu2 %v10052_v60  ;;  %v10057_v13 = vshll.u32 %v10056_v19, 16 }
0x1b55   :  { %v10039_v11 = vpop.xlane.xlu1 %10038 }
0x1b56   :  { %v10040_v38 = vcvt.f32.s32 %v10039_v11 }
0x1b58   :  { %v10043_v49 = vadd.s32 %v10042_v56, %v10040_v38 }
0x1b5a   :  { %vm10059_vm8 = vcmp.eq.s32.totalorder %v14796_v62, %v10043_v49 }
0x1b5b   :  { %v10061_v6 = vsel %vm10059_vm8, 1.0, %v10017_v37  ;;  %v9276_v37 = vsel %vm9240_vm5, %v15113_v9, 0.0 }
0x1b5c   :  { %10063 = vxpose.xlu0.b32.start [1/2] (short) (narrow) %v10061_v6, 16 }
0x1b5d   :  { %v10054_v14 = vpop.xlane.xlu2 %10053 }
0x1b5e   :  { %v10055_v57 = vcvt.f32.s32 %v10054_v14 }
0x1b60   :  { %v10058_v59 = vadd.s32 %v10057_v13, %v10055_v57 }
0x1b62   :  { %vm10060_vm9 = vcmp.eq.s32.totalorder %v14796_v62, %v10058_v59 }
0x1b63   :  { %v10062_v22 = vsel %vm10060_vm9, 1.0, %v10018_v31 }
0x1b64   :  { %10064 = vxpose.xlu0.b32.end [2/2] (short) (narrow) %v10062_v22, 16 }
0x1c00   :  { %v10079_v34 = vpop.trf.xlu0 }
0x1c01   :  { %v10095_v43 = vmul.f32 %v10079_v34, %v10061_v6 }
0x1c03   :  { %vm10097_vm10 = vcmp.gt.f32.partialorder %v10095_v43, 0.0 }
0x1c04   :  { %v10099_v21 = vsel %vm10097_vm10, %v15132_v52, -inf }
0x1c05   :  { %v10101_v25 = vsel %vm8476_vm11, %v10099_v21, -inf }
0x1c06   :  { %10102 = vmax.xlane.f32.xlu1 %v10101_v25 }
0x1c08   :  { %v10080_v2 = vpop.trf.xlu0 }
0x1c09   :  { %v10096_v40 = vmul.f32 %v10080_v2, %v10062_v22 }
0x1c0b   :  { %vm10098_vm13 = vcmp.gt.f32.partialorder %v10096_v40, 0.0 }
0x1c0c   :  { %v10100_v42 = vsel %vm10098_vm13, %v15136_v3, -inf }
0x1c0d   :  { %v10104_v8 = vsel %vm9607_vm15, %v10100_v42, -inf }
0x1c0e   :  { %10105 = vmax.xlane.f32.xlu2 %v10104_v8 }
0x1c79   :  { %v10103_v28 = vpop.xlane.xlu1 %10102 }
0x1c7a   :  { %v10107_v0 = vsub.f32 %v15132_v52, %v10103_v28 }
0x1c7c   :  { %v10109_v51 = vmul.f32 1.442695, %v10107_v0 }
0x1c7e   :  { %12756 = vpow2.f32 %v10109_v51 }
0x1c81   :  { %v10106_v1 = vpop.xlane.xlu2 %10105 }
0x1c82   :  { %v10108_v41 = vsub.f32 %v15136_v3, %v10106_v1  ;;  %v9270_v3 = vrot.slane %v15109_v10, 4 }
0x1c84   :  { %v12757_v50 = vpop.eup %12756  ;;  %v10111_v36 = vmul.f32 1.442695, %v10108_v41  ;;  %v9271_v20 = vadd.f32 %v9270_v3, %v15109_v10 }
0x1c85   :  { %v10113_v33 = vsel %vm10097_vm10, %v12757_v50, 0.0 }
0x1c86   :  { %12758 = vpow2.f32 %v10111_v36  ;;  %v10115_v29 = vsel %vm8476_vm11, %v10113_v33, 0.0  ;;  %v9272_v15 = vrot.slane %v9271_v20, 2 }
0x1c87   :  { %10116 = vadd.xlane.f32.xlu1 %v10115_v29 }
0x1c88   :  { %v9273_v17 = vadd.f32 %v9272_v15, %v9271_v20 }
0x1c8a   :  { %v9274_v54 = vrot.slane %v9273_v17, 1 }
0x1c8c   :  { %v12759_v26 = vpop.eup %12758  ;;  %v9275_v23 = vadd.f32 %v9274_v54, %v9273_v17 }
0x1c8d   :  { %v10114_v16 = vsel %vm10098_vm13, %v12759_v26, 0.0 }
0x1c8e   :  { %v10118_v52 = vsel %vm9607_vm15, %v10114_v16, 0.0 }
0x1c8f   :  { %9277 = vadd.xlane.f32.xlu1 %v9276_v37  ;;  %10119 = vadd.xlane.f32.xlu2 %v10118_v52 }
0x1cfa   :  { %v10117_v63 = vpop.xlane.xlu1 %10116 }
0x1cfb   :  { %12760 = vrcp.f32 %v10117_v63  ;;  %v10132_v45 = vand.u32 2147483648, %v10117_v63  ;;  %v10130_v58 = vand.u32 2147483647, %v10117_v63  ;;  %vm10126_vm15 = vweird.f32 %v10117_v63 }
0x1cfd   :  { %v10133_v48 = vor.u32 1.1754944e-38, %v10132_v45  ;;  %vm10131_vm2 = vcmp.eq.f32.partialorder %v10130_v58, 8.507059e+37 }
0x1d01   :  { %v12761_v46 = vpop.eup %12760 }
0x1d02   :  { %v10122_v31 = vmul.f32 %v12761_v46, %v10117_v63  ;;  %v9278_v18 = vpop.xlane.xlu1 %9277  ;;  %v10120_v47 = vpop.xlane.xlu2 %10119  ;;  %vm10127_vm5 = vweird.f32 %v12761_v46 }
0x1d03   :  { %v9280_v9 = vperm.slane %v9278_v18, %v14796_v62  ;;  %12762 = vrcp.f32 %v10120_v47  ;;  %vm10128_vm14 = vmor %vm10126_vm15, %vm10127_vm5  ;;  %v10147_v30 = vand.u32 2147483648, %v10120_v47  ;;  %v10145_v32 = vand.u32 2147483647, %v10120_v47 }
0x1d04   :  { %v10123_v12 = vsub.f32 1.0, %v10122_v31  ;;  %vm10141_vm4 = vweird.f32 %v10120_v47 }
0x1d05   :  { %v9282_v4 = vadd.f32 %v9280_v9, %v9275_v23  ;;  %v10148_v35 = vor.u32 1.1754944e-38, %v10147_v30  ;;  %vm10146_vm8 = vcmp.eq.f32.partialorder %v10145_v32, 8.507059e+37 }
0x1d06   :  { %v10124_v27 = vmul.f32 %v12761_v46, %v10123_v12 }
0x1d07   :  { %v9392_v10 = vperm.slane %v9282_v4, 0 }
0x1d08   :  { %v10125_v44 = vadd.f32 %v12761_v46, %v10124_v27 }
0x1d09   :  { %v12763_v7 = vpop.eup %12762  ;;  %9397 = vperm.xlu2 %12739, %v9392_v10  }
0x1d0a   :  { %v10129_v24 = vsel %vm10128_vm14, %v12761_v46, %v10125_v44  ;;  %v10137_v61 = vmul.f32 %v12763_v7, %v10120_v47  ;;  %vm10142_vm3 = vweird.f32 %v12763_v7 }
0x1d0b   :  { %v10134_v55 = vsel %vm10131_vm2, %v10133_v48, %v10129_v24  ;;  %vm10143_vm7 = vmor %vm10141_vm4, %vm10142_vm3 }
0x1d0c   :  { %v10135_v5 = vmul.f32 %v10134_v55, %v10113_v33  ;;  %v10138_v62 = vsub.f32 1.0, %v10137_v61 }
0x1d0e   :  { %v10139_v53 = vmul.f32 %v12763_v7, %v10138_v62  ;;  %12223 = vmatmul.msk.f32.vlgmr.msrb.gmra.mxu1 %vm8476_vm11, %v10135_v5 }
0x1d10   :  { %v10140_v60 = vadd.f32 %v12763_v7, %v10139_v53 }
0x1d12   :  { %v10144_v11 = vsel %vm10143_vm7, %v12763_v7, %v10140_v60  ;;  %v10251_v7 = vstv %s15267_s2 }
0x1d13   :  { %v10149_v56 = vsel %vm10146_vm8, %v10148_v35, %v10144_v11 }
0x1d14   :  { %v10150_v38 = vmul.f32 %v10149_v56, %v10114_v16 }
0x1d16   :  { %12224 = vmatmul.msk.f32.gmra.mxu1 %vm8476_vm11, %v10150_v38 }
0x1d63   :  { %v9398_v49 = vpop.permute.xlu2 %9397 }
0x1d64   :  { %12764 = vrcp.f32 %v9398_v49  ;;  %v9410_v13 = vand.u32 2147483648, %v9398_v49  ;;  %v9408_v59 = vand.u32 2147483647, %v9398_v49  ;;  %vm9404_vm10 = vweird.f32 %v9398_v49 }
0x1d66   :  { %v9411_v34 = vor.u32 1.1754944e-38, %v9410_v13  ;;  %vm9409_vm5 = vcmp.eq.f32.partialorder %v9408_v59, 8.507059e+37 }
0x1d6a   :  { %v12765_v19 = vpop.eup %12764 }
0x1d6b   :  { %v9400_v6 = vmul.f32 %v12765_v19, %v9398_v49  ;;  %vm9405_vm9 = vweird.f32 %v12765_v19 }
0x1d6c   :  { %vm9406_vm13 = vmor %vm9404_vm10, %vm9405_vm9 }
0x1d6d   :  { %v9401_v14 = vsub.f32 1.0, %v9400_v6 }
0x1d6f   :  { %v9402_v57 = vmul.f32 %v12765_v19, %v9401_v14 }
0x1d71   :  { %v9403_v22 = vadd.f32 %v12765_v19, %v9402_v57 }
0x1d73   :  { %v9407_v43 = vsel %vm9406_vm13, %v12765_v19, %v9403_v22 }
0x1d74   :  { %v9412_v21 = vsel %vm9409_vm5, %v9411_v34, %v9407_v43 }
0x1d75   :  { %v9413_v25 = vmul.f32 %v9412_v21, %v15130_v39 }
0x1d77   :  { %v10211_v2 = vmul.f32 %v9413_v25, %v9413_v25 }
0x1d79   :  { %v10212_v40 = vsel %vm8761_vm12, %v10211_v2, 0.0 }
0x1d7a   :  { %10213 = vadd.xlane.f32.xlu1 %v10212_v40 }
0x1d8b   :  { %v10174_v42 = vpop.f32.mrf.mxu1 }
0x1d8c   :  { %v10180_v8 = vmul.f32 %v10174_v42, %v10174_v42 }
0x1d8e   :  { %10182 = vadd.xlane.f32.xlu1 %v10180_v8 }
0x1d93   :  { %v10177_v28 = vpop.f32.mrf.mxu1 }
0x1d94   :  { %v10181_v0 = vmul.f32 %v10177_v28, %v10177_v28 }
0x1d96   :  { %v10184_v51 = vsel %vm8480_vm6, %v10181_v0, 0.0 }
0x1d97   :  { %10185 = vadd.xlane.f32.xlu1 %v10184_v51 }
0x1ded   :  { %v10214_v1 = vpop.xlane.xlu1 %10213 }
0x1dee   :  { %v10215_v41 = vmax.f32 %v10214_v1, 1e-16 }
0x1df0   :  { %12766 = vrsqrt.f32 %v10215_v41  ;;  %vm10222_vm12 = vweird.f32 %v10215_v41 }
0x1df6   :  { %v12767_v50 = vpop.eup %12766 }
0x1df7   :  { %v10217_v36 = vmul.f32 %v12767_v50, %v10215_v41  ;;  %vm10223_vm11 = vweird.f32 %v12767_v50 }
0x1df8   :  { %vm10224_vm15 = vmor %vm10222_vm12, %vm10223_vm11 }
0x1df9   :  { %v10218_v33 = vmul.f32 %v12767_v50, %v10217_v36 }
0x1dfb   :  { %v10219_v29 = vmul.f32 0.5, %v10218_v33 }
0x1dfd   :  { %v10220_v39 = vsub.f32 1.5, %v10219_v29 }
0x1dff   :  { %v10221_v26 = vmul.f32 %v12767_v50, %v10220_v39 }
0x1e01   :  { %v10225_v16 = vsel %vm10224_vm15, %v12767_v50, %v10221_v26  ;;  %v10183_v37 = vpop.xlane.xlu1 %10182 }
0x1e02   :  { %v10187_v52 = vmax.f32 %v10183_v37, 1e-16  ;;  %v10226_v3 = vmul.f32 %v10225_v16, %v9413_v25 }
0x1e04   :  { %12768 = vrsqrt.f32 %v10187_v52  ;;  %10242 = vmatpush.xpose.msra.mxu2 %v10226_v3  ;;  %vm10195_vm14 = vweird.f32 %v10187_v52 }
0x1e0a   :  { %v12769_v20 = vpop.eup %12768  ;;  %v10186_v15 = vpop.xlane.xlu1 %10185 }
0x1e0b   :  { %v10190_v63 = vmul.f32 %v12769_v20, %v10187_v52  ;;  %v10188_v17 = vmax.f32 %v10186_v15, 1e-16  ;;  %vm10196_vm6 = vweird.f32 %v12769_v20 }
0x1e0c   :  { %vm10197_vm2 = vmor %vm10195_vm14, %vm10196_vm6 }
0x1e0d   :  { %v10191_v54 = vmul.f32 %v12769_v20, %v10190_v63  ;;  %12770 = vrsqrt.f32 %v10188_v17  ;;  %vm10205_vm4 = vweird.f32 %v10188_v17 }
0x1e0f   :  { %v10192_v46 = vmul.f32 0.5, %v10191_v54 }
0x1e11   :  { %v10193_v31 = vsub.f32 1.5, %v10192_v46 }
0x1e13   :  { %v12771_v18 = vpop.eup %12770  ;;  %v10194_v47 = vmul.f32 %v12769_v20, %v10193_v31 }
0x1e14   :  { %v10200_v23 = vmul.f32 %v12771_v18, %v10188_v17  ;;  %vm10206_vm3 = vweird.f32 %v12771_v18 }
0x1e15   :  { %v10198_v9 = vsel %vm10197_vm2, %v12769_v20, %v10194_v47  ;;  %vm10207_vm7 = vmor %vm10205_vm4, %vm10206_vm3 }
0x1e16   :  { %v10209_v12 = vmul.f32 %v10198_v9, %v10174_v42  ;;  %v10201_v45 = vmul.f32 %v12771_v18, %v10200_v23 }
0x1e18   :  { %v10202_v4 = vmul.f32 0.5, %v10201_v45  ;;  %10243 = vmatmul.f32.vlgmr.msra.gmra.mxu2 %v10209_v12 }
0x1e1a   :  { %v10203_v27 = vsub.f32 1.5, %v10202_v4 }
0x1e1c   :  { %v10204_v58 = vmul.f32 %v12771_v18, %v10203_v27 }
0x1e1e   :  { %v10208_v10 = vsel %vm10207_vm7, %v12771_v18, %v10204_v58 }
0x1e1f   :  { %v10210_v44 = vmul.f32 %v10208_v10, %v10177_v28 }
0x1e21   :  { %10246 = vmatmul.f32.gmra.mxu2 %v10210_v44 }
0x1e9b   :  { %v10244_v48 = vpop.f32.mrf.mxu2 }
0x1e9c   :  { %v10252_v24 = vmul.f32 %v10251_v7, %v10244_v48 }
0x1e9e   :  { %10254 = vst.msk [vmem:[%s15268_s3] sm:$0xff] %vm9114_vm0, %v10252_v24 }
0x1ea4   :  { %v10247_v61 = vpop.f32.mrf.mxu2 }
0x1ea5   :  { %v10253_v55 = vmul.f32 %v10251_v7, %v10247_v61 }
0x1ea7   :  { %10255 = vst.msk [vmem:[%s15268_s3 + $0x8] sm:$0x7f] %vm9118_vm1, %v10253_v55 }

</bundles_post_ra>
